<compile_context>
chip_gen: v7x
topology: tpu7x:2x2x1
jax: 0.10.0
libtpu: 0.0.40
codegen_flags: <defaults>
</compile_context>

<pallas_src>
import functools
import numpy as np
import jax
import jax.numpy as jnp
from jax.experimental import pallas as pl
from jax.experimental.pallas import tpu as pltpu  # noqa: F401  (TPU backend)

# ----------------------------- configuration ------------------------------- #
EMBED_INPUT_DIM = 5      # (log pt, eta, cos phi, sin phi, log e)
EMBED_NLAYERS   = 1
EMBED_DIM       = 16
MLP_INPUT_DIM   = 3      # pairwise() produces (deta, cos dphi, sin dphi)
MLP_NLAYERS     = 1
MLP_DIM         = 8
ATTN_BLOCKS_N   = 2
NUM_HEADS       = 1
FFWD_NLAYERS    = 1
FFWD_DIM        = 16
OUT_DIM         = 2      # T per block
MAXT            = 2
AE_DIM          = 8
AE_DEPTH        = 2
MASS_SCALE      = 100.0
LN_EPS          = 1e-5   # also BatchNorm1d eval eps
NEG_INF         = -1e30


# ------------------------------ Pallas kernels ------------------------------ #
def _ln(x, g, b):
    """LayerNorm over the last dim.  g, b are (1, D) rows (broadcast)."""
    mu = jnp.mean(x, axis=-1, keepdims=True)
    var = jnp.mean(jnp.square(x - mu), axis=-1, keepdims=True)
    return (x - mu) * jax.lax.rsqrt(var + LN_EPS) * g + b


def _dnn1_kernel(x_ref, w_ref, b_ref, o_ref):
    """Single-layer DNN_block (final Linear only)."""
    o_ref[...] = (jnp.dot(x_ref[...], w_ref[...],
                          preferred_element_type=jnp.float32) + b_ref[...])


def _dnn2_kernel(x_ref, w1_ref, b1_ref, g1_ref, bg1_ref, w2_ref, b2_ref, o_ref):
    """Fused 2-layer DNN_block: Linear -> LayerNorm -> ReLU -> Linear in one kernel."""
    h = (jnp.dot(x_ref[...], w1_ref[...],
                 preferred_element_type=jnp.float32) + b1_ref[...])
    h = jnp.maximum(_ln(h, g1_ref[...], bg1_ref[...]), 0.0)
    o_ref[...] = (jnp.dot(h, w2_ref[...],
                          preferred_element_type=jnp.float32) + b2_ref[...])


def _attn_block_kernel(q_ref, k_ref, v_ref, bias_ref,
                       wq_ref, bq_ref, wk_ref, bk_ref, wv_ref, bv_ref,
                       biask_ref, biasv_ref, wo_ref, bo_ref,
                       gpa_ref, bpa_ref,
                       wf1_ref, bf1_ref, gf1_ref, bg1_ref, wf2_ref, bf2_ref,
                       gpf_ref, bpf_ref,
                       o_ref, *, scale, add_residual):
    """Entire AttnBlock fused in one kernel.

    MultiheadAttention(1 head, add_bias_kv=True) + residual + LN + ffwd + residual + LN.
    The learned bias-kv token is handled as a split softmax term (never masked), which
    avoids any in-kernel concatenation.  The batch dim is tiny & static -> unrolled
    with a Python loop so every op is 2-D (safest Mosaic lowering path).
    """
    nb = q_ref.shape[0]
    wq, bq = wq_ref[...], bq_ref[...]
    wk, bk = wk_ref[...], bk_ref[...]
    wv, bv = wv_ref[...], bv_ref[...]
    bias_k = biask_ref[...]          # (E, 1)
    bias_v = biasv_ref[...]          # (1, E)
    wo, bo = wo_ref[...], bo_ref[...]
    gpa, bpa = gpa_ref[...], bpa_ref[...]
    wf1, bf1 = wf1_ref[...], bf1_ref[...]
    gf1, bg1 = gf1_ref[...], bg1_ref[...]
    wf2, bf2 = wf2_ref[...], bf2_ref[...]
    gpf, bpf = gpf_ref[...], bpf_ref[...]

    for b in range(nb):                              # static unroll over batch
        Q, K, V = q_ref[b], k_ref[b], v_ref[b]       # (Lq,E), (Lk,E), (Lk,E)
        q = jnp.dot(Q, wq, preferred_element_type=jnp.float32) + bq
        k = jnp.dot(K, wk, preferred_element_type=jnp.float32) + bk
        v = jnp.dot(V, wv, preferred_element_type=jnp.float32) + bv

        # scores against real keys (+ additive attn_mask / key_padding bias)
        s = jax.lax.dot_general(q, k, (((1,), (1,)), ((), ())),
                                preferred_element_type=jnp.float32) * scale
        s = s + bias_ref[b]                          # (Lq, Lk)
        # score against the learned bias-kv token (never masked, zero additive bias)
        sb = jnp.dot(q, bias_k, preferred_element_type=jnp.float32) * scale  # (Lq,1)

        m = jnp.maximum(jnp.max(s, axis=-1, keepdims=True), sb)
        e = jnp.exp(s - m)
        eb = jnp.exp(sb - m)
        inv = pl.reciprocal(jnp.sum(e, axis=-1, keepdims=True) + eb, approx=True)
        attn = (jnp.dot(e, v, preferred_element_type=jnp.float32)
                + eb * bias_v) * inv                 # (Lq, E)

        out = jnp.dot(attn, wo, preferred_element_type=jnp.float32) + bo
        if add_residual:                             # torch adds only if shapes match
            out = out + V
        out = _ln(out, gpa, bpa)                     # post_attn_norm

        res = out                                    # ffwd: Linear+LN+ReLU, Linear
        h = jnp.dot(out, wf1, preferred_element_type=jnp.float32) + bf1
        h = jnp.maximum(_ln(h, gf1, bg1), 0.0)
        h = jnp.dot(h, wf2, preferred_element_type=jnp.float32) + bf2
        o_ref[b] = _ln(h + res, gpf, bpf)            # post_ffwd_norm


def _cand_simple_kernel(jt_ref, x_ref, c_ref):
    """Candidates bmm with the 1/(jet_count+0.001) normalisation folded in."""
    for b in range(jt_ref.shape[0]):
        jt = jt_ref[b]                               # (T, J)
        inv = pl.reciprocal(jnp.sum(jt, axis=-1, keepdims=True) + 0.001, approx=True)
        c_ref[b] = jnp.dot(jt, x_ref[b], preferred_element_type=jnp.float32) * inv


def _cand_full_kernel(jt_ref, x_ref, p4_ref, c_ref, cp4_ref):
    """Candidates bmm (normalised) plus the un-normalised candidate p4 bmm."""
    for b in range(jt_ref.shape[0]):
        jt = jt_ref[b]                               # (T, J)
        inv = pl.reciprocal(jnp.sum(jt, axis=-1, keepdims=True) + 0.001, approx=True)
        c_ref[b] = jnp.dot(jt, x_ref[b], preferred_element_type=jnp.float32) * inv
        cp4_ref[b] = jnp.dot(jt, p4_ref[b], preferred_element_type=jnp.float32)


# --------------------------- parameter construction ------------------------- #
def cascade_dims(input_dim, output_dim, depth):
    return [int(output_dim + (input_dim - output_dim) * (depth - i) / depth)
            for i in range(depth + 1)]


def init_linear(key, din, dout):
    kw, kb = jax.random.split(key)
    lim = 1.0 / np.sqrt(din)
    # biases stored pre-shaped (1, N) so wrappers never reshape/astype per call
    return {"W": jax.random.uniform(kw, (din, dout), jnp.float32, -lim, lim),
            "b": jax.random.uniform(kb, (1, dout), jnp.float32, -lim, lim)}


def init_ln(d):
    return {"g": jnp.ones((1, d), jnp.float32), "b": jnp.zeros((1, d), jnp.float32)}


def init_dnn(key, dims):
    """DNN_block: Linear+LN+ReLU for every layer except the last (Linear only)."""
    n = len(dims) - 1
    ks = jax.random.split(key, n)
    layers = []
    for i in range(n):
        layers.append({"lin": init_linear(ks[i], dims[i], dims[i + 1]),
                       "ln": init_ln(dims[i + 1]) if i != n - 1 else None})
    return layers


def init_attn_block(key, e, ffwd_dims):
    ks = jax.random.split(key, 7)
    assert ffwd_dims[-1] == e  # post_ffwd_norm exists in this config
    return {"q": init_linear(ks[0], e, e),
            "k": init_linear(ks[1], e, e),
            "v": init_linear(ks[2], e, e),
            "out": init_linear(ks[3], e, e),
            "bias_k": 0.02 * jax.random.normal(ks[4], (e, 1), jnp.float32),  # column
            "bias_v": 0.02 * jax.random.normal(ks[5], (1, e), jnp.float32),  # row
            "post_attn_ln": init_ln(e),
            "ffwd": init_dnn(ks[6], [e] + list(ffwd_dims)),
            "post_ffwd_ln": init_ln(ffwd_dims[-1])}


def init_encoder(key):
    ks = jax.random.split(key, 12)
    ffwd_dims = [FFWD_DIM] * FFWD_NLAYERS + [EMBED_DIM]
    params = {
        # BatchNorm1d (eval mode) running stats / affine for the embed block
        "bn": {"mean": 0.1 * jax.random.normal(ks[0], (EMBED_INPUT_DIM,), jnp.float32),
               "var": jax.random.uniform(ks[1], (EMBED_INPUT_DIM,), jnp.float32,
                                         0.5, 1.5),
               "g": jnp.ones((EMBED_INPUT_DIM,), jnp.float32),
               "b": jnp.zeros((EMBED_INPUT_DIM,), jnp.float32)},
        "embed": init_dnn(ks[2], [EMBED_INPUT_DIM] + (EMBED_NLAYERS + 1) * [EMBED_DIM]),
        "mlp": init_dnn(ks[3], [MLP_INPUT_DIM] + MLP_NLAYERS * [MLP_DIM] + [1]),
        "obj": [init_attn_block(k, EMBED_DIM, ffwd_dims)
                for k in jax.random.split(ks[4], ATTN_BLOCKS_N)],
        "cand": [init_attn_block(k, EMBED_DIM, ffwd_dims)
                 for k in jax.random.split(ks[5], ATTN_BLOCKS_N)],
        "cross": [init_attn_block(k, EMBED_DIM, ffwd_dims)
                  for k in jax.random.split(ks[6], ATTN_BLOCKS_N)],
        "ae_in": init_dnn(ks[7], cascade_dims(EMBED_DIM - MAXT + 1, AE_DIM, AE_DEPTH)),
        "ae_out": init_dnn(ks[8], cascade_dims(AE_DIM, EMBED_DIM - MAXT + 1, AE_DEPTH)),
        # projector exists in the torch module but only feeds infoNCE, which is never
        # returned by forward(); kept for structural fidelity, never called.
        "projector": init_dnn(ks[9], [AE_DIM, AE_DIM]),
    }
    return params


# ------------------------------ fused wrappers ------------------------------- #
def apply_dnn(layers, x):
    """DNN_block forward: one fused pallas_call (whole array in VMEM, no grid)."""
    lead, d0 = x.shape[:-1], x.shape[-1]
    x2 = x.reshape(-1, d0)
    m = x2.shape[0]
    if len(layers) == 1:
        l0 = layers[0]
        n = l0["lin"]["W"].shape[1]
        out = pl.pallas_call(
            _dnn1_kernel, out_shape=jax.ShapeDtypeStruct((m, n), jnp.float32),
        )(x2, l0["lin"]["W"], l0["lin"]["b"])
    elif len(layers) == 2:
        l0, l1 = layers
        n = l1["lin"]["W"].shape[1]
        out = pl.pallas_call(
            _dnn2_kernel, out_shape=jax.ShapeDtypeStruct((m, n), jnp.float32),
        )(x2, l0["lin"]["W"], l0["lin"]["b"], l0["ln"]["g"], l0["ln"]["b"],
          l1["lin"]["W"], l1["lin"]["b"])
    else:
        raise NotImplementedError("this configuration only builds 1- or 2-layer DNNs")
    return out.reshape(lead + (n,))


def apply_attn_block(p, Q, K, V, bias):
    """Whole AttnBlock (attention + both LayerNorms + ffwd) as a single pallas_call."""
    B, Lq, E = Q.shape
    Lk = K.shape[1]
    if bias is None:
        bias = jnp.zeros((B, Lq, Lk), jnp.float32)   # compile-time constant under jit
    add_residual = (Lq == Lk)                        # torch: add iff shapes match
    kern = functools.partial(_attn_block_kernel,
                             scale=1.0 / float(np.sqrt(E // NUM_HEADS)),
                             add_residual=add_residual)
    f = p["ffwd"]
    return pl.pallas_call(
        kern, out_shape=jax.ShapeDtypeStruct((B, Lq, E), jnp.float32),
    )(Q, K, V, bias,
      p["q"]["W"], p["q"]["b"], p["k"]["W"], p["k"]["b"], p["v"]["W"], p["v"]["b"],
      p["bias_k"], p["bias_v"], p["out"]["W"], p["out"]["b"],
      p["post_attn_ln"]["g"], p["post_attn_ln"]["b"],
      f[0]["lin"]["W"], f[0]["lin"]["b"], f[0]["ln"]["g"], f[0]["ln"]["b"],
      f[1]["lin"]["W"], f[1]["lin"]["b"],
      p["post_ffwd_ln"]["g"], p["post_ffwd_ln"]["b"])


# ------------------------------ plain-JAX glue ------------------------------- #
def pairwise(w):
    eta, cphi, sphi = w[..., 0], w[..., 1], w[..., 2]
    eta_ij = eta[:, :, None] - eta[:, None, :]
    sin_ij = sphi[:, :, None] * cphi[:, None, :] - cphi[:, :, None] * sphi[:, None, :]
    cos_ij = cphi[:, :, None] * cphi[:, None, :] + sphi[:, :, None] * sphi[:, None, :]
    return jnp.stack([eta_ij, cos_ij, sin_ij], -1)


def x_to_p4(x):
    # NOTE: exact float-equality zeroing matches the PyTorch reference (pt==1 / e==1).
    pt = jnp.exp(x[..., 0])
    pt = jnp.where(pt == 1.0, 0.0, pt)
    eta = x[..., 1]
    px = pt * x[..., 2]
    py = pt * x[..., 3]
    e = jnp.exp(x[..., 4])
    e = jnp.where(e == 1.0, 0.0, e)
    pz = pt * jnp.sinh(eta)
    return jnp.stack([e, px, py, pz], -1)


def m2s_from_p4s(p4s, eps=1e-4):
    return ((p4s[..., 0] * (1 + eps)) ** 2 - p4s[..., 1] ** 2
            - p4s[..., 2] ** 2 - p4s[..., 3] ** 2 + eps)


def ms_from_p4s(p4s, eps=1e-4):
    return jnp.sqrt(m2s_from_p4s(p4s, eps=eps))


def get_mse(a, b):
    return jnp.mean((a - b) ** 2, axis=-1)


def get_jet_choice(x, maskb, thisT):
    # eval-mode: one_hot(argmax over the first thisT features), padded jets zeroed
    jc = jax.nn.one_hot(jnp.argmax(x[:, :, :thisT], axis=-1), MAXT, dtype=jnp.float32)
    return jnp.where(maskb[:, :, None], 0.0, jc)


def build_candidates_simple(x, maskb, thisT):
    B, _, E = x.shape
    jc = get_jet_choice(x, maskb, thisT)
    jt = jnp.swapaxes(jc, 1, 2)                       # (B, T, J)
    return pl.pallas_call(
        _cand_simple_kernel,
        out_shape=jax.ShapeDtypeStruct((B, MAXT, E), jnp.float32),
    )(jt, x)


def build_candidates_full(x, jp4, maskb, thisT):
    B, _, E = x.shape
    jc = get_jet_choice(x, maskb, thisT)
    jt = jnp.swapaxes(jc, 1, 2)                       # (B, T, J)
    c, cp4 = pl.pallas_call(
        _cand_full_kernel,
        out_shape=(jax.ShapeDtypeStruct((B, MAXT, E), jnp.float32),
                   jax.ShapeDtypeStruct((B, MAXT, 4), jnp.float32)),
    )(jt, x, jp4)
    cmass = ms_from_p4s(cp4) / MASS_SCALE
    cfeat = jnp.concatenate([c[:, :, MAXT:], cmass[:, :, None]], -1)  # add_mass_feature
    return cfeat, cp4, jc, cmass


# --------------------------------- Encoder ---------------------------------- #
def encoder_forward(params, x, w, mask, tau):
    del tau  # unused in the eval-mode torch forward as well
    originalx = x
    maskb = mask.astype(bool)
    B, J, _ = x.shape

    # embed: BatchNorm1d (eval) over features (tiny XLA elementwise), fused DNN, mask
    bn = params["bn"]
    xb = (x - bn["mean"]) * jax.lax.rsqrt(bn["var"] + LN_EPS) * bn["g"] + bn["b"]
    xcur = apply_dnn(params["embed"], xb)
    xcur = jnp.where(maskb[:, :, None], 0.0, xcur)

    jp4 = x_to_p4(originalx)                          # computed once, reused per block

    # obj-attention additive bias: mlp(pairwise(w)) + key-padding NEG_INF.
    # Built once (doWij computes wij only at ib==0 and reuses it), reused by both blocks.
    wij = apply_dnn(params["mlp"], pairwise(w))[..., 0]               # (B, J, J)
    obj_bias = wij + jnp.where(maskb[:, None, :], NEG_INF, 0.0)

    T = [OUT_DIM] * ATTN_BLOCKS_N
    masses, mu_logvar, loss, latent_mse = [], [], [], []

    for ib in range(ATTN_BLOCKS_N):
        xcur = apply_attn_block(params["obj"][ib], xcur, xcur, xcur, obj_bias)
        xcur = jnp.where(maskb[:, :, None], 0.0, xcur)

        c = build_candidates_simple(xcur, maskb, T[ib])
        c = apply_attn_block(params["cand"][ib], c, c, c, None)
        xcur = apply_attn_block(params["cross"][ib], xcur, c, c, None)
        xcur = jnp.where(maskb[:, :, None], 0.0, xcur)

        c, candidates_p4, jet_choice, cmass = build_candidates_full(
            xcur, jp4, maskb, T[ib])

        # Run both candidates through ae_in / ae_out in a single fused pass each.
        c0, c1 = c[:, 0], c[:, 1]
        c01 = jnp.concatenate([c0, c1], axis=0)                       # (2B, 15)
        lat01 = apply_dnn(params["ae_in"], c01)                       # (2B, 8)
        out01 = apply_dnn(params["ae_out"], lat01)                    # (2B, 15)
        c0_latent, c1_latent = lat01[:B], lat01[B:]
        c0_out, c1_out = out01[:B], out01[B:]
        c0_latent_rep, c1_latent_rep = c0_latent, c1_latent           # do_vae=False

        # Eval-mode dedup: random_mode=False -> rand candidates/latents are identical,
        # and projector/infoNCE/loss_crossed never reach the returned outputs.
        mse_latent = get_mse(c0_latent_rep, c1_latent_rep)

        mu_logvar.append(jnp.stack([c0_latent, c1_latent], axis=1))
        loss.append(get_mse(c0, c0_out) + get_mse(c1, c1_out))
        latent_mse.append(mse_latent)
        masses.append(ms_from_p4s(candidates_p4))

    loss = jnp.stack(loss, -1)
    mu_logvar = jnp.stack(mu_logvar, -1)
    masses = jnp.stack(masses, 2)
    latent_mse = jnp.stack(latent_mse, -1)
    rand_crossed = latent_mse      # identical in eval / non-random mode

    return (loss, mu_logvar, latent_mse, rand_crossed, candidates_p4, jet_choice,
            (masses, c0, c1, c0_latent_rep, c1_latent_rep, c0_out, c1_out))


# ----------------------------------- main ----------------------------------- #
if __name__ == "__main__":
    key = jax.random.PRNGKey(0)
    kpt, keta, kphi, kparam = jax.random.split(key, 4)

    B, J = 2, 8
    # physically sensible inputs so candidate masses are real (sqrt of positive m^2)
    logpt = jax.random.uniform(kpt, (B, J), jnp.float32, 0.0, 1.0)
    eta = jax.random.uniform(keta, (B, J), jnp.float32, -0.3, 0.3)
    phi = jax.random.uniform(kphi, (B, J), jnp.float32, -np.pi, np.pi)
    loge = logpt + 0.5
    x = jnp.stack([logpt, eta, jnp.cos(phi), jnp.sin(phi), loge], -1)   # (B, J, 5)
    w = jnp.stack([eta, jnp.cos(phi), jnp.sin(phi)], -1)                # (B, J, 3)
    mask = jnp.zeros((B, J), jnp.float32).at[1, J - 2:].set(1.0)        # 1 = padded jet
    tau = jnp.float32(1.0)

    params = init_encoder(kparam)

    fwd = jax.jit(encoder_forward)
    outs = fwd(params, x, w, mask, tau)
    for leaf in jax.tree_util.tree_leaves(outs):
        jax.block_until_ready(leaf)

    # TODO(synk): training-only stochastic paths (gumbel-softmax, dropout, VAE
    # reparameterize, random_mode shuffles) and the addefc/addefp EFC/EFP branches are
    # never executed by this eval-mode, default-config forward and are not implemented.
    print("KERNEL_OK")
</pallas_src>

<mosaic_0001>
module attributes {stable_mosaic.version = 11 : i64} {
  func.func @_dnn2_kernel(%arg0: memref<16x5xf32, #tpu.memory_space<vmem>>, %arg1: memref<5x16xf32, #tpu.memory_space<vmem>>, %arg2: memref<1x16xf32, #tpu.memory_space<vmem>>, %arg3: memref<1x16xf32, #tpu.memory_space<vmem>>, %arg4: memref<1x16xf32, #tpu.memory_space<vmem>>, %arg5: memref<16x16xf32, #tpu.memory_space<vmem>>, %arg6: memref<1x16xf32, #tpu.memory_space<vmem>>, %arg7: memref<16x16xf32, #tpu.memory_space<vmem>>) attributes {dimension_semantics = [], scalar_prefetch = 0 : i64, scratch_operands = 0 : i64, tpu.core_type = #tpu.core_type<tc>} {
    %c0 = arith.constant 0 : index
    %c0_0 = arith.constant 0 : index
    %0 = vector.load %arg0[%c0, %c0_0] : memref<16x5xf32, #tpu.memory_space<vmem>>, vector<16x5xf32>
    %c0_1 = arith.constant 0 : index
    %c0_2 = arith.constant 0 : index
    %1 = vector.load %arg1[%c0_1, %c0_2] : memref<5x16xf32, #tpu.memory_space<vmem>>, vector<5x16xf32>
    %cst = arith.constant dense<0.000000e+00> : vector<16x16xf32>
    %2 = tpu.matmul %0, %1, %cst {dimension_numbers = #tpu.dot_dimension_numbers<[1], [0], [0], [1], [0, 0, 1, 1], [], []>} : vector<16x5xf32>, vector<5x16xf32>, vector<16x16xf32> -> vector<16x16xf32>
    %c0_3 = arith.constant 0 : index
    %c0_4 = arith.constant 0 : index
    %3 = vector.load %arg2[%c0_3, %c0_4] : memref<1x16xf32, #tpu.memory_space<vmem>>, vector<1x16xf32>
    %4 = vector.broadcast %3 : vector<1x16xf32> to vector<16x16xf32>
    %5 = arith.addf %2, %4 : vector<16x16xf32>
    %c0_5 = arith.constant 0 : index
    %c0_6 = arith.constant 0 : index
    %6 = vector.load %arg3[%c0_5, %c0_6] : memref<1x16xf32, #tpu.memory_space<vmem>>, vector<1x16xf32>
    %c0_7 = arith.constant 0 : index
    %c0_8 = arith.constant 0 : index
    %7 = vector.load %arg4[%c0_7, %c0_8] : memref<1x16xf32, #tpu.memory_space<vmem>>, vector<1x16xf32>
    %cst_9 = arith.constant dense<0.000000e+00> : vector<16xf32>
    %8 = vector.multi_reduction <add>, %5, %cst_9 [1] : vector<16x16xf32> to vector<16xf32>
    %9 = vector.shape_cast %8 : vector<16xf32> to vector<16x1xf32>
    %cst_10 = arith.constant 1.600000e+01 : f32
    %10 = vector.broadcast %cst_10 : f32 to vector<16x1xf32>
    %11 = arith.divf %9, %10 : vector<16x1xf32>
    %12 = vector.broadcast %11 : vector<16x1xf32> to vector<16x16xf32>
    %13 = arith.subf %5, %12 : vector<16x16xf32>
    %14 = arith.mulf %13, %13 : vector<16x16xf32>
    %cst_11 = arith.constant dense<0.000000e+00> : vector<16xf32>
    %15 = vector.multi_reduction <add>, %14, %cst_11 [1] : vector<16x16xf32> to vector<16xf32>
    %16 = vector.shape_cast %15 : vector<16xf32> to vector<16x1xf32>
    %cst_12 = arith.constant 1.600000e+01 : f32
    %17 = vector.broadcast %cst_12 : f32 to vector<16x1xf32>
    %18 = arith.divf %16, %17 : vector<16x1xf32>
    %19 = vector.broadcast %11 : vector<16x1xf32> to vector<16x16xf32>
    %20 = arith.subf %5, %19 : vector<16x16xf32>
    %cst_13 = arith.constant 9.99999974E-6 : f32
    %21 = vector.broadcast %cst_13 : f32 to vector<16x1xf32>
    %22 = arith.addf %18, %21 : vector<16x1xf32>
    %23 = math.rsqrt %22 : vector<16x1xf32>
    %24 = vector.broadcast %23 : vector<16x1xf32> to vector<16x16xf32>
    %25 = arith.mulf %20, %24 : vector<16x16xf32>
    %26 = vector.broadcast %6 : vector<1x16xf32> to vector<16x16xf32>
    %27 = arith.mulf %25, %26 : vector<16x16xf32>
    %28 = vector.broadcast %7 : vector<1x16xf32> to vector<16x16xf32>
    %29 = arith.addf %27, %28 : vector<16x16xf32>
    %cst_14 = arith.constant 0.000000e+00 : f32
    %30 = vector.broadcast %cst_14 : f32 to vector<16x16xf32>
    %31 = arith.maximumf %29, %30 : vector<16x16xf32>
    %c0_15 = arith.constant 0 : index
    %c0_16 = arith.constant 0 : index
    %32 = vector.load %arg5[%c0_15, %c0_16] : memref<16x16xf32, #tpu.memory_space<vmem>>, vector<16x16xf32>
    %cst_17 = arith.constant dense<0.000000e+00> : vector<16x16xf32>
    %33 = tpu.matmul %31, %32, %cst_17 {dimension_numbers = #tpu.dot_dimension_numbers<[1], [0], [0], [1], [0, 0, 1, 1], [], []>} : vector<16x16xf32>, vector<16x16xf32>, vector<16x16xf32> -> vector<16x16xf32>
    %c0_18 = arith.constant 0 : index
    %c0_19 = arith.constant 0 : index
    %34 = vector.load %arg6[%c0_18, %c0_19] : memref<1x16xf32, #tpu.memory_space<vmem>>, vector<1x16xf32>
    %35 = vector.broadcast %34 : vector<1x16xf32> to vector<16x16xf32>
    %36 = arith.addf %33, %35 : vector<16x16xf32>
    %c0_20 = arith.constant 0 : index
    %c0_21 = arith.constant 0 : index
    %37 = vector.load %arg7[%c0_20, %c0_21] : memref<16x16xf32, #tpu.memory_space<vmem>>, vector<16x16xf32>
    tpu.vector_store %arg7[%c0_20, %c0_21], %36 {strides = array<i32>} : memref<16x16xf32, #tpu.memory_space<vmem>>, vector<16x16xf32>,
    return
  }
}

module attributes {stable_mosaic.version = 11 : i64} {
  func.func @_dnn2_kernel(%arg0: memref<128x3xf32, #tpu.memory_space<vmem>>, %arg1: memref<3x8xf32, #tpu.memory_space<vmem>>, %arg2: memref<1x8xf32, #tpu.memory_space<vmem>>, %arg3: memref<1x8xf32, #tpu.memory_space<vmem>>, %arg4: memref<1x8xf32, #tpu.memory_space<vmem>>, %arg5: memref<8x1xf32, #tpu.memory_space<vmem>>, %arg6: memref<1x1xf32, #tpu.memory_space<vmem>>, %arg7: memref<128x1xf32, #tpu.memory_space<vmem>>) attributes {dimension_semantics = [], scalar_prefetch = 0 : i64, scratch_operands = 0 : i64, tpu.core_type = #tpu.core_type<tc>} {
    %c0 = arith.constant 0 : index
    %c0_0 = arith.constant 0 : index
    %0 = vector.load %arg0[%c0, %c0_0] : memref<128x3xf32, #tpu.memory_space<vmem>>, vector<128x3xf32>
    %c0_1 = arith.constant 0 : index
    %c0_2 = arith.constant 0 : index
    %1 = vector.load %arg1[%c0_1, %c0_2] : memref<3x8xf32, #tpu.memory_space<vmem>>, vector<3x8xf32>
    %cst = arith.constant dense<0.000000e+00> : vector<128x8xf32>
    %2 = tpu.matmul %0, %1, %cst {dimension_numbers = #tpu.dot_dimension_numbers<[1], [0], [0], [1], [0, 0, 1, 1], [], []>} : vector<128x3xf32>, vector<3x8xf32>, vector<128x8xf32> -> vector<128x8xf32>
    %c0_3 = arith.constant 0 : index
    %c0_4 = arith.constant 0 : index
    %3 = vector.load %arg2[%c0_3, %c0_4] : memref<1x8xf32, #tpu.memory_space<vmem>>, vector<1x8xf32>
    %4 = vector.broadcast %3 : vector<1x8xf32> to vector<128x8xf32>
    %5 = arith.addf %2, %4 : vector<128x8xf32>
    %c0_5 = arith.constant 0 : index
    %c0_6 = arith.constant 0 : index
    %6 = vector.load %arg3[%c0_5, %c0_6] : memref<1x8xf32, #tpu.memory_space<vmem>>, vector<1x8xf32>
    %c0_7 = arith.constant 0 : index
    %c0_8 = arith.constant 0 : index
    %7 = vector.load %arg4[%c0_7, %c0_8] : memref<1x8xf32, #tpu.memory_space<vmem>>, vector<1x8xf32>
    %cst_9 = arith.constant dense<0.000000e+00> : vector<128xf32>
    %8 = vector.multi_reduction <add>, %5, %cst_9 [1] : vector<128x8xf32> to vector<128xf32>
    %9 = vector.shape_cast %8 : vector<128xf32> to vector<128x1xf32>
    %cst_10 = arith.constant 8.000000e+00 : f32
    %10 = vector.broadcast %cst_10 : f32 to vector<128x1xf32>
    %11 = arith.divf %9, %10 : vector<128x1xf32>
    %12 = vector.broadcast %11 : vector<128x1xf32> to vector<128x8xf32>
    %13 = arith.subf %5, %12 : vector<128x8xf32>
    %14 = arith.mulf %13, %13 : vector<128x8xf32>
    %cst_11 = arith.constant dense<0.000000e+00> : vector<128xf32>
    %15 = vector.multi_reduction <add>, %14, %cst_11 [1] : vector<128x8xf32> to vector<128xf32>
    %16 = vector.shape_cast %15 : vector<128xf32> to vector<128x1xf32>
    %cst_12 = arith.constant 8.000000e+00 : f32
    %17 = vector.broadcast %cst_12 : f32 to vector<128x1xf32>
    %18 = arith.divf %16, %17 : vector<128x1xf32>
    %19 = vector.broadcast %11 : vector<128x1xf32> to vector<128x8xf32>
    %20 = arith.subf %5, %19 : vector<128x8xf32>
    %cst_13 = arith.constant 9.99999974E-6 : f32
    %21 = vector.broadcast %cst_13 : f32 to vector<128x1xf32>
    %22 = arith.addf %18, %21 : vector<128x1xf32>
    %23 = math.rsqrt %22 : vector<128x1xf32>
    %24 = vector.broadcast %23 : vector<128x1xf32> to vector<128x8xf32>
    %25 = arith.mulf %20, %24 : vector<128x8xf32>
    %26 = vector.broadcast %6 : vector<1x8xf32> to vector<128x8xf32>
    %27 = arith.mulf %25, %26 : vector<128x8xf32>
    %28 = vector.broadcast %7 : vector<1x8xf32> to vector<128x8xf32>
    %29 = arith.addf %27, %28 : vector<128x8xf32>
    %cst_14 = arith.constant 0.000000e+00 : f32
    %30 = vector.broadcast %cst_14 : f32 to vector<128x8xf32>
    %31 = arith.maximumf %29, %30 : vector<128x8xf32>
    %c0_15 = arith.constant 0 : index
    %c0_16 = arith.constant 0 : index
    %32 = vector.load %arg5[%c0_15, %c0_16] : memref<8x1xf32, #tpu.memory_space<vmem>>, vector<8x1xf32>
    %cst_17 = arith.constant dense<0.000000e+00> : vector<128x1xf32>
    %33 = tpu.matmul %31, %32, %cst_17 {dimension_numbers = #tpu.dot_dimension_numbers<[1], [0], [0], [1], [0, 0, 1, 1], [], []>} : vector<128x8xf32>, vector<8x1xf32>, vector<128x1xf32> -> vector<128x1xf32>
    %c0_18 = arith.constant 0 : index
    %c0_19 = arith.constant 0 : index
    %34 = vector.load %arg6[%c0_18, %c0_19] : memref<1x1xf32, #tpu.memory_space<vmem>>, vector<1x1xf32>
    %35 = vector.broadcast %34 : vector<1x1xf32> to vector<128x1xf32>
    %36 = arith.addf %33, %35 : vector<128x1xf32>
    %c0_20 = arith.constant 0 : index
    %c0_21 = arith.constant 0 : index
    %37 = vector.load %arg7[%c0_20, %c0_21] : memref<128x1xf32, #tpu.memory_space<vmem>>, vector<128x1xf32>
    tpu.vector_store %arg7[%c0_20, %c0_21], %36 {strides = array<i32>} : memref<128x1xf32, #tpu.memory_space<vmem>>, vector<128x1xf32>,
    return
  }
}

module attributes {stable_mosaic.version = 11 : i64} {
  func.func @_attn_block_kernel(%arg0: memref<2x8x16xf32, #tpu.memory_space<vmem>>, %arg1: memref<2x8x16xf32, #tpu.memory_space<vmem>>, %arg2: memref<2x8x16xf32, #tpu.memory_space<vmem>>, %arg3: memref<2x8x8xf32, #tpu.memory_space<vmem>>, %arg4: memref<16x16xf32, #tpu.memory_space<vmem>>, %arg5: memref<1x16xf32, #tpu.memory_space<vmem>>, %arg6: memref<16x16xf32, #tpu.memory_space<vmem>>, %arg7: memref<1x16xf32, #tpu.memory_space<vmem>>, %arg8: memref<16x16xf32, #tpu.memory_space<vmem>>, %arg9: memref<1x16xf32, #tpu.memory_space<vmem>>, %arg10: memref<16x1xf32, #tpu.memory_space<vmem>>, %arg11: memref<1x16xf32, #tpu.memory_space<vmem>>, %arg12: memref<16x16xf32, #tpu.memory_space<vmem>>, %arg13: memref<1x16xf32, #tpu.memory_space<vmem>>, %arg14: memref<1x16xf32, #tpu.memory_space<vmem>>, %arg15: memref<1x16xf32, #tpu.memory_space<vmem>>, %arg16: memref<16x16xf32, #tpu.memory_space<vmem>>, %arg17: memref<1x16xf32, #tpu.memory_space<vmem>>, %arg18: memref<1x16xf32, #tpu.memory_space<vmem>>, %arg19: memref<1x16xf32, #tpu.memory_space<vmem>>, %arg20: memref<16x16xf32, #tpu.memory_space<vmem>>, %arg21: memref<1x16xf32, #tpu.memory_space<vmem>>, %arg22: memref<1x16xf32, #tpu.memory_space<vmem>>, %arg23: memref<1x16xf32, #tpu.memory_space<vmem>>, %arg24: memref<2x8x16xf32, #tpu.memory_space<vmem>>) attributes {dimension_semantics = [], scalar_prefetch = 0 : i64, scratch_operands = 0 : i64, tpu.core_type = #tpu.core_type<tc>} {
    %c0 = arith.constant 0 : index
    %c0_0 = arith.constant 0 : index
    %0 = vector.load %arg4[%c0, %c0_0] : memref<16x16xf32, #tpu.memory_space<vmem>>, vector<16x16xf32>
    %c0_1 = arith.constant 0 : index
    %c0_2 = arith.constant 0 : index
    %1 = vector.load %arg5[%c0_1, %c0_2] : memref<1x16xf32, #tpu.memory_space<vmem>>, vector<1x16xf32>
    %c0_3 = arith.constant 0 : index
    %c0_4 = arith.constant 0 : index
    %2 = vector.load %arg6[%c0_3, %c0_4] : memref<16x16xf32, #tpu.memory_space<vmem>>, vector<16x16xf32>
    %c0_5 = arith.constant 0 : index
    %c0_6 = arith.constant 0 : index
    %3 = vector.load %arg7[%c0_5, %c0_6] : memref<1x16xf32, #tpu.memory_space<vmem>>, vector<1x16xf32>
    %c0_7 = arith.constant 0 : index
    %c0_8 = arith.constant 0 : index
    %4 = vector.load %arg8[%c0_7, %c0_8] : memref<16x16xf32, #tpu.memory_space<vmem>>, vector<16x16xf32>
    %c0_9 = arith.constant 0 : index
    %c0_10 = arith.constant 0 : index
    %5 = vector.load %arg9[%c0_9, %c0_10] : memref<1x16xf32, #tpu.memory_space<vmem>>, vector<1x16xf32>
    %c0_11 = arith.constant 0 : index
    %c0_12 = arith.constant 0 : index
    %6 = vector.load %arg10[%c0_11, %c0_12] : memref<16x1xf32, #tpu.memory_space<vmem>>, vector<16x1xf32>
    %c0_13 = arith.constant 0 : index
    %c0_14 = arith.constant 0 : index
    %7 = vector.load %arg11[%c0_13, %c0_14] : memref<1x16xf32, #tpu.memory_space<vmem>>, vector<1x16xf32>
    %c0_15 = arith.constant 0 : index
    %c0_16 = arith.constant 0 : index
    %8 = vector.load %arg12[%c0_15, %c0_16] : memref<16x16xf32, #tpu.memory_space<vmem>>, vector<16x16xf32>
    %c0_17 = arith.constant 0 : index
    %c0_18 = arith.constant 0 : index
    %9 = vector.load %arg13[%c0_17, %c0_18] : memref<1x16xf32, #tpu.memory_space<vmem>>, vector<1x16xf32>
    %c0_19 = arith.constant 0 : index
    %c0_20 = arith.constant 0 : index
    %10 = vector.load %arg14[%c0_19, %c0_20] : memref<1x16xf32, #tpu.memory_space<vmem>>, vector<1x16xf32>
    %c0_21 = arith.constant 0 : index
    %c0_22 = arith.constant 0 : index
    %11 = vector.load %arg15[%c0_21, %c0_22] : memref<1x16xf32, #tpu.memory_space<vmem>>, vector<1x16xf32>
    %c0_23 = arith.constant 0 : index
    %c0_24 = arith.constant 0 : index
    %12 = vector.load %arg16[%c0_23, %c0_24] : memref<16x16xf32, #tpu.memory_space<vmem>>, vector<16x16xf32>
    %c0_25 = arith.constant 0 : index
    %c0_26 = arith.constant 0 : index
    %13 = vector.load %arg17[%c0_25, %c0_26] : memref<1x16xf32, #tpu.memory_space<vmem>>, vector<1x16xf32>
    %c0_27 = arith.constant 0 : index
    %c0_28 = arith.constant 0 : index
    %14 = vector.load %arg18[%c0_27, %c0_28] : memref<1x16xf32, #tpu.memory_space<vmem>>, vector<1x16xf32>
    %c0_29 = arith.constant 0 : index
    %c0_30 = arith.constant 0 : index
    %15 = vector.load %arg19[%c0_29, %c0_30] : memref<1x16xf32, #tpu.memory_space<vmem>>, vector<1x16xf32>
    %c0_31 = arith.constant 0 : index
    %c0_32 = arith.constant 0 : index
    %16 = vector.load %arg20[%c0_31, %c0_32] : memref<16x16xf32, #tpu.memory_space<vmem>>, vector<16x16xf32>
    %c0_33 = arith.constant 0 : index
    %c0_34 = arith.constant 0 : index
    %17 = vector.load %arg21[%c0_33, %c0_34] : memref<1x16xf32, #tpu.memory_space<vmem>>, vector<1x16xf32>
    %c0_35 = arith.constant 0 : index
    %c0_36 = arith.constant 0 : index
    %18 = vector.load %arg22[%c0_35, %c0_36] : memref<1x16xf32, #tpu.memory_space<vmem>>, vector<1x16xf32>
    %c0_37 = arith.constant 0 : index
    %c0_38 = arith.constant 0 : index
    %19 = vector.load %arg23[%c0_37, %c0_38] : memref<1x16xf32, #tpu.memory_space<vmem>>, vector<1x16xf32>
    %c0_39 = arith.constant 0 : index
    %c0_40 = arith.constant 0 : index
    %c0_41 = arith.constant 0 : index
    %20 = vector.load %arg0[%c0_39, %c0_40, %c0_41] : memref<2x8x16xf32, #tpu.memory_space<vmem>>, vector<1x8x16xf32>
    %21 = vector.shape_cast %20 : vector<1x8x16xf32> to vector<8x16xf32>
    %c0_42 = arith.constant 0 : index
    %c0_43 = arith.constant 0 : index
    %c0_44 = arith.constant 0 : index
    %22 = vector.load %arg1[%c0_42, %c0_43, %c0_44] : memref<2x8x16xf32, #tpu.memory_space<vmem>>, vector<1x8x16xf32>
    %23 = vector.shape_cast %22 : vector<1x8x16xf32> to vector<8x16xf32>
    %c0_45 = arith.constant 0 : index
    %c0_46 = arith.constant 0 : index
    %c0_47 = arith.constant 0 : index
    %24 = vector.load %arg2[%c0_45, %c0_46, %c0_47] : memref<2x8x16xf32, #tpu.memory_space<vmem>>, vector<1x8x16xf32>
    %25 = vector.shape_cast %24 : vector<1x8x16xf32> to vector<8x16xf32>
    %cst = arith.constant dense<0.000000e+00> : vector<8x16xf32>
    %26 = tpu.matmul %21, %0, %cst {dimension_numbers = #tpu.dot_dimension_numbers<[1], [0], [0], [1], [0, 0, 1, 1], [], []>} : vector<8x16xf32>, vector<16x16xf32>, vector<8x16xf32> -> vector<8x16xf32>
    %27 = vector.broadcast %1 : vector<1x16xf32> to vector<8x16xf32>
    %28 = arith.addf %26, %27 : vector<8x16xf32>
    %cst_48 = arith.constant dense<0.000000e+00> : vector<8x16xf32>
    %29 = tpu.matmul %23, %2, %cst_48 {dimension_numbers = #tpu.dot_dimension_numbers<[1], [0], [0], [1], [0, 0, 1, 1], [], []>} : vector<8x16xf32>, vector<16x16xf32>, vector<8x16xf32> -> vector<8x16xf32>
    %30 = vector.broadcast %3 : vector<1x16xf32> to vector<8x16xf32>
    %31 = arith.addf %29, %30 : vector<8x16xf32>
    %cst_49 = arith.constant dense<0.000000e+00> : vector<8x16xf32>
    %32 = tpu.matmul %25, %4, %cst_49 {dimension_numbers = #tpu.dot_dimension_numbers<[1], [0], [0], [1], [0, 0, 1, 1], [], []>} : vector<8x16xf32>, vector<16x16xf32>, vector<8x16xf32> -> vector<8x16xf32>
    %33 = vector.broadcast %5 : vector<1x16xf32> to vector<8x16xf32>
    %34 = arith.addf %32, %33 : vector<8x16xf32>
    %cst_50 = arith.constant dense<0.000000e+00> : vector<8x8xf32>
    %35 = tpu.matmul %28, %31, %cst_50 {dimension_numbers = #tpu.dot_dimension_numbers<[1], [1], [0], [0], [0, 0, 1, 0], [], []>} : vector<8x16xf32>, vector<8x16xf32>, vector<8x8xf32> -> vector<8x8xf32>
    %cst_51 = arith.constant 2.500000e-01 : f32
    %36 = vector.broadcast %cst_51 : f32 to vector<8x8xf32>
    %37 = arith.mulf %35, %36 : vector<8x8xf32>
    %c0_52 = arith.constant 0 : index
    %c0_53 = arith.constant 0 : index
    %c0_54 = arith.constant 0 : index
    %38 = vector.load %arg3[%c0_52, %c0_53, %c0_54] : memref<2x8x8xf32, #tpu.memory_space<vmem>>, vector<1x8x8xf32>
    %39 = vector.shape_cast %38 : vector<1x8x8xf32> to vector<8x8xf32>
    %40 = arith.addf %37, %39 : vector<8x8xf32>
    %cst_55 = arith.constant dense<0.000000e+00> : vector<8x1xf32>
    %41 = tpu.matmul %28, %6, %cst_55 {dimension_numbers = #tpu.dot_dimension_numbers<[1], [0], [0], [1], [0, 0, 1, 1], [], []>} : vector<8x16xf32>, vector<16x1xf32>, vector<8x1xf32> -> vector<8x1xf32>
    %cst_56 = arith.constant 2.500000e-01 : f32
    %42 = vector.broadcast %cst_56 : f32 to vector<8x1xf32>
    %43 = arith.mulf %41, %42 : vector<8x1xf32>
    %cst_57 = arith.constant dense<0xFF800000> : vector<8xf32>
    %44 = vector.multi_reduction <maximumf>, %40, %cst_57 [1] : vector<8x8xf32> to vector<8xf32>
    %45 = vector.shape_cast %44 : vector<8xf32> to vector<8x1xf32>
    %46 = arith.maximumf %45, %43 : vector<8x1xf32>
    %47 = vector.broadcast %46 : vector<8x1xf32> to vector<8x8xf32>
    %48 = arith.subf %40, %47 : vector<8x8xf32>
    %49 = math.exp %48 : vector<8x8xf32>
    %50 = arith.subf %43, %46 : vector<8x1xf32>
    %51 = math.exp %50 : vector<8x1xf32>
    %cst_58 = arith.constant dense<0.000000e+00> : vector<8xf32>
    %52 = vector.multi_reduction <add>, %49, %cst_58 [1] : vector<8x8xf32> to vector<8xf32>
    %53 = vector.shape_cast %52 : vector<8xf32> to vector<8x1xf32>
    %54 = arith.addf %53, %51 : vector<8x1xf32>
    %55 = tpu.reciprocal %54 {approx = true} : vector<8x1xf32> -> vector<8x1xf32>
    %cst_59 = arith.constant dense<0.000000e+00> : vector<8x16xf32>
    %56 = tpu.matmul %49, %34, %cst_59 {dimension_numbers = #tpu.dot_dimension_numbers<[1], [0], [0], [1], [0, 0, 1, 1], [], []>} : vector<8x8xf32>, vector<8x16xf32>, vector<8x16xf32> -> vector<8x16xf32>
    %57 = vector.broadcast %51 : vector<8x1xf32> to vector<8x16xf32>
    %58 = vector.broadcast %7 : vector<1x16xf32> to vector<8x16xf32>
    %59 = arith.mulf %57, %58 : vector<8x16xf32>
    %60 = arith.addf %56, %59 : vector<8x16xf32>
    %61 = vector.broadcast %55 : vector<8x1xf32> to vector<8x16xf32>
    %62 = arith.mulf %60, %61 : vector<8x16xf32>
    %cst_60 = arith.constant dense<0.000000e+00> : vector<8x16xf32>
    %63 = tpu.matmul %62, %8, %cst_60 {dimension_numbers = #tpu.dot_dimension_numbers<[1], [0], [0], [1], [0, 0, 1, 1], [], []>} : vector<8x16xf32>, vector<16x16xf32>, vector<8x16xf32> -> vector<8x16xf32>
    %64 = vector.broadcast %9 : vector<1x16xf32> to vector<8x16xf32>
    %65 = arith.addf %63, %64 : vector<8x16xf32>
    %66 = arith.addf %65, %25 : vector<8x16xf32>
    %cst_61 = arith.constant dense<0.000000e+00> : vector<8xf32>
    %67 = vector.multi_reduction <add>, %66, %cst_61 [1] : vector<8x16xf32> to vector<8xf32>
    %68 = vector.shape_cast %67 : vector<8xf32> to vector<8x1xf32>
    %cst_62 = arith.constant 1.600000e+01 : f32
    %69 = vector.broadcast %cst_62 : f32 to vector<8x1xf32>
    %70 = arith.divf %68, %69 : vector<8x1xf32>
    %71 = vector.broadcast %70 : vector<8x1xf32> to vector<8x16xf32>
    %72 = arith.subf %66, %71 : vector<8x16xf32>
    %73 = arith.mulf %72, %72 : vector<8x16xf32>
    %cst_63 = arith.constant dense<0.000000e+00> : vector<8xf32>
    %74 = vector.multi_reduction <add>, %73, %cst_63 [1] : vector<8x16xf32> to vector<8xf32>
    %75 = vector.shape_cast %74 : vector<8xf32> to vector<8x1xf32>
    %cst_64 = arith.constant 1.600000e+01 : f32
    %76 = vector.broadcast %cst_64 : f32 to vector<8x1xf32>
    %77 = arith.divf %75, %76 : vector<8x1xf32>
    %78 = vector.broadcast %70 : vector<8x1xf32> to vector<8x16xf32>
    %79 = arith.subf %66, %78 : vector<8x16xf32>
    %cst_65 = arith.constant 9.99999974E-6 : f32
    %80 = vector.broadcast %cst_65 : f32 to vector<8x1xf32>
    %81 = arith.addf %77, %80 : vector<8x1xf32>
    %82 = math.rsqrt %81 : vector<8x1xf32>
    %83 = vector.broadcast %82 : vector<8x1xf32> to vector<8x16xf32>
    %84 = arith.mulf %79, %83 : vector<8x16xf32>
    %85 = vector.broadcast %10 : vector<1x16xf32> to vector<8x16xf32>
    %86 = arith.mulf %84, %85 : vector<8x16xf32>
    %87 = vector.broadcast %11 : vector<1x16xf32> to vector<8x16xf32>
    %88 = arith.addf %86, %87 : vector<8x16xf32>
    %cst_66 = arith.constant dense<0.000000e+00> : vector<8x16xf32>
    %89 = tpu.matmul %88, %12, %cst_66 {dimension_numbers = #tpu.dot_dimension_numbers<[1], [0], [0], [1], [0, 0, 1, 1], [], []>} : vector<8x16xf32>, vector<16x16xf32>, vector<8x16xf32> -> vector<8x16xf32>
    %90 = vector.broadcast %13 : vector<1x16xf32> to vector<8x16xf32>
    %91 = arith.addf %89, %90 : vector<8x16xf32>
    %cst_67 = arith.constant dense<0.000000e+00> : vector<8xf32>
    %92 = vector.multi_reduction <add>, %91, %cst_67 [1] : vector<8x16xf32> to vector<8xf32>
    %93 = vector.shape_cast %92 : vector<8xf32> to vector<8x1xf32>
    %cst_68 = arith.constant 1.600000e+01 : f32
    %94 = vector.broadcast %cst_68 : f32 to vector<8x1xf32>
    %95 = arith.divf %93, %94 : vector<8x1xf32>
    %96 = vector.broadcast %95 : vector<8x1xf32> to vector<8x16xf32>
    %97 = arith.subf %91, %96 : vector<8x16xf32>
    %98 = arith.mulf %97, %97 : vector<8x16xf32>
    %cst_69 = arith.constant dense<0.000000e+00> : vector<8xf32>
    %99 = vector.multi_reduction <add>, %98, %cst_69 [1] : vector<8x16xf32> to vector<8xf32>
    %100 = vector.shape_cast %99 : vector<8xf32> to vector<8x1xf32>
    %cst_70 = arith.constant 1.600000e+01 : f32
    %101 = vector.broadcast %cst_70 : f32 to vector<8x1xf32>
    %102 = arith.divf %100, %101 : vector<8x1xf32>
    %103 = vector.broadcast %95 : vector<8x1xf32> to vector<8x16xf32>
    %104 = arith.subf %91, %103 : vector<8x16xf32>
    %cst_71 = arith.constant 9.99999974E-6 : f32
    %105 = vector.broadcast %cst_71 : f32 to vector<8x1xf32>
    %106 = arith.addf %102, %105 : vector<8x1xf32>
    %107 = math.rsqrt %106 : vector<8x1xf32>
    %108 = vector.broadcast %107 : vector<8x1xf32> to vector<8x16xf32>
    %109 = arith.mulf %104, %108 : vector<8x16xf32>
    %110 = vector.broadcast %14 : vector<1x16xf32> to vector<8x16xf32>
    %111 = arith.mulf %109, %110 : vector<8x16xf32>
    %112 = vector.broadcast %15 : vector<1x16xf32> to vector<8x16xf32>
    %113 = arith.addf %111, %112 : vector<8x16xf32>
    %cst_72 = arith.constant 0.000000e+00 : f32
    %114 = vector.broadcast %cst_72 : f32 to vector<8x16xf32>
    %115 = arith.maximumf %113, %114 : vector<8x16xf32>
    %cst_73 = arith.constant dense<0.000000e+00> : vector<8x16xf32>
    %116 = tpu.matmul %115, %16, %cst_73 {dimension_numbers = #tpu.dot_dimension_numbers<[1], [0], [0], [1], [0, 0, 1, 1], [], []>} : vector<8x16xf32>, vector<16x16xf32>, vector<8x16xf32> -> vector<8x16xf32>
    %117 = vector.broadcast %17 : vector<1x16xf32> to vector<8x16xf32>
    %118 = arith.addf %116, %117 : vector<8x16xf32>
    %119 = arith.addf %118, %88 : vector<8x16xf32>
    %cst_74 = arith.constant dense<0.000000e+00> : vector<8xf32>
    %120 = vector.multi_reduction <add>, %119, %cst_74 [1] : vector<8x16xf32> to vector<8xf32>
    %121 = vector.shape_cast %120 : vector<8xf32> to vector<8x1xf32>
    %cst_75 = arith.constant 1.600000e+01 : f32
    %122 = vector.broadcast %cst_75 : f32 to vector<8x1xf32>
    %123 = arith.divf %121, %122 : vector<8x1xf32>
    %124 = vector.broadcast %123 : vector<8x1xf32> to vector<8x16xf32>
    %125 = arith.subf %119, %124 : vector<8x16xf32>
    %126 = arith.mulf %125, %125 : vector<8x16xf32>
    %cst_76 = arith.constant dense<0.000000e+00> : vector<8xf32>
    %127 = vector.multi_reduction <add>, %126, %cst_76 [1] : vector<8x16xf32> to vector<8xf32>
    %128 = vector.shape_cast %127 : vector<8xf32> to vector<8x1xf32>
    %cst_77 = arith.constant 1.600000e+01 : f32
    %129 = vector.broadcast %cst_77 : f32 to vector<8x1xf32>
    %130 = arith.divf %128, %129 : vector<8x1xf32>
    %131 = vector.broadcast %123 : vector<8x1xf32> to vector<8x16xf32>
    %132 = arith.subf %119, %131 : vector<8x16xf32>
    %cst_78 = arith.constant 9.99999974E-6 : f32
    %133 = vector.broadcast %cst_78 : f32 to vector<8x1xf32>
    %134 = arith.addf %130, %133 : vector<8x1xf32>
    %135 = math.rsqrt %134 : vector<8x1xf32>
    %136 = vector.broadcast %135 : vector<8x1xf32> to vector<8x16xf32>
    %137 = arith.mulf %132, %136 : vector<8x16xf32>
    %138 = vector.broadcast %18 : vector<1x16xf32> to vector<8x16xf32>
    %139 = arith.mulf %137, %138 : vector<8x16xf32>
    %140 = vector.broadcast %19 : vector<1x16xf32> to vector<8x16xf32>
    %141 = arith.addf %139, %140 : vector<8x16xf32>
    %c0_79 = arith.constant 0 : index
    %c0_80 = arith.constant 0 : index
    %c0_81 = arith.constant 0 : index
    %142 = vector.load %arg24[%c0_79, %c0_80, %c0_81] : memref<2x8x16xf32, #tpu.memory_space<vmem>>, vector<1x8x16xf32>
    %143 = vector.shape_cast %142 : vector<1x8x16xf32> to vector<8x16xf32>
    %144 = vector.shape_cast %141 : vector<8x16xf32> to vector<1x8x16xf32>
    tpu.vector_store %arg24[%c0_79, %c0_80, %c0_81], %144 {strides = array<i32>} : memref<2x8x16xf32, #tpu.memory_space<vmem>>, vector<1x8x16xf32>,
    %c1 = arith.constant 1 : index
    %c0_82 = arith.constant 0 : index
    %c0_83 = arith.constant 0 : index
    %145 = vector.load %arg0[%c1, %c0_82, %c0_83] : memref<2x8x16xf32, #tpu.memory_space<vmem>>, vector<1x8x16xf32>
    %146 = vector.shape_cast %145 : vector<1x8x16xf32> to vector<8x16xf32>
    %c1_84 = arith.constant 1 : index
    %c0_85 = arith.constant 0 : index
    %c0_86 = arith.constant 0 : index
    %147 = vector.load %arg1[%c1_84, %c0_85, %c0_86] : memref<2x8x16xf32, #tpu.memory_space<vmem>>, vector<1x8x16xf32>
    %148 = vector.shape_cast %147 : vector<1x8x16xf32> to vector<8x16xf32>
    %c1_87 = arith.constant 1 : index
    %c0_88 = arith.constant 0 : index
    %c0_89 = arith.constant 0 : index
    %149 = vector.load %arg2[%c1_87, %c0_88, %c0_89] : memref<2x8x16xf32, #tpu.memory_space<vmem>>, vector<1x8x16xf32>
    %150 = vector.shape_cast %149 : vector<1x8x16xf32> to vector<8x16xf32>
    %cst_90 = arith.constant dense<0.000000e+00> : vector<8x16xf32>
    %151 = tpu.matmul %146, %0, %cst_90 {dimension_numbers = #tpu.dot_dimension_numbers<[1], [0], [0], [1], [0, 0, 1, 1], [], []>} : vector<8x16xf32>, vector<16x16xf32>, vector<8x16xf32> -> vector<8x16xf32>
    %152 = vector.broadcast %1 : vector<1x16xf32> to vector<8x16xf32>
    %153 = arith.addf %151, %152 : vector<8x16xf32>
    %cst_91 = arith.constant dense<0.000000e+00> : vector<8x16xf32>
    %154 = tpu.matmul %148, %2, %cst_91 {dimension_numbers = #tpu.dot_dimension_numbers<[1], [0], [0], [1], [0, 0, 1, 1], [], []>} : vector<8x16xf32>, vector<16x16xf32>, vector<8x16xf32> -> vector<8x16xf32>
    %155 = vector.broadcast %3 : vector<1x16xf32> to vector<8x16xf32>
    %156 = arith.addf %154, %155 : vector<8x16xf32>
    %cst_92 = arith.constant dense<0.000000e+00> : vector<8x16xf32>
    %157 = tpu.matmul %150, %4, %cst_92 {dimension_numbers = #tpu.dot_dimension_numbers<[1], [0], [0], [1], [0, 0, 1, 1], [], []>} : vector<8x16xf32>, vector<16x16xf32>, vector<8x16xf32> -> vector<8x16xf32>
    %158 = vector.broadcast %5 : vector<1x16xf32> to vector<8x16xf32>
    %159 = arith.addf %157, %158 : vector<8x16xf32>
    %cst_93 = arith.constant dense<0.000000e+00> : vector<8x8xf32>
    %160 = tpu.matmul %153, %156, %cst_93 {dimension_numbers = #tpu.dot_dimension_numbers<[1], [1], [0], [0], [0, 0, 1, 0], [], []>} : vector<8x16xf32>, vector<8x16xf32>, vector<8x8xf32> -> vector<8x8xf32>
    %cst_94 = arith.constant 2.500000e-01 : f32
    %161 = vector.broadcast %cst_94 : f32 to vector<8x8xf32>
    %162 = arith.mulf %160, %161 : vector<8x8xf32>
    %c1_95 = arith.constant 1 : index
    %c0_96 = arith.constant 0 : index
    %c0_97 = arith.constant 0 : index
    %163 = vector.load %arg3[%c1_95, %c0_96, %c0_97] : memref<2x8x8xf32, #tpu.memory_space<vmem>>, vector<1x8x8xf32>
    %164 = vector.shape_cast %163 : vector<1x8x8xf32> to vector<8x8xf32>
    %165 = arith.addf %162, %164 : vector<8x8xf32>
    %cst_98 = arith.constant dense<0.000000e+00> : vector<8x1xf32>
    %166 = tpu.matmul %153, %6, %cst_98 {dimension_numbers = #tpu.dot_dimension_numbers<[1], [0], [0], [1], [0, 0, 1, 1], [], []>} : vector<8x16xf32>, vector<16x1xf32>, vector<8x1xf32> -> vector<8x1xf32>
    %cst_99 = arith.constant 2.500000e-01 : f32
    %167 = vector.broadcast %cst_99 : f32 to vector<8x1xf32>
    %168 = arith.mulf %166, %167 : vector<8x1xf32>
    %cst_100 = arith.constant dense<0xFF800000> : vector<8xf32>
    %169 = vector.multi_reduction <maximumf>, %165, %cst_100 [1] : vector<8x8xf32> to vector<8xf32>
    %170 = vector.shape_cast %169 : vector<8xf32> to vector<8x1xf32>
    %171 = arith.maximumf %170, %168 : vector<8x1xf32>
    %172 = vector.broadcast %171 : vector<8x1xf32> to vector<8x8xf32>
    %173 = arith.subf %165, %172 : vector<8x8xf32>
    %174 = math.exp %173 : vector<8x8xf32>
    %175 = arith.subf %168, %171 : vector<8x1xf32>
    %176 = math.exp %175 : vector<8x1xf32>
    %cst_101 = arith.constant dense<0.000000e+00> : vector<8xf32>
    %177 = vector.multi_reduction <add>, %174, %cst_101 [1] : vector<8x8xf32> to vector<8xf32>
    %178 = vector.shape_cast %177 : vector<8xf32> to vector<8x1xf32>
    %179 = arith.addf %178, %176 : vector<8x1xf32>
    %180 = tpu.reciprocal %179 {approx = true} : vector<8x1xf32> -> vector<8x1xf32>
    %cst_102 = arith.constant dense<0.000000e+00> : vector<8x16xf32>
    %181 = tpu.matmul %174, %159, %cst_102 {dimension_numbers = #tpu.dot_dimension_numbers<[1], [0], [0], [1], [0, 0, 1, 1], [], []>} : vector<8x8xf32>, vector<8x16xf32>, vector<8x16xf32> -> vector<8x16xf32>
    %182 = vector.broadcast %176 : vector<8x1xf32> to vector<8x16xf32>
    %183 = vector.broadcast %7 : vector<1x16xf32> to vector<8x16xf32>
    %184 = arith.mulf %182, %183 : vector<8x16xf32>
    %185 = arith.addf %181, %184 : vector<8x16xf32>
    %186 = vector.broadcast %180 : vector<8x1xf32> to vector<8x16xf32>
    %187 = arith.mulf %185, %186 : vector<8x16xf32>
    %cst_103 = arith.constant dense<0.000000e+00> : vector<8x16xf32>
    %188 = tpu.matmul %187, %8, %cst_103 {dimension_numbers = #tpu.dot_dimension_numbers<[1], [0], [0], [1], [0, 0, 1, 1], [], []>} : vector<8x16xf32>, vector<16x16xf32>, vector<8x16xf32> -> vector<8x16xf32>
    %189 = vector.broadcast %9 : vector<1x16xf32> to vector<8x16xf32>
    %190 = arith.addf %188, %189 : vector<8x16xf32>
    %191 = arith.addf %190, %150 : vector<8x16xf32>
    %cst_104 = arith.constant dense<0.000000e+00> : vector<8xf32>
    %192 = vector.multi_reduction <add>, %191, %cst_104 [1] : vector<8x16xf32> to vector<8xf32>
    %193 = vector.shape_cast %192 : vector<8xf32> to vector<8x1xf32>
    %cst_105 = arith.constant 1.600000e+01 : f32
    %194 = vector.broadcast %cst_105 : f32 to vector<8x1xf32>
    %195 = arith.divf %193, %194 : vector<8x1xf32>
    %196 = vector.broadcast %195 : vector<8x1xf32> to vector<8x16xf32>
    %197 = arith.subf %191, %196 : vector<8x16xf32>
    %198 = arith.mulf %197, %197 : vector<8x16xf32>
    %cst_106 = arith.constant dense<0.000000e+00> : vector<8xf32>
    %199 = vector.multi_reduction <add>, %198, %cst_106 [1] : vector<8x16xf32> to vector<8xf32>
    %200 = vector.shape_cast %199 : vector<8xf32> to vector<8x1xf32>
    %cst_107 = arith.constant 1.600000e+01 : f32
    %201 = vector.broadcast %cst_107 : f32 to vector<8x1xf32>
    %202 = arith.divf %200, %201 : vector<8x1xf32>
    %203 = vector.broadcast %195 : vector<8x1xf32> to vector<8x16xf32>
    %204 = arith.subf %191, %203 : vector<8x16xf32>
    %cst_108 = arith.constant 9.99999974E-6 : f32
    %205 = vector.broadcast %cst_108 : f32 to vector<8x1xf32>
    %206 = arith.addf %202, %205 : vector<8x1xf32>
    %207 = math.rsqrt %206 : vector<8x1xf32>
    %208 = vector.broadcast %207 : vector<8x1xf32> to vector<8x16xf32>
    %209 = arith.mulf %204, %208 : vector<8x16xf32>
    %210 = vector.broadcast %10 : vector<1x16xf32> to vector<8x16xf32>
    %211 = arith.mulf %209, %210 : vector<8x16xf32>
    %212 = vector.broadcast %11 : vector<1x16xf32> to vector<8x16xf32>
    %213 = arith.addf %211, %212 : vector<8x16xf32>
    %cst_109 = arith.constant dense<0.000000e+00> : vector<8x16xf32>
    %214 = tpu.matmul %213, %12, %cst_109 {dimension_numbers = #tpu.dot_dimension_numbers<[1], [0], [0], [1], [0, 0, 1, 1], [], []>} : vector<8x16xf32>, vector<16x16xf32>, vector<8x16xf32> -> vector<8x16xf32>
    %215 = vector.broadcast %13 : vector<1x16xf32> to vector<8x16xf32>
    %216 = arith.addf %214, %215 : vector<8x16xf32>
    %cst_110 = arith.constant dense<0.000000e+00> : vector<8xf32>
    %217 = vector.multi_reduction <add>, %216, %cst_110 [1] : vector<8x16xf32> to vector<8xf32>
    %218 = vector.shape_cast %217 : vector<8xf32> to vector<8x1xf32>
    %cst_111 = arith.constant 1.600000e+01 : f32
    %219 = vector.broadcast %cst_111 : f32 to vector<8x1xf32>
    %220 = arith.divf %218, %219 : vector<8x1xf32>
    %221 = vector.broadcast %220 : vector<8x1xf32> to vector<8x16xf32>
    %222 = arith.subf %216, %221 : vector<8x16xf32>
    %223 = arith.mulf %222, %222 : vector<8x16xf32>
    %cst_112 = arith.constant dense<0.000000e+00> : vector<8xf32>
    %224 = vector.multi_reduction <add>, %223, %cst_112 [1] : vector<8x16xf32> to vector<8xf32>
    %225 = vector.shape_cast %224 : vector<8xf32> to vector<8x1xf32>
    %cst_113 = arith.constant 1.600000e+01 : f32
    %226 = vector.broadcast %cst_113 : f32 to vector<8x1xf32>
    %227 = arith.divf %225, %226 : vector<8x1xf32>
    %228 = vector.broadcast %220 : vector<8x1xf32> to vector<8x16xf32>
    %229 = arith.subf %216, %228 : vector<8x16xf32>
    %cst_114 = arith.constant 9.99999974E-6 : f32
    %230 = vector.broadcast %cst_114 : f32 to vector<8x1xf32>
    %231 = arith.addf %227, %230 : vector<8x1xf32>
    %232 = math.rsqrt %231 : vector<8x1xf32>
    %233 = vector.broadcast %232 : vector<8x1xf32> to vector<8x16xf32>
    %234 = arith.mulf %229, %233 : vector<8x16xf32>
    %235 = vector.broadcast %14 : vector<1x16xf32> to vector<8x16xf32>
    %236 = arith.mulf %234, %235 : vector<8x16xf32>
    %237 = vector.broadcast %15 : vector<1x16xf32> to vector<8x16xf32>
    %238 = arith.addf %236, %237 : vector<8x16xf32>
    %cst_115 = arith.constant 0.000000e+00 : f32
    %239 = vector.broadcast %cst_115 : f32 to vector<8x16xf32>
    %240 = arith.maximumf %238, %239 : vector<8x16xf32>
    %cst_116 = arith.constant dense<0.000000e+00> : vector<8x16xf32>
    %241 = tpu.matmul %240, %16, %cst_116 {dimension_numbers = #tpu.dot_dimension_numbers<[1], [0], [0], [1], [0, 0, 1, 1], [], []>} : vector<8x16xf32>, vector<16x16xf32>, vector<8x16xf32> -> vector<8x16xf32>
    %242 = vector.broadcast %17 : vector<1x16xf32> to vector<8x16xf32>
    %243 = arith.addf %241, %242 : vector<8x16xf32>
    %244 = arith.addf %243, %213 : vector<8x16xf32>
    %cst_117 = arith.constant dense<0.000000e+00> : vector<8xf32>
    %245 = vector.multi_reduction <add>, %244, %cst_117 [1] : vector<8x16xf32> to vector<8xf32>
    %246 = vector.shape_cast %245 : vector<8xf32> to vector<8x1xf32>
    %cst_118 = arith.constant 1.600000e+01 : f32
    %247 = vector.broadcast %cst_118 : f32 to vector<8x1xf32>
    %248 = arith.divf %246, %247 : vector<8x1xf32>
    %249 = vector.broadcast %248 : vector<8x1xf32> to vector<8x16xf32>
    %250 = arith.subf %244, %249 : vector<8x16xf32>
    %251 = arith.mulf %250, %250 : vector<8x16xf32>
    %cst_119 = arith.constant dense<0.000000e+00> : vector<8xf32>
    %252 = vector.multi_reduction <add>, %251, %cst_119 [1] : vector<8x16xf32> to vector<8xf32>
    %253 = vector.shape_cast %252 : vector<8xf32> to vector<8x1xf32>
    %cst_120 = arith.constant 1.600000e+01 : f32
    %254 = vector.broadcast %cst_120 : f32 to vector<8x1xf32>
    %255 = arith.divf %253, %254 : vector<8x1xf32>
    %256 = vector.broadcast %248 : vector<8x1xf32> to vector<8x16xf32>
    %257 = arith.subf %244, %256 : vector<8x16xf32>
    %cst_121 = arith.constant 9.99999974E-6 : f32
    %258 = vector.broadcast %cst_121 : f32 to vector<8x1xf32>
    %259 = arith.addf %255, %258 : vector<8x1xf32>
    %260 = math.rsqrt %259 : vector<8x1xf32>
    %261 = vector.broadcast %260 : vector<8x1xf32> to vector<8x16xf32>
    %262 = arith.mulf %257, %261 : vector<8x16xf32>
    %263 = vector.broadcast %18 : vector<1x16xf32> to vector<8x16xf32>
    %264 = arith.mulf %262, %263 : vector<8x16xf32>
    %265 = vector.broadcast %19 : vector<1x16xf32> to vector<8x16xf32>
    %266 = arith.addf %264, %265 : vector<8x16xf32>
    %c1_122 = arith.constant 1 : index
    %c0_123 = arith.constant 0 : index
    %c0_124 = arith.constant 0 : index
    %267 = vector.load %arg24[%c1_122, %c0_123, %c0_124] : memref<2x8x16xf32, #tpu.memory_space<vmem>>, vector<1x8x16xf32>
    %268 = vector.shape_cast %267 : vector<1x8x16xf32> to vector<8x16xf32>
    %269 = vector.shape_cast %266 : vector<8x16xf32> to vector<1x8x16xf32>
    tpu.vector_store %arg24[%c1_122, %c0_123, %c0_124], %269 {strides = array<i32>} : memref<2x8x16xf32, #tpu.memory_space<vmem>>, vector<1x8x16xf32>,
    return
  }
}

module attributes {stable_mosaic.version = 11 : i64} {
  func.func @_cand_simple_kernel(%arg0: memref<2x2x8xf32, #tpu.memory_space<vmem>>, %arg1: memref<2x8x16xf32, #tpu.memory_space<vmem>>, %arg2: memref<2x2x16xf32, #tpu.memory_space<vmem>>) attributes {dimension_semantics = [], scalar_prefetch = 0 : i64, scratch_operands = 0 : i64, tpu.core_type = #tpu.core_type<tc>} {
    %c0 = arith.constant 0 : index
    %c0_0 = arith.constant 0 : index
    %c0_1 = arith.constant 0 : index
    %0 = vector.load %arg0[%c0, %c0_0, %c0_1] : memref<2x2x8xf32, #tpu.memory_space<vmem>>, vector<1x2x8xf32>
    %1 = vector.shape_cast %0 : vector<1x2x8xf32> to vector<2x8xf32>
    %cst = arith.constant dense<0.000000e+00> : vector<2xf32>
    %2 = vector.multi_reduction <add>, %1, %cst [1] : vector<2x8xf32> to vector<2xf32>
    %3 = vector.shape_cast %2 : vector<2xf32> to vector<2x1xf32>
    %cst_2 = arith.constant 1.000000e-03 : f32
    %4 = vector.broadcast %cst_2 : f32 to vector<2x1xf32>
    %5 = arith.addf %3, %4 : vector<2x1xf32>
    %6 = tpu.reciprocal %5 {approx = true} : vector<2x1xf32> -> vector<2x1xf32>
    %c0_3 = arith.constant 0 : index
    %c0_4 = arith.constant 0 : index
    %c0_5 = arith.constant 0 : index
    %7 = vector.load %arg1[%c0_3, %c0_4, %c0_5] : memref<2x8x16xf32, #tpu.memory_space<vmem>>, vector<1x8x16xf32>
    %8 = vector.shape_cast %7 : vector<1x8x16xf32> to vector<8x16xf32>
    %cst_6 = arith.constant dense<0.000000e+00> : vector<2x16xf32>
    %9 = tpu.matmul %1, %8, %cst_6 {dimension_numbers = #tpu.dot_dimension_numbers<[1], [0], [0], [1], [0, 0, 1, 1], [], []>} : vector<2x8xf32>, vector<8x16xf32>, vector<2x16xf32> -> vector<2x16xf32>
    %10 = vector.broadcast %6 : vector<2x1xf32> to vector<2x16xf32>
    %11 = arith.mulf %9, %10 : vector<2x16xf32>
    %c0_7 = arith.constant 0 : index
    %c0_8 = arith.constant 0 : index
    %c0_9 = arith.constant 0 : index
    %12 = vector.load %arg2[%c0_7, %c0_8, %c0_9] : memref<2x2x16xf32, #tpu.memory_space<vmem>>, vector<1x2x16xf32>
    %13 = vector.shape_cast %12 : vector<1x2x16xf32> to vector<2x16xf32>
    %14 = vector.shape_cast %11 : vector<2x16xf32> to vector<1x2x16xf32>
    tpu.vector_store %arg2[%c0_7, %c0_8, %c0_9], %14 {strides = array<i32>} : memref<2x2x16xf32, #tpu.memory_space<vmem>>, vector<1x2x16xf32>,
    %c1 = arith.constant 1 : index
    %c0_10 = arith.constant 0 : index
    %c0_11 = arith.constant 0 : index
    %15 = vector.load %arg0[%c1, %c0_10, %c0_11] : memref<2x2x8xf32, #tpu.memory_space<vmem>>, vector<1x2x8xf32>
    %16 = vector.shape_cast %15 : vector<1x2x8xf32> to vector<2x8xf32>
    %cst_12 = arith.constant dense<0.000000e+00> : vector<2xf32>
    %17 = vector.multi_reduction <add>, %16, %cst_12 [1] : vector<2x8xf32> to vector<2xf32>
    %18 = vector.shape_cast %17 : vector<2xf32> to vector<2x1xf32>
    %cst_13 = arith.constant 1.000000e-03 : f32
    %19 = vector.broadcast %cst_13 : f32 to vector<2x1xf32>
    %20 = arith.addf %18, %19 : vector<2x1xf32>
    %21 = tpu.reciprocal %20 {approx = true} : vector<2x1xf32> -> vector<2x1xf32>
    %c1_14 = arith.constant 1 : index
    %c0_15 = arith.constant 0 : index
    %c0_16 = arith.constant 0 : index
    %22 = vector.load %arg1[%c1_14, %c0_15, %c0_16] : memref<2x8x16xf32, #tpu.memory_space<vmem>>, vector<1x8x16xf32>
    %23 = vector.shape_cast %22 : vector<1x8x16xf32> to vector<8x16xf32>
    %cst_17 = arith.constant dense<0.000000e+00> : vector<2x16xf32>
    %24 = tpu.matmul %16, %23, %cst_17 {dimension_numbers = #tpu.dot_dimension_numbers<[1], [0], [0], [1], [0, 0, 1, 1], [], []>} : vector<2x8xf32>, vector<8x16xf32>, vector<2x16xf32> -> vector<2x16xf32>
    %25 = vector.broadcast %21 : vector<2x1xf32> to vector<2x16xf32>
    %26 = arith.mulf %24, %25 : vector<2x16xf32>
    %c1_18 = arith.constant 1 : index
    %c0_19 = arith.constant 0 : index
    %c0_20 = arith.constant 0 : index
    %27 = vector.load %arg2[%c1_18, %c0_19, %c0_20] : memref<2x2x16xf32, #tpu.memory_space<vmem>>, vector<1x2x16xf32>
    %28 = vector.shape_cast %27 : vector<1x2x16xf32> to vector<2x16xf32>
    %29 = vector.shape_cast %26 : vector<2x16xf32> to vector<1x2x16xf32>
    tpu.vector_store %arg2[%c1_18, %c0_19, %c0_20], %29 {strides = array<i32>} : memref<2x2x16xf32, #tpu.memory_space<vmem>>, vector<1x2x16xf32>,
    return
  }
}

module attributes {stable_mosaic.version = 11 : i64} {
  func.func @_attn_block_kernel(%arg0: memref<2x2x16xf32, #tpu.memory_space<vmem>>, %arg1: memref<2x2x16xf32, #tpu.memory_space<vmem>>, %arg2: memref<2x2x16xf32, #tpu.memory_space<vmem>>, %arg3: memref<2x2x2xf32, #tpu.memory_space<vmem>>, %arg4: memref<16x16xf32, #tpu.memory_space<vmem>>, %arg5: memref<1x16xf32, #tpu.memory_space<vmem>>, %arg6: memref<16x16xf32, #tpu.memory_space<vmem>>, %arg7: memref<1x16xf32, #tpu.memory_space<vmem>>, %arg8: memref<16x16xf32, #tpu.memory_space<vmem>>, %arg9: memref<1x16xf32, #tpu.memory_space<vmem>>, %arg10: memref<16x1xf32, #tpu.memory_space<vmem>>, %arg11: memref<1x16xf32, #tpu.memory_space<vmem>>, %arg12: memref<16x16xf32, #tpu.memory_space<vmem>>, %arg13: memref<1x16xf32, #tpu.memory_space<vmem>>, %arg14: memref<1x16xf32, #tpu.memory_space<vmem>>, %arg15: memref<1x16xf32, #tpu.memory_space<vmem>>, %arg16: memref<16x16xf32, #tpu.memory_space<vmem>>, %arg17: memref<1x16xf32, #tpu.memory_space<vmem>>, %arg18: memref<1x16xf32, #tpu.memory_space<vmem>>, %arg19: memref<1x16xf32, #tpu.memory_space<vmem>>, %arg20: memref<16x16xf32, #tpu.memory_space<vmem>>, %arg21: memref<1x16xf32, #tpu.memory_space<vmem>>, %arg22: memref<1x16xf32, #tpu.memory_space<vmem>>, %arg23: memref<1x16xf32, #tpu.memory_space<vmem>>, %arg24: memref<2x2x16xf32, #tpu.memory_space<vmem>>) attributes {dimension_semantics = [], scalar_prefetch = 0 : i64, scratch_operands = 0 : i64, tpu.core_type = #tpu.core_type<tc>} {
    %c0 = arith.constant 0 : index
    %c0_0 = arith.constant 0 : index
    %0 = vector.load %arg4[%c0, %c0_0] : memref<16x16xf32, #tpu.memory_space<vmem>>, vector<16x16xf32>
    %c0_1 = arith.constant 0 : index
    %c0_2 = arith.constant 0 : index
    %1 = vector.load %arg5[%c0_1, %c0_2] : memref<1x16xf32, #tpu.memory_space<vmem>>, vector<1x16xf32>
    %c0_3 = arith.constant 0 : index
    %c0_4 = arith.constant 0 : index
    %2 = vector.load %arg6[%c0_3, %c0_4] : memref<16x16xf32, #tpu.memory_space<vmem>>, vector<16x16xf32>
    %c0_5 = arith.constant 0 : index
    %c0_6 = arith.constant 0 : index
    %3 = vector.load %arg7[%c0_5, %c0_6] : memref<1x16xf32, #tpu.memory_space<vmem>>, vector<1x16xf32>
    %c0_7 = arith.constant 0 : index
    %c0_8 = arith.constant 0 : index
    %4 = vector.load %arg8[%c0_7, %c0_8] : memref<16x16xf32, #tpu.memory_space<vmem>>, vector<16x16xf32>
    %c0_9 = arith.constant 0 : index
    %c0_10 = arith.constant 0 : index
    %5 = vector.load %arg9[%c0_9, %c0_10] : memref<1x16xf32, #tpu.memory_space<vmem>>, vector<1x16xf32>
    %c0_11 = arith.constant 0 : index
    %c0_12 = arith.constant 0 : index
    %6 = vector.load %arg10[%c0_11, %c0_12] : memref<16x1xf32, #tpu.memory_space<vmem>>, vector<16x1xf32>
    %c0_13 = arith.constant 0 : index
    %c0_14 = arith.constant 0 : index
    %7 = vector.load %arg11[%c0_13, %c0_14] : memref<1x16xf32, #tpu.memory_space<vmem>>, vector<1x16xf32>
    %c0_15 = arith.constant 0 : index
    %c0_16 = arith.constant 0 : index
    %8 = vector.load %arg12[%c0_15, %c0_16] : memref<16x16xf32, #tpu.memory_space<vmem>>, vector<16x16xf32>
    %c0_17 = arith.constant 0 : index
    %c0_18 = arith.constant 0 : index
    %9 = vector.load %arg13[%c0_17, %c0_18] : memref<1x16xf32, #tpu.memory_space<vmem>>, vector<1x16xf32>
    %c0_19 = arith.constant 0 : index
    %c0_20 = arith.constant 0 : index
    %10 = vector.load %arg14[%c0_19, %c0_20] : memref<1x16xf32, #tpu.memory_space<vmem>>, vector<1x16xf32>
    %c0_21 = arith.constant 0 : index
    %c0_22 = arith.constant 0 : index
    %11 = vector.load %arg15[%c0_21, %c0_22] : memref<1x16xf32, #tpu.memory_space<vmem>>, vector<1x16xf32>
    %c0_23 = arith.constant 0 : index
    %c0_24 = arith.constant 0 : index
    %12 = vector.load %arg16[%c0_23, %c0_24] : memref<16x16xf32, #tpu.memory_space<vmem>>, vector<16x16xf32>
    %c0_25 = arith.constant 0 : index
    %c0_26 = arith.constant 0 : index
    %13 = vector.load %arg17[%c0_25, %c0_26] : memref<1x16xf32, #tpu.memory_space<vmem>>, vector<1x16xf32>
    %c0_27 = arith.constant 0 : index
    %c0_28 = arith.constant 0 : index
    %14 = vector.load %arg18[%c0_27, %c0_28] : memref<1x16xf32, #tpu.memory_space<vmem>>, vector<1x16xf32>
    %c0_29 = arith.constant 0 : index
    %c0_30 = arith.constant 0 : index
    %15 = vector.load %arg19[%c0_29, %c0_30] : memref<1x16xf32, #tpu.memory_space<vmem>>, vector<1x16xf32>
    %c0_31 = arith.constant 0 : index
    %c0_32 = arith.constant 0 : index
    %16 = vector.load %arg20[%c0_31, %c0_32] : memref<16x16xf32, #tpu.memory_space<vmem>>, vector<16x16xf32>
    %c0_33 = arith.constant 0 : index
    %c0_34 = arith.constant 0 : index
    %17 = vector.load %arg21[%c0_33, %c0_34] : memref<1x16xf32, #tpu.memory_space<vmem>>, vector<1x16xf32>
    %c0_35 = arith.constant 0 : index
    %c0_36 = arith.constant 0 : index
    %18 = vector.load %arg22[%c0_35, %c0_36] : memref<1x16xf32, #tpu.memory_space<vmem>>, vector<1x16xf32>
    %c0_37 = arith.constant 0 : index
    %c0_38 = arith.constant 0 : index
    %19 = vector.load %arg23[%c0_37, %c0_38] : memref<1x16xf32, #tpu.memory_space<vmem>>, vector<1x16xf32>
    %c0_39 = arith.constant 0 : index
    %c0_40 = arith.constant 0 : index
    %c0_41 = arith.constant 0 : index
    %20 = vector.load %arg0[%c0_39, %c0_40, %c0_41] : memref<2x2x16xf32, #tpu.memory_space<vmem>>, vector<1x2x16xf32>
    %21 = vector.shape_cast %20 : vector<1x2x16xf32> to vector<2x16xf32>
    %c0_42 = arith.constant 0 : index
    %c0_43 = arith.constant 0 : index
    %c0_44 = arith.constant 0 : index
    %22 = vector.load %arg1[%c0_42, %c0_43, %c0_44] : memref<2x2x16xf32, #tpu.memory_space<vmem>>, vector<1x2x16xf32>
    %23 = vector.shape_cast %22 : vector<1x2x16xf32> to vector<2x16xf32>
    %c0_45 = arith.constant 0 : index
    %c0_46 = arith.constant 0 : index
    %c0_47 = arith.constant 0 : index
    %24 = vector.load %arg2[%c0_45, %c0_46, %c0_47] : memref<2x2x16xf32, #tpu.memory_space<vmem>>, vector<1x2x16xf32>
    %25 = vector.shape_cast %24 : vector<1x2x16xf32> to vector<2x16xf32>
    %cst = arith.constant dense<0.000000e+00> : vector<2x16xf32>
    %26 = tpu.matmul %21, %0, %cst {dimension_numbers = #tpu.dot_dimension_numbers<[1], [0], [0], [1], [0, 0, 1, 1], [], []>} : vector<2x16xf32>, vector<16x16xf32>, vector<2x16xf32> -> vector<2x16xf32>
    %27 = vector.broadcast %1 : vector<1x16xf32> to vector<2x16xf32>
    %28 = arith.addf %26, %27 : vector<2x16xf32>
    %cst_48 = arith.constant dense<0.000000e+00> : vector<2x16xf32>
    %29 = tpu.matmul %23, %2, %cst_48 {dimension_numbers = #tpu.dot_dimension_numbers<[1], [0], [0], [1], [0, 0, 1, 1], [], []>} : vector<2x16xf32>, vector<16x16xf32>, vector<2x16xf32> -> vector<2x16xf32>
    %30 = vector.broadcast %3 : vector<1x16xf32> to vector<2x16xf32>
    %31 = arith.addf %29, %30 : vector<2x16xf32>
    %cst_49 = arith.constant dense<0.000000e+00> : vector<2x16xf32>
    %32 = tpu.matmul %25, %4, %cst_49 {dimension_numbers = #tpu.dot_dimension_numbers<[1], [0], [0], [1], [0, 0, 1, 1], [], []>} : vector<2x16xf32>, vector<16x16xf32>, vector<2x16xf32> -> vector<2x16xf32>
    %33 = vector.broadcast %5 : vector<1x16xf32> to vector<2x16xf32>
    %34 = arith.addf %32, %33 : vector<2x16xf32>
    %cst_50 = arith.constant dense<0.000000e+00> : vector<2x2xf32>
    %35 = tpu.matmul %28, %31, %cst_50 {dimension_numbers = #tpu.dot_dimension_numbers<[1], [1], [0], [0], [0, 0, 1, 0], [], []>} : vector<2x16xf32>, vector<2x16xf32>, vector<2x2xf32> -> vector<2x2xf32>
    %cst_51 = arith.constant 2.500000e-01 : f32
    %36 = vector.broadcast %cst_51 : f32 to vector<2x2xf32>
    %37 = arith.mulf %35, %36 : vector<2x2xf32>
    %c0_52 = arith.constant 0 : index
    %c0_53 = arith.constant 0 : index
    %c0_54 = arith.constant 0 : index
    %38 = vector.load %arg3[%c0_52, %c0_53, %c0_54] : memref<2x2x2xf32, #tpu.memory_space<vmem>>, vector<1x2x2xf32>
    %39 = vector.shape_cast %38 : vector<1x2x2xf32> to vector<2x2xf32>
    %40 = arith.addf %37, %39 : vector<2x2xf32>
    %cst_55 = arith.constant dense<0.000000e+00> : vector<2x1xf32>
    %41 = tpu.matmul %28, %6, %cst_55 {dimension_numbers = #tpu.dot_dimension_numbers<[1], [0], [0], [1], [0, 0, 1, 1], [], []>} : vector<2x16xf32>, vector<16x1xf32>, vector<2x1xf32> -> vector<2x1xf32>
    %cst_56 = arith.constant 2.500000e-01 : f32
    %42 = vector.broadcast %cst_56 : f32 to vector<2x1xf32>
    %43 = arith.mulf %41, %42 : vector<2x1xf32>
    %cst_57 = arith.constant dense<0xFF800000> : vector<2xf32>
    %44 = vector.multi_reduction <maximumf>, %40, %cst_57 [1] : vector<2x2xf32> to vector<2xf32>
    %45 = vector.shape_cast %44 : vector<2xf32> to vector<2x1xf32>
    %46 = arith.maximumf %45, %43 : vector<2x1xf32>
    %47 = vector.broadcast %46 : vector<2x1xf32> to vector<2x2xf32>
    %48 = arith.subf %40, %47 : vector<2x2xf32>
    %49 = math.exp %48 : vector<2x2xf32>
    %50 = arith.subf %43, %46 : vector<2x1xf32>
    %51 = math.exp %50 : vector<2x1xf32>
    %cst_58 = arith.constant dense<0.000000e+00> : vector<2xf32>
    %52 = vector.multi_reduction <add>, %49, %cst_58 [1] : vector<2x2xf32> to vector<2xf32>
    %53 = vector.shape_cast %52 : vector<2xf32> to vector<2x1xf32>
    %54 = arith.addf %53, %51 : vector<2x1xf32>
    %55 = tpu.reciprocal %54 {approx = true} : vector<2x1xf32> -> vector<2x1xf32>
    %cst_59 = arith.constant dense<0.000000e+00> : vector<2x16xf32>
    %56 = tpu.matmul %49, %34, %cst_59 {dimension_numbers = #tpu.dot_dimension_numbers<[1], [0], [0], [1], [0, 0, 1, 1], [], []>} : vector<2x2xf32>, vector<2x16xf32>, vector<2x16xf32> -> vector<2x16xf32>
    %57 = vector.broadcast %51 : vector<2x1xf32> to vector<2x16xf32>
    %58 = vector.broadcast %7 : vector<1x16xf32> to vector<2x16xf32>
    %59 = arith.mulf %57, %58 : vector<2x16xf32>
    %60 = arith.addf %56, %59 : vector<2x16xf32>
    %61 = vector.broadcast %55 : vector<2x1xf32> to vector<2x16xf32>
    %62 = arith.mulf %60, %61 : vector<2x16xf32>
    %cst_60 = arith.constant dense<0.000000e+00> : vector<2x16xf32>
    %63 = tpu.matmul %62, %8, %cst_60 {dimension_numbers = #tpu.dot_dimension_numbers<[1], [0], [0], [1], [0, 0, 1, 1], [], []>} : vector<2x16xf32>, vector<16x16xf32>, vector<2x16xf32> -> vector<2x16xf32>
    %64 = vector.broadcast %9 : vector<1x16xf32> to vector<2x16xf32>
    %65 = arith.addf %63, %64 : vector<2x16xf32>
    %66 = arith.addf %65, %25 : vector<2x16xf32>
    %cst_61 = arith.constant dense<0.000000e+00> : vector<2xf32>
    %67 = vector.multi_reduction <add>, %66, %cst_61 [1] : vector<2x16xf32> to vector<2xf32>
    %68 = vector.shape_cast %67 : vector<2xf32> to vector<2x1xf32>
    %cst_62 = arith.constant 1.600000e+01 : f32
    %69 = vector.broadcast %cst_62 : f32 to vector<2x1xf32>
    %70 = arith.divf %68, %69 : vector<2x1xf32>
    %71 = vector.broadcast %70 : vector<2x1xf32> to vector<2x16xf32>
    %72 = arith.subf %66, %71 : vector<2x16xf32>
    %73 = arith.mulf %72, %72 : vector<2x16xf32>
    %cst_63 = arith.constant dense<0.000000e+00> : vector<2xf32>
    %74 = vector.multi_reduction <add>, %73, %cst_63 [1] : vector<2x16xf32> to vector<2xf32>
    %75 = vector.shape_cast %74 : vector<2xf32> to vector<2x1xf32>
    %cst_64 = arith.constant 1.600000e+01 : f32
    %76 = vector.broadcast %cst_64 : f32 to vector<2x1xf32>
    %77 = arith.divf %75, %76 : vector<2x1xf32>
    %78 = vector.broadcast %70 : vector<2x1xf32> to vector<2x16xf32>
    %79 = arith.subf %66, %78 : vector<2x16xf32>
    %cst_65 = arith.constant 9.99999974E-6 : f32
    %80 = vector.broadcast %cst_65 : f32 to vector<2x1xf32>
    %81 = arith.addf %77, %80 : vector<2x1xf32>
    %82 = math.rsqrt %81 : vector<2x1xf32>
    %83 = vector.broadcast %82 : vector<2x1xf32> to vector<2x16xf32>
    %84 = arith.mulf %79, %83 : vector<2x16xf32>
    %85 = vector.broadcast %10 : vector<1x16xf32> to vector<2x16xf32>
    %86 = arith.mulf %84, %85 : vector<2x16xf32>
    %87 = vector.broadcast %11 : vector<1x16xf32> to vector<2x16xf32>
    %88 = arith.addf %86, %87 : vector<2x16xf32>
    %cst_66 = arith.constant dense<0.000000e+00> : vector<2x16xf32>
    %89 = tpu.matmul %88, %12, %cst_66 {dimension_numbers = #tpu.dot_dimension_numbers<[1], [0], [0], [1], [0, 0, 1, 1], [], []>} : vector<2x16xf32>, vector<16x16xf32>, vector<2x16xf32> -> vector<2x16xf32>
    %90 = vector.broadcast %13 : vector<1x16xf32> to vector<2x16xf32>
    %91 = arith.addf %89, %90 : vector<2x16xf32>
    %cst_67 = arith.constant dense<0.000000e+00> : vector<2xf32>
    %92 = vector.multi_reduction <add>, %91, %cst_67 [1] : vector<2x16xf32> to vector<2xf32>
    %93 = vector.shape_cast %92 : vector<2xf32> to vector<2x1xf32>
    %cst_68 = arith.constant 1.600000e+01 : f32
    %94 = vector.broadcast %cst_68 : f32 to vector<2x1xf32>
    %95 = arith.divf %93, %94 : vector<2x1xf32>
    %96 = vector.broadcast %95 : vector<2x1xf32> to vector<2x16xf32>
    %97 = arith.subf %91, %96 : vector<2x16xf32>
    %98 = arith.mulf %97, %97 : vector<2x16xf32>
    %cst_69 = arith.constant dense<0.000000e+00> : vector<2xf32>
    %99 = vector.multi_reduction <add>, %98, %cst_69 [1] : vector<2x16xf32> to vector<2xf32>
    %100 = vector.shape_cast %99 : vector<2xf32> to vector<2x1xf32>
    %cst_70 = arith.constant 1.600000e+01 : f32
    %101 = vector.broadcast %cst_70 : f32 to vector<2x1xf32>
    %102 = arith.divf %100, %101 : vector<2x1xf32>
    %103 = vector.broadcast %95 : vector<2x1xf32> to vector<2x16xf32>
    %104 = arith.subf %91, %103 : vector<2x16xf32>
    %cst_71 = arith.constant 9.99999974E-6 : f32
    %105 = vector.broadcast %cst_71 : f32 to vector<2x1xf32>
    %106 = arith.addf %102, %105 : vector<2x1xf32>
    %107 = math.rsqrt %106 : vector<2x1xf32>
    %108 = vector.broadcast %107 : vector<2x1xf32> to vector<2x16xf32>
    %109 = arith.mulf %104, %108 : vector<2x16xf32>
    %110 = vector.broadcast %14 : vector<1x16xf32> to vector<2x16xf32>
    %111 = arith.mulf %109, %110 : vector<2x16xf32>
    %112 = vector.broadcast %15 : vector<1x16xf32> to vector<2x16xf32>
    %113 = arith.addf %111, %112 : vector<2x16xf32>
    %cst_72 = arith.constant 0.000000e+00 : f32
    %114 = vector.broadcast %cst_72 : f32 to vector<2x16xf32>
    %115 = arith.maximumf %113, %114 : vector<2x16xf32>
    %cst_73 = arith.constant dense<0.000000e+00> : vector<2x16xf32>
    %116 = tpu.matmul %115, %16, %cst_73 {dimension_numbers = #tpu.dot_dimension_numbers<[1], [0], [0], [1], [0, 0, 1, 1], [], []>} : vector<2x16xf32>, vector<16x16xf32>, vector<2x16xf32> -> vector<2x16xf32>
    %117 = vector.broadcast %17 : vector<1x16xf32> to vector<2x16xf32>
    %118 = arith.addf %116, %117 : vector<2x16xf32>
    %119 = arith.addf %118, %88 : vector<2x16xf32>
    %cst_74 = arith.constant dense<0.000000e+00> : vector<2xf32>
    %120 = vector.multi_reduction <add>, %119, %cst_74 [1] : vector<2x16xf32> to vector<2xf32>
    %121 = vector.shape_cast %120 : vector<2xf32> to vector<2x1xf32>
    %cst_75 = arith.constant 1.600000e+01 : f32
    %122 = vector.broadcast %cst_75 : f32 to vector<2x1xf32>
    %123 = arith.divf %121, %122 : vector<2x1xf32>
    %124 = vector.broadcast %123 : vector<2x1xf32> to vector<2x16xf32>
    %125 = arith.subf %119, %124 : vector<2x16xf32>
    %126 = arith.mulf %125, %125 : vector<2x16xf32>
    %cst_76 = arith.constant dense<0.000000e+00> : vector<2xf32>
    %127 = vector.multi_reduction <add>, %126, %cst_76 [1] : vector<2x16xf32> to vector<2xf32>
    %128 = vector.shape_cast %127 : vector<2xf32> to vector<2x1xf32>
    %cst_77 = arith.constant 1.600000e+01 : f32
    %129 = vector.broadcast %cst_77 : f32 to vector<2x1xf32>
    %130 = arith.divf %128, %129 : vector<2x1xf32>
    %131 = vector.broadcast %123 : vector<2x1xf32> to vector<2x16xf32>
    %132 = arith.subf %119, %131 : vector<2x16xf32>
    %cst_78 = arith.constant 9.99999974E-6 : f32
    %133 = vector.broadcast %cst_78 : f32 to vector<2x1xf32>
    %134 = arith.addf %130, %133 : vector<2x1xf32>
    %135 = math.rsqrt %134 : vector<2x1xf32>
    %136 = vector.broadcast %135 : vector<2x1xf32> to vector<2x16xf32>
    %137 = arith.mulf %132, %136 : vector<2x16xf32>
    %138 = vector.broadcast %18 : vector<1x16xf32> to vector<2x16xf32>
    %139 = arith.mulf %137, %138 : vector<2x16xf32>
    %140 = vector.broadcast %19 : vector<1x16xf32> to vector<2x16xf32>
    %141 = arith.addf %139, %140 : vector<2x16xf32>
    %c0_79 = arith.constant 0 : index
    %c0_80 = arith.constant 0 : index
    %c0_81 = arith.constant 0 : index
    %142 = vector.load %arg24[%c0_79, %c0_80, %c0_81] : memref<2x2x16xf32, #tpu.memory_space<vmem>>, vector<1x2x16xf32>
    %143 = vector.shape_cast %142 : vector<1x2x16xf32> to vector<2x16xf32>
    %144 = vector.shape_cast %141 : vector<2x16xf32> to vector<1x2x16xf32>
    tpu.vector_store %arg24[%c0_79, %c0_80, %c0_81], %144 {strides = array<i32>} : memref<2x2x16xf32, #tpu.memory_space<vmem>>, vector<1x2x16xf32>,
    %c1 = arith.constant 1 : index
    %c0_82 = arith.constant 0 : index
    %c0_83 = arith.constant 0 : index
    %145 = vector.load %arg0[%c1, %c0_82, %c0_83] : memref<2x2x16xf32, #tpu.memory_space<vmem>>, vector<1x2x16xf32>
    %146 = vector.shape_cast %145 : vector<1x2x16xf32> to vector<2x16xf32>
    %c1_84 = arith.constant 1 : index
    %c0_85 = arith.constant 0 : index
    %c0_86 = arith.constant 0 : index
    %147 = vector.load %arg1[%c1_84, %c0_85, %c0_86] : memref<2x2x16xf32, #tpu.memory_space<vmem>>, vector<1x2x16xf32>
    %148 = vector.shape_cast %147 : vector<1x2x16xf32> to vector<2x16xf32>
    %c1_87 = arith.constant 1 : index
    %c0_88 = arith.constant 0 : index
    %c0_89 = arith.constant 0 : index
    %149 = vector.load %arg2[%c1_87, %c0_88, %c0_89] : memref<2x2x16xf32, #tpu.memory_space<vmem>>, vector<1x2x16xf32>
    %150 = vector.shape_cast %149 : vector<1x2x16xf32> to vector<2x16xf32>
    %cst_90 = arith.constant dense<0.000000e+00> : vector<2x16xf32>
    %151 = tpu.matmul %146, %0, %cst_90 {dimension_numbers = #tpu.dot_dimension_numbers<[1], [0], [0], [1], [0, 0, 1, 1], [], []>} : vector<2x16xf32>, vector<16x16xf32>, vector<2x16xf32> -> vector<2x16xf32>
    %152 = vector.broadcast %1 : vector<1x16xf32> to vector<2x16xf32>
    %153 = arith.addf %151, %152 : vector<2x16xf32>
    %cst_91 = arith.constant dense<0.000000e+00> : vector<2x16xf32>
    %154 = tpu.matmul %148, %2, %cst_91 {dimension_numbers = #tpu.dot_dimension_numbers<[1], [0], [0], [1], [0, 0, 1, 1], [], []>} : vector<2x16xf32>, vector<16x16xf32>, vector<2x16xf32> -> vector<2x16xf32>
    %155 = vector.broadcast %3 : vector<1x16xf32> to vector<2x16xf32>
    %156 = arith.addf %154, %155 : vector<2x16xf32>
    %cst_92 = arith.constant dense<0.000000e+00> : vector<2x16xf32>
    %157 = tpu.matmul %150, %4, %cst_92 {dimension_numbers = #tpu.dot_dimension_numbers<[1], [0], [0], [1], [0, 0, 1, 1], [], []>} : vector<2x16xf32>, vector<16x16xf32>, vector<2x16xf32> -> vector<2x16xf32>
    %158 = vector.broadcast %5 : vector<1x16xf32> to vector<2x16xf32>
    %159 = arith.addf %157, %158 : vector<2x16xf32>
    %cst_93 = arith.constant dense<0.000000e+00> : vector<2x2xf32>
    %160 = tpu.matmul %153, %156, %cst_93 {dimension_numbers = #tpu.dot_dimension_numbers<[1], [1], [0], [0], [0, 0, 1, 0], [], []>} : vector<2x16xf32>, vector<2x16xf32>, vector<2x2xf32> -> vector<2x2xf32>
    %cst_94 = arith.constant 2.500000e-01 : f32
    %161 = vector.broadcast %cst_94 : f32 to vector<2x2xf32>
    %162 = arith.mulf %160, %161 : vector<2x2xf32>
    %c1_95 = arith.constant 1 : index
    %c0_96 = arith.constant 0 : index
    %c0_97 = arith.constant 0 : index
    %163 = vector.load %arg3[%c1_95, %c0_96, %c0_97] : memref<2x2x2xf32, #tpu.memory_space<vmem>>, vector<1x2x2xf32>
    %164 = vector.shape_cast %163 : vector<1x2x2xf32> to vector<2x2xf32>
    %165 = arith.addf %162, %164 : vector<2x2xf32>
    %cst_98 = arith.constant dense<0.000000e+00> : vector<2x1xf32>
    %166 = tpu.matmul %153, %6, %cst_98 {dimension_numbers = #tpu.dot_dimension_numbers<[1], [0], [0], [1], [0, 0, 1, 1], [], []>} : vector<2x16xf32>, vector<16x1xf32>, vector<2x1xf32> -> vector<2x1xf32>
    %cst_99 = arith.constant 2.500000e-01 : f32
    %167 = vector.broadcast %cst_99 : f32 to vector<2x1xf32>
    %168 = arith.mulf %166, %167 : vector<2x1xf32>
    %cst_100 = arith.constant dense<0xFF800000> : vector<2xf32>
    %169 = vector.multi_reduction <maximumf>, %165, %cst_100 [1] : vector<2x2xf32> to vector<2xf32>
    %170 = vector.shape_cast %169 : vector<2xf32> to vector<2x1xf32>
    %171 = arith.maximumf %170, %168 : vector<2x1xf32>
    %172 = vector.broadcast %171 : vector<2x1xf32> to vector<2x2xf32>
    %173 = arith.subf %165, %172 : vector<2x2xf32>
    %174 = math.exp %173 : vector<2x2xf32>
    %175 = arith.subf %168, %171 : vector<2x1xf32>
    %176 = math.exp %175 : vector<2x1xf32>
    %cst_101 = arith.constant dense<0.000000e+00> : vector<2xf32>
    %177 = vector.multi_reduction <add>, %174, %cst_101 [1] : vector<2x2xf32> to vector<2xf32>
    %178 = vector.shape_cast %177 : vector<2xf32> to vector<2x1xf32>
    %179 = arith.addf %178, %176 : vector<2x1xf32>
    %180 = tpu.reciprocal %179 {approx = true} : vector<2x1xf32> -> vector<2x1xf32>
    %cst_102 = arith.constant dense<0.000000e+00> : vector<2x16xf32>
    %181 = tpu.matmul %174, %159, %cst_102 {dimension_numbers = #tpu.dot_dimension_numbers<[1], [0], [0], [1], [0, 0, 1, 1], [], []>} : vector<2x2xf32>, vector<2x16xf32>, vector<2x16xf32> -> vector<2x16xf32>
    %182 = vector.broadcast %176 : vector<2x1xf32> to vector<2x16xf32>
    %183 = vector.broadcast %7 : vector<1x16xf32> to vector<2x16xf32>
    %184 = arith.mulf %182, %183 : vector<2x16xf32>
    %185 = arith.addf %181, %184 : vector<2x16xf32>
    %186 = vector.broadcast %180 : vector<2x1xf32> to vector<2x16xf32>
    %187 = arith.mulf %185, %186 : vector<2x16xf32>
    %cst_103 = arith.constant dense<0.000000e+00> : vector<2x16xf32>
    %188 = tpu.matmul %187, %8, %cst_103 {dimension_numbers = #tpu.dot_dimension_numbers<[1], [0], [0], [1], [0, 0, 1, 1], [], []>} : vector<2x16xf32>, vector<16x16xf32>, vector<2x16xf32> -> vector<2x16xf32>
    %189 = vector.broadcast %9 : vector<1x16xf32> to vector<2x16xf32>
    %190 = arith.addf %188, %189 : vector<2x16xf32>
    %191 = arith.addf %190, %150 : vector<2x16xf32>
    %cst_104 = arith.constant dense<0.000000e+00> : vector<2xf32>
    %192 = vector.multi_reduction <add>, %191, %cst_104 [1] : vector<2x16xf32> to vector<2xf32>
    %193 = vector.shape_cast %192 : vector<2xf32> to vector<2x1xf32>
    %cst_105 = arith.constant 1.600000e+01 : f32
    %194 = vector.broadcast %cst_105 : f32 to vector<2x1xf32>
    %195 = arith.divf %193, %194 : vector<2x1xf32>
    %196 = vector.broadcast %195 : vector<2x1xf32> to vector<2x16xf32>
    %197 = arith.subf %191, %196 : vector<2x16xf32>
    %198 = arith.mulf %197, %197 : vector<2x16xf32>
    %cst_106 = arith.constant dense<0.000000e+00> : vector<2xf32>
    %199 = vector.multi_reduction <add>, %198, %cst_106 [1] : vector<2x16xf32> to vector<2xf32>
    %200 = vector.shape_cast %199 : vector<2xf32> to vector<2x1xf32>
    %cst_107 = arith.constant 1.600000e+01 : f32
    %201 = vector.broadcast %cst_107 : f32 to vector<2x1xf32>
    %202 = arith.divf %200, %201 : vector<2x1xf32>
    %203 = vector.broadcast %195 : vector<2x1xf32> to vector<2x16xf32>
    %204 = arith.subf %191, %203 : vector<2x16xf32>
    %cst_108 = arith.constant 9.99999974E-6 : f32
    %205 = vector.broadcast %cst_108 : f32 to vector<2x1xf32>
    %206 = arith.addf %202, %205 : vector<2x1xf32>
    %207 = math.rsqrt %206 : vector<2x1xf32>
    %208 = vector.broadcast %207 : vector<2x1xf32> to vector<2x16xf32>
    %209 = arith.mulf %204, %208 : vector<2x16xf32>
    %210 = vector.broadcast %10 : vector<1x16xf32> to vector<2x16xf32>
    %211 = arith.mulf %209, %210 : vector<2x16xf32>
    %212 = vector.broadcast %11 : vector<1x16xf32> to vector<2x16xf32>
    %213 = arith.addf %211, %212 : vector<2x16xf32>
    %cst_109 = arith.constant dense<0.000000e+00> : vector<2x16xf32>
    %214 = tpu.matmul %213, %12, %cst_109 {dimension_numbers = #tpu.dot_dimension_numbers<[1], [0], [0], [1], [0, 0, 1, 1], [], []>} : vector<2x16xf32>, vector<16x16xf32>, vector<2x16xf32> -> vector<2x16xf32>
    %215 = vector.broadcast %13 : vector<1x16xf32> to vector<2x16xf32>
    %216 = arith.addf %214, %215 : vector<2x16xf32>
    %cst_110 = arith.constant dense<0.000000e+00> : vector<2xf32>
    %217 = vector.multi_reduction <add>, %216, %cst_110 [1] : vector<2x16xf32> to vector<2xf32>
    %218 = vector.shape_cast %217 : vector<2xf32> to vector<2x1xf32>
    %cst_111 = arith.constant 1.600000e+01 : f32
    %219 = vector.broadcast %cst_111 : f32 to vector<2x1xf32>
    %220 = arith.divf %218, %219 : vector<2x1xf32>
    %221 = vector.broadcast %220 : vector<2x1xf32> to vector<2x16xf32>
    %222 = arith.subf %216, %221 : vector<2x16xf32>
    %223 = arith.mulf %222, %222 : vector<2x16xf32>
    %cst_112 = arith.constant dense<0.000000e+00> : vector<2xf32>
    %224 = vector.multi_reduction <add>, %223, %cst_112 [1] : vector<2x16xf32> to vector<2xf32>
    %225 = vector.shape_cast %224 : vector<2xf32> to vector<2x1xf32>
    %cst_113 = arith.constant 1.600000e+01 : f32
    %226 = vector.broadcast %cst_113 : f32 to vector<2x1xf32>
    %227 = arith.divf %225, %226 : vector<2x1xf32>
    %228 = vector.broadcast %220 : vector<2x1xf32> to vector<2x16xf32>
    %229 = arith.subf %216, %228 : vector<2x16xf32>
    %cst_114 = arith.constant 9.99999974E-6 : f32
    %230 = vector.broadcast %cst_114 : f32 to vector<2x1xf32>
    %231 = arith.addf %227, %230 : vector<2x1xf32>
    %232 = math.rsqrt %231 : vector<2x1xf32>
    %233 = vector.broadcast %232 : vector<2x1xf32> to vector<2x16xf32>
    %234 = arith.mulf %229, %233 : vector<2x16xf32>
    %235 = vector.broadcast %14 : vector<1x16xf32> to vector<2x16xf32>
    %236 = arith.mulf %234, %235 : vector<2x16xf32>
    %237 = vector.broadcast %15 : vector<1x16xf32> to vector<2x16xf32>
    %238 = arith.addf %236, %237 : vector<2x16xf32>
    %cst_115 = arith.constant 0.000000e+00 : f32
    %239 = vector.broadcast %cst_115 : f32 to vector<2x16xf32>
    %240 = arith.maximumf %238, %239 : vector<2x16xf32>
    %cst_116 = arith.constant dense<0.000000e+00> : vector<2x16xf32>
    %241 = tpu.matmul %240, %16, %cst_116 {dimension_numbers = #tpu.dot_dimension_numbers<[1], [0], [0], [1], [0, 0, 1, 1], [], []>} : vector<2x16xf32>, vector<16x16xf32>, vector<2x16xf32> -> vector<2x16xf32>
    %242 = vector.broadcast %17 : vector<1x16xf32> to vector<2x16xf32>
    %243 = arith.addf %241, %242 : vector<2x16xf32>
    %244 = arith.addf %243, %213 : vector<2x16xf32>
    %cst_117 = arith.constant dense<0.000000e+00> : vector<2xf32>
    %245 = vector.multi_reduction <add>, %244, %cst_117 [1] : vector<2x16xf32> to vector<2xf32>
    %246 = vector.shape_cast %245 : vector<2xf32> to vector<2x1xf32>
    %cst_118 = arith.constant 1.600000e+01 : f32
    %247 = vector.broadcast %cst_118 : f32 to vector<2x1xf32>
    %248 = arith.divf %246, %247 : vector<2x1xf32>
    %249 = vector.broadcast %248 : vector<2x1xf32> to vector<2x16xf32>
    %250 = arith.subf %244, %249 : vector<2x16xf32>
    %251 = arith.mulf %250, %250 : vector<2x16xf32>
    %cst_119 = arith.constant dense<0.000000e+00> : vector<2xf32>
    %252 = vector.multi_reduction <add>, %251, %cst_119 [1] : vector<2x16xf32> to vector<2xf32>
    %253 = vector.shape_cast %252 : vector<2xf32> to vector<2x1xf32>
    %cst_120 = arith.constant 1.600000e+01 : f32
    %254 = vector.broadcast %cst_120 : f32 to vector<2x1xf32>
    %255 = arith.divf %253, %254 : vector<2x1xf32>
    %256 = vector.broadcast %248 : vector<2x1xf32> to vector<2x16xf32>
    %257 = arith.subf %244, %256 : vector<2x16xf32>
    %cst_121 = arith.constant 9.99999974E-6 : f32
    %258 = vector.broadcast %cst_121 : f32 to vector<2x1xf32>
    %259 = arith.addf %255, %258 : vector<2x1xf32>
    %260 = math.rsqrt %259 : vector<2x1xf32>
    %261 = vector.broadcast %260 : vector<2x1xf32> to vector<2x16xf32>
    %262 = arith.mulf %257, %261 : vector<2x16xf32>
    %263 = vector.broadcast %18 : vector<1x16xf32> to vector<2x16xf32>
    %264 = arith.mulf %262, %263 : vector<2x16xf32>
    %265 = vector.broadcast %19 : vector<1x16xf32> to vector<2x16xf32>
    %266 = arith.addf %264, %265 : vector<2x16xf32>
    %c1_122 = arith.constant 1 : index
    %c0_123 = arith.constant 0 : index
    %c0_124 = arith.constant 0 : index
    %267 = vector.load %arg24[%c1_122, %c0_123, %c0_124] : memref<2x2x16xf32, #tpu.memory_space<vmem>>, vector<1x2x16xf32>
    %268 = vector.shape_cast %267 : vector<1x2x16xf32> to vector<2x16xf32>
    %269 = vector.shape_cast %266 : vector<2x16xf32> to vector<1x2x16xf32>
    tpu.vector_store %arg24[%c1_122, %c0_123, %c0_124], %269 {strides = array<i32>} : memref<2x2x16xf32, #tpu.memory_space<vmem>>, vector<1x2x16xf32>,
    return
  }
}

module attributes {stable_mosaic.version = 11 : i64} {
  func.func @_attn_block_kernel(%arg0: memref<2x2x16xf32, #tpu.memory_space<vmem>>, %arg1: memref<2x2x16xf32, #tpu.memory_space<vmem>>, %arg2: memref<2x2x16xf32, #tpu.memory_space<vmem>>, %arg3: memref<2x2x2xf32, #tpu.memory_space<vmem>>, %arg4: memref<16x16xf32, #tpu.memory_space<vmem>>, %arg5: memref<1x16xf32, #tpu.memory_space<vmem>>, %arg6: memref<16x16xf32, #tpu.memory_space<vmem>>, %arg7: memref<1x16xf32, #tpu.memory_space<vmem>>, %arg8: memref<16x16xf32, #tpu.memory_space<vmem>>, %arg9: memref<1x16xf32, #tpu.memory_space<vmem>>, %arg10: memref<16x1xf32, #tpu.memory_space<vmem>>, %arg11: memref<1x16xf32, #tpu.memory_space<vmem>>, %arg12: memref<16x16xf32, #tpu.memory_space<vmem>>, %arg13: memref<1x16xf32, #tpu.memory_space<vmem>>, %arg14: memref<1x16xf32, #tpu.memory_space<vmem>>, %arg15: memref<1x16xf32, #tpu.memory_space<vmem>>, %arg16: memref<16x16xf32, #tpu.memory_space<vmem>>, %arg17: memref<1x16xf32, #tpu.memory_space<vmem>>, %arg18: memref<1x16xf32, #tpu.memory_space<vmem>>, %arg19: memref<1x16xf32, #tpu.memory_space<vmem>>, %arg20: memref<16x16xf32, #tpu.memory_space<vmem>>, %arg21: memref<1x16xf32, #tpu.memory_space<vmem>>, %arg22: memref<1x16xf32, #tpu.memory_space<vmem>>, %arg23: memref<1x16xf32, #tpu.memory_space<vmem>>, %arg24: memref<2x2x16xf32, #tpu.memory_space<vmem>>) attributes {dimension_semantics = [], scalar_prefetch = 0 : i64, scratch_operands = 0 : i64, tpu.core_type = #tpu.core_type<tc>} {
    %c0 = arith.constant 0 : index
    %c0_0 = arith.constant 0 : index
    %0 = vector.load %arg4[%c0, %c0_0] : memref<16x16xf32, #tpu.memory_space<vmem>>, vector<16x16xf32>
    %c0_1 = arith.constant 0 : index
    %c0_2 = arith.constant 0 : index
    %1 = vector.load %arg5[%c0_1, %c0_2] : memref<1x16xf32, #tpu.memory_space<vmem>>, vector<1x16xf32>
    %c0_3 = arith.constant 0 : index
    %c0_4 = arith.constant 0 : index
    %2 = vector.load %arg6[%c0_3, %c0_4] : memref<16x16xf32, #tpu.memory_space<vmem>>, vector<16x16xf32>
    %c0_5 = arith.constant 0 : index
    %c0_6 = arith.constant 0 : index
    %3 = vector.load %arg7[%c0_5, %c0_6] : memref<1x16xf32, #tpu.memory_space<vmem>>, vector<1x16xf32>
    %c0_7 = arith.constant 0 : index
    %c0_8 = arith.constant 0 : index
    %4 = vector.load %arg8[%c0_7, %c0_8] : memref<16x16xf32, #tpu.memory_space<vmem>>, vector<16x16xf32>
    %c0_9 = arith.constant 0 : index
    %c0_10 = arith.constant 0 : index
    %5 = vector.load %arg9[%c0_9, %c0_10] : memref<1x16xf32, #tpu.memory_space<vmem>>, vector<1x16xf32>
    %c0_11 = arith.constant 0 : index
    %c0_12 = arith.constant 0 : index
    %6 = vector.load %arg10[%c0_11, %c0_12] : memref<16x1xf32, #tpu.memory_space<vmem>>, vector<16x1xf32>
    %c0_13 = arith.constant 0 : index
    %c0_14 = arith.constant 0 : index
    %7 = vector.load %arg11[%c0_13, %c0_14] : memref<1x16xf32, #tpu.memory_space<vmem>>, vector<1x16xf32>
    %c0_15 = arith.constant 0 : index
    %c0_16 = arith.constant 0 : index
    %8 = vector.load %arg12[%c0_15, %c0_16] : memref<16x16xf32, #tpu.memory_space<vmem>>, vector<16x16xf32>
    %c0_17 = arith.constant 0 : index
    %c0_18 = arith.constant 0 : index
    %9 = vector.load %arg13[%c0_17, %c0_18] : memref<1x16xf32, #tpu.memory_space<vmem>>, vector<1x16xf32>
    %c0_19 = arith.constant 0 : index
    %c0_20 = arith.constant 0 : index
    %10 = vector.load %arg14[%c0_19, %c0_20] : memref<1x16xf32, #tpu.memory_space<vmem>>, vector<1x16xf32>
    %c0_21 = arith.constant 0 : index
    %c0_22 = arith.constant 0 : index
    %11 = vector.load %arg15[%c0_21, %c0_22] : memref<1x16xf32, #tpu.memory_space<vmem>>, vector<1x16xf32>
    %c0_23 = arith.constant 0 : index
    %c0_24 = arith.constant 0 : index
    %12 = vector.load %arg16[%c0_23, %c0_24] : memref<16x16xf32, #tpu.memory_space<vmem>>, vector<16x16xf32>
    %c0_25 = arith.constant 0 : index
    %c0_26 = arith.constant 0 : index
    %13 = vector.load %arg17[%c0_25, %c0_26] : memref<1x16xf32, #tpu.memory_space<vmem>>, vector<1x16xf32>
    %c0_27 = arith.constant 0 : index
    %c0_28 = arith.constant 0 : index
    %14 = vector.load %arg18[%c0_27, %c0_28] : memref<1x16xf32, #tpu.memory_space<vmem>>, vector<1x16xf32>
    %c0_29 = arith.constant 0 : index
    %c0_30 = arith.constant 0 : index
    %15 = vector.load %arg19[%c0_29, %c0_30] : memref<1x16xf32, #tpu.memory_space<vmem>>, vector<1x16xf32>
    %c0_31 = arith.constant 0 : index
    %c0_32 = arith.constant 0 : index
    %16 = vector.load %arg20[%c0_31, %c0_32] : memref<16x16xf32, #tpu.memory_space<vmem>>, vector<16x16xf32>
    %c0_33 = arith.constant 0 : index
    %c0_34 = arith.constant 0 : index
    %17 = vector.load %arg21[%c0_33, %c0_34] : memref<1x16xf32, #tpu.memory_space<vmem>>, vector<1x16xf32>
    %c0_35 = arith.constant 0 : index
    %c0_36 = arith.constant 0 : index
    %18 = vector.load %arg22[%c0_35, %c0_36] : memref<1x16xf32, #tpu.memory_space<vmem>>, vector<1x16xf32>
    %c0_37 = arith.constant 0 : index
    %c0_38 = arith.constant 0 : index
    %19 = vector.load %arg23[%c0_37, %c0_38] : memref<1x16xf32, #tpu.memory_space<vmem>>, vector<1x16xf32>
    %c0_39 = arith.constant 0 : index
    %c0_40 = arith.constant 0 : index
    %c0_41 = arith.constant 0 : index
    %20 = vector.load %arg0[%c0_39, %c0_40, %c0_41] : memref<2x2x16xf32, #tpu.memory_space<vmem>>, vector<1x2x16xf32>
    %21 = vector.shape_cast %20 : vector<1x2x16xf32> to vector<2x16xf32>
    %c0_42 = arith.constant 0 : index
    %c0_43 = arith.constant 0 : index
    %c0_44 = arith.constant 0 : index
    %22 = vector.load %arg1[%c0_42, %c0_43, %c0_44] : memref<2x2x16xf32, #tpu.memory_space<vmem>>, vector<1x2x16xf32>
    %23 = vector.shape_cast %22 : vector<1x2x16xf32> to vector<2x16xf32>
    %c0_45 = arith.constant 0 : index
    %c0_46 = arith.constant 0 : index
    %c0_47 = arith.constant 0 : index
    %24 = vector.load %arg2[%c0_45, %c0_46, %c0_47] : memref<2x2x16xf32, #tpu.memory_space<vmem>>, vector<1x2x16xf32>
    %25 = vector.shape_cast %24 : vector<1x2x16xf32> to vector<2x16xf32>
    %cst = arith.constant dense<0.000000e+00> : vector<2x16xf32>
    %26 = tpu.matmul %21, %0, %cst {dimension_numbers = #tpu.dot_dimension_numbers<[1], [0], [0], [1], [0, 0, 1, 1], [], []>} : vector<2x16xf32>, vector<16x16xf32>, vector<2x16xf32> -> vector<2x16xf32>
    %27 = vector.broadcast %1 : vector<1x16xf32> to vector<2x16xf32>
    %28 = arith.addf %26, %27 : vector<2x16xf32>
    %cst_48 = arith.constant dense<0.000000e+00> : vector<2x16xf32>
    %29 = tpu.matmul %23, %2, %cst_48 {dimension_numbers = #tpu.dot_dimension_numbers<[1], [0], [0], [1], [0, 0, 1, 1], [], []>} : vector<2x16xf32>, vector<16x16xf32>, vector<2x16xf32> -> vector<2x16xf32>
    %30 = vector.broadcast %3 : vector<1x16xf32> to vector<2x16xf32>
    %31 = arith.addf %29, %30 : vector<2x16xf32>
    %cst_49 = arith.constant dense<0.000000e+00> : vector<2x16xf32>
    %32 = tpu.matmul %25, %4, %cst_49 {dimension_numbers = #tpu.dot_dimension_numbers<[1], [0], [0], [1], [0, 0, 1, 1], [], []>} : vector<2x16xf32>, vector<16x16xf32>, vector<2x16xf32> -> vector<2x16xf32>
    %33 = vector.broadcast %5 : vector<1x16xf32> to vector<2x16xf32>
    %34 = arith.addf %32, %33 : vector<2x16xf32>
    %cst_50 = arith.constant dense<0.000000e+00> : vector<2x2xf32>
    %35 = tpu.matmul %28, %31, %cst_50 {dimension_numbers = #tpu.dot_dimension_numbers<[1], [1], [0], [0], [0, 0, 1, 0], [], []>} : vector<2x16xf32>, vector<2x16xf32>, vector<2x2xf32> -> vector<2x2xf32>
    %cst_51 = arith.constant 2.500000e-01 : f32
    %36 = vector.broadcast %cst_51 : f32 to vector<2x2xf32>
    %37 = arith.mulf %35, %36 : vector<2x2xf32>
    %c0_52 = arith.constant 0 : index
    %c0_53 = arith.constant 0 : index
    %c0_54 = arith.constant 0 : index
    %38 = vector.load %arg3[%c0_52, %c0_53, %c0_54] : memref<2x2x2xf32, #tpu.memory_space<vmem>>, vector<1x2x2xf32>
    %39 = vector.shape_cast %38 : vector<1x2x2xf32> to vector<2x2xf32>
    %40 = arith.addf %37, %39 : vector<2x2xf32>
    %cst_55 = arith.constant dense<0.000000e+00> : vector<2x1xf32>
    %41 = tpu.matmul %28, %6, %cst_55 {dimension_numbers = #tpu.dot_dimension_numbers<[1], [0], [0], [1], [0, 0, 1, 1], [], []>} : vector<2x16xf32>, vector<16x1xf32>, vector<2x1xf32> -> vector<2x1xf32>
    %cst_56 = arith.constant 2.500000e-01 : f32
    %42 = vector.broadcast %cst_56 : f32 to vector<2x1xf32>
    %43 = arith.mulf %41, %42 : vector<2x1xf32>
    %cst_57 = arith.constant dense<0xFF800000> : vector<2xf32>
    %44 = vector.multi_reduction <maximumf>, %40, %cst_57 [1] : vector<2x2xf32> to vector<2xf32>
    %45 = vector.shape_cast %44 : vector<2xf32> to vector<2x1xf32>
    %46 = arith.maximumf %45, %43 : vector<2x1xf32>
    %47 = vector.broadcast %46 : vector<2x1xf32> to vector<2x2xf32>
    %48 = arith.subf %40, %47 : vector<2x2xf32>
    %49 = math.exp %48 : vector<2x2xf32>
    %50 = arith.subf %43, %46 : vector<2x1xf32>
    %51 = math.exp %50 : vector<2x1xf32>
    %cst_58 = arith.constant dense<0.000000e+00> : vector<2xf32>
    %52 = vector.multi_reduction <add>, %49, %cst_58 [1] : vector<2x2xf32> to vector<2xf32>
    %53 = vector.shape_cast %52 : vector<2xf32> to vector<2x1xf32>
    %54 = arith.addf %53, %51 : vector<2x1xf32>
    %55 = tpu.reciprocal %54 {approx = true} : vector<2x1xf32> -> vector<2x1xf32>
    %cst_59 = arith.constant dense<0.000000e+00> : vector<2x16xf32>
    %56 = tpu.matmul %49, %34, %cst_59 {dimension_numbers = #tpu.dot_dimension_numbers<[1], [0], [0], [1], [0, 0, 1, 1], [], []>} : vector<2x2xf32>, vector<2x16xf32>, vector<2x16xf32> -> vector<2x16xf32>
    %57 = vector.broadcast %51 : vector<2x1xf32> to vector<2x16xf32>
    %58 = vector.broadcast %7 : vector<1x16xf32> to vector<2x16xf32>
    %59 = arith.mulf %57, %58 : vector<2x16xf32>
    %60 = arith.addf %56, %59 : vector<2x16xf32>
    %61 = vector.broadcast %55 : vector<2x1xf32> to vector<2x16xf32>
    %62 = arith.mulf %60, %61 : vector<2x16xf32>
    %cst_60 = arith.constant dense<0.000000e+00> : vector<2x16xf32>
    %63 = tpu.matmul %62, %8, %cst_60 {dimension_numbers = #tpu.dot_dimension_numbers<[1], [0], [0], [1], [0, 0, 1, 1], [], []>} : vector<2x16xf32>, vector<16x16xf32>, vector<2x16xf32> -> vector<2x16xf32>
    %64 = vector.broadcast %9 : vector<1x16xf32> to vector<2x16xf32>
    %65 = arith.addf %63, %64 : vector<2x16xf32>
    %66 = arith.addf %65, %25 : vector<2x16xf32>
    %cst_61 = arith.constant dense<0.000000e+00> : vector<2xf32>
    %67 = vector.multi_reduction <add>, %66, %cst_61 [1] : vector<2x16xf32> to vector<2xf32>
    %68 = vector.shape_cast %67 : vector<2xf32> to vector<2x1xf32>
    %cst_62 = arith.constant 1.600000e+01 : f32
    %69 = vector.broadcast %cst_62 : f32 to vector<2x1xf32>
    %70 = arith.divf %68, %69 : vector<2x1xf32>
    %71 = vector.broadcast %70 : vector<2x1xf32> to vector<2x16xf32>
    %72 = arith.subf %66, %71 : vector<2x16xf32>
    %73 = arith.mulf %72, %72 : vector<2x16xf32>
    %cst_63 = arith.constant dense<0.000000e+00> : vector<2xf32>
    %74 = vector.multi_reduction <add>, %73, %cst_63 [1] : vector<2x16xf32> to vector<2xf32>
    %75 = vector.shape_cast %74 : vector<2xf32> to vector<2x1xf32>
    %cst_64 = arith.constant 1.600000e+01 : f32
    %76 = vector.broadcast %cst_64 : f32 to vector<2x1xf32>
    %77 = arith.divf %75, %76 : vector<2x1xf32>
    %78 = vector.broadcast %70 : vector<2x1xf32> to vector<2x16xf32>
    %79 = arith.subf %66, %78 : vector<2x16xf32>
    %cst_65 = arith.constant 9.99999974E-6 : f32
    %80 = vector.broadcast %cst_65 : f32 to vector<2x1xf32>
    %81 = arith.addf %77, %80 : vector<2x1xf32>
    %82 = math.rsqrt %81 : vector<2x1xf32>
    %83 = vector.broadcast %82 : vector<2x1xf32> to vector<2x16xf32>
    %84 = arith.mulf %79, %83 : vector<2x16xf32>
    %85 = vector.broadcast %10 : vector<1x16xf32> to vector<2x16xf32>
    %86 = arith.mulf %84, %85 : vector<2x16xf32>
    %87 = vector.broadcast %11 : vector<1x16xf32> to vector<2x16xf32>
    %88 = arith.addf %86, %87 : vector<2x16xf32>
    %cst_66 = arith.constant dense<0.000000e+00> : vector<2x16xf32>
    %89 = tpu.matmul %88, %12, %cst_66 {dimension_numbers = #tpu.dot_dimension_numbers<[1], [0], [0], [1], [0, 0, 1, 1], [], []>} : vector<2x16xf32>, vector<16x16xf32>, vector<2x16xf32> -> vector<2x16xf32>
    %90 = vector.broadcast %13 : vector<1x16xf32> to vector<2x16xf32>
    %91 = arith.addf %89, %90 : vector<2x16xf32>
    %cst_67 = arith.constant dense<0.000000e+00> : vector<2xf32>
    %92 = vector.multi_reduction <add>, %91, %cst_67 [1] : vector<2x16xf32> to vector<2xf32>
    %93 = vector.shape_cast %92 : vector<2xf32> to vector<2x1xf32>
    %cst_68 = arith.constant 1.600000e+01 : f32
    %94 = vector.broadcast %cst_68 : f32 to vector<2x1xf32>
    %95 = arith.divf %93, %94 : vector<2x1xf32>
    %96 = vector.broadcast %95 : vector<2x1xf32> to vector<2x16xf32>
    %97 = arith.subf %91, %96 : vector<2x16xf32>
    %98 = arith.mulf %97, %97 : vector<2x16xf32>
    %cst_69 = arith.constant dense<0.000000e+00> : vector<2xf32>
    %99 = vector.multi_reduction <add>, %98, %cst_69 [1] : vector<2x16xf32> to vector<2xf32>
    %100 = vector.shape_cast %99 : vector<2xf32> to vector<2x1xf32>
    %cst_70 = arith.constant 1.600000e+01 : f32
    %101 = vector.broadcast %cst_70 : f32 to vector<2x1xf32>
    %102 = arith.divf %100, %101 : vector<2x1xf32>
    %103 = vector.broadcast %95 : vector<2x1xf32> to vector<2x16xf32>
    %104 = arith.subf %91, %103 : vector<2x16xf32>
    %cst_71 = arith.constant 9.99999974E-6 : f32
    %105 = vector.broadcast %cst_71 : f32 to vector<2x1xf32>
    %106 = arith.addf %102, %105 : vector<2x1xf32>
    %107 = math.rsqrt %106 : vector<2x1xf32>
    %108 = vector.broadcast %107 : vector<2x1xf32> to vector<2x16xf32>
    %109 = arith.mulf %104, %108 : vector<2x16xf32>
    %110 = vector.broadcast %14 : vector<1x16xf32> to vector<2x16xf32>
    %111 = arith.mulf %109, %110 : vector<2x16xf32>
    %112 = vector.broadcast %15 : vector<1x16xf32> to vector<2x16xf32>
    %113 = arith.addf %111, %112 : vector<2x16xf32>
    %cst_72 = arith.constant 0.000000e+00 : f32
    %114 = vector.broadcast %cst_72 : f32 to vector<2x16xf32>
    %115 = arith.maximumf %113, %114 : vector<2x16xf32>
    %cst_73 = arith.constant dense<0.000000e+00> : vector<2x16xf32>
    %116 = tpu.matmul %115, %16, %cst_73 {dimension_numbers = #tpu.dot_dimension_numbers<[1], [0], [0], [1], [0, 0, 1, 1], [], []>} : vector<2x16xf32>, vector<16x16xf32>, vector<2x16xf32> -> vector<2x16xf32>
    %117 = vector.broadcast %17 : vector<1x16xf32> to vector<2x16xf32>
    %118 = arith.addf %116, %117 : vector<2x16xf32>
    %119 = arith.addf %118, %88 : vector<2x16xf32>
    %cst_74 = arith.constant dense<0.000000e+00> : vector<2xf32>
    %120 = vector.multi_reduction <add>, %119, %cst_74 [1] : vector<2x16xf32> to vector<2xf32>
    %121 = vector.shape_cast %120 : vector<2xf32> to vector<2x1xf32>
    %cst_75 = arith.constant 1.600000e+01 : f32
    %122 = vector.broadcast %cst_75 : f32 to vector<2x1xf32>
    %123 = arith.divf %121, %122 : vector<2x1xf32>
    %124 = vector.broadcast %123 : vector<2x1xf32> to vector<2x16xf32>
    %125 = arith.subf %119, %124 : vector<2x16xf32>
    %126 = arith.mulf %125, %125 : vector<2x16xf32>
    %cst_76 = arith.constant dense<0.000000e+00> : vector<2xf32>
    %127 = vector.multi_reduction <add>, %126, %cst_76 [1] : vector<2x16xf32> to vector<2xf32>
    %128 = vector.shape_cast %127 : vector<2xf32> to vector<2x1xf32>
    %cst_77 = arith.constant 1.600000e+01 : f32
    %129 = vector.broadcast %cst_77 : f32 to vector<2x1xf32>
    %130 = arith.divf %128, %129 : vector<2x1xf32>
    %131 = vector.broadcast %123 : vector<2x1xf32> to vector<2x16xf32>
    %132 = arith.subf %119, %131 : vector<2x16xf32>
    %cst_78 = arith.constant 9.99999974E-6 : f32
    %133 = vector.broadcast %cst_78 : f32 to vector<2x1xf32>
    %134 = arith.addf %130, %133 : vector<2x1xf32>
    %135 = math.rsqrt %134 : vector<2x1xf32>
    %136 = vector.broadcast %135 : vector<2x1xf32> to vector<2x16xf32>
    %137 = arith.mulf %132, %136 : vector<2x16xf32>
    %138 = vector.broadcast %18 : vector<1x16xf32> to vector<2x16xf32>
    %139 = arith.mulf %137, %138 : vector<2x16xf32>
    %140 = vector.broadcast %19 : vector<1x16xf32> to vector<2x16xf32>
    %141 = arith.addf %139, %140 : vector<2x16xf32>
    %c0_79 = arith.constant 0 : index
    %c0_80 = arith.constant 0 : index
    %c0_81 = arith.constant 0 : index
    %142 = vector.load %arg24[%c0_79, %c0_80, %c0_81] : memref<2x2x16xf32, #tpu.memory_space<vmem>>, vector<1x2x16xf32>
    %143 = vector.shape_cast %142 : vector<1x2x16xf32> to vector<2x16xf32>
    %144 = vector.shape_cast %141 : vector<2x16xf32> to vector<1x2x16xf32>
    tpu.vector_store %arg24[%c0_79, %c0_80, %c0_81], %144 {strides = array<i32>} : memref<2x2x16xf32, #tpu.memory_space<vmem>>, vector<1x2x16xf32>,
    %c1 = arith.constant 1 : index
    %c0_82 = arith.constant 0 : index
    %c0_83 = arith.constant 0 : index
    %145 = vector.load %arg0[%c1, %c0_82, %c0_83] : memref<2x2x16xf32, #tpu.memory_space<vmem>>, vector<1x2x16xf32>
    %146 = vector.shape_cast %145 : vector<1x2x16xf32> to vector<2x16xf32>
    %c1_84 = arith.constant 1 : index
    %c0_85 = arith.constant 0 : index
    %c0_86 = arith.constant 0 : index
    %147 = vector.load %arg1[%c1_84, %c0_85, %c0_86] : memref<2x2x16xf32, #tpu.memory_space<vmem>>, vector<1x2x16xf32>
    %148 = vector.shape_cast %147 : vector<1x2x16xf32> to vector<2x16xf32>
    %c1_87 = arith.constant 1 : index
    %c0_88 = arith.constant 0 : index
    %c0_89 = arith.constant 0 : index
    %149 = vector.load %arg2[%c1_87, %c0_88, %c0_89] : memref<2x2x16xf32, #tpu.memory_space<vmem>>, vector<1x2x16xf32>
    %150 = vector.shape_cast %149 : vector<1x2x16xf32> to vector<2x16xf32>
    %cst_90 = arith.constant dense<0.000000e+00> : vector<2x16xf32>
    %151 = tpu.matmul %146, %0, %cst_90 {dimension_numbers = #tpu.dot_dimension_numbers<[1], [0], [0], [1], [0, 0, 1, 1], [], []>} : vector<2x16xf32>, vector<16x16xf32>, vector<2x16xf32> -> vector<2x16xf32>
    %152 = vector.broadcast %1 : vector<1x16xf32> to vector<2x16xf32>
    %153 = arith.addf %151, %152 : vector<2x16xf32>
    %cst_91 = arith.constant dense<0.000000e+00> : vector<2x16xf32>
    %154 = tpu.matmul %148, %2, %cst_91 {dimension_numbers = #tpu.dot_dimension_numbers<[1], [0], [0], [1], [0, 0, 1, 1], [], []>} : vector<2x16xf32>, vector<16x16xf32>, vector<2x16xf32> -> vector<2x16xf32>
    %155 = vector.broadcast %3 : vector<1x16xf32> to vector<2x16xf32>
    %156 = arith.addf %154, %155 : vector<2x16xf32>
    %cst_92 = arith.constant dense<0.000000e+00> : vector<2x16xf32>
    %157 = tpu.matmul %150, %4, %cst_92 {dimension_numbers = #tpu.dot_dimension_numbers<[1], [0], [0], [1], [0, 0, 1, 1], [], []>} : vector<2x16xf32>, vector<16x16xf32>, vector<2x16xf32> -> vector<2x16xf32>
    %158 = vector.broadcast %5 : vector<1x16xf32> to vector<2x16xf32>
    %159 = arith.addf %157, %158 : vector<2x16xf32>
    %cst_93 = arith.constant dense<0.000000e+00> : vector<2x2xf32>
    %160 = tpu.matmul %153, %156, %cst_93 {dimension_numbers = #tpu.dot_dimension_numbers<[1], [1], [0], [0], [0, 0, 1, 0], [], []>} : vector<2x16xf32>, vector<2x16xf32>, vector<2x2xf32> -> vector<2x2xf32>
    %cst_94 = arith.constant 2.500000e-01 : f32
    %161 = vector.broadcast %cst_94 : f32 to vector<2x2xf32>
    %162 = arith.mulf %160, %161 : vector<2x2xf32>
    %c1_95 = arith.constant 1 : index
    %c0_96 = arith.constant 0 : index
    %c0_97 = arith.constant 0 : index
    %163 = vector.load %arg3[%c1_95, %c0_96, %c0_97] : memref<2x2x2xf32, #tpu.memory_space<vmem>>, vector<1x2x2xf32>
    %164 = vector.shape_cast %163 : vector<1x2x2xf32> to vector<2x2xf32>
    %165 = arith.addf %162, %164 : vector<2x2xf32>
    %cst_98 = arith.constant dense<0.000000e+00> : vector<2x1xf32>
    %166 = tpu.matmul %153, %6, %cst_98 {dimension_numbers = #tpu.dot_dimension_numbers<[1], [0], [0], [1], [0, 0, 1, 1], [], []>} : vector<2x16xf32>, vector<16x1xf32>, vector<2x1xf32> -> vector<2x1xf32>
    %cst_99 = arith.constant 2.500000e-01 : f32
    %167 = vector.broadcast %cst_99 : f32 to vector<2x1xf32>
    %168 = arith.mulf %166, %167 : vector<2x1xf32>
    %cst_100 = arith.constant dense<0xFF800000> : vector<2xf32>
    %169 = vector.multi_reduction <maximumf>, %165, %cst_100 [1] : vector<2x2xf32> to vector<2xf32>
    %170 = vector.shape_cast %169 : vector<2xf32> to vector<2x1xf32>
    %171 = arith.maximumf %170, %168 : vector<2x1xf32>
    %172 = vector.broadcast %171 : vector<2x1xf32> to vector<2x2xf32>
    %173 = arith.subf %165, %172 : vector<2x2xf32>
    %174 = math.exp %173 : vector<2x2xf32>
    %175 = arith.subf %168, %171 : vector<2x1xf32>
    %176 = math.exp %175 : vector<2x1xf32>
    %cst_101 = arith.constant dense<0.000000e+00> : vector<2xf32>
    %177 = vector.multi_reduction <add>, %174, %cst_101 [1] : vector<2x2xf32> to vector<2xf32>
    %178 = vector.shape_cast %177 : vector<2xf32> to vector<2x1xf32>
    %179 = arith.addf %178, %176 : vector<2x1xf32>
    %180 = tpu.reciprocal %179 {approx = true} : vector<2x1xf32> -> vector<2x1xf32>
    %cst_102 = arith.constant dense<0.000000e+00> : vector<2x16xf32>
    %181 = tpu.matmul %174, %159, %cst_102 {dimension_numbers = #tpu.dot_dimension_numbers<[1], [0], [0], [1], [0, 0, 1, 1], [], []>} : vector<2x2xf32>, vector<2x16xf32>, vector<2x16xf32> -> vector<2x16xf32>
    %182 = vector.broadcast %176 : vector<2x1xf32> to vector<2x16xf32>
    %183 = vector.broadcast %7 : vector<1x16xf32> to vector<2x16xf32>
    %184 = arith.mulf %182, %183 : vector<2x16xf32>
    %185 = arith.addf %181, %184 : vector<2x16xf32>
    %186 = vector.broadcast %180 : vector<2x1xf32> to vector<2x16xf32>
    %187 = arith.mulf %185, %186 : vector<2x16xf32>
    %cst_103 = arith.constant dense<0.000000e+00> : vector<2x16xf32>
    %188 = tpu.matmul %187, %8, %cst_103 {dimension_numbers = #tpu.dot_dimension_numbers<[1], [0], [0], [1], [0, 0, 1, 1], [], []>} : vector<2x16xf32>, vector<16x16xf32>, vector<2x16xf32> -> vector<2x16xf32>
    %189 = vector.broadcast %9 : vector<1x16xf32> to vector<2x16xf32>
    %190 = arith.addf %188, %189 : vector<2x16xf32>
    %191 = arith.addf %190, %150 : vector<2x16xf32>
    %cst_104 = arith.constant dense<0.000000e+00> : vector<2xf32>
    %192 = vector.multi_reduction <add>, %191, %cst_104 [1] : vector<2x16xf32> to vector<2xf32>
    %193 = vector.shape_cast %192 : vector<2xf32> to vector<2x1xf32>
    %cst_105 = arith.constant 1.600000e+01 : f32
    %194 = vector.broadcast %cst_105 : f32 to vector<2x1xf32>
    %195 = arith.divf %193, %194 : vector<2x1xf32>
    %196 = vector.broadcast %195 : vector<2x1xf32> to vector<2x16xf32>
    %197 = arith.subf %191, %196 : vector<2x16xf32>
    %198 = arith.mulf %197, %197 : vector<2x16xf32>
    %cst_106 = arith.constant dense<0.000000e+00> : vector<2xf32>
    %199 = vector.multi_reduction <add>, %198, %cst_106 [1] : vector<2x16xf32> to vector<2xf32>
    %200 = vector.shape_cast %199 : vector<2xf32> to vector<2x1xf32>
    %cst_107 = arith.constant 1.600000e+01 : f32
    %201 = vector.broadcast %cst_107 : f32 to vector<2x1xf32>
    %202 = arith.divf %200, %201 : vector<2x1xf32>
    %203 = vector.broadcast %195 : vector<2x1xf32> to vector<2x16xf32>
    %204 = arith.subf %191, %203 : vector<2x16xf32>
    %cst_108 = arith.constant 9.99999974E-6 : f32
    %205 = vector.broadcast %cst_108 : f32 to vector<2x1xf32>
    %206 = arith.addf %202, %205 : vector<2x1xf32>
    %207 = math.rsqrt %206 : vector<2x1xf32>
    %208 = vector.broadcast %207 : vector<2x1xf32> to vector<2x16xf32>
    %209 = arith.mulf %204, %208 : vector<2x16xf32>
    %210 = vector.broadcast %10 : vector<1x16xf32> to vector<2x16xf32>
    %211 = arith.mulf %209, %210 : vector<2x16xf32>
    %212 = vector.broadcast %11 : vector<1x16xf32> to vector<2x16xf32>
    %213 = arith.addf %211, %212 : vector<2x16xf32>
    %cst_109 = arith.constant dense<0.000000e+00> : vector<2x16xf32>
    %214 = tpu.matmul %213, %12, %cst_109 {dimension_numbers = #tpu.dot_dimension_numbers<[1], [0], [0], [1], [0, 0, 1, 1], [], []>} : vector<2x16xf32>, vector<16x16xf32>, vector<2x16xf32> -> vector<2x16xf32>
    %215 = vector.broadcast %13 : vector<1x16xf32> to vector<2x16xf32>
    %216 = arith.addf %214, %215 : vector<2x16xf32>
    %cst_110 = arith.constant dense<0.000000e+00> : vector<2xf32>
    %217 = vector.multi_reduction <add>, %216, %cst_110 [1] : vector<2x16xf32> to vector<2xf32>
    %218 = vector.shape_cast %217 : vector<2xf32> to vector<2x1xf32>
    %cst_111 = arith.constant 1.600000e+01 : f32
    %219 = vector.broadcast %cst_111 : f32 to vector<2x1xf32>
    %220 = arith.divf %218, %219 : vector<2x1xf32>
    %221 = vector.broadcast %220 : vector<2x1xf32> to vector<2x16xf32>
    %222 = arith.subf %216, %221 : vector<2x16xf32>
    %223 = arith.mulf %222, %222 : vector<2x16xf32>
    %cst_112 = arith.constant dense<0.000000e+00> : vector<2xf32>
    %224 = vector.multi_reduction <add>, %223, %cst_112 [1] : vector<2x16xf32> to vector<2xf32>
    %225 = vector.shape_cast %224 : vector<2xf32> to vector<2x1xf32>
    %cst_113 = arith.constant 1.600000e+01 : f32
    %226 = vector.broadcast %cst_113 : f32 to vector<2x1xf32>
    %227 = arith.divf %225, %226 : vector<2x1xf32>
    %228 = vector.broadcast %220 : vector<2x1xf32> to vector<2x16xf32>
    %229 = arith.subf %216, %228 : vector<2x16xf32>
    %cst_114 = arith.constant 9.99999974E-6 : f32
    %230 = vector.broadcast %cst_114 : f32 to vector<2x1xf32>
    %231 = arith.addf %227, %230 : vector<2x1xf32>
    %232 = math.rsqrt %231 : vector<2x1xf32>
    %233 = vector.broadcast %232 : vector<2x1xf32> to vector<2x16xf32>
    %234 = arith.mulf %229, %233 : vector<2x16xf32>
    %235 = vector.broadcast %14 : vector<1x16xf32> to vector<2x16xf32>
    %236 = arith.mulf %234, %235 : vector<2x16xf32>
    %237 = vector.broadcast %15 : vector<1x16xf32> to vector<2x16xf32>
    %238 = arith.addf %236, %237 : vector<2x16xf32>
    %cst_115 = arith.constant 0.000000e+00 : f32
    %239 = vector.broadcast %cst_115 : f32 to vector<2x16xf32>
    %240 = arith.maximumf %238, %239 : vector<2x16xf32>
    %cst_116 = arith.constant dense<0.000000e+00> : vector<2x16xf32>
    %241 = tpu.matmul %240, %16, %cst_116 {dimension_numbers = #tpu.dot_dimension_numbers<[1], [0], [0], [1], [0, 0, 1, 1], [], []>} : vector<2x16xf32>, vector<16x16xf32>, vector<2x16xf32> -> vector<2x16xf32>
    %242 = vector.broadcast %17 : vector<1x16xf32> to vector<2x16xf32>
    %243 = arith.addf %241, %242 : vector<2x16xf32>
    %244 = arith.addf %243, %213 : vector<2x16xf32>
    %cst_117 = arith.constant dense<0.000000e+00> : vector<2xf32>
    %245 = vector.multi_reduction <add>, %244, %cst_117 [1] : vector<2x16xf32> to vector<2xf32>
    %246 = vector.shape_cast %245 : vector<2xf32> to vector<2x1xf32>
    %cst_118 = arith.constant 1.600000e+01 : f32
    %247 = vector.broadcast %cst_118 : f32 to vector<2x1xf32>
    %248 = arith.divf %246, %247 : vector<2x1xf32>
    %249 = vector.broadcast %248 : vector<2x1xf32> to vector<2x16xf32>
    %250 = arith.subf %244, %249 : vector<2x16xf32>
    %251 = arith.mulf %250, %250 : vector<2x16xf32>
    %cst_119 = arith.constant dense<0.000000e+00> : vector<2xf32>
    %252 = vector.multi_reduction <add>, %251, %cst_119 [1] : vector<2x16xf32> to vector<2xf32>
    %253 = vector.shape_cast %252 : vector<2xf32> to vector<2x1xf32>
    %cst_120 = arith.constant 1.600000e+01 : f32
    %254 = vector.broadcast %cst_120 : f32 to vector<2x1xf32>
    %255 = arith.divf %253, %254 : vector<2x1xf32>
    %256 = vector.broadcast %248 : vector<2x1xf32> to vector<2x16xf32>
    %257 = arith.subf %244, %256 : vector<2x16xf32>
    %cst_121 = arith.constant 9.99999974E-6 : f32
    %258 = vector.broadcast %cst_121 : f32 to vector<2x1xf32>
    %259 = arith.addf %255, %258 : vector<2x1xf32>
    %260 = math.rsqrt %259 : vector<2x1xf32>
    %261 = vector.broadcast %260 : vector<2x1xf32> to vector<2x16xf32>
    %262 = arith.mulf %257, %261 : vector<2x16xf32>
    %263 = vector.broadcast %18 : vector<1x16xf32> to vector<2x16xf32>
    %264 = arith.mulf %262, %263 : vector<2x16xf32>
    %265 = vector.broadcast %19 : vector<1x16xf32> to vector<2x16xf32>
    %266 = arith.addf %264, %265 : vector<2x16xf32>
    %c1_122 = arith.constant 1 : index
    %c0_123 = arith.constant 0 : index
    %c0_124 = arith.constant 0 : index
    %267 = vector.load %arg24[%c1_122, %c0_123, %c0_124] : memref<2x2x16xf32, #tpu.memory_space<vmem>>, vector<1x2x16xf32>
    %268 = vector.shape_cast %267 : vector<1x2x16xf32> to vector<2x16xf32>
    %269 = vector.shape_cast %266 : vector<2x16xf32> to vector<1x2x16xf32>
    tpu.vector_store %arg24[%c1_122, %c0_123, %c0_124], %269 {strides = array<i32>} : memref<2x2x16xf32, #tpu.memory_space<vmem>>, vector<1x2x16xf32>,
    return
  }
}

module attributes {stable_mosaic.version = 11 : i64} {
  func.func @_attn_block_kernel(%arg0: memref<2x8x16xf32, #tpu.memory_space<vmem>>, %arg1: memref<2x2x16xf32, #tpu.memory_space<vmem>>, %arg2: memref<2x2x16xf32, #tpu.memory_space<vmem>>, %arg3: memref<2x8x2xf32, #tpu.memory_space<vmem>>, %arg4: memref<16x16xf32, #tpu.memory_space<vmem>>, %arg5: memref<1x16xf32, #tpu.memory_space<vmem>>, %arg6: memref<16x16xf32, #tpu.memory_space<vmem>>, %arg7: memref<1x16xf32, #tpu.memory_space<vmem>>, %arg8: memref<16x16xf32, #tpu.memory_space<vmem>>, %arg9: memref<1x16xf32, #tpu.memory_space<vmem>>, %arg10: memref<16x1xf32, #tpu.memory_space<vmem>>, %arg11: memref<1x16xf32, #tpu.memory_space<vmem>>, %arg12: memref<16x16xf32, #tpu.memory_space<vmem>>, %arg13: memref<1x16xf32, #tpu.memory_space<vmem>>, %arg14: memref<1x16xf32, #tpu.memory_space<vmem>>, %arg15: memref<1x16xf32, #tpu.memory_space<vmem>>, %arg16: memref<16x16xf32, #tpu.memory_space<vmem>>, %arg17: memref<1x16xf32, #tpu.memory_space<vmem>>, %arg18: memref<1x16xf32, #tpu.memory_space<vmem>>, %arg19: memref<1x16xf32, #tpu.memory_space<vmem>>, %arg20: memref<16x16xf32, #tpu.memory_space<vmem>>, %arg21: memref<1x16xf32, #tpu.memory_space<vmem>>, %arg22: memref<1x16xf32, #tpu.memory_space<vmem>>, %arg23: memref<1x16xf32, #tpu.memory_space<vmem>>, %arg24: memref<2x8x16xf32, #tpu.memory_space<vmem>>) attributes {dimension_semantics = [], scalar_prefetch = 0 : i64, scratch_operands = 0 : i64, tpu.core_type = #tpu.core_type<tc>} {
    %c0 = arith.constant 0 : index
    %c0_0 = arith.constant 0 : index
    %0 = vector.load %arg4[%c0, %c0_0] : memref<16x16xf32, #tpu.memory_space<vmem>>, vector<16x16xf32>
    %c0_1 = arith.constant 0 : index
    %c0_2 = arith.constant 0 : index
    %1 = vector.load %arg5[%c0_1, %c0_2] : memref<1x16xf32, #tpu.memory_space<vmem>>, vector<1x16xf32>
    %c0_3 = arith.constant 0 : index
    %c0_4 = arith.constant 0 : index
    %2 = vector.load %arg6[%c0_3, %c0_4] : memref<16x16xf32, #tpu.memory_space<vmem>>, vector<16x16xf32>
    %c0_5 = arith.constant 0 : index
    %c0_6 = arith.constant 0 : index
    %3 = vector.load %arg7[%c0_5, %c0_6] : memref<1x16xf32, #tpu.memory_space<vmem>>, vector<1x16xf32>
    %c0_7 = arith.constant 0 : index
    %c0_8 = arith.constant 0 : index
    %4 = vector.load %arg8[%c0_7, %c0_8] : memref<16x16xf32, #tpu.memory_space<vmem>>, vector<16x16xf32>
    %c0_9 = arith.constant 0 : index
    %c0_10 = arith.constant 0 : index
    %5 = vector.load %arg9[%c0_9, %c0_10] : memref<1x16xf32, #tpu.memory_space<vmem>>, vector<1x16xf32>
    %c0_11 = arith.constant 0 : index
    %c0_12 = arith.constant 0 : index
    %6 = vector.load %arg10[%c0_11, %c0_12] : memref<16x1xf32, #tpu.memory_space<vmem>>, vector<16x1xf32>
    %c0_13 = arith.constant 0 : index
    %c0_14 = arith.constant 0 : index
    %7 = vector.load %arg11[%c0_13, %c0_14] : memref<1x16xf32, #tpu.memory_space<vmem>>, vector<1x16xf32>
    %c0_15 = arith.constant 0 : index
    %c0_16 = arith.constant 0 : index
    %8 = vector.load %arg12[%c0_15, %c0_16] : memref<16x16xf32, #tpu.memory_space<vmem>>, vector<16x16xf32>
    %c0_17 = arith.constant 0 : index
    %c0_18 = arith.constant 0 : index
    %9 = vector.load %arg13[%c0_17, %c0_18] : memref<1x16xf32, #tpu.memory_space<vmem>>, vector<1x16xf32>
    %c0_19 = arith.constant 0 : index
    %c0_20 = arith.constant 0 : index
    %10 = vector.load %arg14[%c0_19, %c0_20] : memref<1x16xf32, #tpu.memory_space<vmem>>, vector<1x16xf32>
    %c0_21 = arith.constant 0 : index
    %c0_22 = arith.constant 0 : index
    %11 = vector.load %arg15[%c0_21, %c0_22] : memref<1x16xf32, #tpu.memory_space<vmem>>, vector<1x16xf32>
    %c0_23 = arith.constant 0 : index
    %c0_24 = arith.constant 0 : index
    %12 = vector.load %arg16[%c0_23, %c0_24] : memref<16x16xf32, #tpu.memory_space<vmem>>, vector<16x16xf32>
    %c0_25 = arith.constant 0 : index
    %c0_26 = arith.constant 0 : index
    %13 = vector.load %arg17[%c0_25, %c0_26] : memref<1x16xf32, #tpu.memory_space<vmem>>, vector<1x16xf32>
    %c0_27 = arith.constant 0 : index
    %c0_28 = arith.constant 0 : index
    %14 = vector.load %arg18[%c0_27, %c0_28] : memref<1x16xf32, #tpu.memory_space<vmem>>, vector<1x16xf32>
    %c0_29 = arith.constant 0 : index
    %c0_30 = arith.constant 0 : index
    %15 = vector.load %arg19[%c0_29, %c0_30] : memref<1x16xf32, #tpu.memory_space<vmem>>, vector<1x16xf32>
    %c0_31 = arith.constant 0 : index
    %c0_32 = arith.constant 0 : index
    %16 = vector.load %arg20[%c0_31, %c0_32] : memref<16x16xf32, #tpu.memory_space<vmem>>, vector<16x16xf32>
    %c0_33 = arith.constant 0 : index
    %c0_34 = arith.constant 0 : index
    %17 = vector.load %arg21[%c0_33, %c0_34] : memref<1x16xf32, #tpu.memory_space<vmem>>, vector<1x16xf32>
    %c0_35 = arith.constant 0 : index
    %c0_36 = arith.constant 0 : index
    %18 = vector.load %arg22[%c0_35, %c0_36] : memref<1x16xf32, #tpu.memory_space<vmem>>, vector<1x16xf32>
    %c0_37 = arith.constant 0 : index
    %c0_38 = arith.constant 0 : index
    %19 = vector.load %arg23[%c0_37, %c0_38] : memref<1x16xf32, #tpu.memory_space<vmem>>, vector<1x16xf32>
    %c0_39 = arith.constant 0 : index
    %c0_40 = arith.constant 0 : index
    %c0_41 = arith.constant 0 : index
    %20 = vector.load %arg0[%c0_39, %c0_40, %c0_41] : memref<2x8x16xf32, #tpu.memory_space<vmem>>, vector<1x8x16xf32>
    %21 = vector.shape_cast %20 : vector<1x8x16xf32> to vector<8x16xf32>
    %c0_42 = arith.constant 0 : index
    %c0_43 = arith.constant 0 : index
    %c0_44 = arith.constant 0 : index
    %22 = vector.load %arg1[%c0_42, %c0_43, %c0_44] : memref<2x2x16xf32, #tpu.memory_space<vmem>>, vector<1x2x16xf32>
    %23 = vector.shape_cast %22 : vector<1x2x16xf32> to vector<2x16xf32>
    %c0_45 = arith.constant 0 : index
    %c0_46 = arith.constant 0 : index
    %c0_47 = arith.constant 0 : index
    %24 = vector.load %arg2[%c0_45, %c0_46, %c0_47] : memref<2x2x16xf32, #tpu.memory_space<vmem>>, vector<1x2x16xf32>
    %25 = vector.shape_cast %24 : vector<1x2x16xf32> to vector<2x16xf32>
    %cst = arith.constant dense<0.000000e+00> : vector<8x16xf32>
    %26 = tpu.matmul %21, %0, %cst {dimension_numbers = #tpu.dot_dimension_numbers<[1], [0], [0], [1], [0, 0, 1, 1], [], []>} : vector<8x16xf32>, vector<16x16xf32>, vector<8x16xf32> -> vector<8x16xf32>
    %27 = vector.broadcast %1 : vector<1x16xf32> to vector<8x16xf32>
    %28 = arith.addf %26, %27 : vector<8x16xf32>
    %cst_48 = arith.constant dense<0.000000e+00> : vector<2x16xf32>
    %29 = tpu.matmul %23, %2, %cst_48 {dimension_numbers = #tpu.dot_dimension_numbers<[1], [0], [0], [1], [0, 0, 1, 1], [], []>} : vector<2x16xf32>, vector<16x16xf32>, vector<2x16xf32> -> vector<2x16xf32>
    %30 = vector.broadcast %3 : vector<1x16xf32> to vector<2x16xf32>
    %31 = arith.addf %29, %30 : vector<2x16xf32>
    %cst_49 = arith.constant dense<0.000000e+00> : vector<2x16xf32>
    %32 = tpu.matmul %25, %4, %cst_49 {dimension_numbers = #tpu.dot_dimension_numbers<[1], [0], [0], [1], [0, 0, 1, 1], [], []>} : vector<2x16xf32>, vector<16x16xf32>, vector<2x16xf32> -> vector<2x16xf32>
    %33 = vector.broadcast %5 : vector<1x16xf32> to vector<2x16xf32>
    %34 = arith.addf %32, %33 : vector<2x16xf32>
    %cst_50 = arith.constant dense<0.000000e+00> : vector<8x2xf32>
    %35 = tpu.matmul %28, %31, %cst_50 {dimension_numbers = #tpu.dot_dimension_numbers<[1], [1], [0], [0], [0, 0, 1, 0], [], []>} : vector<8x16xf32>, vector<2x16xf32>, vector<8x2xf32> -> vector<8x2xf32>
    %cst_51 = arith.constant 2.500000e-01 : f32
    %36 = vector.broadcast %cst_51 : f32 to vector<8x2xf32>
    %37 = arith.mulf %35, %36 : vector<8x2xf32>
    %c0_52 = arith.constant 0 : index
    %c0_53 = arith.constant 0 : index
    %c0_54 = arith.constant 0 : index
    %38 = vector.load %arg3[%c0_52, %c0_53, %c0_54] : memref<2x8x2xf32, #tpu.memory_space<vmem>>, vector<1x8x2xf32>
    %39 = vector.shape_cast %38 : vector<1x8x2xf32> to vector<8x2xf32>
    %40 = arith.addf %37, %39 : vector<8x2xf32>
    %cst_55 = arith.constant dense<0.000000e+00> : vector<8x1xf32>
    %41 = tpu.matmul %28, %6, %cst_55 {dimension_numbers = #tpu.dot_dimension_numbers<[1], [0], [0], [1], [0, 0, 1, 1], [], []>} : vector<8x16xf32>, vector<16x1xf32>, vector<8x1xf32> -> vector<8x1xf32>
    %cst_56 = arith.constant 2.500000e-01 : f32
    %42 = vector.broadcast %cst_56 : f32 to vector<8x1xf32>
    %43 = arith.mulf %41, %42 : vector<8x1xf32>
    %cst_57 = arith.constant dense<0xFF800000> : vector<8xf32>
    %44 = vector.multi_reduction <maximumf>, %40, %cst_57 [1] : vector<8x2xf32> to vector<8xf32>
    %45 = vector.shape_cast %44 : vector<8xf32> to vector<8x1xf32>
    %46 = arith.maximumf %45, %43 : vector<8x1xf32>
    %47 = vector.broadcast %46 : vector<8x1xf32> to vector<8x2xf32>
    %48 = arith.subf %40, %47 : vector<8x2xf32>
    %49 = math.exp %48 : vector<8x2xf32>
    %50 = arith.subf %43, %46 : vector<8x1xf32>
    %51 = math.exp %50 : vector<8x1xf32>
    %cst_58 = arith.constant dense<0.000000e+00> : vector<8xf32>
    %52 = vector.multi_reduction <add>, %49, %cst_58 [1] : vector<8x2xf32> to vector<8xf32>
    %53 = vector.shape_cast %52 : vector<8xf32> to vector<8x1xf32>
    %54 = arith.addf %53, %51 : vector<8x1xf32>
    %55 = tpu.reciprocal %54 {approx = true} : vector<8x1xf32> -> vector<8x1xf32>
    %cst_59 = arith.constant dense<0.000000e+00> : vector<8x16xf32>
    %56 = tpu.matmul %49, %34, %cst_59 {dimension_numbers = #tpu.dot_dimension_numbers<[1], [0], [0], [1], [0, 0, 1, 1], [], []>} : vector<8x2xf32>, vector<2x16xf32>, vector<8x16xf32> -> vector<8x16xf32>
    %57 = vector.broadcast %51 : vector<8x1xf32> to vector<8x16xf32>
    %58 = vector.broadcast %7 : vector<1x16xf32> to vector<8x16xf32>
    %59 = arith.mulf %57, %58 : vector<8x16xf32>
    %60 = arith.addf %56, %59 : vector<8x16xf32>
    %61 = vector.broadcast %55 : vector<8x1xf32> to vector<8x16xf32>
    %62 = arith.mulf %60, %61 : vector<8x16xf32>
    %cst_60 = arith.constant dense<0.000000e+00> : vector<8x16xf32>
    %63 = tpu.matmul %62, %8, %cst_60 {dimension_numbers = #tpu.dot_dimension_numbers<[1], [0], [0], [1], [0, 0, 1, 1], [], []>} : vector<8x16xf32>, vector<16x16xf32>, vector<8x16xf32> -> vector<8x16xf32>
    %64 = vector.broadcast %9 : vector<1x16xf32> to vector<8x16xf32>
    %65 = arith.addf %63, %64 : vector<8x16xf32>
    %cst_61 = arith.constant dense<0.000000e+00> : vector<8xf32>
    %66 = vector.multi_reduction <add>, %65, %cst_61 [1] : vector<8x16xf32> to vector<8xf32>
    %67 = vector.shape_cast %66 : vector<8xf32> to vector<8x1xf32>
    %cst_62 = arith.constant 1.600000e+01 : f32
    %68 = vector.broadcast %cst_62 : f32 to vector<8x1xf32>
    %69 = arith.divf %67, %68 : vector<8x1xf32>
    %70 = vector.broadcast %69 : vector<8x1xf32> to vector<8x16xf32>
    %71 = arith.subf %65, %70 : vector<8x16xf32>
    %72 = arith.mulf %71, %71 : vector<8x16xf32>
    %cst_63 = arith.constant dense<0.000000e+00> : vector<8xf32>
    %73 = vector.multi_reduction <add>, %72, %cst_63 [1] : vector<8x16xf32> to vector<8xf32>
    %74 = vector.shape_cast %73 : vector<8xf32> to vector<8x1xf32>
    %cst_64 = arith.constant 1.600000e+01 : f32
    %75 = vector.broadcast %cst_64 : f32 to vector<8x1xf32>
    %76 = arith.divf %74, %75 : vector<8x1xf32>
    %77 = vector.broadcast %69 : vector<8x1xf32> to vector<8x16xf32>
    %78 = arith.subf %65, %77 : vector<8x16xf32>
    %cst_65 = arith.constant 9.99999974E-6 : f32
    %79 = vector.broadcast %cst_65 : f32 to vector<8x1xf32>
    %80 = arith.addf %76, %79 : vector<8x1xf32>
    %81 = math.rsqrt %80 : vector<8x1xf32>
    %82 = vector.broadcast %81 : vector<8x1xf32> to vector<8x16xf32>
    %83 = arith.mulf %78, %82 : vector<8x16xf32>
    %84 = vector.broadcast %10 : vector<1x16xf32> to vector<8x16xf32>
    %85 = arith.mulf %83, %84 : vector<8x16xf32>
    %86 = vector.broadcast %11 : vector<1x16xf32> to vector<8x16xf32>
    %87 = arith.addf %85, %86 : vector<8x16xf32>
    %cst_66 = arith.constant dense<0.000000e+00> : vector<8x16xf32>
    %88 = tpu.matmul %87, %12, %cst_66 {dimension_numbers = #tpu.dot_dimension_numbers<[1], [0], [0], [1], [0, 0, 1, 1], [], []>} : vector<8x16xf32>, vector<16x16xf32>, vector<8x16xf32> -> vector<8x16xf32>
    %89 = vector.broadcast %13 : vector<1x16xf32> to vector<8x16xf32>
    %90 = arith.addf %88, %89 : vector<8x16xf32>
    %cst_67 = arith.constant dense<0.000000e+00> : vector<8xf32>
    %91 = vector.multi_reduction <add>, %90, %cst_67 [1] : vector<8x16xf32> to vector<8xf32>
    %92 = vector.shape_cast %91 : vector<8xf32> to vector<8x1xf32>
    %cst_68 = arith.constant 1.600000e+01 : f32
    %93 = vector.broadcast %cst_68 : f32 to vector<8x1xf32>
    %94 = arith.divf %92, %93 : vector<8x1xf32>
    %95 = vector.broadcast %94 : vector<8x1xf32> to vector<8x16xf32>
    %96 = arith.subf %90, %95 : vector<8x16xf32>
    %97 = arith.mulf %96, %96 : vector<8x16xf32>
    %cst_69 = arith.constant dense<0.000000e+00> : vector<8xf32>
    %98 = vector.multi_reduction <add>, %97, %cst_69 [1] : vector<8x16xf32> to vector<8xf32>
    %99 = vector.shape_cast %98 : vector<8xf32> to vector<8x1xf32>
    %cst_70 = arith.constant 1.600000e+01 : f32
    %100 = vector.broadcast %cst_70 : f32 to vector<8x1xf32>
    %101 = arith.divf %99, %100 : vector<8x1xf32>
    %102 = vector.broadcast %94 : vector<8x1xf32> to vector<8x16xf32>
    %103 = arith.subf %90, %102 : vector<8x16xf32>
    %cst_71 = arith.constant 9.99999974E-6 : f32
    %104 = vector.broadcast %cst_71 : f32 to vector<8x1xf32>
    %105 = arith.addf %101, %104 : vector<8x1xf32>
    %106 = math.rsqrt %105 : vector<8x1xf32>
    %107 = vector.broadcast %106 : vector<8x1xf32> to vector<8x16xf32>
    %108 = arith.mulf %103, %107 : vector<8x16xf32>
    %109 = vector.broadcast %14 : vector<1x16xf32> to vector<8x16xf32>
    %110 = arith.mulf %108, %109 : vector<8x16xf32>
    %111 = vector.broadcast %15 : vector<1x16xf32> to vector<8x16xf32>
    %112 = arith.addf %110, %111 : vector<8x16xf32>
    %cst_72 = arith.constant 0.000000e+00 : f32
    %113 = vector.broadcast %cst_72 : f32 to vector<8x16xf32>
    %114 = arith.maximumf %112, %113 : vector<8x16xf32>
    %cst_73 = arith.constant dense<0.000000e+00> : vector<8x16xf32>
    %115 = tpu.matmul %114, %16, %cst_73 {dimension_numbers = #tpu.dot_dimension_numbers<[1], [0], [0], [1], [0, 0, 1, 1], [], []>} : vector<8x16xf32>, vector<16x16xf32>, vector<8x16xf32> -> vector<8x16xf32>
    %116 = vector.broadcast %17 : vector<1x16xf32> to vector<8x16xf32>
    %117 = arith.addf %115, %116 : vector<8x16xf32>
    %118 = arith.addf %117, %87 : vector<8x16xf32>
    %cst_74 = arith.constant dense<0.000000e+00> : vector<8xf32>
    %119 = vector.multi_reduction <add>, %118, %cst_74 [1] : vector<8x16xf32> to vector<8xf32>
    %120 = vector.shape_cast %119 : vector<8xf32> to vector<8x1xf32>
    %cst_75 = arith.constant 1.600000e+01 : f32
    %121 = vector.broadcast %cst_75 : f32 to vector<8x1xf32>
    %122 = arith.divf %120, %121 : vector<8x1xf32>
    %123 = vector.broadcast %122 : vector<8x1xf32> to vector<8x16xf32>
    %124 = arith.subf %118, %123 : vector<8x16xf32>
    %125 = arith.mulf %124, %124 : vector<8x16xf32>
    %cst_76 = arith.constant dense<0.000000e+00> : vector<8xf32>
    %126 = vector.multi_reduction <add>, %125, %cst_76 [1] : vector<8x16xf32> to vector<8xf32>
    %127 = vector.shape_cast %126 : vector<8xf32> to vector<8x1xf32>
    %cst_77 = arith.constant 1.600000e+01 : f32
    %128 = vector.broadcast %cst_77 : f32 to vector<8x1xf32>
    %129 = arith.divf %127, %128 : vector<8x1xf32>
    %130 = vector.broadcast %122 : vector<8x1xf32> to vector<8x16xf32>
    %131 = arith.subf %118, %130 : vector<8x16xf32>
    %cst_78 = arith.constant 9.99999974E-6 : f32
    %132 = vector.broadcast %cst_78 : f32 to vector<8x1xf32>
    %133 = arith.addf %129, %132 : vector<8x1xf32>
    %134 = math.rsqrt %133 : vector<8x1xf32>
    %135 = vector.broadcast %134 : vector<8x1xf32> to vector<8x16xf32>
    %136 = arith.mulf %131, %135 : vector<8x16xf32>
    %137 = vector.broadcast %18 : vector<1x16xf32> to vector<8x16xf32>
    %138 = arith.mulf %136, %137 : vector<8x16xf32>
    %139 = vector.broadcast %19 : vector<1x16xf32> to vector<8x16xf32>
    %140 = arith.addf %138, %139 : vector<8x16xf32>
    %c0_79 = arith.constant 0 : index
    %c0_80 = arith.constant 0 : index
    %c0_81 = arith.constant 0 : index
    %141 = vector.load %arg24[%c0_79, %c0_80, %c0_81] : memref<2x8x16xf32, #tpu.memory_space<vmem>>, vector<1x8x16xf32>
    %142 = vector.shape_cast %141 : vector<1x8x16xf32> to vector<8x16xf32>
    %143 = vector.shape_cast %140 : vector<8x16xf32> to vector<1x8x16xf32>
    tpu.vector_store %arg24[%c0_79, %c0_80, %c0_81], %143 {strides = array<i32>} : memref<2x8x16xf32, #tpu.memory_space<vmem>>, vector<1x8x16xf32>,
    %c1 = arith.constant 1 : index
    %c0_82 = arith.constant 0 : index
    %c0_83 = arith.constant 0 : index
    %144 = vector.load %arg0[%c1, %c0_82, %c0_83] : memref<2x8x16xf32, #tpu.memory_space<vmem>>, vector<1x8x16xf32>
    %145 = vector.shape_cast %144 : vector<1x8x16xf32> to vector<8x16xf32>
    %c1_84 = arith.constant 1 : index
    %c0_85 = arith.constant 0 : index
    %c0_86 = arith.constant 0 : index
    %146 = vector.load %arg1[%c1_84, %c0_85, %c0_86] : memref<2x2x16xf32, #tpu.memory_space<vmem>>, vector<1x2x16xf32>
    %147 = vector.shape_cast %146 : vector<1x2x16xf32> to vector<2x16xf32>
    %c1_87 = arith.constant 1 : index
    %c0_88 = arith.constant 0 : index
    %c0_89 = arith.constant 0 : index
    %148 = vector.load %arg2[%c1_87, %c0_88, %c0_89] : memref<2x2x16xf32, #tpu.memory_space<vmem>>, vector<1x2x16xf32>
    %149 = vector.shape_cast %148 : vector<1x2x16xf32> to vector<2x16xf32>
    %cst_90 = arith.constant dense<0.000000e+00> : vector<8x16xf32>
    %150 = tpu.matmul %145, %0, %cst_90 {dimension_numbers = #tpu.dot_dimension_numbers<[1], [0], [0], [1], [0, 0, 1, 1], [], []>} : vector<8x16xf32>, vector<16x16xf32>, vector<8x16xf32> -> vector<8x16xf32>
    %151 = vector.broadcast %1 : vector<1x16xf32> to vector<8x16xf32>
    %152 = arith.addf %150, %151 : vector<8x16xf32>
    %cst_91 = arith.constant dense<0.000000e+00> : vector<2x16xf32>
    %153 = tpu.matmul %147, %2, %cst_91 {dimension_numbers = #tpu.dot_dimension_numbers<[1], [0], [0], [1], [0, 0, 1, 1], [], []>} : vector<2x16xf32>, vector<16x16xf32>, vector<2x16xf32> -> vector<2x16xf32>
    %154 = vector.broadcast %3 : vector<1x16xf32> to vector<2x16xf32>
    %155 = arith.addf %153, %154 : vector<2x16xf32>
    %cst_92 = arith.constant dense<0.000000e+00> : vector<2x16xf32>
    %156 = tpu.matmul %149, %4, %cst_92 {dimension_numbers = #tpu.dot_dimension_numbers<[1], [0], [0], [1], [0, 0, 1, 1], [], []>} : vector<2x16xf32>, vector<16x16xf32>, vector<2x16xf32> -> vector<2x16xf32>
    %157 = vector.broadcast %5 : vector<1x16xf32> to vector<2x16xf32>
    %158 = arith.addf %156, %157 : vector<2x16xf32>
    %cst_93 = arith.constant dense<0.000000e+00> : vector<8x2xf32>
    %159 = tpu.matmul %152, %155, %cst_93 {dimension_numbers = #tpu.dot_dimension_numbers<[1], [1], [0], [0], [0, 0, 1, 0], [], []>} : vector<8x16xf32>, vector<2x16xf32>, vector<8x2xf32> -> vector<8x2xf32>
    %cst_94 = arith.constant 2.500000e-01 : f32
    %160 = vector.broadcast %cst_94 : f32 to vector<8x2xf32>
    %161 = arith.mulf %159, %160 : vector<8x2xf32>
    %c1_95 = arith.constant 1 : index
    %c0_96 = arith.constant 0 : index
    %c0_97 = arith.constant 0 : index
    %162 = vector.load %arg3[%c1_95, %c0_96, %c0_97] : memref<2x8x2xf32, #tpu.memory_space<vmem>>, vector<1x8x2xf32>
    %163 = vector.shape_cast %162 : vector<1x8x2xf32> to vector<8x2xf32>
    %164 = arith.addf %161, %163 : vector<8x2xf32>
    %cst_98 = arith.constant dense<0.000000e+00> : vector<8x1xf32>
    %165 = tpu.matmul %152, %6, %cst_98 {dimension_numbers = #tpu.dot_dimension_numbers<[1], [0], [0], [1], [0, 0, 1, 1], [], []>} : vector<8x16xf32>, vector<16x1xf32>, vector<8x1xf32> -> vector<8x1xf32>
    %cst_99 = arith.constant 2.500000e-01 : f32
    %166 = vector.broadcast %cst_99 : f32 to vector<8x1xf32>
    %167 = arith.mulf %165, %166 : vector<8x1xf32>
    %cst_100 = arith.constant dense<0xFF800000> : vector<8xf32>
    %168 = vector.multi_reduction <maximumf>, %164, %cst_100 [1] : vector<8x2xf32> to vector<8xf32>
    %169 = vector.shape_cast %168 : vector<8xf32> to vector<8x1xf32>
    %170 = arith.maximumf %169, %167 : vector<8x1xf32>
    %171 = vector.broadcast %170 : vector<8x1xf32> to vector<8x2xf32>
    %172 = arith.subf %164, %171 : vector<8x2xf32>
    %173 = math.exp %172 : vector<8x2xf32>
    %174 = arith.subf %167, %170 : vector<8x1xf32>
    %175 = math.exp %174 : vector<8x1xf32>
    %cst_101 = arith.constant dense<0.000000e+00> : vector<8xf32>
    %176 = vector.multi_reduction <add>, %173, %cst_101 [1] : vector<8x2xf32> to vector<8xf32>
    %177 = vector.shape_cast %176 : vector<8xf32> to vector<8x1xf32>
    %178 = arith.addf %177, %175 : vector<8x1xf32>
    %179 = tpu.reciprocal %178 {approx = true} : vector<8x1xf32> -> vector<8x1xf32>
    %cst_102 = arith.constant dense<0.000000e+00> : vector<8x16xf32>
    %180 = tpu.matmul %173, %158, %cst_102 {dimension_numbers = #tpu.dot_dimension_numbers<[1], [0], [0], [1], [0, 0, 1, 1], [], []>} : vector<8x2xf32>, vector<2x16xf32>, vector<8x16xf32> -> vector<8x16xf32>
    %181 = vector.broadcast %175 : vector<8x1xf32> to vector<8x16xf32>
    %182 = vector.broadcast %7 : vector<1x16xf32> to vector<8x16xf32>
    %183 = arith.mulf %181, %182 : vector<8x16xf32>
    %184 = arith.addf %180, %183 : vector<8x16xf32>
    %185 = vector.broadcast %179 : vector<8x1xf32> to vector<8x16xf32>
    %186 = arith.mulf %184, %185 : vector<8x16xf32>
    %cst_103 = arith.constant dense<0.000000e+00> : vector<8x16xf32>
    %187 = tpu.matmul %186, %8, %cst_103 {dimension_numbers = #tpu.dot_dimension_numbers<[1], [0], [0], [1], [0, 0, 1, 1], [], []>} : vector<8x16xf32>, vector<16x16xf32>, vector<8x16xf32> -> vector<8x16xf32>
    %188 = vector.broadcast %9 : vector<1x16xf32> to vector<8x16xf32>
    %189 = arith.addf %187, %188 : vector<8x16xf32>
    %cst_104 = arith.constant dense<0.000000e+00> : vector<8xf32>
    %190 = vector.multi_reduction <add>, %189, %cst_104 [1] : vector<8x16xf32> to vector<8xf32>
    %191 = vector.shape_cast %190 : vector<8xf32> to vector<8x1xf32>
    %cst_105 = arith.constant 1.600000e+01 : f32
    %192 = vector.broadcast %cst_105 : f32 to vector<8x1xf32>
    %193 = arith.divf %191, %192 : vector<8x1xf32>
    %194 = vector.broadcast %193 : vector<8x1xf32> to vector<8x16xf32>
    %195 = arith.subf %189, %194 : vector<8x16xf32>
    %196 = arith.mulf %195, %195 : vector<8x16xf32>
    %cst_106 = arith.constant dense<0.000000e+00> : vector<8xf32>
    %197 = vector.multi_reduction <add>, %196, %cst_106 [1] : vector<8x16xf32> to vector<8xf32>
    %198 = vector.shape_cast %197 : vector<8xf32> to vector<8x1xf32>
    %cst_107 = arith.constant 1.600000e+01 : f32
    %199 = vector.broadcast %cst_107 : f32 to vector<8x1xf32>
    %200 = arith.divf %198, %199 : vector<8x1xf32>
    %201 = vector.broadcast %193 : vector<8x1xf32> to vector<8x16xf32>
    %202 = arith.subf %189, %201 : vector<8x16xf32>
    %cst_108 = arith.constant 9.99999974E-6 : f32
    %203 = vector.broadcast %cst_108 : f32 to vector<8x1xf32>
    %204 = arith.addf %200, %203 : vector<8x1xf32>
    %205 = math.rsqrt %204 : vector<8x1xf32>
    %206 = vector.broadcast %205 : vector<8x1xf32> to vector<8x16xf32>
    %207 = arith.mulf %202, %206 : vector<8x16xf32>
    %208 = vector.broadcast %10 : vector<1x16xf32> to vector<8x16xf32>
    %209 = arith.mulf %207, %208 : vector<8x16xf32>
    %210 = vector.broadcast %11 : vector<1x16xf32> to vector<8x16xf32>
    %211 = arith.addf %209, %210 : vector<8x16xf32>
    %cst_109 = arith.constant dense<0.000000e+00> : vector<8x16xf32>
    %212 = tpu.matmul %211, %12, %cst_109 {dimension_numbers = #tpu.dot_dimension_numbers<[1], [0], [0], [1], [0, 0, 1, 1], [], []>} : vector<8x16xf32>, vector<16x16xf32>, vector<8x16xf32> -> vector<8x16xf32>
    %213 = vector.broadcast %13 : vector<1x16xf32> to vector<8x16xf32>
    %214 = arith.addf %212, %213 : vector<8x16xf32>
    %cst_110 = arith.constant dense<0.000000e+00> : vector<8xf32>
    %215 = vector.multi_reduction <add>, %214, %cst_110 [1] : vector<8x16xf32> to vector<8xf32>
    %216 = vector.shape_cast %215 : vector<8xf32> to vector<8x1xf32>
    %cst_111 = arith.constant 1.600000e+01 : f32
    %217 = vector.broadcast %cst_111 : f32 to vector<8x1xf32>
    %218 = arith.divf %216, %217 : vector<8x1xf32>
    %219 = vector.broadcast %218 : vector<8x1xf32> to vector<8x16xf32>
    %220 = arith.subf %214, %219 : vector<8x16xf32>
    %221 = arith.mulf %220, %220 : vector<8x16xf32>
    %cst_112 = arith.constant dense<0.000000e+00> : vector<8xf32>
    %222 = vector.multi_reduction <add>, %221, %cst_112 [1] : vector<8x16xf32> to vector<8xf32>
    %223 = vector.shape_cast %222 : vector<8xf32> to vector<8x1xf32>
    %cst_113 = arith.constant 1.600000e+01 : f32
    %224 = vector.broadcast %cst_113 : f32 to vector<8x1xf32>
    %225 = arith.divf %223, %224 : vector<8x1xf32>
    %226 = vector.broadcast %218 : vector<8x1xf32> to vector<8x16xf32>
    %227 = arith.subf %214, %226 : vector<8x16xf32>
    %cst_114 = arith.constant 9.99999974E-6 : f32
    %228 = vector.broadcast %cst_114 : f32 to vector<8x1xf32>
    %229 = arith.addf %225, %228 : vector<8x1xf32>
    %230 = math.rsqrt %229 : vector<8x1xf32>
    %231 = vector.broadcast %230 : vector<8x1xf32> to vector<8x16xf32>
    %232 = arith.mulf %227, %231 : vector<8x16xf32>
    %233 = vector.broadcast %14 : vector<1x16xf32> to vector<8x16xf32>
    %234 = arith.mulf %232, %233 : vector<8x16xf32>
    %235 = vector.broadcast %15 : vector<1x16xf32> to vector<8x16xf32>
    %236 = arith.addf %234, %235 : vector<8x16xf32>
    %cst_115 = arith.constant 0.000000e+00 : f32
    %237 = vector.broadcast %cst_115 : f32 to vector<8x16xf32>
    %238 = arith.maximumf %236, %237 : vector<8x16xf32>
    %cst_116 = arith.constant dense<0.000000e+00> : vector<8x16xf32>
    %239 = tpu.matmul %238, %16, %cst_116 {dimension_numbers = #tpu.dot_dimension_numbers<[1], [0], [0], [1], [0, 0, 1, 1], [], []>} : vector<8x16xf32>, vector<16x16xf32>, vector<8x16xf32> -> vector<8x16xf32>
    %240 = vector.broadcast %17 : vector<1x16xf32> to vector<8x16xf32>
    %241 = arith.addf %239, %240 : vector<8x16xf32>
    %242 = arith.addf %241, %211 : vector<8x16xf32>
    %cst_117 = arith.constant dense<0.000000e+00> : vector<8xf32>
    %243 = vector.multi_reduction <add>, %242, %cst_117 [1] : vector<8x16xf32> to vector<8xf32>
    %244 = vector.shape_cast %243 : vector<8xf32> to vector<8x1xf32>
    %cst_118 = arith.constant 1.600000e+01 : f32
    %245 = vector.broadcast %cst_118 : f32 to vector<8x1xf32>
    %246 = arith.divf %244, %245 : vector<8x1xf32>
    %247 = vector.broadcast %246 : vector<8x1xf32> to vector<8x16xf32>
    %248 = arith.subf %242, %247 : vector<8x16xf32>
    %249 = arith.mulf %248, %248 : vector<8x16xf32>
    %cst_119 = arith.constant dense<0.000000e+00> : vector<8xf32>
    %250 = vector.multi_reduction <add>, %249, %cst_119 [1] : vector<8x16xf32> to vector<8xf32>
    %251 = vector.shape_cast %250 : vector<8xf32> to vector<8x1xf32>
    %cst_120 = arith.constant 1.600000e+01 : f32
    %252 = vector.broadcast %cst_120 : f32 to vector<8x1xf32>
    %253 = arith.divf %251, %252 : vector<8x1xf32>
    %254 = vector.broadcast %246 : vector<8x1xf32> to vector<8x16xf32>
    %255 = arith.subf %242, %254 : vector<8x16xf32>
    %cst_121 = arith.constant 9.99999974E-6 : f32
    %256 = vector.broadcast %cst_121 : f32 to vector<8x1xf32>
    %257 = arith.addf %253, %256 : vector<8x1xf32>
    %258 = math.rsqrt %257 : vector<8x1xf32>
    %259 = vector.broadcast %258 : vector<8x1xf32> to vector<8x16xf32>
    %260 = arith.mulf %255, %259 : vector<8x16xf32>
    %261 = vector.broadcast %18 : vector<1x16xf32> to vector<8x16xf32>
    %262 = arith.mulf %260, %261 : vector<8x16xf32>
    %263 = vector.broadcast %19 : vector<1x16xf32> to vector<8x16xf32>
    %264 = arith.addf %262, %263 : vector<8x16xf32>
    %c1_122 = arith.constant 1 : index
    %c0_123 = arith.constant 0 : index
    %c0_124 = arith.constant 0 : index
    %265 = vector.load %arg24[%c1_122, %c0_123, %c0_124] : memref<2x8x16xf32, #tpu.memory_space<vmem>>, vector<1x8x16xf32>
    %266 = vector.shape_cast %265 : vector<1x8x16xf32> to vector<8x16xf32>
    %267 = vector.shape_cast %264 : vector<8x16xf32> to vector<1x8x16xf32>
    tpu.vector_store %arg24[%c1_122, %c0_123, %c0_124], %267 {strides = array<i32>} : memref<2x8x16xf32, #tpu.memory_space<vmem>>, vector<1x8x16xf32>,
    return
  }
}

module attributes {stable_mosaic.version = 11 : i64} {
  func.func @_cand_full_kernel(%arg0: memref<2x2x8xf32, #tpu.memory_space<vmem>>, %arg1: memref<2x8x16xf32, #tpu.memory_space<vmem>>, %arg2: memref<2x8x4xf32, #tpu.memory_space<vmem>>, %arg3: memref<2x2x16xf32, #tpu.memory_space<vmem>>, %arg4: memref<2x2x4xf32, #tpu.memory_space<vmem>>) attributes {dimension_semantics = [], scalar_prefetch = 0 : i64, scratch_operands = 0 : i64, tpu.core_type = #tpu.core_type<tc>} {
    %c0 = arith.constant 0 : index
    %c0_0 = arith.constant 0 : index
    %c0_1 = arith.constant 0 : index
    %0 = vector.load %arg0[%c0, %c0_0, %c0_1] : memref<2x2x8xf32, #tpu.memory_space<vmem>>, vector<1x2x8xf32>
    %1 = vector.shape_cast %0 : vector<1x2x8xf32> to vector<2x8xf32>
    %cst = arith.constant dense<0.000000e+00> : vector<2xf32>
    %2 = vector.multi_reduction <add>, %1, %cst [1] : vector<2x8xf32> to vector<2xf32>
    %3 = vector.shape_cast %2 : vector<2xf32> to vector<2x1xf32>
    %cst_2 = arith.constant 1.000000e-03 : f32
    %4 = vector.broadcast %cst_2 : f32 to vector<2x1xf32>
    %5 = arith.addf %3, %4 : vector<2x1xf32>
    %6 = tpu.reciprocal %5 {approx = true} : vector<2x1xf32> -> vector<2x1xf32>
    %c0_3 = arith.constant 0 : index
    %c0_4 = arith.constant 0 : index
    %c0_5 = arith.constant 0 : index
    %7 = vector.load %arg1[%c0_3, %c0_4, %c0_5] : memref<2x8x16xf32, #tpu.memory_space<vmem>>, vector<1x8x16xf32>
    %8 = vector.shape_cast %7 : vector<1x8x16xf32> to vector<8x16xf32>
    %cst_6 = arith.constant dense<0.000000e+00> : vector<2x16xf32>
    %9 = tpu.matmul %1, %8, %cst_6 {dimension_numbers = #tpu.dot_dimension_numbers<[1], [0], [0], [1], [0, 0, 1, 1], [], []>} : vector<2x8xf32>, vector<8x16xf32>, vector<2x16xf32> -> vector<2x16xf32>
    %10 = vector.broadcast %6 : vector<2x1xf32> to vector<2x16xf32>
    %11 = arith.mulf %9, %10 : vector<2x16xf32>
    %c0_7 = arith.constant 0 : index
    %c0_8 = arith.constant 0 : index
    %c0_9 = arith.constant 0 : index
    %12 = vector.load %arg3[%c0_7, %c0_8, %c0_9] : memref<2x2x16xf32, #tpu.memory_space<vmem>>, vector<1x2x16xf32>
    %13 = vector.shape_cast %12 : vector<1x2x16xf32> to vector<2x16xf32>
    %14 = vector.shape_cast %11 : vector<2x16xf32> to vector<1x2x16xf32>
    tpu.vector_store %arg3[%c0_7, %c0_8, %c0_9], %14 {strides = array<i32>} : memref<2x2x16xf32, #tpu.memory_space<vmem>>, vector<1x2x16xf32>,
    %c0_10 = arith.constant 0 : index
    %c0_11 = arith.constant 0 : index
    %c0_12 = arith.constant 0 : index
    %15 = vector.load %arg2[%c0_10, %c0_11, %c0_12] : memref<2x8x4xf32, #tpu.memory_space<vmem>>, vector<1x8x4xf32>
    %16 = vector.shape_cast %15 : vector<1x8x4xf32> to vector<8x4xf32>
    %cst_13 = arith.constant dense<0.000000e+00> : vector<2x4xf32>
    %17 = tpu.matmul %1, %16, %cst_13 {dimension_numbers = #tpu.dot_dimension_numbers<[1], [0], [0], [1], [0, 0, 1, 1], [], []>} : vector<2x8xf32>, vector<8x4xf32>, vector<2x4xf32> -> vector<2x4xf32>
    %c0_14 = arith.constant 0 : index
    %c0_15 = arith.constant 0 : index
    %c0_16 = arith.constant 0 : index
    %18 = vector.load %arg4[%c0_14, %c0_15, %c0_16] : memref<2x2x4xf32, #tpu.memory_space<vmem>>, vector<1x2x4xf32>
    %19 = vector.shape_cast %18 : vector<1x2x4xf32> to vector<2x4xf32>
    %20 = vector.shape_cast %17 : vector<2x4xf32> to vector<1x2x4xf32>
    tpu.vector_store %arg4[%c0_14, %c0_15, %c0_16], %20 {strides = array<i32>} : memref<2x2x4xf32, #tpu.memory_space<vmem>>, vector<1x2x4xf32>,
    %c1 = arith.constant 1 : index
    %c0_17 = arith.constant 0 : index
    %c0_18 = arith.constant 0 : index
    %21 = vector.load %arg0[%c1, %c0_17, %c0_18] : memref<2x2x8xf32, #tpu.memory_space<vmem>>, vector<1x2x8xf32>
    %22 = vector.shape_cast %21 : vector<1x2x8xf32> to vector<2x8xf32>
    %cst_19 = arith.constant dense<0.000000e+00> : vector<2xf32>
    %23 = vector.multi_reduction <add>, %22, %cst_19 [1] : vector<2x8xf32> to vector<2xf32>
    %24 = vector.shape_cast %23 : vector<2xf32> to vector<2x1xf32>
    %cst_20 = arith.constant 1.000000e-03 : f32
    %25 = vector.broadcast %cst_20 : f32 to vector<2x1xf32>
    %26 = arith.addf %24, %25 : vector<2x1xf32>
    %27 = tpu.reciprocal %26 {approx = true} : vector<2x1xf32> -> vector<2x1xf32>
    %c1_21 = arith.constant 1 : index
    %c0_22 = arith.constant 0 : index
    %c0_23 = arith.constant 0 : index
    %28 = vector.load %arg1[%c1_21, %c0_22, %c0_23] : memref<2x8x16xf32, #tpu.memory_space<vmem>>, vector<1x8x16xf32>
    %29 = vector.shape_cast %28 : vector<1x8x16xf32> to vector<8x16xf32>
    %cst_24 = arith.constant dense<0.000000e+00> : vector<2x16xf32>
    %30 = tpu.matmul %22, %29, %cst_24 {dimension_numbers = #tpu.dot_dimension_numbers<[1], [0], [0], [1], [0, 0, 1, 1], [], []>} : vector<2x8xf32>, vector<8x16xf32>, vector<2x16xf32> -> vector<2x16xf32>
    %31 = vector.broadcast %27 : vector<2x1xf32> to vector<2x16xf32>
    %32 = arith.mulf %30, %31 : vector<2x16xf32>
    %c1_25 = arith.constant 1 : index
    %c0_26 = arith.constant 0 : index
    %c0_27 = arith.constant 0 : index
    %33 = vector.load %arg3[%c1_25, %c0_26, %c0_27] : memref<2x2x16xf32, #tpu.memory_space<vmem>>, vector<1x2x16xf32>
    %34 = vector.shape_cast %33 : vector<1x2x16xf32> to vector<2x16xf32>
    %35 = vector.shape_cast %32 : vector<2x16xf32> to vector<1x2x16xf32>
    tpu.vector_store %arg3[%c1_25, %c0_26, %c0_27], %35 {strides = array<i32>} : memref<2x2x16xf32, #tpu.memory_space<vmem>>, vector<1x2x16xf32>,
    %c1_28 = arith.constant 1 : index
    %c0_29 = arith.constant 0 : index
    %c0_30 = arith.constant 0 : index
    %36 = vector.load %arg2[%c1_28, %c0_29, %c0_30] : memref<2x8x4xf32, #tpu.memory_space<vmem>>, vector<1x8x4xf32>
    %37 = vector.shape_cast %36 : vector<1x8x4xf32> to vector<8x4xf32>
    %cst_31 = arith.constant dense<0.000000e+00> : vector<2x4xf32>
    %38 = tpu.matmul %22, %37, %cst_31 {dimension_numbers = #tpu.dot_dimension_numbers<[1], [0], [0], [1], [0, 0, 1, 1], [], []>} : vector<2x8xf32>, vector<8x4xf32>, vector<2x4xf32> -> vector<2x4xf32>
    %c1_32 = arith.constant 1 : index
    %c0_33 = arith.constant 0 : index
    %c0_34 = arith.constant 0 : index
    %39 = vector.load %arg4[%c1_32, %c0_33, %c0_34] : memref<2x2x4xf32, #tpu.memory_space<vmem>>, vector<1x2x4xf32>
    %40 = vector.shape_cast %39 : vector<1x2x4xf32> to vector<2x4xf32>
    %41 = vector.shape_cast %38 : vector<2x4xf32> to vector<1x2x4xf32>
    tpu.vector_store %arg4[%c1_32, %c0_33, %c0_34], %41 {strides = array<i32>} : memref<2x2x4xf32, #tpu.memory_space<vmem>>, vector<1x2x4xf32>,
    return
  }
}

module attributes {stable_mosaic.version = 11 : i64} {
  func.func @_dnn2_kernel(%arg0: memref<4x15xf32, #tpu.memory_space<vmem>>, %arg1: memref<15x11xf32, #tpu.memory_space<vmem>>, %arg2: memref<1x11xf32, #tpu.memory_space<vmem>>, %arg3: memref<1x11xf32, #tpu.memory_space<vmem>>, %arg4: memref<1x11xf32, #tpu.memory_space<vmem>>, %arg5: memref<11x8xf32, #tpu.memory_space<vmem>>, %arg6: memref<1x8xf32, #tpu.memory_space<vmem>>, %arg7: memref<4x8xf32, #tpu.memory_space<vmem>>) attributes {dimension_semantics = [], scalar_prefetch = 0 : i64, scratch_operands = 0 : i64, tpu.core_type = #tpu.core_type<tc>} {
    %c0 = arith.constant 0 : index
    %c0_0 = arith.constant 0 : index
    %0 = vector.load %arg0[%c0, %c0_0] : memref<4x15xf32, #tpu.memory_space<vmem>>, vector<4x15xf32>
    %c0_1 = arith.constant 0 : index
    %c0_2 = arith.constant 0 : index
    %1 = vector.load %arg1[%c0_1, %c0_2] : memref<15x11xf32, #tpu.memory_space<vmem>>, vector<15x11xf32>
    %cst = arith.constant dense<0.000000e+00> : vector<4x11xf32>
    %2 = tpu.matmul %0, %1, %cst {dimension_numbers = #tpu.dot_dimension_numbers<[1], [0], [0], [1], [0, 0, 1, 1], [], []>} : vector<4x15xf32>, vector<15x11xf32>, vector<4x11xf32> -> vector<4x11xf32>
    %c0_3 = arith.constant 0 : index
    %c0_4 = arith.constant 0 : index
    %3 = vector.load %arg2[%c0_3, %c0_4] : memref<1x11xf32, #tpu.memory_space<vmem>>, vector<1x11xf32>
    %4 = vector.broadcast %3 : vector<1x11xf32> to vector<4x11xf32>
    %5 = arith.addf %2, %4 : vector<4x11xf32>
    %c0_5 = arith.constant 0 : index
    %c0_6 = arith.constant 0 : index
    %6 = vector.load %arg3[%c0_5, %c0_6] : memref<1x11xf32, #tpu.memory_space<vmem>>, vector<1x11xf32>
    %c0_7 = arith.constant 0 : index
    %c0_8 = arith.constant 0 : index
    %7 = vector.load %arg4[%c0_7, %c0_8] : memref<1x11xf32, #tpu.memory_space<vmem>>, vector<1x11xf32>
    %cst_9 = arith.constant dense<0.000000e+00> : vector<4xf32>
    %8 = vector.multi_reduction <add>, %5, %cst_9 [1] : vector<4x11xf32> to vector<4xf32>
    %9 = vector.shape_cast %8 : vector<4xf32> to vector<4x1xf32>
    %cst_10 = arith.constant 1.100000e+01 : f32
    %10 = vector.broadcast %cst_10 : f32 to vector<4x1xf32>
    %11 = arith.divf %9, %10 : vector<4x1xf32>
    %12 = vector.broadcast %11 : vector<4x1xf32> to vector<4x11xf32>
    %13 = arith.subf %5, %12 : vector<4x11xf32>
    %14 = arith.mulf %13, %13 : vector<4x11xf32>
    %cst_11 = arith.constant dense<0.000000e+00> : vector<4xf32>
    %15 = vector.multi_reduction <add>, %14, %cst_11 [1] : vector<4x11xf32> to vector<4xf32>
    %16 = vector.shape_cast %15 : vector<4xf32> to vector<4x1xf32>
    %cst_12 = arith.constant 1.100000e+01 : f32
    %17 = vector.broadcast %cst_12 : f32 to vector<4x1xf32>
    %18 = arith.divf %16, %17 : vector<4x1xf32>
    %19 = vector.broadcast %11 : vector<4x1xf32> to vector<4x11xf32>
    %20 = arith.subf %5, %19 : vector<4x11xf32>
    %cst_13 = arith.constant 9.99999974E-6 : f32
    %21 = vector.broadcast %cst_13 : f32 to vector<4x1xf32>
    %22 = arith.addf %18, %21 : vector<4x1xf32>
    %23 = math.rsqrt %22 : vector<4x1xf32>
    %24 = vector.broadcast %23 : vector<4x1xf32> to vector<4x11xf32>
    %25 = arith.mulf %20, %24 : vector<4x11xf32>
    %26 = vector.broadcast %6 : vector<1x11xf32> to vector<4x11xf32>
    %27 = arith.mulf %25, %26 : vector<4x11xf32>
    %28 = vector.broadcast %7 : vector<1x11xf32> to vector<4x11xf32>
    %29 = arith.addf %27, %28 : vector<4x11xf32>
    %cst_14 = arith.constant 0.000000e+00 : f32
    %30 = vector.broadcast %cst_14 : f32 to vector<4x11xf32>
    %31 = arith.maximumf %29, %30 : vector<4x11xf32>
    %c0_15 = arith.constant 0 : index
    %c0_16 = arith.constant 0 : index
    %32 = vector.load %arg5[%c0_15, %c0_16] : memref<11x8xf32, #tpu.memory_space<vmem>>, vector<11x8xf32>
    %cst_17 = arith.constant dense<0.000000e+00> : vector<4x8xf32>
    %33 = tpu.matmul %31, %32, %cst_17 {dimension_numbers = #tpu.dot_dimension_numbers<[1], [0], [0], [1], [0, 0, 1, 1], [], []>} : vector<4x11xf32>, vector<11x8xf32>, vector<4x8xf32> -> vector<4x8xf32>
    %c0_18 = arith.constant 0 : index
    %c0_19 = arith.constant 0 : index
    %34 = vector.load %arg6[%c0_18, %c0_19] : memref<1x8xf32, #tpu.memory_space<vmem>>, vector<1x8xf32>
    %35 = vector.broadcast %34 : vector<1x8xf32> to vector<4x8xf32>
    %36 = arith.addf %33, %35 : vector<4x8xf32>
    %c0_20 = arith.constant 0 : index
    %c0_21 = arith.constant 0 : index
    %37 = vector.load %arg7[%c0_20, %c0_21] : memref<4x8xf32, #tpu.memory_space<vmem>>, vector<4x8xf32>
    tpu.vector_store %arg7[%c0_20, %c0_21], %36 {strides = array<i32>} : memref<4x8xf32, #tpu.memory_space<vmem>>, vector<4x8xf32>,
    return
  }
}

module attributes {stable_mosaic.version = 11 : i64} {
  func.func @_dnn2_kernel(%arg0: memref<4x8xf32, #tpu.memory_space<vmem>>, %arg1: memref<8x11xf32, #tpu.memory_space<vmem>>, %arg2: memref<1x11xf32, #tpu.memory_space<vmem>>, %arg3: memref<1x11xf32, #tpu.memory_space<vmem>>, %arg4: memref<1x11xf32, #tpu.memory_space<vmem>>, %arg5: memref<11x15xf32, #tpu.memory_space<vmem>>, %arg6: memref<1x15xf32, #tpu.memory_space<vmem>>, %arg7: memref<4x15xf32, #tpu.memory_space<vmem>>) attributes {dimension_semantics = [], scalar_prefetch = 0 : i64, scratch_operands = 0 : i64, tpu.core_type = #tpu.core_type<tc>} {
    %c0 = arith.constant 0 : index
    %c0_0 = arith.constant 0 : index
    %0 = vector.load %arg0[%c0, %c0_0] : memref<4x8xf32, #tpu.memory_space<vmem>>, vector<4x8xf32>
    %c0_1 = arith.constant 0 : index
    %c0_2 = arith.constant 0 : index
    %1 = vector.load %arg1[%c0_1, %c0_2] : memref<8x11xf32, #tpu.memory_space<vmem>>, vector<8x11xf32>
    %cst = arith.constant dense<0.000000e+00> : vector<4x11xf32>
    %2 = tpu.matmul %0, %1, %cst {dimension_numbers = #tpu.dot_dimension_numbers<[1], [0], [0], [1], [0, 0, 1, 1], [], []>} : vector<4x8xf32>, vector<8x11xf32>, vector<4x11xf32> -> vector<4x11xf32>
    %c0_3 = arith.constant 0 : index
    %c0_4 = arith.constant 0 : index
    %3 = vector.load %arg2[%c0_3, %c0_4] : memref<1x11xf32, #tpu.memory_space<vmem>>, vector<1x11xf32>
    %4 = vector.broadcast %3 : vector<1x11xf32> to vector<4x11xf32>
    %5 = arith.addf %2, %4 : vector<4x11xf32>
    %c0_5 = arith.constant 0 : index
    %c0_6 = arith.constant 0 : index
    %6 = vector.load %arg3[%c0_5, %c0_6] : memref<1x11xf32, #tpu.memory_space<vmem>>, vector<1x11xf32>
    %c0_7 = arith.constant 0 : index
    %c0_8 = arith.constant 0 : index
    %7 = vector.load %arg4[%c0_7, %c0_8] : memref<1x11xf32, #tpu.memory_space<vmem>>, vector<1x11xf32>
    %cst_9 = arith.constant dense<0.000000e+00> : vector<4xf32>
    %8 = vector.multi_reduction <add>, %5, %cst_9 [1] : vector<4x11xf32> to vector<4xf32>
    %9 = vector.shape_cast %8 : vector<4xf32> to vector<4x1xf32>
    %cst_10 = arith.constant 1.100000e+01 : f32
    %10 = vector.broadcast %cst_10 : f32 to vector<4x1xf32>
    %11 = arith.divf %9, %10 : vector<4x1xf32>
    %12 = vector.broadcast %11 : vector<4x1xf32> to vector<4x11xf32>
    %13 = arith.subf %5, %12 : vector<4x11xf32>
    %14 = arith.mulf %13, %13 : vector<4x11xf32>
    %cst_11 = arith.constant dense<0.000000e+00> : vector<4xf32>
    %15 = vector.multi_reduction <add>, %14, %cst_11 [1] : vector<4x11xf32> to vector<4xf32>
    %16 = vector.shape_cast %15 : vector<4xf32> to vector<4x1xf32>
    %cst_12 = arith.constant 1.100000e+01 : f32
    %17 = vector.broadcast %cst_12 : f32 to vector<4x1xf32>
    %18 = arith.divf %16, %17 : vector<4x1xf32>
    %19 = vector.broadcast %11 : vector<4x1xf32> to vector<4x11xf32>
    %20 = arith.subf %5, %19 : vector<4x11xf32>
    %cst_13 = arith.constant 9.99999974E-6 : f32
    %21 = vector.broadcast %cst_13 : f32 to vector<4x1xf32>
    %22 = arith.addf %18, %21 : vector<4x1xf32>
    %23 = math.rsqrt %22 : vector<4x1xf32>
    %24 = vector.broadcast %23 : vector<4x1xf32> to vector<4x11xf32>
    %25 = arith.mulf %20, %24 : vector<4x11xf32>
    %26 = vector.broadcast %6 : vector<1x11xf32> to vector<4x11xf32>
    %27 = arith.mulf %25, %26 : vector<4x11xf32>
    %28 = vector.broadcast %7 : vector<1x11xf32> to vector<4x11xf32>
    %29 = arith.addf %27, %28 : vector<4x11xf32>
    %cst_14 = arith.constant 0.000000e+00 : f32
    %30 = vector.broadcast %cst_14 : f32 to vector<4x11xf32>
    %31 = arith.maximumf %29, %30 : vector<4x11xf32>
    %c0_15 = arith.constant 0 : index
    %c0_16 = arith.constant 0 : index
    %32 = vector.load %arg5[%c0_15, %c0_16] : memref<11x15xf32, #tpu.memory_space<vmem>>, vector<11x15xf32>
    %cst_17 = arith.constant dense<0.000000e+00> : vector<4x15xf32>
    %33 = tpu.matmul %31, %32, %cst_17 {dimension_numbers = #tpu.dot_dimension_numbers<[1], [0], [0], [1], [0, 0, 1, 1], [], []>} : vector<4x11xf32>, vector<11x15xf32>, vector<4x15xf32> -> vector<4x15xf32>
    %c0_18 = arith.constant 0 : index
    %c0_19 = arith.constant 0 : index
    %34 = vector.load %arg6[%c0_18, %c0_19] : memref<1x15xf32, #tpu.memory_space<vmem>>, vector<1x15xf32>
    %35 = vector.broadcast %34 : vector<1x15xf32> to vector<4x15xf32>
    %36 = arith.addf %33, %35 : vector<4x15xf32>
    %c0_20 = arith.constant 0 : index
    %c0_21 = arith.constant 0 : index
    %37 = vector.load %arg7[%c0_20, %c0_21] : memref<4x15xf32, #tpu.memory_space<vmem>>, vector<4x15xf32>
    tpu.vector_store %arg7[%c0_20, %c0_21], %36 {strides = array<i32>} : memref<4x15xf32, #tpu.memory_space<vmem>>, vector<4x15xf32>,
    return
  }
}

</mosaic_0001>

<bundles_post_ra>
// kernel: encoder_forward.16
= control target key start
LH: loop header
LB: loop body
LE: loop exit
PB: predicated region body
PF: predicated region fallthrough
CT: control target
= control target key end

     0   :  { %vm43_vm0 = vcmask 1044480   ;;  %vm36_vm1 = vcmask 39936   ;;  %vm124_vm2 = vcmask 130048   ;;  %s383_s1 = inlined_call_operand.vmem [shape: f32[5,16], index: 1, kind: input, shape index: {}]   ;;  %s384_s0 = inlined_call_operand.vmem [shape: f32[16,5], index: 0, kind: input, shape index: {}]   ;;  %s385_s2 = inlined_call_operand.vmem [shape: f32[1,16], index: 2, kind: input, shape index: {}]   ;;  %s386_s5 = inlined_call_operand.vmem [shape: f32[16,16], index: 5, kind: input, shape index: {}]   ;;  %s387_s3 = inlined_call_operand.vmem [shape: f32[1,16], index: 3, kind: input, shape index: {}]   ;;  %s388_s4 = inlined_call_operand.vmem [shape: f32[1,16], index: 4, kind: input, shape index: {}]   ;;  %s389_s6 = inlined_call_operand.vmem [shape: f32[1,16], index: 6, kind: input, shape index: {}]   ;;  %s390_s7 = inlined_call_operand.vmem [shape: f32[16,16], index: 7, kind: output, shape index: {}]  }
   0x1   :  { %v28_v0 = vld [vmem:[%s383_s1] sm:$0x1f]  ;;  %v27_v2 = vld [vmem:[%s384_s0 + $0x8] sm:$0xff] }
   0x2   :  { %v26_v1 = vld [vmem:[%s384_s0] sm:$0xff]  ;;  %282 = vmatprep.subr.msk.mxu0 %vm43_vm0, %v28_v0  ;;  %v171_v21 = vld [vmem:[%s386_s5 + $0x8] sm:$0xff] }
   0x3   :  { %284 = vmatprep.mubr.msk.f32.mxu0 %vm36_vm1, %v26_v1  ;;  %283 = vmatpush3.msk.msra.mxu0 %vm43_vm0, %v28_v0  ;;  %v266_v3 = vld [vmem:[%s385_s2] ss:$0 sm:$0xff] }
   0x4   :  { %285 = vmatmul.mubr.msk.f32.vlgmr.msra.gmra.mrb[0].mxu0 %vm36_vm1, %v27_v2  ;;  %v170_v20 = vld [vmem:[%s386_s5] sm:$0xff] }
   0x5   :  { %v294_v22 = vpack.c.bf16 %v171_v21, %v170_v20  ;;  %v270_v30 = vld [vmem:[%s387_s3] ss:$0 sm:$0xff] }
   0x6   :  { %v271_v32 = vld [vmem:[%s388_s4] ss:$0 sm:$0xff] }
   0x7   :  { %295 = vmatprep.subr.bf16.mxu1 %v294_v22  ;;  %v272_v41 = vld [vmem:[%s389_s6] ss:$0 sm:$0xff] }
   0x8   :  { %297 = vmatpush3.bf16.msra.mxu1 %v294_v22 }
  0xd7   :  { %v286_v4 = vpop.f32.mrb[0].mxu0 }
  0xd8   :  { %v113_v5 = vpop.f32.mrb[1].mxu0  ;;  %v119_v7 = vadd.f32 %v286_v4, %v266_v3 }
  0xd9   :  { %v114_v6 = vadd.f32 %v266_v3, %v113_v5 }
  0xda   :  { %v128_v9 = vsel %vm124_vm2, %v119_v7, 0.0 }
  0xdb   :  { %v125_v8 = vsel %vm124_vm2, %v114_v6, 0.0 }
  0xdc   :  { %126 = vadd.xlane.f32.xlu0 %v125_v8 }
  0xe0   :  { %129 = vadd.xlane.f32.xlu0 %v128_v9 }
 0x169   :  { %v127_v10 = vpop.xlane.xlu0 %126 }
 0x16a   :  { %v132_v11 = vmul.f32 0.0625, %v127_v10 }
 0x16c   :  { %v134_v12 = vsub.f32 %v114_v6, %v132_v11 }
 0x16d   :  { %v130_v13 = vpop.xlane.xlu0 %129 }
 0x16e   :  { %v133_v14 = vmul.f32 0.0625, %v130_v13  ;;  %v136_v15 = vmul.f32 %v134_v12, %v134_v12 }
 0x170   :  { %v135_v16 = vsub.f32 %v119_v7, %v133_v14  ;;  %v138_v17 = vsel %vm124_vm2, %v136_v15, 0.0 }
 0x171   :  { %139 = vadd.xlane.f32.xlu1 %v138_v17 }
 0x172   :  { %v137_v18 = vmul.f32 %v135_v16, %v135_v16 }
 0x174   :  { %v141_v19 = vsel %vm124_vm2, %v137_v18, 0.0 }
 0x175   :  { %142 = vadd.xlane.f32.xlu1 %v141_v19 }
 0x1fe   :  { %v140_v23 = vpop.xlane.xlu1 %139 }
 0x1ff   :  { %v144_v24 = vmul.f32 0.0625, %v140_v23 }
 0x201   :  { %v146_v25 = vadd.f32 1e-05, %v144_v24 }
 0x202   :  { %v143_v26 = vpop.xlane.xlu1 %142 }
 0x203   :  { %298 = vrsqrt.f32 %v146_v25  ;;  %v145_v27 = vmul.f32 0.0625, %v143_v26 }
 0x205   :  { %v147_v28 = vadd.f32 1e-05, %v145_v27 }
 0x207   :  { %300 = vrsqrt.f32 %v147_v28 }
 0x20d   :  { %v299_v29 = vpop.eup %298 }
 0x20e   :  { %v150_v31 = vmul.f32 %v299_v29, %v134_v12 }
 0x210   :  { %v158_v33 = vmul.f32 %v270_v30, %v150_v31 }
 0x211   :  { %v301_v34 = vpop.eup %300 }
 0x212   :  { %v151_v35 = vmul.f32 %v301_v34, %v135_v16  ;;  %v166_v36 = vadd.f32 %v271_v32, %v158_v33 }
 0x214   :  { %v159_v37 = vmul.f32 %v270_v30, %v151_v35  ;;  %v168_v38 = vmax.f32 %v166_v36, 0.0 }
 0x216   :  { %v167_v39 = vadd.f32 %v271_v32, %v159_v37  ;;  %291 = vmatprep.mubr.msk.f32.mxu1 %vm124_vm2, %v168_v38 }
 0x218   :  { %v169_v40 = vmax.f32 %v167_v39, 0.0 }
 0x21a   :  { %292 = vmatmul.mubr.msk.f32.vlgmr.msra.gmra.mrb[0].mxu1 %vm124_vm2, %v169_v40 }
 0x2ed   :  { %v293_v42 = vpop.f32.mrb[0].mxu1 }
 0x2ee   :  { %v257_v43 = vadd.f32 %v293_v42, %v272_v41  ;;  %v251_v44 = vpop.f32.mrb[1].mxu1 }
 0x2ef   :  { %v252_v45 = vadd.f32 %v272_v41, %v251_v44 }
 0x2f0   :  { %261 = vst.msk [vmem:[%s390_s7 + $0x8] sm:$0xff] %vm124_vm2, %v257_v43 }
 0x2f1   :  { %260 = vst.msk [vmem:[%s390_s7] sm:$0xff] %vm124_vm2, %v252_v45 }

// kernel: encoder_forward.19
= control target key start
LH: loop header
LB: loop body
LE: loop exit
PB: predicated region body
PF: predicated region fallthrough
CT: control target
= control target key end

     0   :  { %vm12_vm0 = vcmask 58368   ;;  %v210_v0 = vmov 0.0   ;;  %vm19_vm1 = vcmask 64512   ;;  %vm211_vm2 = vmmov 0   ;;  %s247_s1 = inlined_call_operand.vmem [shape: f32[2,8,16], index: 1, kind: input, shape index: {}]   ;;  %s248_s0 = inlined_call_operand.vmem [shape: f32[2,2,8], index: 0, kind: input, shape index: {}]   ;;  %s249_s2 = inlined_call_operand.vmem [shape: f32[2,2,16], index: 2, kind: output, shape index: {}]  }
   0x1   :  { %194 = vmatprep.subr.mxu0 %v210_v0  ;;  %199 = vmatprep.subr.mxu1 %v210_v0  ;;  %v18_v1 = vld [vmem:[%s247_s1] sm:$0xff]  ;;  %v187_v2 = vld [vmem:[%s247_s1 + $0x8] sm:$0xff]  ;;  %vm94_vm3 = vcmask 123904  }
   0x2   :  { %v11_v3 = vld [vmem:[%s248_s0] sm:$0x3]  ;;  %195 = vmatpush3.msra.mxu0 %v18_v1  ;;  %196 = vmatprep.mubr.msk.f32.mxu0 %vm211_vm2, %v210_v0  ;;  %v186_v4 = vld [vmem:[%s248_s0 + $0x2] sm:$0x3] }
   0x3   :  { %v13_v5 = vsel %vm12_vm0, %v11_v3, 0.0  ;;  %200 = vmatpush3.msra.mxu1 %v187_v2  ;;  %201 = vmatprep.mubr.msk.f32.mxu1 %vm211_vm2, %v210_v0  ;;  %v98_v6 = vsel %vm12_vm0, %v186_v4, 0.0 }
   0x4   :  { %197 = vmatmul.mubr.msk.f32.vlgmr.msra.gmra.mrb[0].mxu0 %vm19_vm1, %v11_v3  ;;  %202 = vmatmul.mubr.msk.f32.vlgmr.msra.gmra.mrb[0].mxu1 %vm19_vm1, %v186_v4 }
   0x5   :  { %14 = vadd.xlane.f32.xlu0 %v13_v5 }
   0x9   :  { %99 = vadd.xlane.f32.xlu0 %v98_v6 }
  0x92   :  { %v15_v7 = vpop.xlane.xlu0 %14 }
  0x93   :  { %v16_v10 = vadd.f32 0.001, %v15_v7 }
  0x96   :  { %v100_v8 = vpop.xlane.xlu0 %99 }
  0x97   :  { %v101_v9 = vadd.f32 0.001, %v100_v8 }
  0x99   :  { %206 = vrcp.f32 %v101_v9 }
  0x9a   :  { %208 = vrcp.f32 %v16_v10 }
  0xa3   :  { %v207_v11 = vpop.eup %206 }
  0xa4   :  { %v209_v12 = vpop.eup %208 }
  0xd7   :  { %v89_v13 = vpop.f32.mrb[0].mxu0  ;;  %v174_v14 = vpop.f32.mrb[0].mxu1 }
  0xd8   :  { %v93_v15 = vmul.f32 %v209_v12, %v89_v13  ;;  %v178_v16 = vmul.f32 %v207_v11, %v174_v14  ;;  %v198_v17 = vpop.f32.mrb[1].mxu0  ;;  %v203_v18 = vpop.f32.mrb[1].mxu1 }
  0xda   :  { %95 = vst.msk [vmem:[%s249_s2] sm:$0x3] %vm94_vm3, %v93_v15  ;;  %189 = vst.msk [vmem:[%s249_s2 + $0x2] sm:$0x3] %vm94_vm3, %v178_v16 }

// kernel: encoder_forward.17
= control target key start
LH: loop header
LB: loop body
LE: loop exit
PB: predicated region body
PF: predicated region fallthrough
CT: control target
= control target key end

     0   :  { %vm101_vm0 = vcmask 1042432   ;;  %vm52_vm1 = vcmask 23552   ;;  %vm252_vm2 = vcmask 64512   ;;  %vm723_vm3 = vcmask 7168   ;;  %s1313_s1 = inlined_call_operand.vmem [shape: f32[3,8], index: 1, kind: input, shape index: {}]   ;;  %s1314_s0 = inlined_call_operand.vmem [shape: f32[128,3], index: 0, kind: input, shape index: {}]   ;;  %s1315_s2 = inlined_call_operand.vmem [shape: f32[1,8], index: 2, kind: input, shape index: {}]   ;;  %s1316_s5 = inlined_call_operand.vmem [shape: f32[8,1], index: 5, kind: input, shape index: {}]   ;;  %s1317_s6 = inlined_call_operand.<no memory space> [shape: f32[1,1], index: 6, kind: input, shape index: {}]   ;;  %s1318_s3 = inlined_call_operand.vmem [shape: f32[1,8], index: 3, kind: input, shape index: {}]   ;;  %s1319_s4 = inlined_call_operand.vmem [shape: f32[1,8], index: 4, kind: input, shape index: {}]   ;;  %s1320_s7 = inlined_call_operand.vmem [shape: f32[128,1], index: 7, kind: output, shape index: {}]  }
   0x1   :  { %v44_v0 = vld [vmem:[%s1313_s1] sm:$0x7]  ;;  %v29_v2 = vld [vmem:[%s1314_s0 + $0x8] sm:$0xff]  ;;  %v30_v3 = vld [vmem:[%s1314_s0 + $0x10] sm:$0xff] }
   0x2   :  { %v28_v1 = vld [vmem:[%s1314_s0] sm:$0xff]  ;;  %815 = vmatprep.subr.msk.mxu0 %vm101_vm0, %v44_v0  ;;  %v31_v4 = vld [vmem:[%s1314_s0 + $0x18] sm:$0xff]  ;;  %v33_v6 = vld [vmem:[%s1314_s0 + $0x28] sm:$0xff] }
   0x3   :  { %817 = vmatprep.mubr.msk.f32.mxu0 %vm52_vm1, %v28_v1  ;;  %816 = vmatpush3.msk.msra.mxu0 %vm101_vm0, %v44_v0  ;;  %v32_v5 = vld [vmem:[%s1314_s0 + $0x20] sm:$0xff]  ;;  %v34_v7 = vld [vmem:[%s1314_s0 + $0x30] sm:$0xff]  ;;  %v35_v8 = vld [vmem:[%s1314_s0 + $0x38] sm:$0xff] }
   0x4   :  { %818 = vmatmul.mubr.msk.f32.vlgmr.msra.gmra.mrb[0].mxu0 %vm52_vm1, %v29_v2  ;;  %v36_v9 = vld [vmem:[%s1314_s0 + $0x40] sm:$0xff]  ;;  %v37_v10 = vld [vmem:[%s1314_s0 + $0x48] sm:$0xff]  ;;  %v38_v11 = vld [vmem:[%s1314_s0 + $0x50] sm:$0xff] }
   0x5   :  { %820 = vmatprep.mubr.msk.f32.mxu0 %vm52_vm1, %v30_v3  ;;  %v39_v12 = vld [vmem:[%s1314_s0 + $0x58] sm:$0xff]  ;;  %v40_v13 = vld [vmem:[%s1314_s0 + $0x60] sm:$0xff]  ;;  %v41_v14 = vld [vmem:[%s1314_s0 + $0x68] sm:$0xff] }
   0x6   :  { %v42_v15 = vld [vmem:[%s1314_s0 + $0x70] sm:$0xff]  ;;  %v43_v16 = vld [vmem:[%s1314_s0 + $0x78] sm:$0xff]  ;;  %v744_v17 = vld [vmem:[%s1315_s2] ss:$0 sm:$0xff] }
   0x8   :  { %821 = vmatmul.mubr.msk.f32.gmra.mrb[2].mxu0 %vm52_vm1, %v31_v4 }
   0x9   :  { %823 = vmatprep.mubr.msk.f32.mxu0 %vm52_vm1, %v32_v5 }
   0xc   :  { %824 = vmatmul.mubr.msk.f32.gmra.mrb[4].mxu0 %vm52_vm1, %v33_v6 }
   0xd   :  { %826 = vmatprep.mubr.msk.f32.mxu0 %vm52_vm1, %v34_v7 }
  0x10   :  { %827 = vmatmul.mubr.msk.f32.gmra.mrb[6].mxu0 %vm52_vm1, %v35_v8 }
  0x11   :  { %829 = vmatprep.mubr.msk.f32.mxu0 %vm52_vm1, %v36_v9 }
  0x14   :  { %830 = vmatmul.mubr.msk.f32.gmra.mrb[8].mxu0 %vm52_vm1, %v37_v10 }
  0x15   :  { %832 = vmatprep.mubr.msk.f32.mxu0 %vm52_vm1, %v38_v11 }
  0x18   :  { %833 = vmatmul.mubr.msk.f32.gmra.mrb[10].mxu0 %vm52_vm1, %v39_v12 }
  0x19   :  { %835 = vmatprep.mubr.msk.f32.mxu0 %vm52_vm1, %v40_v13 }
  0x1c   :  { %836 = vmatmul.mubr.msk.f32.gmra.mrb[12].mxu0 %vm52_vm1, %v41_v14 }
  0x1d   :  { %838 = vmatprep.mubr.msk.f32.mxu0 %vm52_vm1, %v42_v15 }
  0x20   :  { %839 = vmatmul.mubr.msk.f32.gmra.mrb[14].mxu0 %vm52_vm1, %v43_v16 }
  0xd7   :  { %v819_v18 = vpop.f32.mrb[0].mxu0 }
  0xd8   :  { %v171_v19 = vpop.f32.mrb[1].mxu0  ;;  %v1011_v21 = vadd.f32 %v819_v18, %v744_v17 }
  0xd9   :  { %v1009_v20 = vadd.f32 %v744_v17, %v171_v19 }
  0xda   :  { %v256_v29 = vsel %vm252_vm2, %v1011_v21, 0.0 }
  0xdb   :  { %v822_v22 = vpop.f32.mrb[2].mxu0  ;;  %v253_v23 = vsel %vm252_vm2, %v1009_v20, 0.0 }
  0xdc   :  { %v181_v24 = vpop.f32.mrb[3].mxu0  ;;  %254 = vadd.xlane.f32.xlu0 %v253_v23  ;;  %v1017_v26 = vadd.f32 %v822_v22, %v744_v17 }
  0xdd   :  { %v1015_v25 = vadd.f32 %v744_v17, %v181_v24 }
  0xde   :  { %v262_v34 = vsel %vm252_vm2, %v1017_v26, 0.0 }
  0xdf   :  { %v825_v27 = vpop.f32.mrb[4].mxu0  ;;  %v259_v28 = vsel %vm252_vm2, %v1015_v25, 0.0 }
  0xe0   :  { %v191_v30 = vpop.f32.mrb[5].mxu0  ;;  %260 = vadd.xlane.f32.xlu1 %v259_v28  ;;  %257 = vadd.xlane.f32.xlu0 %v256_v29  ;;  %v1025_v32 = vadd.f32 %v825_v27, %v744_v17 }
  0xe1   :  { %v1023_v31 = vadd.f32 %v744_v17, %v191_v30 }
  0xe2   :  { %v268_v40 = vsel %vm252_vm2, %v1025_v32, 0.0 }
  0xe3   :  { %v828_v33 = vpop.f32.mrb[6].mxu0  ;;  %v265_v35 = vsel %vm252_vm2, %v1023_v31, 0.0 }
  0xe4   :  { %v201_v36 = vpop.f32.mrb[7].mxu0  ;;  %263 = vadd.xlane.f32.xlu1 %v262_v34  ;;  %266 = vadd.xlane.f32.xlu0 %v265_v35  ;;  %v1033_v38 = vadd.f32 %v828_v33, %v744_v17 }
  0xe5   :  { %v1031_v37 = vadd.f32 %v744_v17, %v201_v36 }
  0xe6   :  { %v274_v46 = vsel %vm252_vm2, %v1033_v38, 0.0 }
  0xe7   :  { %v831_v39 = vpop.f32.mrb[8].mxu0  ;;  %v271_v41 = vsel %vm252_vm2, %v1031_v37, 0.0 }
  0xe8   :  { %v211_v42 = vpop.f32.mrb[9].mxu0  ;;  %269 = vadd.xlane.f32.xlu1 %v268_v40  ;;  %272 = vadd.xlane.f32.xlu0 %v271_v41  ;;  %v1041_v44 = vadd.f32 %v831_v39, %v744_v17 }
  0xe9   :  { %v1039_v43 = vadd.f32 %v744_v17, %v211_v42 }
  0xea   :  { %v280_v52 = vsel %vm252_vm2, %v1041_v44, 0.0 }
  0xeb   :  { %v834_v45 = vpop.f32.mrb[10].mxu0  ;;  %v277_v47 = vsel %vm252_vm2, %v1039_v43, 0.0 }
  0xec   :  { %v221_v48 = vpop.f32.mrb[11].mxu0  ;;  %275 = vadd.xlane.f32.xlu1 %v274_v46  ;;  %278 = vadd.xlane.f32.xlu0 %v277_v47  ;;  %v1049_v50 = vadd.f32 %v834_v45, %v744_v17 }
  0xed   :  { %v1047_v49 = vadd.f32 %v744_v17, %v221_v48 }
  0xee   :  { %v286_v58 = vsel %vm252_vm2, %v1049_v50, 0.0 }
  0xef   :  { %v837_v51 = vpop.f32.mrb[12].mxu0  ;;  %v283_v53 = vsel %vm252_vm2, %v1047_v49, 0.0 }
  0xf0   :  { %v231_v54 = vpop.f32.mrb[13].mxu0  ;;  %281 = vadd.xlane.f32.xlu1 %v280_v52  ;;  %284 = vadd.xlane.f32.xlu0 %v283_v53  ;;  %v1057_v56 = vadd.f32 %v837_v51, %v744_v17 }
  0xf1   :  { %v1055_v55 = vadd.f32 %v744_v17, %v231_v54 }
  0xf2   :  { %v292_v63 = vsel %vm252_vm2, %v1057_v56, 0.0 }
  0xf3   :  { %v840_v57 = vpop.f32.mrb[14].mxu0  ;;  %v289_v59 = vsel %vm252_vm2, %v1055_v55, 0.0 }
  0xf4   :  { %v241_v60 = vpop.f32.mrb[15].mxu0  ;;  %287 = vadd.xlane.f32.xlu1 %v286_v58  ;;  %290 = vadd.xlane.f32.xlu0 %v289_v59  ;;  %v1065_v62 = vadd.f32 %v840_v57, %v744_v17 }
  0xf5   :  { %v1063_v61 = vadd.f32 %v744_v17, %v241_v60 }
  0xf6   :  { %v298_v1 = vsel %vm252_vm2, %v1065_v62, 0.0 }
  0xf7   :  { %v295_v0 = vsel %vm252_vm2, %v1063_v61, 0.0 }
  0xf8   :  { %293 = vadd.xlane.f32.xlu1 %v292_v63  ;;  %296 = vadd.xlane.f32.xlu0 %v295_v0 }
  0xfc   :  { %299 = vadd.xlane.f32.xlu1 %v298_v1 }
 0x169   :  { %v255_v2 = vpop.xlane.xlu0 %254 }
 0x16a   :  { %v302_v3 = vmul.f32 0.125, %v255_v2 }
 0x16c   :  { %v1074_v4 = vsub.f32 %v1009_v20, %v302_v3 }
 0x16d   :  { %v261_v5 = vpop.xlane.xlu1 %260  ;;  %v258_v6 = vpop.xlane.xlu0 %257 }
 0x16e   :  { %v304_v7 = vmul.f32 0.125, %v261_v5  ;;  %v303_v8 = vmul.f32 0.125, %v258_v6  ;;  %v334_v9 = vmul.f32 %v1074_v4, %v1074_v4 }
 0x170   :  { %v1079_v10 = vsub.f32 %v1015_v25, %v304_v7  ;;  %v1082_v11 = vsub.f32 %v1011_v21, %v303_v8  ;;  %v350_v12 = vsel %vm252_vm2, %v334_v9, 0.0 }
 0x171   :  { %v264_v13 = vpop.xlane.xlu1 %263  ;;  %351 = vadd.xlane.f32.xlu0 %v350_v12  ;;  %v267_v14 = vpop.xlane.xlu0 %266 }
 0x172   :  { %v305_v15 = vmul.f32 0.125, %v264_v13  ;;  %v306_v16 = vmul.f32 0.125, %v267_v14  ;;  %v336_v17 = vmul.f32 %v1079_v10, %v1079_v10  ;;  %v335_v18 = vmul.f32 %v1082_v11, %v1082_v11 }
 0x174   :  { %v1090_v19 = vsub.f32 %v1017_v26, %v305_v15  ;;  %v1093_v20 = vsub.f32 %v1023_v31, %v306_v16  ;;  %v356_v21 = vsel %vm252_vm2, %v336_v17, 0.0  ;;  %v353_v22 = vsel %vm252_vm2, %v335_v18, 0.0 }
 0x175   :  { %v270_v23 = vpop.xlane.xlu1 %269  ;;  %357 = vadd.xlane.f32.xlu0 %v356_v21  ;;  %354 = vadd.xlane.f32.xlu1 %v353_v22  ;;  %v273_v24 = vpop.xlane.xlu0 %272 }
 0x176   :  { %v307_v25 = vmul.f32 0.125, %v270_v23  ;;  %v308_v27 = vmul.f32 0.125, %v273_v24  ;;  %v337_v28 = vmul.f32 %v1090_v19, %v1090_v19  ;;  %v338_v26 = vmul.f32 %v1093_v20, %v1093_v20  ;;  %v522_v24 = vld [vmem:[%s1316_s5] sm:$0xff] }
 0x177   :  { %841 = vmatprep.subr.mxu1 %v522_v24 }
 0x178   :  { %v1102_v29 = vsub.f32 %v1025_v32, %v307_v25  ;;  %v1105_v30 = vsub.f32 %v1031_v37, %v308_v27  ;;  %v359_v31 = vsel %vm252_vm2, %v337_v28, 0.0  ;;  %v362_v33 = vsel %vm252_vm2, %v338_v26, 0.0  ;;  %842 = vmatpush3.msra.mxu1 %v522_v24 }
 0x179   :  { %v276_v34 = vpop.xlane.xlu1 %275  ;;  %360 = vadd.xlane.f32.xlu1 %v359_v31  ;;  %363 = vadd.xlane.f32.xlu0 %v362_v33  ;;  %v279_v35 = vpop.xlane.xlu0 %278 }
 0x17a   :  { %v309_v36 = vmul.f32 0.125, %v276_v34  ;;  %v310_v39 = vmul.f32 0.125, %v279_v35  ;;  %v339_v40 = vmul.f32 %v1102_v29, %v1102_v29  ;;  %v340_v32 = vmul.f32 %v1105_v30, %v1105_v30 }
 0x17c   :  { %v1114_v41 = vsub.f32 %v1033_v38, %v309_v36  ;;  %v1117_v37 = vsub.f32 %v1039_v43, %v310_v39  ;;  %v365_v42 = vsel %vm252_vm2, %v339_v40, 0.0  ;;  %v368_v45 = vsel %vm252_vm2, %v340_v32, 0.0 }
 0x17d   :  { %v282_v46 = vpop.xlane.xlu1 %281  ;;  %366 = vadd.xlane.f32.xlu1 %v365_v42  ;;  %369 = vadd.xlane.f32.xlu0 %v368_v45  ;;  %v285_v47 = vpop.xlane.xlu0 %284 }
 0x17e   :  { %v311_v48 = vmul.f32 0.125, %v282_v46  ;;  %v312_v51 = vmul.f32 0.125, %v285_v47  ;;  %v341_v52 = vmul.f32 %v1114_v41, %v1114_v41  ;;  %v342_v38 = vmul.f32 %v1117_v37, %v1117_v37 }
 0x180   :  { %v1126_v53 = vsub.f32 %v1041_v44, %v311_v48  ;;  %v1129_v43 = vsub.f32 %v1047_v49, %v312_v51  ;;  %v371_v54 = vsel %vm252_vm2, %v341_v52, 0.0  ;;  %v374_v57 = vsel %vm252_vm2, %v342_v38, 0.0 }
 0x181   :  { %v288_v58 = vpop.xlane.xlu1 %287  ;;  %372 = vadd.xlane.f32.xlu1 %v371_v54  ;;  %375 = vadd.xlane.f32.xlu0 %v374_v57  ;;  %v291_v59 = vpop.xlane.xlu0 %290 }
 0x182   :  { %v313_v60 = vmul.f32 0.125, %v288_v58  ;;  %v314_v63 = vmul.f32 0.125, %v291_v59  ;;  %v343_v0 = vmul.f32 %v1126_v53, %v1126_v53  ;;  %v344_v44 = vmul.f32 %v1129_v43, %v1129_v43  ;;  %v1178_v58 = vld [vmem:[%s1318_s3] ss:$0 sm:$0xff] }
 0x184   :  { %v1138_v1 = vsub.f32 %v1049_v50, %v313_v60  ;;  %v1141_v49 = vsub.f32 %v1055_v55, %v314_v63  ;;  %v377_v2 = vsel %vm252_vm2, %v343_v0, 0.0  ;;  %v380_v3 = vsel %vm252_vm2, %v344_v44, 0.0 }
 0x185   :  { %v294_v5 = vpop.xlane.xlu1 %293  ;;  %378 = vadd.xlane.f32.xlu1 %v377_v2  ;;  %381 = vadd.xlane.f32.xlu0 %v380_v3  ;;  %v297_v6 = vpop.xlane.xlu0 %296  ;;  %v1184_v2 = vld [vmem:[%s1319_s4] ss:$0 sm:$0xff] }
 0x186   :  { %v315_v7 = vmul.f32 0.125, %v294_v5  ;;  %v316_v8 = vmul.f32 0.125, %v297_v6  ;;  %v345_v9 = vmul.f32 %v1138_v1, %v1138_v1  ;;  %v346_v50 = vmul.f32 %v1141_v49, %v1141_v49 }
 0x188   :  { %v1150_v12 = vsub.f32 %v1057_v56, %v315_v7  ;;  %v1153_v55 = vsub.f32 %v1063_v61, %v316_v8  ;;  %v383_v13 = vsel %vm252_vm2, %v345_v9, 0.0  ;;  %v386_v14 = vsel %vm252_vm2, %v346_v50, 0.0 }
 0x189   :  { %v300_v15 = vpop.xlane.xlu1 %299  ;;  %384 = vadd.xlane.f32.xlu1 %v383_v13  ;;  %387 = vadd.xlane.f32.xlu0 %v386_v14 }
 0x18a   :  { %v317_v16 = vmul.f32 0.125, %v300_v15  ;;  %v347_v17 = vmul.f32 %v1150_v12, %v1150_v12  ;;  %v348_v18 = vmul.f32 %v1153_v55, %v1153_v55 }
 0x18c   :  { %v1162_v56 = vsub.f32 %v1065_v62, %v317_v16  ;;  %v389_v61 = vsel %vm252_vm2, %v347_v17, 0.0  ;;  %v392_v21 = vsel %vm252_vm2, %v348_v18, 0.0  ;;  %v12_v62 = vstv %s1317_s6 }
 0x18d   :  { %390 = vadd.xlane.f32.xlu1 %v389_v61  ;;  %393 = vadd.xlane.f32.xlu0 %v392_v21  ;;  %13 = vst [vmem:[#allocation2] sm:$0x1] %v12_v62 }
 0x18e   :  { %v349_v22 = vmul.f32 %v1162_v56, %v1162_v56 }
 0x190   :  { %v395_v23 = vsel %vm252_vm2, %v349_v22, 0.0 }
 0x191   :  { %396 = vadd.xlane.f32.xlu1 %v395_v23 }
 0x1fe   :  { %v352_v25 = vpop.xlane.xlu0 %351 }
 0x1ff   :  { %v398_v27 = vmul.f32 0.125, %v352_v25 }
 0x201   :  { %v414_v28 = vadd.f32 1e-05, %v398_v27 }
 0x202   :  { %v355_v26 = vpop.xlane.xlu1 %354  ;;  %v358_v31 = vpop.xlane.xlu0 %357 }
 0x203   :  { %867 = vrsqrt.f32 %v414_v28  ;;  %v399_v33 = vmul.f32 0.125, %v355_v26  ;;  %v400_v34 = vmul.f32 0.125, %v358_v31 }
 0x205   :  { %v415_v35 = vadd.f32 1e-05, %v399_v33  ;;  %v416_v36 = vadd.f32 1e-05, %v400_v34 }
 0x206   :  { %v361_v39 = vpop.xlane.xlu1 %360  ;;  %v364_v40 = vpop.xlane.xlu0 %363 }
 0x207   :  { %869 = vrsqrt.f32 %v415_v35  ;;  %v401_v32 = vmul.f32 0.125, %v361_v39  ;;  %v402_v42 = vmul.f32 0.125, %v364_v40 }
 0x208   :  { %871 = vrsqrt.f32 %v416_v36 }
 0x209   :  { %v417_v45 = vadd.f32 1e-05, %v401_v32  ;;  %v418_v46 = vadd.f32 1e-05, %v402_v42 }
 0x20a   :  { %v367_v47 = vpop.xlane.xlu1 %366  ;;  %v370_v48 = vpop.xlane.xlu0 %369 }
 0x20b   :  { %873 = vrsqrt.f32 %v417_v45  ;;  %v403_v51 = vmul.f32 0.125, %v367_v47  ;;  %v404_v52 = vmul.f32 0.125, %v370_v48 }
 0x20c   :  { %875 = vrsqrt.f32 %v418_v46 }
 0x20d   :  { %v868_v38 = vpop.eup %867  ;;  %v419_v54 = vadd.f32 1e-05, %v403_v51  ;;  %v420_v57 = vadd.f32 1e-05, %v404_v52 }
 0x20e   :  { %v373_v59 = vpop.xlane.xlu1 %372  ;;  %v376_v60 = vpop.xlane.xlu0 %375  ;;  %v446_v63 = vmul.f32 %v868_v38, %v1074_v4 }
 0x20f   :  { %877 = vrsqrt.f32 %v419_v54  ;;  %v405_v0 = vmul.f32 0.125, %v373_v59  ;;  %v406_v44 = vmul.f32 0.125, %v376_v60 }
 0x210   :  { %879 = vrsqrt.f32 %v420_v57  ;;  %v468_v3 = vmul.f32 %v1178_v58, %v446_v63 }
 0x211   :  { %v870_v5 = vpop.eup %869  ;;  %v421_v6 = vadd.f32 1e-05, %v405_v0  ;;  %v422_v7 = vadd.f32 1e-05, %v406_v44 }
 0x212   :  { %v872_v8 = vpop.eup %871  ;;  %v379_v9 = vpop.xlane.xlu1 %378  ;;  %v490_v13 = vadd.f32 %v1184_v2, %v468_v3  ;;  %v447_v4 = vmul.f32 %v870_v5, %v1082_v11 }
 0x213   :  { %v382_v50 = vpop.xlane.xlu0 %381  ;;  %881 = vrsqrt.f32 %v421_v6  ;;  %v407_v14 = vmul.f32 0.125, %v379_v9  ;;  %v448_v16 = vmul.f32 %v872_v8, %v1079_v10 }
 0x214   :  { %v408_v15 = vmul.f32 0.125, %v382_v50  ;;  %883 = vrsqrt.f32 %v422_v7  ;;  %v506_v17 = vmax.f32 %v490_v13, 0.0  ;;  %v469_v18 = vmul.f32 %v1178_v58, %v447_v4 }
 0x215   :  { %v874_v61 = vpop.eup %873  ;;  %v423_v21 = vadd.f32 1e-05, %v407_v14  ;;  %v470_v23 = vmul.f32 %v1178_v58, %v448_v16 }
 0x216   :  { %v424_v22 = vadd.f32 1e-05, %v408_v15  ;;  %v876_v24 = vpop.eup %875  ;;  %v385_v62 = vpop.xlane.xlu1 %384  ;;  %843 = vmatprep.mubr.msk.f32.mxu1 %vm252_vm2, %v506_v17  ;;  %v491_v11 = vadd.f32 %v1184_v2, %v469_v18  ;;  %v449_v27 = vmul.f32 %v874_v61, %v1090_v19 }
 0x217   :  { %v388_v25 = vpop.xlane.xlu0 %387  ;;  %885 = vrsqrt.f32 %v423_v21  ;;  %v409_v10 = vmul.f32 0.125, %v385_v62  ;;  %v492_v26 = vadd.f32 %v1184_v2, %v470_v23  ;;  %v450_v34 = vmul.f32 %v876_v24, %v1093_v20 }
 0x218   :  { %v410_v28 = vmul.f32 0.125, %v388_v25  ;;  %887 = vrsqrt.f32 %v424_v22  ;;  %v507_v31 = vmax.f32 %v491_v11, 0.0  ;;  %v471_v33 = vmul.f32 %v1178_v58, %v449_v27 }
 0x219   :  { %v878_v35 = vpop.eup %877  ;;  %v425_v36 = vadd.f32 1e-05, %v409_v10  ;;  %v508_v40 = vmax.f32 %v492_v26, 0.0  ;;  %v472_v46 = vmul.f32 %v1178_v58, %v450_v34 }
 0x21a   :  { %v426_v39 = vadd.f32 1e-05, %v410_v28  ;;  %v880_v32 = vpop.eup %879  ;;  %v391_v42 = vpop.xlane.xlu1 %390  ;;  %844 = vmatmul.mubr.msk.f32.vlgmr.msra.gmra.mrb[0].mxu1 %vm252_vm2, %v507_v31  ;;  %v493_v45 = vadd.f32 %v1184_v2, %v471_v33  ;;  %v451_v47 = vmul.f32 %v878_v35, %v1102_v29 }
 0x21b   :  { %v394_v19 = vpop.xlane.xlu0 %393  ;;  %889 = vrsqrt.f32 %v425_v36  ;;  %v411_v48 = vmul.f32 0.125, %v391_v42  ;;  %846 = vmatprep.mubr.msk.f32.mxu1 %vm252_vm2, %v508_v40  ;;  %v452_v20 = vmul.f32 %v880_v32, %v1105_v30  ;;  %v494_v38 = vadd.f32 %v1184_v2, %v472_v46 }
 0x21c   :  { %v412_v51 = vmul.f32 0.125, %v394_v19  ;;  %891 = vrsqrt.f32 %v426_v39  ;;  %v509_v52 = vmax.f32 %v493_v45, 0.0  ;;  %v473_v54 = vmul.f32 %v1178_v58, %v451_v47 }
 0x21d   :  { %v882_v57 = vpop.eup %881  ;;  %v427_v59 = vadd.f32 1e-05, %v411_v48  ;;  %v474_v63 = vmul.f32 %v1178_v58, %v452_v20  ;;  %v510_v44 = vmax.f32 %v494_v38, 0.0 }
 0x21e   :  { %v428_v60 = vadd.f32 1e-05, %v412_v51  ;;  %v884_v0 = vpop.eup %883  ;;  %v397_v29 = vpop.xlane.xlu1 %396  ;;  %847 = vmatmul.mubr.msk.f32.gmra.mrb[2].mxu1 %vm252_vm2, %v509_v52  ;;  %v495_v3 = vadd.f32 %v1184_v2, %v473_v54  ;;  %v453_v30 = vmul.f32 %v882_v57, %v1114_v41 }
 0x21f   :  { %893 = vrsqrt.f32 %v427_v59  ;;  %v413_v5 = vmul.f32 0.125, %v397_v29  ;;  %v496_v6 = vadd.f32 %v1184_v2, %v474_v63  ;;  %v454_v7 = vmul.f32 %v884_v0, %v1117_v37  ;;  %849 = vmatprep.mubr.msk.f32.mxu1 %vm252_vm2, %v510_v44 }
 0x220   :  { %895 = vrsqrt.f32 %v428_v60  ;;  %v511_v8 = vmax.f32 %v495_v3, 0.0  ;;  %v475_v9 = vmul.f32 %v1178_v58, %v453_v30 }
 0x221   :  { %v886_v50 = vpop.eup %885  ;;  %v429_v13 = vadd.f32 1e-05, %v413_v5  ;;  %v512_v4 = vmax.f32 %v496_v6, 0.0  ;;  %v476_v14 = vmul.f32 %v1178_v58, %v454_v7 }
 0x222   :  { %v888_v15 = vpop.eup %887  ;;  %850 = vmatmul.mubr.msk.f32.gmra.mrb[4].mxu1 %vm252_vm2, %v511_v8  ;;  %v497_v41 = vadd.f32 %v1184_v2, %v475_v9  ;;  %v455_v16 = vmul.f32 %v886_v50, %v1126_v53 }
 0x223   :  { %897 = vrsqrt.f32 %v429_v13  ;;  %852 = vmatprep.mubr.msk.f32.mxu1 %vm252_vm2, %v512_v4  ;;  %v498_v37 = vadd.f32 %v1184_v2, %v476_v14  ;;  %v456_v17 = vmul.f32 %v888_v15, %v1129_v43 }
 0x224   :  { %v513_v18 = vmax.f32 %v497_v41, 0.0  ;;  %v477_v61 = vmul.f32 %v1178_v58, %v455_v16 }
 0x225   :  { %v890_v21 = vpop.eup %889  ;;  %v514_v22 = vmax.f32 %v498_v37, 0.0  ;;  %v478_v23 = vmul.f32 %v1178_v58, %v456_v17 }
 0x226   :  { %v892_v24 = vpop.eup %891  ;;  %853 = vmatmul.mubr.msk.f32.gmra.mrb[6].mxu1 %vm252_vm2, %v513_v18  ;;  %v499_v62 = vadd.f32 %v1184_v2, %v477_v61  ;;  %v457_v53 = vmul.f32 %v890_v21, %v1138_v1 }
 0x227   :  { %855 = vmatprep.mubr.msk.f32.mxu1 %vm252_vm2, %v514_v22  ;;  %v500_v25 = vadd.f32 %v1184_v2, %v478_v23  ;;  %v458_v43 = vmul.f32 %v892_v24, %v1141_v49 }
 0x228   :  { %v515_v11 = vmax.f32 %v499_v62, 0.0  ;;  %v479_v27 = vmul.f32 %v1178_v58, %v457_v53 }
 0x229   :  { %v894_v10 = vpop.eup %893  ;;  %v516_v28 = vmax.f32 %v500_v25, 0.0  ;;  %v480_v26 = vmul.f32 %v1178_v58, %v458_v43 }
 0x22a   :  { %v896_v31 = vpop.eup %895  ;;  %856 = vmatmul.mubr.msk.f32.gmra.mrb[8].mxu1 %vm252_vm2, %v515_v11  ;;  %v501_v33 = vadd.f32 %v1184_v2, %v479_v27  ;;  %v459_v1 = vmul.f32 %v894_v10, %v1150_v12 }
 0x22b   :  { %v460_v34 = vmul.f32 %v896_v31, %v1153_v55  ;;  %858 = vmatprep.mubr.msk.f32.mxu1 %vm252_vm2, %v516_v28  ;;  %v502_v49 = vadd.f32 %v1184_v2, %v480_v26 }
 0x22c   :  { %v517_v35 = vmax.f32 %v501_v33, 0.0  ;;  %v481_v36 = vmul.f32 %v1178_v58, %v459_v1 }
 0x22d   :  { %v898_v39 = vpop.eup %897  ;;  %v518_v40 = vmax.f32 %v502_v49, 0.0  ;;  %v482_v32 = vmul.f32 %v1178_v58, %v460_v34 }
 0x22e   :  { %v461_v42 = vmul.f32 %v898_v39, %v1162_v56  ;;  %859 = vmatmul.mubr.msk.f32.gmra.mrb[10].mxu1 %vm252_vm2, %v517_v35  ;;  %v503_v19 = vadd.f32 %v1184_v2, %v481_v36  ;;  %v764_v56 = vld [vmem:[#allocation2] ss:$0 sm:$0xff] }
 0x22f   :  { %861 = vmatprep.mubr.msk.f32.mxu1 %vm252_vm2, %v518_v40  ;;  %v504_v12 = vadd.f32 %v1184_v2, %v482_v32 }
 0x230   :  { %v519_v55 = vmax.f32 %v503_v19, 0.0  ;;  %v483_v45 = vmul.f32 %v1178_v58, %v461_v42 }
 0x231   :  { %v520_v46 = vmax.f32 %v504_v12, 0.0 }
 0x232   :  { %862 = vmatmul.mubr.msk.f32.gmra.mrb[12].mxu1 %vm252_vm2, %v519_v55  ;;  %v505_v47 = vadd.f32 %v1184_v2, %v483_v45 }
 0x233   :  { %864 = vmatprep.mubr.msk.f32.mxu1 %vm252_vm2, %v520_v46 }
 0x234   :  { %v521_v48 = vmax.f32 %v505_v47, 0.0 }
 0x236   :  { %865 = vmatmul.mubr.msk.f32.gmra.mrb[14].mxu1 %vm252_vm2, %v521_v48 }
 0x2ed   :  { %v845_v51 = vpop.f32.mrb[0].mxu1 }
 0x2ee   :  { %v650_v20 = vadd.f32 %v845_v51, %v764_v56  ;;  %v644_v52 = vpop.f32.mrb[1].mxu1 }
 0x2ef   :  { %v645_v38 = vadd.f32 %v764_v56, %v644_v52 }
 0x2f0   :  { %725 = vst.msk [vmem:[%s1320_s7 + $0x8] sm:$0xff] %vm723_vm3, %v650_v20 }
 0x2f1   :  { %724 = vst.msk [vmem:[%s1320_s7] sm:$0xff] %vm723_vm3, %v645_v38  ;;  %v848_v58 = vpop.f32.mrb[2].mxu1 }
 0x2f2   :  { %v660_v2 = vadd.f32 %v848_v58, %v764_v56  ;;  %v654_v54 = vpop.f32.mrb[3].mxu1 }
 0x2f3   :  { %v655_v57 = vadd.f32 %v764_v56, %v654_v54 }
 0x2f4   :  { %727 = vst.msk [vmem:[%s1320_s7 + $0x18] sm:$0xff] %vm723_vm3, %v660_v2 }
 0x2f5   :  { %726 = vst.msk [vmem:[%s1320_s7 + $0x10] sm:$0xff] %vm723_vm3, %v655_v57  ;;  %v851_v59 = vpop.f32.mrb[4].mxu1 }
 0x2f6   :  { %v670_v60 = vadd.f32 %v851_v59, %v764_v56  ;;  %v664_v63 = vpop.f32.mrb[5].mxu1 }
 0x2f7   :  { %v665_v0 = vadd.f32 %v764_v56, %v664_v63 }
 0x2f8   :  { %729 = vst.msk [vmem:[%s1320_s7 + $0x28] sm:$0xff] %vm723_vm3, %v670_v60 }
 0x2f9   :  { %728 = vst.msk [vmem:[%s1320_s7 + $0x20] sm:$0xff] %vm723_vm3, %v665_v0  ;;  %v854_v29 = vpop.f32.mrb[6].mxu1 }
 0x2fa   :  { %v680_v44 = vadd.f32 %v854_v29, %v764_v56  ;;  %v674_v3 = vpop.f32.mrb[7].mxu1 }
 0x2fb   :  { %v675_v30 = vadd.f32 %v764_v56, %v674_v3 }
 0x2fc   :  { %731 = vst.msk [vmem:[%s1320_s7 + $0x38] sm:$0xff] %vm723_vm3, %v680_v44 }
 0x2fd   :  { %730 = vst.msk [vmem:[%s1320_s7 + $0x30] sm:$0xff] %vm723_vm3, %v675_v30  ;;  %v857_v5 = vpop.f32.mrb[8].mxu1 }
 0x2fe   :  { %v690_v6 = vadd.f32 %v857_v5, %v764_v56  ;;  %v684_v7 = vpop.f32.mrb[9].mxu1 }
 0x2ff   :  { %v685_v8 = vadd.f32 %v764_v56, %v684_v7 }
 0x300   :  { %733 = vst.msk [vmem:[%s1320_s7 + $0x48] sm:$0xff] %vm723_vm3, %v690_v6 }
 0x301   :  { %732 = vst.msk [vmem:[%s1320_s7 + $0x40] sm:$0xff] %vm723_vm3, %v685_v8  ;;  %v860_v9 = vpop.f32.mrb[10].mxu1 }
 0x302   :  { %v700_v50 = vadd.f32 %v860_v9, %v764_v56  ;;  %v694_v13 = vpop.f32.mrb[11].mxu1 }
 0x303   :  { %v695_v4 = vadd.f32 %v764_v56, %v694_v13 }
 0x304   :  { %735 = vst.msk [vmem:[%s1320_s7 + $0x58] sm:$0xff] %vm723_vm3, %v700_v50 }
 0x305   :  { %734 = vst.msk [vmem:[%s1320_s7 + $0x50] sm:$0xff] %vm723_vm3, %v695_v4  ;;  %v863_v14 = vpop.f32.mrb[12].mxu1 }
 0x306   :  { %v710_v15 = vadd.f32 %v863_v14, %v764_v56  ;;  %v704_v41 = vpop.f32.mrb[13].mxu1 }
 0x307   :  { %v705_v16 = vadd.f32 %v764_v56, %v704_v41 }
 0x308   :  { %737 = vst.msk [vmem:[%s1320_s7 + $0x68] sm:$0xff] %vm723_vm3, %v710_v15 }
 0x309   :  { %736 = vst.msk [vmem:[%s1320_s7 + $0x60] sm:$0xff] %vm723_vm3, %v705_v16  ;;  %v866_v37 = vpop.f32.mrb[14].mxu1 }
 0x30a   :  { %v720_v17 = vadd.f32 %v866_v37, %v764_v56  ;;  %v714_v18 = vpop.f32.mrb[15].mxu1 }
 0x30b   :  { %v715_v61 = vadd.f32 %v764_v56, %v714_v18 }
 0x30c   :  { %739 = vst.msk [vmem:[%s1320_s7 + $0x78] sm:$0xff] %vm723_vm3, %v720_v17 }
 0x30d   :  { %738 = vst.msk [vmem:[%s1320_s7 + $0x70] sm:$0xff] %vm723_vm3, %v715_v61 }

// kernel: encoder_forward.18
= control target key start
LH: loop header
LB: loop body
LE: loop exit
PB: predicated region body
PF: predicated region fallthrough
CT: control target
= control target key end

     0   :  { %v1962_v0 = vmov 0.0|0.0   ;;  %vm1963_vm0 = vmmov 0   ;;  %v1964_v6 = vmov 0.0   ;;  %vm113_vm1 = vcmask 130048   ;;  %s2377_s6 = inlined_call_operand.vmem [shape: f32[16,16], index: 6, kind: input, shape index: {}]   ;;  %s2378_s4 = inlined_call_operand.vmem [shape: f32[16,16], index: 4, kind: input, shape index: {}]   ;;  %s2379_s8 = inlined_call_operand.vmem [shape: f32[16,16], index: 8, kind: input, shape index: {}]   ;;  %s2380_s1 = inlined_call_operand.vmem [shape: f32[2,8,16], index: 1, kind: input, shape index: {}, may-alias: {0,1,2}]   ;;  %s2381_s0 = inlined_call_operand.vmem [shape: f32[2,8,16], index: 0, kind: input, shape index: {}, may-alias: {0,1,2}]   ;;  %s2382_s10 = inlined_call_operand.vmem [shape: f32[16,1], index: 10, kind: input, shape index: {}]   ;;  %s2383_s2 = inlined_call_operand.vmem [shape: f32[2,8,16], index: 2, kind: input, shape index: {}, may-alias: {0,1,2}]   ;;  %s2384_s7 = inlined_call_operand.vmem [shape: f32[1,16], index: 7, kind: input, shape index: {}]   ;;  %s2385_s5 = inlined_call_operand.vmem [shape: f32[1,16], index: 5, kind: input, shape index: {}]   ;;  %s2386_s9 = inlined_call_operand.vmem [shape: f32[1,16], index: 9, kind: input, shape index: {}]   ;;  %s2387_s3 = inlined_call_operand.vmem [shape: f32[2,8,8], index: 3, kind: input, shape index: {}]   ;;  %s2388_s12 = inlined_call_operand.vmem [shape: f32[16,16], index: 12, kind: input, shape index: {}]   ;;  %s2389_s11 = inlined_call_operand.vmem [shape: f32[1,16], index: 11, kind: input, shape index: {}]   ;;  %s2390_s13 = inlined_call_operand.vmem [shape: f32[1,16], index: 13, kind: input, shape index: {}]   ;;  %s2391_s16 = inlined_call_operand.vmem [shape: f32[16,16], index: 16, kind: input, shape index: {}]   ;;  %s2392_s14 = inlined_call_operand.vmem [shape: f32[1,16], index: 14, kind: input, shape index: {}]   ;;  %s2393_s15 = inlined_call_operand.vmem [shape: f32[1,16], index: 15, kind: input, shape index: {}]   ;;  %s2394_s17 = inlined_call_operand.vmem [shape: f32[1,16], index: 17, kind: input, shape index: {}]   ;;  %s2395_s20 = inlined_call_operand.vmem [shape: f32[16,16], index: 20, kind: input, shape index: {}]   ;;  %s2396_s18 = inlined_call_operand.vmem [shape: f32[1,16], index: 18, kind: input, shape index: {}]   ;;  %s2397_s19 = inlined_call_operand.vmem [shape: f32[1,16], index: 19, kind: input, shape index: {}]   ;;  %s2398_s21 = inlined_call_operand.vmem [shape: f32[1,16], index: 21, kind: input, shape index: {}]   ;;  %s2399_s22 = inlined_call_operand.vmem [shape: f32[1,16], index: 22, kind: input, shape index: {}]   ;;  %s2400_s23 = inlined_call_operand.vmem [shape: f32[1,16], index: 23, kind: input, shape index: {}]   ;;  %s2401_s24 = inlined_call_operand.vmem [shape: f32[2,8,16], index: 24, kind: output, shape index: {}]  }
   0x1   :  { %2409 = sst [smem:[#allocation2_spill]] %s2377_s6  ;;  %1893 = vmatprep.subr.bf16.mxu1 %v1962_v0  ;;  %1890 = vmatprep.subr.bf16.mxu0 %v1962_v0  ;;  %v2181_v25 = vld [vmem:[%s2386_s9] ss:$0 sm:$0xff]  ;;  %vm495_vm2 = vcmask 64512   ;;  %v1965_v37 = vmov 0   ;;  %v90_v50 = vld [vmem:[%s2388_s12 + $0x8] sm:$0xff] }
   0x2   :  { %2410 = sst [smem:[#allocation3_spill]] %s2378_s4  ;;  %s2418_s27 = sld [smem:[#allocation2_spill]]  ;;  %1783 = vmatprep.mubr.msk.f32.mxu1 %vm1963_vm0, %v1964_v6  ;;  %1776 = vmatprep.mubr.msk.f32.mxu0 %vm1963_vm0, %v1964_v6  ;;  %v422_v32 = vld [vmem:[%s2387_s3] sm:$0xff] }
   0x3   :  { %2411 = sst [smem:[#allocation4_spill]] %s2379_s8  ;;  %1936 = vset.pattern.permute.xlu0 %v1965_v37  ;;  %1937 = vset.pattern.permute.xlu1 %v1965_v37  ;;  %v89_v49 = vld [vmem:[%s2388_s12] sm:$0xff] }
   0x4   :  { %2412 = sst [smem:[#allocation5_spill]] %s2380_s1  ;;  %s2419_s1 = sld [smem:[#allocation3_spill]]  ;;  %v2199_v51 = vpack.c.bf16 %v90_v50, %v89_v49  ;;  %v2206_v57 = vld [vmem:[%s2389_s11] ss:$0 sm:$0xff] }
   0x5   :  { %2413 = sst [smem:[#allocation6_spill]] %s2381_s0  ;;  %s2420_s25 = sld [smem:[#allocation4_spill]]  ;;  %v2215_v63 = vld [vmem:[%s2390_s13] ss:$0 sm:$0xff] }
   0x6   :  { %2414 = sst [smem:[#allocation7_spill]] %s2382_s10  ;;  %s2421_s10 = sld [smem:[#allocation5_spill]]  ;;  %v2285_v49 = vld [vmem:[%s2397_s19] ss:$0 sm:$0xff] }
   0x7   :  { %2415 = sst [smem:[#allocation8_spill]] %s2383_s2  ;;  %s2422_s8 = sld [smem:[#allocation6_spill]] }
   0x8   :  { %2416 = sst [smem:[#allocation9_spill]] %s2384_s7  ;;  %v80_v1 = vld [vmem:[%s2418_s27] sm:$0xff]  ;;  %v81_v2 = vld [vmem:[%s2418_s27 + $0x8] sm:$0xff]  ;;  %s2423_s7 = sld [smem:[#allocation7_spill]] }
   0x9   :  { %2417 = sst [smem:[#allocation10_spill]] %s2385_s5  ;;  %v2102_v4 = vpack.c.bf16 %v81_v2, %v80_v1  ;;  %s2424_s0 = sld [smem:[#allocation8_spill]] }
   0xa   :  { %v77_v3 = vld [vmem:[%s2419_s1] sm:$0xff]  ;;  %v78_v5 = vld [vmem:[%s2419_s1 + $0x8] sm:$0xff]  ;;  %s2425_s27 = sld [smem:[#allocation9_spill]]  ;;  %s2426_s29 = sld [smem:[#allocation10_spill]] }
   0xb   :  { %v2111_v7 = vpack.c.bf16 %v78_v5, %v77_v3  ;;  %v83_v8 = vld [vmem:[%s2420_s25] sm:$0xff]  ;;  %1895 = vmatpush3.bf16.msra.mxu1 %v2102_v4  ;;  %v84_v10 = vld [vmem:[%s2420_s25 + $0x8] sm:$0xff] }
   0xc   :  { %v105_v9 = vld [vmem:[%s2421_s10] sm:$0xff]  ;;  %v2127_v12 = vpack.c.bf16 %v84_v10, %v83_v8  ;;  %1793 = vmatprep.subr.mxu1 %v1964_v6 }
   0xd   :  { %1892 = vmatpush3.bf16.msra.mxu0 %v2111_v7  ;;  %v104_v11 = vld [vmem:[%s2422_s8] sm:$0xff] }
   0xe   :  { %1896 = vmatprep.subr.bf16.mxu0 %v1962_v0  ;;  %1784 = vmatmul.mubr.msk.f32.vlgmr.msra.gmra.mrb[0].mxu1 %vm113_vm1, %v105_v9  ;;  %v86_v13 = vld [vmem:[%s2423_s7] sm:$0xff]  ;;  %v87_v14 = vld [vmem:[%s2423_s7 + $0x8] sm:$0xff] }
   0xf   :  { %1795 = vmatprep.mubr.msk.f32.mxu1 %vm1963_vm0, %v1964_v6  ;;  %v2148_v15 = vld [vmem:[%s2424_s0] sm:$0xff]  ;;  %v2150_v16 = vpack.c.bf16 %v87_v14, %v86_v13 }
  0x10   :  { %1777 = vmatmul.mubr.msk.f32.vlgmr.msra.gmra.mrb[0].mxu0 %vm113_vm1, %v104_v11  ;;  %v2161_v17 = vld [vmem:[%s2425_s27] ss:$0 sm:$0xff] }
  0x11   :  { %1898 = vmatpush3.bf16.msra.mxu0 %v2127_v12  ;;  %1790 = vmatprep.mubr.msk.f32.mxu0 %vm1963_vm0, %v1964_v6  ;;  %v2166_v18 = vld [vmem:[%s2426_s29] ss:$0 sm:$0xff] }
  0x12   :  { %1899 = vmatprep.subr.bf16.mxu0 %v1962_v0 }
  0x14   :  { %1791 = vmatmul.mubr.msk.f32.vlgmr.msra.gmra.mrb[2].mxu0 %vm113_vm1, %v2148_v15 }
  0x15   :  { %1901 = vmatpush3.bf16.msra.mxu0 %v2150_v16  ;;  %1802 = vmatprep.mubr.msk.f32.mxu0 %vm1963_vm0, %v1964_v6 }
  0x16   :  { %1902 = vmatprep.subr.bf16.mxu0 %v1962_v0 }
  0xe1   :  { %v262_v19 = vpop.f32.mrb[0].mxu1 }
  0xe2   :  { %v263_v20 = vadd.f32 %v2161_v17, %v262_v19  ;;  %v1785_v21 = vpop.f32.mrb[1].mxu1  ;;  %v94_v19 = vld [vmem:[%s2391_s16] sm:$0xff] }
  0xe3   :  { %v183_v22 = vpop.f32.mrb[0].mxu0 }
  0xe4   :  { %v184_v23 = vadd.f32 %v2166_v18, %v183_v22  ;;  %v1778_v24 = vpop.f32.mrb[1].mxu0  ;;  %1794 = vmatpush3.xpose.msk.msra.mxu1 %vm113_vm1, %v263_v20  ;;  %v95_v20 = vld [vmem:[%s2391_s16 + $0x8] sm:$0xff] }
  0xe5   :  { %1805 = vmatprep.subr.mxu1 %v1964_v6  ;;  %v2227_v21 = vpack.c.bf16 %v95_v20, %v94_v19 }
  0xe6   :  { %1803 = vmatmul.mubr.msk.f32.vlgmr.msra.gmra.mrb[4].mxu0 %vm113_vm1, %v184_v23 }
  0xe7   :  { %1814 = vmatprep.mubr.msk.f32.mxu0 %vm1963_vm0, %v1964_v6  ;;  %1796 = vmatmul.mubr.msk.f32.vlgmr.msra.gmra.mrb[2].mxu1 %vm113_vm1, %v184_v23  ;;  %v341_v26 = vpop.f32.mrb[2].mxu0 }
  0xe8   :  { %1807 = vmatprep.mubr.msk.f32.mxu1 %vm1963_vm0, %v1964_v6  ;;  %v342_v27 = vadd.f32 %v2181_v25, %v341_v26  ;;  %v1792_v28 = vpop.f32.mrb[3].mxu0  ;;  %1904 = vmatpush3.bf16.msra.mxu0 %v2199_v51  ;;  %v2234_v26 = vld [vmem:[%s2392_s14] ss:$0 sm:$0xff] }
  0xe9   :  { %1908 = vmatprep.subr.bf16.mxu0 %v1962_v0  ;;  %v2239_v28 = vld [vmem:[%s2393_s15] ss:$0 sm:$0xff] }
  0xea   :  { %1806 = vmatpush3.msra.mxu1 %v342_v27 }
  0xeb   :  { %1905 = vmatprep.subr.bf16.mxu1 %v1962_v0 }
 0x1b9   :  { %v490_v29 = vpop.f32.mrb[4].mxu0 }
 0x1ba   :  { %v1804_v30 = vpop.f32.mrb[5].mxu0  ;;  %v417_v31 = vpop.f32.mrb[2].mxu1  ;;  %v494_v38 = vmul.f32 0.25, %v490_v29 }
 0x1bb   :  { %v421_v33 = vmul.f32 0.25, %v417_v31  ;;  %v1797_v34 = vpop.f32.mrb[3].mxu1  ;;  %v1707_v31 = vld [vmem:[%s2422_s8 + $0x8] sm:$0xff] }
 0x1bd   :  { %v423_v35 = vadd.f32 %v422_v32, %v421_v33  ;;  %v2262_v32 = vld [vmem:[%s2394_s17] ss:$0 sm:$0xff] }
 0x1bf   :  { %v496_v36 = vsel %vm495_vm2, %v423_v35, -inf }
 0x1c0   :  { %497 = vmax.xlane.f32.xlu0 %v496_v36 }
 0x24d   :  { %v498_v39 = vpop.xlane.xlu0 %497 }
 0x24e   :  { %v499_v40 = vmax.f32 %v498_v39, %v494_v38 }
 0x250   :  { %v508_v41 = vsub.f32 %v494_v38, %v499_v40  ;;  %502 = vperm.xlu0 %1936, %v499_v40   ;;  %v99_v40 = vld [vmem:[%s2395_s20] sm:$0xff] }
 0x252   :  { %v509_v47 = vmul.f32 1.442695, %v508_v41  ;;  %v100_v41 = vld [vmem:[%s2395_s20 + $0x8] sm:$0xff] }
 0x2cf   :  { %v503_v42 = vpop.permute.xlu0 %502 }
 0x2d0   :  { %v505_v43 = vsub.f32 %v423_v35, %v503_v42  ;;  %v2273_v42 = vpack.c.bf16 %v100_v41, %v99_v40 }
 0x2d2   :  { %v506_v44 = vmul.f32 1.442695, %v505_v43 }
 0x2d4   :  { %1938 = vpow2.f32 %v506_v44 }
 0x2d5   :  { %1940 = vpow2.f32 %v509_v47  ;;  %v2280_v47 = vld [vmem:[%s2396_s18] ss:$0 sm:$0xff] }
 0x2de   :  { %v1939_v45 = vpop.eup %1938 }
 0x2df   :  { %1808 = vmatmul.mubr.msk.f32.vlgmr.msra.gmra.mrb[4].mxu1 %vm495_vm2, %v1939_v45  ;;  %v511_v46 = vsel %vm495_vm2, %v1939_v45, 0.0  ;;  %v1941_v48 = vpop.eup %1940 }
 0x2e0   :  { %512 = vadd.xlane.f32.xlu1 %v511_v46  ;;  %1821 = vmatprep.mubr.msk.f32.mxu1 %vm1963_vm0, %v1964_v6 }
 0x2e1   :  { %1907 = vmatpush3.bf16.msra.mxu1 %v2227_v21 }
 0x2e2   :  { %1911 = vmatprep.subr.bf16.mxu1 %v1962_v0 }
 0x2f1   :  { %518 = vperm.xlu1 %1937, %v1941_v48  }
 0x36d   :  { %v513_v52 = vpop.xlane.xlu1 %512 }
 0x36e   :  { %v514_v53 = vadd.f32 %v1941_v48, %v513_v52 }
 0x370   :  { %1942 = vrcp.f32 %v514_v53 }
 0x371   :  { %v519_v58 = vpop.permute.xlu1 %518 }
 0x372   :  { %v527_v59 = vmul.f32 %v2206_v57, %v519_v58 }
 0x37a   :  { %v1943_v54 = vpop.eup %1942 }
 0x37b   :  { %603 = vperm.xlu1 %1937, %v1943_v54   ;;  %v1708_v54 = vld [vmem:[%s2421_s10 + $0x8] sm:$0xff] }
 0x3b2   :  { %v597_v55 = vpop.f32.mrb[4].mxu1 }
 0x3b3   :  { %v1809_v56 = vpop.f32.mrb[5].mxu1  ;;  %v598_v60 = vadd.f32 %v597_v55, %v527_v59  ;;  %v2303_v55 = vld [vmem:[%s2424_s0 + $0x8] sm:$0xff] }
 0x3fa   :  { %v604_v61 = vpop.permute.xlu1 %603 }
 0x3fb   :  { %v606_v62 = vmul.f32 %v604_v61, %v598_v60 }
 0x3fd   :  { %1815 = vmatmul.mubr.msk.f32.vlgmr.msra.gmra.mrb[6].mxu0 %vm113_vm1, %v606_v62 }
 0x3fe   :  { %1828 = vmatprep.mubr.msk.f32.mxu0 %vm1963_vm0, %v1964_v6  ;;  %1910 = vmatpush3.bf16.msra.mxu0 %v2273_v42 }
 0x3ff   :  { %1914 = vmatprep.subr.bf16.mxu0 %v1962_v0 }
 0x4d0   :  { %v682_v1 = vpop.f32.mrb[6].mxu0 }
 0x4d1   :  { %v683_v2 = vadd.f32 %v2215_v63, %v682_v1  ;;  %v1816_v3 = vpop.f32.mrb[7].mxu0 }
 0x4d3   :  { %v686_v5 = vadd.f32 %v683_v2, %v2148_v15 }
 0x4d5   :  { %v687_v8 = vsel %vm113_vm1, %v686_v5, 0.0 }
 0x4d6   :  { %688 = vadd.xlane.f32.xlu1 %v687_v8 }
 0x563   :  { %v689_v9 = vpop.xlane.xlu1 %688 }
 0x564   :  { %v691_v10 = vmul.f32 0.0625, %v689_v9 }
 0x566   :  { %v692_v11 = vsub.f32 %v686_v5, %v691_v10  ;;  %v1715_v5 = vld [vmem:[%s2387_s3 + $0x8] sm:$0xff] }
 0x568   :  { %v693_v13 = vmul.f32 %v692_v11, %v692_v11 }
 0x56a   :  { %v694_v14 = vsel %vm113_vm1, %v693_v13, 0.0 }
 0x56b   :  { %695 = vadd.xlane.f32.xlu0 %v694_v14 }
 0x5f8   :  { %v696_v15 = vpop.xlane.xlu0 %695 }
 0x5f9   :  { %v697_v22 = vmul.f32 0.0625, %v696_v15 }
 0x5fb   :  { %v698_v23 = vadd.f32 1e-05, %v697_v22 }
 0x5fd   :  { %1944 = vrsqrt.f32 %v698_v23 }
 0x607   :  { %v1945_v24 = vpop.eup %1944 }
 0x608   :  { %v700_v27 = vmul.f32 %v1945_v24, %v692_v11 }
 0x60a   :  { %v707_v29 = vmul.f32 %v2234_v26, %v700_v27 }
 0x60c   :  { %v2243_v30 = vadd.f32 %v2239_v28, %v707_v29 }
 0x60e   :  { %1822 = vmatmul.mubr.msk.f32.vlgmr.msra.gmra.mrb[6].mxu1 %vm113_vm1, %v2243_v30 }
 0x60f   :  { %1913 = vmatpush3.bf16.msra.mxu1 %v2111_v7  ;;  %1835 = vmatprep.mubr.msk.f32.mxu1 %vm1963_vm0, %v1964_v6 }
 0x610   :  { %1917 = vmatprep.subr.bf16.mxu1 %v1962_v0 }
 0x612   :  { %1836 = vmatmul.mubr.msk.f32.vlgmr.msra.gmra.mrb[8].mxu1 %vm113_vm1, %v1707_v31 }
 0x613   :  { %1919 = vmatpush3.bf16.msra.mxu1 %v2127_v12  ;;  %1849 = vmatprep.mubr.msk.f32.mxu1 %vm1963_vm0, %v1964_v6 }
 0x614   :  { %1920 = vmatprep.subr.bf16.mxu1 %v1962_v0 }
 0x616   :  { %1850 = vmatmul.mubr.msk.f32.vlgmr.msra.gmra.mrb[10].mxu1 %vm113_vm1, %v2303_v55 }
 0x617   :  { %1922 = vmatpush3.bf16.msra.mxu1 %v2150_v16  ;;  %1861 = vmatprep.mubr.msk.f32.mxu1 %vm1963_vm0, %v1964_v6 }
 0x618   :  { %1923 = vmatprep.subr.bf16.mxu1 %v1962_v0 }
 0x6e1   :  { %v790_v7 = vpop.f32.mrb[6].mxu1 }
 0x6e2   :  { %v791_v33 = vadd.f32 %v2262_v32, %v790_v7  ;;  %v1823_v34 = vpop.f32.mrb[7].mxu1 }
 0x6e4   :  { %v794_v35 = vsel %vm113_vm1, %v791_v33, 0.0 }
 0x6e5   :  { %795 = vadd.xlane.f32.xlu1 %v794_v35  ;;  %v1005_v56 = vpop.f32.mrb[8].mxu1 }
 0x6e6   :  { %v1837_v58 = vpop.f32.mrb[9].mxu1 }
 0x772   :  { %v796_v36 = vpop.xlane.xlu1 %795 }
 0x773   :  { %v797_v37 = vmul.f32 0.0625, %v796_v36 }
 0x775   :  { %v798_v12 = vsub.f32 %v791_v33, %v797_v37 }
 0x777   :  { %v799_v38 = vmul.f32 %v798_v12, %v798_v12 }
 0x779   :  { %v800_v39 = vsel %vm113_vm1, %v799_v38, 0.0 }
 0x77a   :  { %801 = vadd.xlane.f32.xlu1 %v800_v39 }
 0x807   :  { %v802_v43 = vpop.xlane.xlu1 %801 }
 0x808   :  { %v803_v44 = vmul.f32 0.0625, %v802_v43 }
 0x80a   :  { %v804_v45 = vadd.f32 1e-05, %v803_v44 }
 0x80c   :  { %1946 = vrsqrt.f32 %v804_v45 }
 0x816   :  { %v1947_v46 = vpop.eup %1946 }
 0x817   :  { %v806_v48 = vmul.f32 %v1947_v46, %v798_v12 }
 0x819   :  { %v813_v50 = vmul.f32 %v2280_v47, %v806_v48 }
 0x81b   :  { %v820_v52 = vadd.f32 %v2285_v49, %v813_v50 }
 0x81d   :  { %v821_v53 = vmax.f32 %v820_v52, 0.0 }
 0x81f   :  { %1829 = vmatmul.mubr.msk.f32.vlgmr.msra.gmra.mrb[8].mxu0 %vm113_vm1, %v821_v53 }
 0x820   :  { %1916 = vmatpush3.bf16.msra.mxu0 %v2102_v4  ;;  %1842 = vmatprep.mubr.msk.f32.mxu0 %vm1963_vm0, %v1964_v6  ;;  %v1006_v4 = vadd.f32 %v2166_v18, %v1005_v56 }
 0x821   :  { %1852 = vmatprep.subr.mxu0 %v1964_v6 }
 0x822   :  { %1862 = vmatmul.mubr.msk.f32.vlgmr.msra.gmra.mrb[12].mxu1 %vm113_vm1, %v1006_v4 }
 0x823   :  { %1843 = vmatmul.mubr.msk.f32.vlgmr.msra.gmra.mrb[10].mxu0 %vm113_vm1, %v1708_v54  ;;  %1925 = vmatpush3.bf16.msra.mxu1 %v2199_v51  ;;  %v1151_v51 = vpop.f32.mrb[10].mxu1 }
 0x824   :  { %1854 = vmatprep.mubr.msk.f32.mxu0 %vm1963_vm0, %v1964_v6  ;;  %1873 = vmatprep.mubr.msk.f32.mxu1 %vm1963_vm0, %v1964_v6  ;;  %v1152_v62 = vadd.f32 %v2181_v25, %v1151_v51  ;;  %v1851_v1 = vpop.f32.mrb[11].mxu1 }
 0x825   :  { %1929 = vmatprep.subr.bf16.mxu1 %v1962_v0 }
 0x8f2   :  { %v2317_v59 = vpop.f32.mrb[8].mxu0 }
 0x8f3   :  { %v1830_v18 = vpop.f32.mrb[9].mxu0 }
 0x8f5   :  { %v1301_v2 = vpop.f32.mrb[12].mxu1 }
 0x8f6   :  { %v1078_v60 = vpop.f32.mrb[10].mxu0  ;;  %v1863_v3 = vpop.f32.mrb[13].mxu1  ;;  %v1305_v13 = vmul.f32 0.25, %v1301_v2  ;;  %v1705_v2 = vld [vmem:[%s2399_s22] ss:$0 sm:$0xff] }
 0x8f7   :  { %v1079_v16 = vadd.f32 %v2161_v17, %v1078_v60  ;;  %v1844_v61 = vpop.f32.mrb[11].mxu0 }
 0x8f9   :  { %1853 = vmatpush3.xpose.msk.msra.mxu0 %vm113_vm1, %v1079_v16 }
 0x8fa   :  { %1864 = vmatprep.subr.mxu0 %v1964_v6 }
 0x8fc   :  { %1855 = vmatmul.mubr.msk.f32.vlgmr.msra.gmra.mrb[12].mxu0 %vm113_vm1, %v1006_v4 }
 0x8fd   :  { %1866 = vmatprep.mubr.msk.f32.mxu0 %vm1963_vm0, %v1964_v6  ;;  %1865 = vmatpush3.msra.mxu0 %v1152_v62 }
 0x8fe   :  { %1926 = vmatprep.subr.bf16.mxu0 %v1962_v0 }
 0x9cf   :  { %v1227_v17 = vpop.f32.mrb[12].mxu0 }
 0x9d0   :  { %v1231_v8 = vmul.f32 0.25, %v1227_v17  ;;  %v1856_v9 = vpop.f32.mrb[13].mxu0  ;;  %v1706_v17 = vld [vmem:[%s2400_s23] ss:$0 sm:$0xff] }
 0x9d2   :  { %v1234_v10 = vadd.f32 %v1715_v5, %v1231_v8 }
 0x9d4   :  { %v1306_v11 = vsel %vm495_vm2, %v1234_v10, -inf }
 0x9d5   :  { %1307 = vmax.xlane.f32.xlu1 %v1306_v11 }
 0xa62   :  { %v1308_v14 = vpop.xlane.xlu1 %1307 }
 0xa63   :  { %v1309_v25 = vmax.f32 %v1308_v14, %v1305_v13 }
 0xa65   :  { %v1318_v19 = vsub.f32 %v1305_v13, %v1309_v25  ;;  %1312 = vperm.xlu1 %1937, %v1309_v25  }
 0xa67   :  { %v1319_v24 = vmul.f32 1.442695, %v1318_v19 }
 0xae4   :  { %v1313_v20 = vpop.permute.xlu1 %1312 }
 0xae5   :  { %v1315_v15 = vsub.f32 %v1234_v10, %v1313_v20 }
 0xae7   :  { %v1316_v0 = vmul.f32 1.442695, %v1315_v15 }
 0xae9   :  { %1948 = vpow2.f32 %v1316_v0 }
 0xaea   :  { %1950 = vpow2.f32 %v1319_v24 }
 0xaf3   :  { %v1949_v22 = vpop.eup %1948 }
 0xaf4   :  { %1867 = vmatmul.mubr.msk.f32.vlgmr.msra.gmra.mrb[14].mxu0 %vm495_vm2, %v1949_v22  ;;  %v1321_v23 = vsel %vm495_vm2, %v1949_v22, 0.0  ;;  %v1951_v27 = vpop.eup %1950 }
 0xaf5   :  { %1322 = vadd.xlane.f32.xlu0 %v1321_v23  ;;  %1928 = vmatpush3.bf16.msra.mxu0 %v2227_v21 }
 0xaf6   :  { %1880 = vmatprep.mubr.msk.f32.mxu0 %vm1963_vm0, %v1964_v6 }
 0xb0b   :  { %1328 = vperm.xlu0 %1936, %v1951_v27  }
 0xb82   :  { %v1323_v29 = vpop.xlane.xlu0 %1322 }
 0xb83   :  { %v1324_v31 = vadd.f32 %v1951_v27, %v1323_v29 }
 0xb85   :  { %1952 = vrcp.f32 %v1324_v31 }
 0xb8a   :  { %v1329_v35 = vpop.permute.xlu0 %1328 }
 0xb8b   :  { %v1331_v36 = vmul.f32 %v2206_v57, %v1329_v35  ;;  %v1703_v57 = vld [vmem:[%s2398_s21] ss:$0 sm:$0xff] }
 0xb8f   :  { %v1953_v7 = vpop.eup %1952 }
 0xb90   :  { %1407 = vperm.xlu1 %1937, %v1953_v7  }
 0xbc7   :  { %v1401_v33 = vpop.f32.mrb[14].mxu0 }
 0xbc8   :  { %v1868_v34 = vpop.f32.mrb[15].mxu0  ;;  %v1402_v37 = vadd.f32 %v1401_v33, %v1331_v36 }
 0xc0f   :  { %v1408_v12 = vpop.permute.xlu1 %1407 }
 0xc10   :  { %v1410_v21 = vmul.f32 %v1408_v12, %v1402_v37 }
 0xc12   :  { %1874 = vmatmul.mubr.msk.f32.vlgmr.msra.gmra.mrb[14].mxu1 %vm113_vm1, %v1410_v21 }
 0xc13   :  { %1931 = vmatpush3.bf16.msra.mxu1 %v2273_v42  ;;  %1887 = vmatprep.mubr.msk.f32.mxu1 %vm1963_vm0, %v1964_v6  ;;  %v898_v42 = vadd.f32 %v1703_v57, %v2317_v59 }
 0xce5   :  { %v1480_v38 = vpop.f32.mrb[14].mxu1 }
 0xce6   :  { %v1481_v39 = vadd.f32 %v2215_v63, %v1480_v38  ;;  %v1875_v40 = vpop.f32.mrb[15].mxu1  ;;  %v901_v63 = vadd.f32 %v898_v42, %v2243_v30 }
 0xce8   :  { %v1484_v41 = vadd.f32 %v2303_v55, %v1481_v39  ;;  %v902_v50 = vsel %vm113_vm1, %v901_v63, 0.0 }
 0xcea   :  { %v1485_v43 = vsel %vm113_vm1, %v1484_v41, 0.0 }
 0xceb   :  { %1486 = vadd.xlane.f32.xlu1 %v1485_v43 }
 0xd78   :  { %v1487_v44 = vpop.xlane.xlu1 %1486 }
 0xd79   :  { %v1488_v45 = vmul.f32 0.0625, %v1487_v44 }
 0xd7b   :  { %v1489_v46 = vsub.f32 %v1484_v41, %v1488_v45 }
 0xd7d   :  { %v1490_v48 = vmul.f32 %v1489_v46, %v1489_v46 }
 0xd7f   :  { %v1491_v6 = vsel %vm113_vm1, %v1490_v48, 0.0 }
 0xd80   :  { %1492 = vadd.xlane.f32.xlu0 %v1491_v6 }
 0xd84   :  { %903 = vadd.xlane.f32.xlu0 %v902_v50 }
 0xe0d   :  { %v1493_v52 = vpop.xlane.xlu0 %1492 }
 0xe0e   :  { %v1494_v53 = vmul.f32 0.0625, %v1493_v52 }
 0xe10   :  { %v1495_v54 = vadd.f32 1e-05, %v1494_v53 }
 0xe11   :  { %v904_v55 = vpop.xlane.xlu0 %903 }
 0xe12   :  { %1954 = vrsqrt.f32 %v1495_v54  ;;  %v905_v56 = vmul.f32 0.0625, %v904_v55 }
 0xe14   :  { %v906_v4 = vsub.f32 %v901_v63, %v905_v56 }
 0xe16   :  { %v907_v58 = vmul.f32 %v906_v4, %v906_v4 }
 0xe18   :  { %v908_v59 = vsel %vm113_vm1, %v907_v58, 0.0 }
 0xe19   :  { %909 = vadd.xlane.f32.xlu0 %v908_v59 }
 0xe1c   :  { %v1955_v18 = vpop.eup %1954 }
 0xe1d   :  { %v1497_v60 = vmul.f32 %v1955_v18, %v1489_v46 }
 0xe1f   :  { %v1498_v16 = vmul.f32 %v2234_v26, %v1497_v60 }
 0xe21   :  { %v1499_v30 = vadd.f32 %v2239_v28, %v1498_v16 }
 0xe23   :  { %1881 = vmatmul.mubr.msk.f32.vlgmr.msra.gmra.mrb[16].mxu0 %vm113_vm1, %v1499_v30 }
 0xea6   :  { %v910_v61 = vpop.xlane.xlu0 %909 }
 0xea7   :  { %v911_v51 = vmul.f32 0.0625, %v910_v61 }
 0xea9   :  { %v912_v62 = vadd.f32 1e-05, %v911_v51 }
 0xeab   :  { %1956 = vrsqrt.f32 %v912_v62 }
 0xeb5   :  { %v1957_v1 = vpop.eup %1956 }
 0xeb6   :  { %v914_v3 = vmul.f32 %v1957_v1, %v906_v4 }
 0xeb8   :  { %v921_v5 = vmul.f32 %v1705_v2, %v914_v3 }
 0xeba   :  { %v928_v26 = vadd.f32 %v1706_v17, %v921_v5 }
 0xebc   :  { %929 = vst.msk [vmem:[%s2401_s24] sm:$0xff] %vm113_vm1, %v928_v26 }
 0xef6   :  { %v1569_v28 = vpop.f32.mrb[16].mxu0 }
 0xef7   :  { %v1570_v8 = vadd.f32 %v2262_v32, %v1569_v28  ;;  %v1882_v9 = vpop.f32.mrb[17].mxu0 }
 0xef9   :  { %v1573_v10 = vsel %vm113_vm1, %v1570_v8, 0.0 }
 0xefa   :  { %1574 = vadd.xlane.f32.xlu1 %v1573_v10 }
 0xf87   :  { %v1575_v11 = vpop.xlane.xlu1 %1574 }
 0xf88   :  { %v1576_v13 = vmul.f32 0.0625, %v1575_v11 }
 0xf8a   :  { %v1577_v14 = vsub.f32 %v1570_v8, %v1576_v13 }
 0xf8c   :  { %v1578_v25 = vmul.f32 %v1577_v14, %v1577_v14 }
 0xf8e   :  { %v1579_v19 = vsel %vm113_vm1, %v1578_v25, 0.0 }
 0xf8f   :  { %1580 = vadd.xlane.f32.xlu1 %v1579_v19 }
0x101c   :  { %v1581_v20 = vpop.xlane.xlu1 %1580 }
0x101d   :  { %v1582_v15 = vmul.f32 0.0625, %v1581_v20 }
0x101f   :  { %v1583_v0 = vadd.f32 1e-05, %v1582_v15 }
0x1021   :  { %1958 = vrsqrt.f32 %v1583_v0 }
0x102b   :  { %v1959_v22 = vpop.eup %1958 }
0x102c   :  { %v1585_v23 = vmul.f32 %v1959_v22, %v1577_v14 }
0x102e   :  { %v1586_v24 = vmul.f32 %v2280_v47, %v1585_v23 }
0x1030   :  { %v1587_v32 = vadd.f32 %v2285_v49, %v1586_v24 }
0x1032   :  { %v1588_v27 = vmax.f32 %v1587_v32, 0.0 }
0x1034   :  { %1888 = vmatmul.mubr.msk.f32.vlgmr.msra.gmra.mrb[16].mxu1 %vm113_vm1, %v1588_v27 }
0x1107   :  { %v1658_v29 = vpop.f32.mrb[16].mxu1 }
0x1108   :  { %v1659_v31 = vadd.f32 %v1703_v57, %v1658_v29  ;;  %v1889_v7 = vpop.f32.mrb[17].mxu1 }
0x110a   :  { %v1662_v33 = vadd.f32 %v1659_v31, %v1499_v30 }
0x110c   :  { %v1663_v34 = vsel %vm113_vm1, %v1662_v33, 0.0 }
0x110d   :  { %1664 = vadd.xlane.f32.xlu1 %v1663_v34 }
0x119a   :  { %v1665_v35 = vpop.xlane.xlu1 %1664 }
0x119b   :  { %v1666_v36 = vmul.f32 0.0625, %v1665_v35 }
0x119d   :  { %v1667_v37 = vsub.f32 %v1662_v33, %v1666_v36 }
0x119f   :  { %v1668_v12 = vmul.f32 %v1667_v37, %v1667_v37 }
0x11a1   :  { %v1669_v21 = vsel %vm113_vm1, %v1668_v12, 0.0 }
0x11a2   :  { %1670 = vadd.xlane.f32.xlu1 %v1669_v21 }
0x122f   :  { %v1671_v47 = vpop.xlane.xlu1 %1670 }
0x1230   :  { %v1672_v38 = vmul.f32 0.0625, %v1671_v47 }
0x1232   :  { %v1673_v49 = vadd.f32 1e-05, %v1672_v38 }
0x1234   :  { %1960 = vrsqrt.f32 %v1673_v49 }
0x123e   :  { %v1961_v39 = vpop.eup %1960 }
0x123f   :  { %v1675_v40 = vmul.f32 %v1961_v39, %v1667_v37 }
0x1241   :  { %v1676_v41 = vmul.f32 %v1705_v2, %v1675_v40 }
0x1243   :  { %v1677_v43 = vadd.f32 %v1706_v17, %v1676_v41 }
0x1245   :  { %1721 = vst.msk [vmem:[%s2401_s24 + $0x8] sm:$0xff] %vm113_vm1, %v1677_v43 }

// kernel: encoder_forward.20
= control target key start
LH: loop header
LB: loop body
LE: loop exit
PB: predicated region body
PF: predicated region fallthrough
CT: control target
= control target key end

     0   :  { %s2486_s0 = inlined_call_operand.vmem [shape: f32[2,2,16], index: 0, kind: input, shape index: {}, may-alias: {0,1,2}]   ;;  %s2487_s1 = inlined_call_operand.vmem [shape: f32[2,2,16], index: 1, kind: input, shape index: {}, may-alias: {0,1,2}]   ;;  %s2488_s2 = inlined_call_operand.vmem [shape: f32[2,2,16], index: 2, kind: input, shape index: {}, may-alias: {0,1,2}]   ;;  %s2489_s3 = inlined_call_operand.vmem [shape: f32[2,2,2], index: 3, kind: input, shape index: {}]   ;;  %s2490_s4 = inlined_call_operand.vmem [shape: f32[16,16], index: 4, kind: input, shape index: {}]   ;;  %s2491_s5 = inlined_call_operand.vmem [shape: f32[1,16], index: 5, kind: input, shape index: {}]   ;;  %s2492_s6 = inlined_call_operand.vmem [shape: f32[16,16], index: 6, kind: input, shape index: {}]   ;;  %s2493_s7 = inlined_call_operand.vmem [shape: f32[1,16], index: 7, kind: input, shape index: {}]   ;;  %s2494_s8 = inlined_call_operand.vmem [shape: f32[16,16], index: 8, kind: input, shape index: {}]   ;;  %s2495_s9 = inlined_call_operand.vmem [shape: f32[1,16], index: 9, kind: input, shape index: {}]   ;;  %s2496_s10 = inlined_call_operand.vmem [shape: f32[16,1], index: 10, kind: input, shape index: {}]   ;;  %s2497_s11 = inlined_call_operand.vmem [shape: f32[1,16], index: 11, kind: input, shape index: {}]   ;;  %s2498_s12 = inlined_call_operand.vmem [shape: f32[16,16], index: 12, kind: input, shape index: {}]   ;;  %s2499_s13 = inlined_call_operand.vmem [shape: f32[1,16], index: 13, kind: input, shape index: {}]   ;;  %s2500_s14 = inlined_call_operand.vmem [shape: f32[1,16], index: 14, kind: input, shape index: {}]   ;;  %s2501_s15 = inlined_call_operand.vmem [shape: f32[1,16], index: 15, kind: input, shape index: {}]   ;;  %s2502_s16 = inlined_call_operand.vmem [shape: f32[16,16], index: 16, kind: input, shape index: {}]   ;;  %s2503_s17 = inlined_call_operand.vmem [shape: f32[1,16], index: 17, kind: input, shape index: {}]   ;;  %s2504_s18 = inlined_call_operand.vmem [shape: f32[1,16], index: 18, kind: input, shape index: {}]   ;;  %s2505_s19 = inlined_call_operand.vmem [shape: f32[1,16], index: 19, kind: input, shape index: {}]   ;;  %s2506_s20 = inlined_call_operand.vmem [shape: f32[16,16], index: 20, kind: input, shape index: {}]   ;;  %s2507_s21 = inlined_call_operand.vmem [shape: f32[1,16], index: 21, kind: input, shape index: {}]   ;;  %s2508_s22 = inlined_call_operand.hbm [shape: f32[1,16], index: 22, kind: input, shape index: {}]   ;;  %s2509_s23 = inlined_call_operand.hbm [shape: f32[1,16], index: 23, kind: input, shape index: {}]   ;;  %s2510_s24 = inlined_call_operand.vmem [shape: f32[2,2,16], index: 24, kind: output, shape index: {}]  }
   0x1   :  { %2518 = sst [smem:[#allocation8_spill]] %s2486_s0 }
   0x2   :  { %2519 = sst [smem:[#allocation9_spill]] %s2487_s1 }
   0x3   :  { %2520 = sst [smem:[#allocation10_spill]] %s2488_s2 }
   0x4   :  { %2521 = sst [smem:[#allocation11_spill]] %s2489_s3 }
   0x5   :  { %2522 = sst [smem:[#allocation12_spill]] %s2490_s4 }
   0x6   :  { %2523 = sst [smem:[#allocation13_spill]] %s2491_s5 }
   0x7   :  { %2524 = sst [smem:[#allocation14_spill]] %s2492_s6 }
   0x8   :  { %2525 = sst [smem:[#allocation15_spill]] %s2493_s7 }
   0x9   :  { %2526 = sst [smem:[#allocation16_spill]] %s2494_s8 }
   0xa   :  { %29 = vsyncpa [#allocation3], 0 }
   0xb   :  { %30 = vsyncpa [#allocation5], 0  ;;  %s2049_s5 = smov [#allocation2]   ;;  %s2050_s27 = smov [#allocation4]  }
   0xc   :  { %s81_s26 = sshll.u32 %s2049_s5, 4  ;;  %s91_s28 = sshll.u32 %s2050_s27, 4  ;;  %s82_s26 = int_to_ptr.vmem [resolvable:$true] %s81_s26  ;;  %s92_s28 = int_to_ptr.vmem [resolvable:$true] %s91_s28 }
   0xd   :  { %s2001_s29 = scalar_lea.hbm %s2508_s22, 16 }
   0xe   :  { %p2002_p0 = scmp.ne.s32.totalorder %s2508_s22, %s2001_s29  ;;  %p2005_p1 = scmp.lt.u32.totalorder %s2001_s29, %s2508_s22 }
  0x10   :  { %p2007_p2 = pnand %p2005_p1, %p2002_p0 }
  0x12   :  { %2010 = shalt.err (!%p2007_p2)
}
  0x13   :  { %s2011_s25 = scalar_lea.vmem %s82_s26, 16  ;;  %s2015_s8 = scalar_lea.vmem %s82_s26, 32 }
  0x14   :  { %p2012_p3 = scmp.ne.s32.totalorder %s82_s26, %s2011_s25  ;;  %p2016_p4 = scmp.lt.s32.totalorder %s82_s26, %s82_s26 }
  0x15   :  { %p2017_p5 = scmp.lt.s32.totalorder %s2015_s8, %s2011_s25 }
  0x17   :  { %p2018_p6 = por %p2017_p5, %p2016_p4 }
  0x19   :  { %p2019_p7 = pnand %p2018_p6, %p2012_p3 }
  0x1b   :  { %2022 = shalt.err (!%p2019_p7)
}
  0x1c   :  { %84 = dma.hbm_to_vmem [thread:$0]  %s2508_s22, 16, %s82_s26, [#allocation3]  }
  0x1d   :  { %s2023_s6 = scalar_lea.hbm %s2509_s23, 16 }
  0x1e   :  { %p2024_p8 = scmp.ne.s32.totalorder %s2509_s23, %s2023_s6  ;;  %p2027_p9 = scmp.lt.u32.totalorder %s2023_s6, %s2509_s23 }
  0x20   :  { %p2029_p10 = pnand %p2027_p9, %p2024_p8 }
  0x22   :  { %2032 = shalt.err (!%p2029_p10)
}
  0x23   :  { %s2033_s30 = scalar_lea.vmem %s92_s28, 16  ;;  %s2037_s3 = scalar_lea.vmem %s92_s28, 32 }
  0x24   :  { %p2034_p11 = scmp.ne.s32.totalorder %s92_s28, %s2033_s30  ;;  %p2038_p12 = scmp.lt.s32.totalorder %s92_s28, %s92_s28 }
  0x25   :  { %p2039_p13 = scmp.lt.s32.totalorder %s2037_s3, %s2033_s30 }
  0x27   :  { %p2040_p0 = por %p2039_p13, %p2038_p12 }
  0x29   :  { %p2041_p1 = pnand %p2040_p0, %p2034_p11 }
  0x2b   :  { %2044 = shalt.err (!%p2041_p1)
}
  0x2c   :  { %94 = dma.hbm_to_vmem [thread:$0]  %s2509_s23, 16, %s92_s28, [#allocation5]  }
  0x2d   :  { %2045 = dma.done.wait [#allocation3], 16  }
  0x2e   :  { %2046 = vsyncadd [#allocation3], 4294967280 }
  0x2f   :  { %2047 = dma.done.wait [#allocation5], 16  }
  0x30   :  { %2048 = vsyncadd [#allocation5], 4294967280  ;;  %v2051_v0 = vmov 0.0|0.0   ;;  %vm2052_vm0 = vmmov 0   ;;  %v2053_v1 = vmov 0.0   ;;  %s2527_s23 = sld [smem:[#allocation14_spill]] }
  0x31   :  { %1930 = vmatprep.subr.bf16.mxu1 %v2051_v0  ;;  %1927 = vmatprep.subr.bf16.mxu0 %v2051_v0  ;;  %s2528_s27 = sld [smem:[#allocation12_spill]]  ;;  %s2529_s7 = sld [smem:[#allocation16_spill]]  ;;  %vm137_vm1 = vcmask 130048   ;;  %v110_v13 = vld [vmem:[%s2496_s10] sm:$0xff]  ;;  %v111_v14 = vld [vmem:[%s2496_s10 + $0x8] sm:$0xff]  ;;  %vm556_vm2 = vcmask 1041408  }
  0x32   :  { %1820 = vmatprep.mubr.msk.f32.mxu1 %vm2052_vm0, %v2053_v1  ;;  %1813 = vmatprep.mubr.msk.f32.mxu0 %vm2052_vm0, %v2053_v1  ;;  %s2530_s25 = sld [smem:[#allocation9_spill]]  ;;  %s2531_s28 = sld [smem:[#allocation8_spill]]  ;;  %v2263_v16 = vpack.c.bf16 %v111_v14, %v110_v13  ;;  %v2294_v27 = vld [vmem:[%s2495_s9] ss:$0 sm:$0xff]  ;;  %vm519_vm3 = vcmask 9216   ;;  %v2054_v37 = vmov 0  }
  0x33   :  { %s2532_s29 = sld [smem:[#allocation10_spill]]  ;;  %s2533_s10 = sld [smem:[#allocation15_spill]]  ;;  %1975 = vset.pattern.permute.xlu0 %v2054_v37  ;;  %1976 = vset.pattern.permute.xlu1 %v2054_v37  ;;  %vm552_vm4 = vcmask 15360   ;;  %v113_v49 = vld [vmem:[%s2498_s12] sm:$0xff]  ;;  %v114_v50 = vld [vmem:[%s2498_s12 + $0x8] sm:$0xff]  ;;  %vm716_vm5 = vcmask 123904  }
  0x34   :  { %s2534_s22 = sld [smem:[#allocation13_spill]]  ;;  %s2535_s1 = sld [smem:[#allocation11_spill]]  ;;  %v2313_v51 = vpack.c.bf16 %v114_v50, %v113_v49  ;;  %v2320_v57 = vld [vmem:[%s2497_s11] ss:$0 sm:$0xff] }
  0x35   :  { %v2329_v63 = vld [vmem:[%s2499_s13] ss:$0 sm:$0xff] }
  0x36   :  { %v104_v2 = vld [vmem:[%s2527_s23] sm:$0xff]  ;;  %v105_v3 = vld [vmem:[%s2527_s23 + $0x8] sm:$0xff] }
  0x37   :  { %v101_v4 = vld [vmem:[%s2528_s27] sm:$0xff]  ;;  %v2219_v5 = vpack.c.bf16 %v105_v3, %v104_v2  ;;  %v102_v6 = vld [vmem:[%s2528_s27 + $0x8] sm:$0xff] }
  0x38   :  { %v2224_v7 = vpack.c.bf16 %v102_v6, %v101_v4  ;;  %v107_v8 = vld [vmem:[%s2529_s7] sm:$0xff]  ;;  %v108_v9 = vld [vmem:[%s2529_s7 + $0x8] sm:$0xff] }
  0x39   :  { %1932 = vmatpush3.bf16.msra.mxu1 %v2219_v5  ;;  %v129_v10 = vld [vmem:[%s2530_s25] sm:$0x3]  ;;  %v2240_v12 = vpack.c.bf16 %v108_v9, %v107_v8 }
  0x3a   :  { %1929 = vmatpush3.bf16.msra.mxu0 %v2224_v7  ;;  %v128_v11 = vld [vmem:[%s2531_s28] sm:$0x3]  ;;  %1830 = vmatprep.subr.mxu1 %v2053_v1 }
  0x3b   :  { %1933 = vmatprep.subr.bf16.mxu0 %v2051_v0  ;;  %v2261_v15 = vld [vmem:[%s2532_s29] sm:$0x3] }
  0x3c   :  { %1821 = vmatmul.mubr.msk.f32.vlgmr.msra.gmra.mrb[0].mxu1 %vm137_vm1, %v129_v10  ;;  %v2274_v17 = vld [vmem:[%s2533_s10] ss:$0 sm:$0xff] }
  0x3d   :  { %1814 = vmatmul.mubr.msk.f32.vlgmr.msra.gmra.mrb[0].mxu0 %vm137_vm1, %v128_v11  ;;  %1832 = vmatprep.mubr.msk.f32.mxu1 %vm2052_vm0, %v2053_v1  ;;  %v2279_v18 = vld [vmem:[%s2534_s22] ss:$0 sm:$0xff] }
  0x3e   :  { %1935 = vmatpush3.bf16.msra.mxu0 %v2240_v12  ;;  %1827 = vmatprep.mubr.msk.f32.mxu0 %vm2052_vm0, %v2053_v1  ;;  %v446_v32 = vld [vmem:[%s2535_s1] sm:$0x3] }
  0x3f   :  { %1936 = vmatprep.subr.bf16.mxu0 %v2051_v0 }
  0x41   :  { %1828 = vmatmul.mubr.msk.f32.vlgmr.msra.gmra.mrb[2].mxu0 %vm137_vm1, %v2261_v15 }
  0x42   :  { %1938 = vmatpush3.bf16.msra.mxu0 %v2263_v16  ;;  %1839 = vmatprep.mubr.msk.f32.mxu0 %vm2052_vm0, %v2053_v1 }
  0x43   :  { %1939 = vmatprep.subr.bf16.mxu0 %v2051_v0 }
 0x10f   :  { %v286_v19 = vpop.f32.mrb[0].mxu1 }
 0x110   :  { %v287_v20 = vadd.f32 %v2274_v17, %v286_v19  ;;  %v1822_v21 = vpop.f32.mrb[1].mxu1  ;;  %v207_v22 = vpop.f32.mrb[0].mxu0  ;;  %v118_v19 = vld [vmem:[%s2502_s16] sm:$0xff] }
 0x111   :  { %v208_v23 = vadd.f32 %v2279_v18, %v207_v22  ;;  %v1815_v24 = vpop.f32.mrb[1].mxu0 }
 0x112   :  { %1831 = vmatpush3.xpose.msk.msra.mxu1 %vm137_vm1, %v287_v20  ;;  %v119_v20 = vld [vmem:[%s2502_s16 + $0x8] sm:$0xff] }
 0x113   :  { %1840 = vmatmul.mubr.msk.f32.vlgmr.msra.gmra.mrb[4].mxu0 %vm137_vm1, %v208_v23  ;;  %1842 = vmatprep.subr.mxu1 %v2053_v1  ;;  %v2341_v21 = vpack.c.bf16 %v119_v20, %v118_v19 }
 0x114   :  { %1851 = vmatprep.mubr.msk.f32.mxu0 %vm2052_vm0, %v2053_v1  ;;  %v365_v25 = vpop.f32.mrb[2].mxu0  ;;  %1941 = vmatpush3.bf16.msra.mxu0 %v2313_v51 }
 0x115   :  { %1833 = vmatmul.mubr.msk.f32.vlgmr.msra.gmra.mrb[2].mxu1 %vm137_vm1, %v208_v23  ;;  %v1829_v26 = vpop.f32.mrb[3].mxu0  ;;  %v366_v28 = vadd.f32 %v2294_v27, %v365_v25  ;;  %1945 = vmatprep.subr.bf16.mxu0 %v2051_v0  ;;  %v2348_v25 = vld [vmem:[%s2500_s14] ss:$0 sm:$0xff] }
 0x116   :  { %1844 = vmatprep.mubr.msk.f32.mxu1 %vm2052_vm0, %v2053_v1 }
 0x117   :  { %1843 = vmatpush3.msk.msra.mxu1 %vm556_vm2, %v366_v28  ;;  %v2353_v28 = vld [vmem:[%s2501_s15] ss:$0 sm:$0xff] }
 0x118   :  { %1942 = vmatprep.subr.bf16.mxu1 %v2051_v0 }
 0x1e6   :  { %v514_v29 = vpop.f32.mrb[4].mxu0 }
 0x1e7   :  { %v1841_v30 = vpop.f32.mrb[5].mxu0  ;;  %v518_v38 = vmul.f32 0.25, %v514_v29 }
 0x1e8   :  { %v441_v31 = vpop.f32.mrb[2].mxu1 }
 0x1e9   :  { %v445_v33 = vmul.f32 0.25, %v441_v31  ;;  %v1834_v34 = vpop.f32.mrb[3].mxu1  ;;  %v2368_v31 = vld [vmem:[%s2503_s17] ss:$0 sm:$0xff] }
 0x1eb   :  { %v447_v35 = vadd.f32 %v446_v32, %v445_v33 }
 0x1ed   :  { %v520_v36 = vsel %vm519_vm3, %v447_v35, -inf }
 0x1ee   :  { %521 = vmax.xlane.f32.xlu0 %v520_v36 }
 0x27b   :  { %v522_v39 = vpop.xlane.xlu0 %521 }
 0x27c   :  { %v523_v40 = vmax.f32 %v522_v39, %v518_v38 }
 0x27e   :  { %v532_v41 = vsub.f32 %v518_v38, %v523_v40  ;;  %526 = vperm.xlu0 %1975, %v523_v40   ;;  %v123_v40 = vld [vmem:[%s2506_s20] sm:$0xff] }
 0x280   :  { %v533_v47 = vmul.f32 1.442695, %v532_v41  ;;  %v124_v41 = vld [vmem:[%s2506_s20 + $0x8] sm:$0xff] }
 0x2fd   :  { %v527_v42 = vpop.permute.xlu0 %526 }
 0x2fe   :  { %v529_v43 = vsub.f32 %v447_v35, %v527_v42  ;;  %v2379_v42 = vpack.c.bf16 %v124_v41, %v123_v40 }
 0x300   :  { %v530_v44 = vmul.f32 1.442695, %v529_v43  ;;  %v1743_v43 = vld [vmem:[%s2531_s28 + $0x2] sm:$0x3] }
 0x302   :  { %1977 = vpow2.f32 %v530_v44 }
 0x303   :  { %1979 = vpow2.f32 %v533_v47 }
 0x30c   :  { %v1978_v45 = vpop.eup %1977 }
 0x30d   :  { %1845 = vmatmul.mubr.msk.f32.vlgmr.msra.gmra.mrb[4].mxu1 %vm552_vm4, %v1978_v45  ;;  %v535_v46 = vsel %vm519_vm3, %v1978_v45, 0.0  ;;  %v1980_v48 = vpop.eup %1979 }
 0x30e   :  { %536 = vadd.xlane.f32.xlu1 %v535_v46  ;;  %1858 = vmatprep.mubr.msk.f32.mxu1 %vm2052_vm0, %v2053_v1 }
 0x30f   :  { %1944 = vmatpush3.bf16.msra.mxu1 %v2341_v21 }
 0x310   :  { %1948 = vmatprep.subr.bf16.mxu1 %v2051_v0 }
 0x31f   :  { %542 = vperm.xlu1 %1976, %v1980_v48  }
 0x39b   :  { %v537_v52 = vpop.xlane.xlu1 %536 }
 0x39c   :  { %v538_v53 = vadd.f32 %v1980_v48, %v537_v52  ;;  %v2394_v48 = vld [vmem:[%s2504_s18] ss:$0 sm:$0xff] }
 0x39e   :  { %1981 = vrcp.f32 %v538_v53 }
 0x39f   :  { %v543_v58 = vpop.permute.xlu1 %542 }
 0x3a0   :  { %v551_v59 = vmul.f32 %v2320_v57, %v543_v58 }
 0x3a8   :  { %v1982_v54 = vpop.eup %1981 }
 0x3a9   :  { %632 = vperm.xlu1 %1976, %v1982_v54   ;;  %v1744_v54 = vld [vmem:[%s2530_s25 + $0x2] sm:$0x3] }
 0x3e0   :  { %v626_v55 = vpop.f32.mrb[4].mxu1 }
 0x3e1   :  { %v1846_v56 = vpop.f32.mrb[5].mxu1  ;;  %v627_v60 = vadd.f32 %v626_v55, %v551_v59  ;;  %v2417_v55 = vld [vmem:[%s2532_s29 + $0x2] sm:$0x3] }
 0x428   :  { %v633_v61 = vpop.permute.xlu1 %632 }
 0x429   :  { %v635_v62 = vmul.f32 %v633_v61, %v627_v60 }
 0x42b   :  { %1852 = vmatmul.mubr.msk.f32.vlgmr.msra.gmra.mrb[6].mxu0 %vm137_vm1, %v635_v62 }
 0x42c   :  { %1865 = vmatprep.mubr.msk.f32.mxu0 %vm2052_vm0, %v2053_v1  ;;  %1947 = vmatpush3.bf16.msra.mxu0 %v2379_v42 }
 0x42d   :  { %1951 = vmatprep.subr.bf16.mxu0 %v2051_v0 }
 0x4fe   :  { %v711_v2 = vpop.f32.mrb[6].mxu0 }
 0x4ff   :  { %v712_v3 = vadd.f32 %v2329_v63, %v711_v2  ;;  %v1853_v4 = vpop.f32.mrb[7].mxu0 }
 0x501   :  { %v715_v6 = vadd.f32 %v712_v3, %v2261_v15 }
 0x503   :  { %v717_v8 = vsel %vm716_vm5, %v715_v6, 0.0 }
 0x504   :  { %718 = vadd.xlane.f32.xlu1 %v717_v8 }
 0x591   :  { %v719_v9 = vpop.xlane.xlu1 %718 }
 0x592   :  { %v721_v10 = vmul.f32 0.0625, %v719_v9 }
 0x594   :  { %v722_v11 = vsub.f32 %v715_v6, %v721_v10  ;;  %v1751_v6 = vld [vmem:[%s2535_s1 + $0x2] sm:$0x3] }
 0x596   :  { %v723_v13 = vmul.f32 %v722_v11, %v722_v11 }
 0x598   :  { %v724_v14 = vsel %vm716_vm5, %v723_v13, 0.0 }
 0x599   :  { %725 = vadd.xlane.f32.xlu0 %v724_v14 }
 0x626   :  { %v726_v15 = vpop.xlane.xlu0 %725 }
 0x627   :  { %v727_v22 = vmul.f32 0.0625, %v726_v15 }
 0x629   :  { %v728_v23 = vadd.f32 1e-05, %v727_v22 }
 0x62b   :  { %1983 = vrsqrt.f32 %v728_v23 }
 0x635   :  { %v1984_v24 = vpop.eup %1983 }
 0x636   :  { %v730_v26 = vmul.f32 %v1984_v24, %v722_v11 }
 0x638   :  { %v737_v29 = vmul.f32 %v2348_v25, %v730_v26 }
 0x63a   :  { %v2357_v30 = vadd.f32 %v2353_v28, %v737_v29 }
 0x63c   :  { %1859 = vmatmul.mubr.msk.f32.vlgmr.msra.gmra.mrb[6].mxu1 %vm137_vm1, %v2357_v30 }
 0x63d   :  { %1950 = vmatpush3.bf16.msra.mxu1 %v2224_v7  ;;  %1872 = vmatprep.mubr.msk.f32.mxu1 %vm2052_vm0, %v2053_v1 }
 0x63e   :  { %1954 = vmatprep.subr.bf16.mxu1 %v2051_v0 }
 0x640   :  { %1873 = vmatmul.mubr.msk.f32.vlgmr.msra.gmra.mrb[8].mxu1 %vm137_vm1, %v1743_v43 }
 0x641   :  { %1956 = vmatpush3.bf16.msra.mxu1 %v2240_v12  ;;  %1886 = vmatprep.mubr.msk.f32.mxu1 %vm2052_vm0, %v2053_v1  ;;  %v2399_v12 = vld [vmem:[%s2505_s19] ss:$0 sm:$0xff] }
 0x642   :  { %1957 = vmatprep.subr.bf16.mxu1 %v2051_v0 }
 0x644   :  { %1887 = vmatmul.mubr.msk.f32.vlgmr.msra.gmra.mrb[10].mxu1 %vm137_vm1, %v2417_v55 }
 0x645   :  { %1959 = vmatpush3.bf16.msra.mxu1 %v2263_v16  ;;  %1898 = vmatprep.mubr.msk.f32.mxu1 %vm2052_vm0, %v2053_v1 }
 0x646   :  { %1960 = vmatprep.subr.bf16.mxu1 %v2051_v0 }
 0x70f   :  { %v820_v32 = vpop.f32.mrb[6].mxu1 }
 0x710   :  { %v821_v33 = vadd.f32 %v2368_v31, %v820_v32  ;;  %v1860_v34 = vpop.f32.mrb[7].mxu1 }
 0x712   :  { %v824_v35 = vsel %vm716_vm5, %v821_v33, 0.0 }
 0x713   :  { %825 = vadd.xlane.f32.xlu1 %v824_v35 }
 0x7a0   :  { %v826_v36 = vpop.xlane.xlu1 %825 }
 0x7a1   :  { %v827_v37 = vmul.f32 0.0625, %v826_v36 }
 0x7a3   :  { %v828_v7 = vsub.f32 %v821_v33, %v827_v37 }
 0x7a5   :  { %v829_v38 = vmul.f32 %v828_v7, %v828_v7 }
 0x7a7   :  { %v830_v39 = vsel %vm716_vm5, %v829_v38, 0.0 }
 0x7a8   :  { %831 = vadd.xlane.f32.xlu1 %v830_v39 }
 0x835   :  { %v832_v44 = vpop.xlane.xlu1 %831 }
 0x836   :  { %v833_v45 = vmul.f32 0.0625, %v832_v44 }
 0x838   :  { %v834_v46 = vadd.f32 1e-05, %v833_v45 }
 0x83a   :  { %1985 = vrsqrt.f32 %v834_v46 }
 0x844   :  { %v1986_v47 = vpop.eup %1985 }
 0x845   :  { %v836_v49 = vmul.f32 %v1986_v47, %v828_v7 }
 0x847   :  { %v843_v50 = vmul.f32 %v2394_v48, %v836_v49 }
 0x849   :  { %v850_v52 = vadd.f32 %v2399_v12, %v843_v50 }
 0x84b   :  { %v851_v53 = vmax.f32 %v850_v52, 0.0 }
 0x84d   :  { %1866 = vmatmul.mubr.msk.f32.vlgmr.msra.gmra.mrb[8].mxu0 %vm137_vm1, %v851_v53 }
 0x84e   :  { %1953 = vmatpush3.bf16.msra.mxu0 %v2219_v5  ;;  %1879 = vmatprep.mubr.msk.f32.mxu0 %vm2052_vm0, %v2053_v1  ;;  %v1035_v5 = vpop.f32.mrb[8].mxu1 }
 0x84f   :  { %1889 = vmatprep.subr.mxu0 %v2053_v1  ;;  %v1036_v56 = vadd.f32 %v2279_v18, %v1035_v5  ;;  %v1874_v58 = vpop.f32.mrb[9].mxu1 }
 0x851   :  { %1880 = vmatmul.mubr.msk.f32.vlgmr.msra.gmra.mrb[10].mxu0 %vm137_vm1, %v1744_v54  ;;  %1899 = vmatmul.mubr.msk.f32.vlgmr.msra.gmra.mrb[12].mxu1 %vm137_vm1, %v1036_v56 }
 0x852   :  { %1891 = vmatprep.mubr.msk.f32.mxu0 %vm2052_vm0, %v2053_v1  ;;  %1962 = vmatpush3.bf16.msra.mxu1 %v2313_v51  ;;  %v1181_v51 = vpop.f32.mrb[10].mxu1 }
 0x853   :  { %1910 = vmatprep.mubr.msk.f32.mxu1 %vm2052_vm0, %v2053_v1  ;;  %1966 = vmatprep.subr.bf16.mxu1 %v2051_v0  ;;  %v1182_v62 = vadd.f32 %v2294_v27, %v1181_v51  ;;  %v1888_v2 = vpop.f32.mrb[11].mxu1 }
 0x920   :  { %v2431_v59 = vpop.f32.mrb[8].mxu0 }
 0x921   :  { %v1867_v18 = vpop.f32.mrb[9].mxu0 }
 0x924   :  { %v1108_v60 = vpop.f32.mrb[10].mxu0  ;;  %v1331_v3 = vpop.f32.mrb[12].mxu1 }
 0x925   :  { %v1109_v16 = vadd.f32 %v2274_v17, %v1108_v60  ;;  %v1881_v61 = vpop.f32.mrb[11].mxu0  ;;  %v1900_v17 = vpop.f32.mrb[13].mxu1  ;;  %v1335_v13 = vmul.f32 0.25, %v1331_v3  ;;  %v1741_v3 = vld [vmem:[#allocation2] ss:$0 sm:$0xff] }
 0x927   :  { %1890 = vmatpush3.xpose.msk.msra.mxu0 %vm137_vm1, %v1109_v16 }
 0x928   :  { %1901 = vmatprep.subr.mxu0 %v2053_v1 }
 0x92a   :  { %1892 = vmatmul.mubr.msk.f32.vlgmr.msra.gmra.mrb[12].mxu0 %vm137_vm1, %v1036_v56 }
 0x92b   :  { %1903 = vmatprep.mubr.msk.f32.mxu0 %vm2052_vm0, %v2053_v1  ;;  %1902 = vmatpush3.msk.msra.mxu0 %vm556_vm2, %v1182_v62 }
 0x92c   :  { %1963 = vmatprep.subr.bf16.mxu0 %v2051_v0 }
 0x9fd   :  { %v1257_v4 = vpop.f32.mrb[12].mxu0 }
 0x9fe   :  { %v1261_v8 = vmul.f32 0.25, %v1257_v4  ;;  %v1893_v9 = vpop.f32.mrb[13].mxu0  ;;  %v1742_v4 = vld [vmem:[#allocation4] ss:$0 sm:$0xff] }
 0xa00   :  { %v1264_v10 = vadd.f32 %v1751_v6, %v1261_v8 }
 0xa02   :  { %v1336_v11 = vsel %vm519_vm3, %v1264_v10, -inf }
 0xa03   :  { %1337 = vmax.xlane.f32.xlu1 %v1336_v11 }
 0xa90   :  { %v1338_v27 = vpop.xlane.xlu1 %1337 }
 0xa91   :  { %v1339_v14 = vmax.f32 %v1338_v27, %v1335_v13 }
 0xa93   :  { %v1348_v19 = vsub.f32 %v1335_v13, %v1339_v14  ;;  %1342 = vperm.xlu1 %1976, %v1339_v14  }
 0xa95   :  { %v1349_v24 = vmul.f32 1.442695, %v1348_v19 }
 0xb12   :  { %v1343_v20 = vpop.permute.xlu1 %1342 }
 0xb13   :  { %v1345_v15 = vsub.f32 %v1264_v10, %v1343_v20 }
 0xb15   :  { %v1346_v0 = vmul.f32 1.442695, %v1345_v15 }
 0xb17   :  { %1987 = vpow2.f32 %v1346_v0 }
 0xb18   :  { %1989 = vpow2.f32 %v1349_v24 }
 0xb21   :  { %v1988_v22 = vpop.eup %1987 }
 0xb22   :  { %1904 = vmatmul.mubr.msk.f32.vlgmr.msra.gmra.mrb[14].mxu0 %vm552_vm4, %v1988_v22  ;;  %v1351_v23 = vsel %vm519_vm3, %v1988_v22, 0.0  ;;  %v1990_v26 = vpop.eup %1989 }
 0xb23   :  { %1352 = vadd.xlane.f32.xlu0 %v1351_v23  ;;  %1965 = vmatpush3.bf16.msra.mxu0 %v2341_v21 }
 0xb24   :  { %1917 = vmatprep.mubr.msk.f32.mxu0 %vm2052_vm0, %v2053_v1 }
 0xb39   :  { %1358 = vperm.xlu0 %1975, %v1990_v26  }
 0xbb0   :  { %v1353_v29 = vpop.xlane.xlu0 %1352 }
 0xbb1   :  { %v1354_v32 = vadd.f32 %v1990_v26, %v1353_v29 }
 0xbb3   :  { %1991 = vrcp.f32 %v1354_v32 }
 0xbb8   :  { %v1359_v36 = vpop.permute.xlu0 %1358 }
 0xbb9   :  { %v1361_v37 = vmul.f32 %v2320_v57, %v1359_v36  ;;  %v1739_v57 = vld [vmem:[%s2507_s21] ss:$0 sm:$0xff] }
 0xbbd   :  { %v1992_v33 = vpop.eup %1991 }
 0xbbe   :  { %1440 = vperm.xlu1 %1976, %v1992_v33  }
 0xbf5   :  { %v1434_v34 = vpop.f32.mrb[14].mxu0 }
 0xbf6   :  { %v1905_v35 = vpop.f32.mrb[15].mxu0  ;;  %v1435_v7 = vadd.f32 %v1434_v34, %v1361_v37 }
 0xc3d   :  { %v1441_v38 = vpop.permute.xlu1 %1440 }
 0xc3e   :  { %v1443_v21 = vmul.f32 %v1441_v38, %v1435_v7 }
 0xc40   :  { %1911 = vmatmul.mubr.msk.f32.vlgmr.msra.gmra.mrb[14].mxu1 %vm137_vm1, %v1443_v21 }
 0xc41   :  { %1968 = vmatpush3.bf16.msra.mxu1 %v2379_v42  ;;  %1924 = vmatprep.mubr.msk.f32.mxu1 %vm2052_vm0, %v2053_v1  ;;  %v928_v42 = vadd.f32 %v1739_v57, %v2431_v59 }
 0xd13   :  { %v1513_v39 = vpop.f32.mrb[14].mxu1 }
 0xd14   :  { %v1514_v40 = vadd.f32 %v2329_v63, %v1513_v39  ;;  %v1912_v41 = vpop.f32.mrb[15].mxu1  ;;  %v931_v63 = vadd.f32 %v928_v42, %v2357_v30 }
 0xd16   :  { %v1517_v43 = vadd.f32 %v2417_v55, %v1514_v40  ;;  %v932_v50 = vsel %vm716_vm5, %v931_v63, 0.0 }
 0xd18   :  { %v1518_v44 = vsel %vm716_vm5, %v1517_v43, 0.0 }
 0xd19   :  { %1519 = vadd.xlane.f32.xlu1 %v1518_v44 }
 0xda6   :  { %v1520_v45 = vpop.xlane.xlu1 %1519 }
 0xda7   :  { %v1521_v46 = vmul.f32 0.0625, %v1520_v45 }
 0xda9   :  { %v1522_v47 = vsub.f32 %v1517_v43, %v1521_v46 }
 0xdab   :  { %v1523_v49 = vmul.f32 %v1522_v47, %v1522_v47 }
 0xdad   :  { %v1524_v1 = vsel %vm716_vm5, %v1523_v49, 0.0 }
 0xdae   :  { %1525 = vadd.xlane.f32.xlu0 %v1524_v1 }
 0xdb2   :  { %933 = vadd.xlane.f32.xlu0 %v932_v50 }
 0xe3b   :  { %v1526_v52 = vpop.xlane.xlu0 %1525 }
 0xe3c   :  { %v1527_v53 = vmul.f32 0.0625, %v1526_v52 }
 0xe3e   :  { %v1528_v54 = vadd.f32 1e-05, %v1527_v53 }
 0xe3f   :  { %v934_v55 = vpop.xlane.xlu0 %933 }
 0xe40   :  { %1993 = vrsqrt.f32 %v1528_v54  ;;  %v935_v5 = vmul.f32 0.0625, %v934_v55 }
 0xe42   :  { %v936_v56 = vsub.f32 %v931_v63, %v935_v5 }
 0xe44   :  { %v937_v58 = vmul.f32 %v936_v56, %v936_v56 }
 0xe46   :  { %v938_v59 = vsel %vm716_vm5, %v937_v58, 0.0 }
 0xe47   :  { %939 = vadd.xlane.f32.xlu0 %v938_v59 }
 0xe4a   :  { %v1994_v18 = vpop.eup %1993 }
 0xe4b   :  { %v1530_v60 = vmul.f32 %v1994_v18, %v1522_v47 }
 0xe4d   :  { %v1531_v16 = vmul.f32 %v2348_v25, %v1530_v60 }
 0xe4f   :  { %v1532_v30 = vadd.f32 %v2353_v28, %v1531_v16 }
 0xe51   :  { %1918 = vmatmul.mubr.msk.f32.vlgmr.msra.gmra.mrb[16].mxu0 %vm137_vm1, %v1532_v30 }
 0xed4   :  { %v940_v61 = vpop.xlane.xlu0 %939 }
 0xed5   :  { %v941_v51 = vmul.f32 0.0625, %v940_v61 }
 0xed7   :  { %v942_v62 = vadd.f32 1e-05, %v941_v51 }
 0xed9   :  { %1995 = vrsqrt.f32 %v942_v62 }
 0xee3   :  { %v1996_v2 = vpop.eup %1995 }
 0xee4   :  { %v944_v17 = vmul.f32 %v1996_v2, %v936_v56 }
 0xee6   :  { %v951_v6 = vmul.f32 %v1741_v3, %v944_v17 }
 0xee8   :  { %v958_v8 = vadd.f32 %v1742_v4, %v951_v6 }
 0xeea   :  { %959 = vst.msk [vmem:[%s2510_s24] sm:$0x3] %vm716_vm5, %v958_v8 }
 0xf24   :  { %v1602_v25 = vpop.f32.mrb[16].mxu0 }
 0xf25   :  { %v1603_v28 = vadd.f32 %v2368_v31, %v1602_v25  ;;  %v1919_v9 = vpop.f32.mrb[17].mxu0 }
 0xf27   :  { %v1606_v10 = vsel %vm716_vm5, %v1603_v28, 0.0 }
 0xf28   :  { %1607 = vadd.xlane.f32.xlu1 %v1606_v10 }
 0xfb5   :  { %v1608_v11 = vpop.xlane.xlu1 %1607 }
 0xfb6   :  { %v1609_v13 = vmul.f32 0.0625, %v1608_v11 }
 0xfb8   :  { %v1610_v27 = vsub.f32 %v1603_v28, %v1609_v13 }
 0xfba   :  { %v1611_v14 = vmul.f32 %v1610_v27, %v1610_v27 }
 0xfbc   :  { %v1612_v19 = vsel %vm716_vm5, %v1611_v14, 0.0 }
 0xfbd   :  { %1613 = vadd.xlane.f32.xlu1 %v1612_v19 }
0x104a   :  { %v1614_v20 = vpop.xlane.xlu1 %1613 }
0x104b   :  { %v1615_v15 = vmul.f32 0.0625, %v1614_v20 }
0x104d   :  { %v1616_v0 = vadd.f32 1e-05, %v1615_v15 }
0x104f   :  { %1997 = vrsqrt.f32 %v1616_v0 }
0x1059   :  { %v1998_v22 = vpop.eup %1997 }
0x105a   :  { %v1618_v23 = vmul.f32 %v1998_v22, %v1610_v27 }
0x105c   :  { %v1619_v24 = vmul.f32 %v2394_v48, %v1618_v23 }
0x105e   :  { %v1620_v31 = vadd.f32 %v2399_v12, %v1619_v24 }
0x1060   :  { %v1621_v26 = vmax.f32 %v1620_v31, 0.0 }
0x1062   :  { %1925 = vmatmul.mubr.msk.f32.vlgmr.msra.gmra.mrb[16].mxu1 %vm137_vm1, %v1621_v26 }
0x1135   :  { %v1691_v29 = vpop.f32.mrb[16].mxu1 }
0x1136   :  { %v1692_v32 = vadd.f32 %v1739_v57, %v1691_v29  ;;  %v1926_v33 = vpop.f32.mrb[17].mxu1 }
0x1138   :  { %v1695_v34 = vadd.f32 %v1692_v32, %v1532_v30 }
0x113a   :  { %v1696_v35 = vsel %vm716_vm5, %v1695_v34, 0.0 }
0x113b   :  { %1697 = vadd.xlane.f32.xlu1 %v1696_v35 }
0x11c8   :  { %v1698_v36 = vpop.xlane.xlu1 %1697 }
0x11c9   :  { %v1699_v37 = vmul.f32 0.0625, %v1698_v36 }
0x11cb   :  { %v1700_v7 = vsub.f32 %v1695_v34, %v1699_v37 }
0x11cd   :  { %v1701_v38 = vmul.f32 %v1700_v7, %v1700_v7 }
0x11cf   :  { %v1702_v21 = vsel %vm716_vm5, %v1701_v38, 0.0 }
0x11d0   :  { %1703 = vadd.xlane.f32.xlu1 %v1702_v21 }
0x125d   :  { %v1704_v48 = vpop.xlane.xlu1 %1703 }
0x125e   :  { %v1705_v39 = vmul.f32 0.0625, %v1704_v48 }
0x1260   :  { %v1706_v12 = vadd.f32 1e-05, %v1705_v39 }
0x1262   :  { %1999 = vrsqrt.f32 %v1706_v12 }
0x126c   :  { %v2000_v40 = vpop.eup %1999 }
0x126d   :  { %v1708_v41 = vmul.f32 %v2000_v40, %v1700_v7 }
0x126f   :  { %v1709_v43 = vmul.f32 %v1741_v3, %v1708_v41 }
0x1271   :  { %v1710_v44 = vadd.f32 %v1742_v4, %v1709_v43 }
0x1273   :  { %1758 = vst.msk [vmem:[%s2510_s24 + $0x2] sm:$0x3] %vm716_vm5, %v1710_v44 }
0x1274   :  { %1717 = vsyncpa [#allocation3], 1 }
0x1275   :  { %1718 = vsyncpa [#allocation5], 1 }

// kernel: encoder_forward.27
= control target key start
LH: loop header
LB: loop body
LE: loop exit
PB: predicated region body
PF: predicated region fallthrough
CT: control target
= control target key end

     0   :  { %s2530_s0 = inlined_call_operand.vmem [shape: f32[2,2,16], index: 0, kind: input, shape index: {}, may-alias: {0,1,2}]   ;;  %s2531_s1 = inlined_call_operand.vmem [shape: f32[2,2,16], index: 1, kind: input, shape index: {}, may-alias: {0,1,2}]   ;;  %s2532_s2 = inlined_call_operand.vmem [shape: f32[2,2,16], index: 2, kind: input, shape index: {}, may-alias: {0,1,2}]   ;;  %s2533_s3 = inlined_call_operand.vmem [shape: f32[2,2,2], index: 3, kind: input, shape index: {}]   ;;  %s2534_s4 = inlined_call_operand.vmem [shape: f32[16,16], index: 4, kind: input, shape index: {}]   ;;  %s2535_s5 = inlined_call_operand.vmem [shape: f32[1,16], index: 5, kind: input, shape index: {}]   ;;  %s2536_s6 = inlined_call_operand.vmem [shape: f32[16,16], index: 6, kind: input, shape index: {}]   ;;  %s2537_s7 = inlined_call_operand.vmem [shape: f32[1,16], index: 7, kind: input, shape index: {}]   ;;  %s2538_s8 = inlined_call_operand.vmem [shape: f32[16,16], index: 8, kind: input, shape index: {}]   ;;  %s2539_s9 = inlined_call_operand.vmem [shape: f32[1,16], index: 9, kind: input, shape index: {}]   ;;  %s2540_s10 = inlined_call_operand.vmem [shape: f32[16,1], index: 10, kind: input, shape index: {}]   ;;  %s2541_s11 = inlined_call_operand.vmem [shape: f32[1,16], index: 11, kind: input, shape index: {}]   ;;  %s2542_s12 = inlined_call_operand.vmem [shape: f32[16,16], index: 12, kind: input, shape index: {}]   ;;  %s2543_s13 = inlined_call_operand.vmem [shape: f32[1,16], index: 13, kind: input, shape index: {}]   ;;  %s2544_s14 = inlined_call_operand.vmem [shape: f32[1,16], index: 14, kind: input, shape index: {}]   ;;  %s2545_s15 = inlined_call_operand.vmem [shape: f32[1,16], index: 15, kind: input, shape index: {}]   ;;  %s2546_s16 = inlined_call_operand.vmem [shape: f32[16,16], index: 16, kind: input, shape index: {}]   ;;  %s2547_s17 = inlined_call_operand.vmem [shape: f32[1,16], index: 17, kind: input, shape index: {}]   ;;  %s2548_s18 = inlined_call_operand.vmem [shape: f32[1,16], index: 18, kind: input, shape index: {}]   ;;  %s2549_s19 = inlined_call_operand.vmem [shape: f32[1,16], index: 19, kind: input, shape index: {}]   ;;  %s2550_s20 = inlined_call_operand.vmem [shape: f32[16,16], index: 20, kind: input, shape index: {}]   ;;  %s2551_s21 = inlined_call_operand.hbm [shape: f32[1,16], index: 21, kind: input, shape index: {}]   ;;  %s2552_s22 = inlined_call_operand.hbm [shape: f32[1,16], index: 22, kind: input, shape index: {}]   ;;  %s2553_s23 = inlined_call_operand.hbm [shape: f32[1,16], index: 23, kind: input, shape index: {}]   ;;  %s2554_s24 = inlined_call_operand.vmem [shape: f32[2,2,16], index: 24, kind: output, shape index: {}]  }
   0x1   :  { %2562 = sst [smem:[#allocation9_spill]] %s2530_s0 }
   0x2   :  { %2563 = sst [smem:[#allocation10_spill]] %s2531_s1 }
   0x3   :  { %2564 = sst [smem:[#allocation11_spill]] %s2532_s2 }
   0x4   :  { %2565 = sst [smem:[#allocation12_spill]] %s2533_s3 }
   0x5   :  { %2566 = sst [smem:[#allocation13_spill]] %s2534_s4 }
   0x6   :  { %2567 = sst [smem:[#allocation14_spill]] %s2535_s5 }
   0x7   :  { %2568 = sst [smem:[#allocation15_spill]] %s2536_s6 }
   0x8   :  { %2569 = sst [smem:[#allocation16_spill]] %s2537_s7 }
   0x9   :  { %2570 = sst [smem:[#allocation17_spill]] %s2538_s8 }
   0xa   :  { %29 = vsyncpa [#allocation3], 0 }
   0xb   :  { %30 = vsyncpa [#allocation5], 0  ;;  %s2083_s5 = smov [#allocation4]   ;;  %s2084_s27 = smov [#allocation2]  }
   0xc   :  { %s89_s26 = sshll.u32 %s2083_s5, 4  ;;  %s79_s28 = sshll.u32 %s2084_s27, 4  ;;  %s90_s26 = int_to_ptr.vmem [resolvable:$true] %s89_s26  ;;  %s80_s28 = int_to_ptr.vmem [resolvable:$true] %s79_s28 }
   0xd   :  { %s2013_s29 = scalar_lea.hbm %s2552_s22, 16 }
   0xe   :  { %p2014_p0 = scmp.ne.s32.totalorder %s2552_s22, %s2013_s29  ;;  %p2017_p1 = scmp.lt.u32.totalorder %s2013_s29, %s2552_s22 }
  0x10   :  { %p2019_p2 = pnand %p2017_p1, %p2014_p0 }
  0x12   :  { %2022 = shalt.err (!%p2019_p2)
}
  0x13   :  { %s2023_s25 = scalar_lea.vmem %s90_s26, 16  ;;  %s2027_s8 = scalar_lea.vmem %s90_s26, 32 }
  0x14   :  { %p2024_p3 = scmp.ne.s32.totalorder %s90_s26, %s2023_s25  ;;  %p2028_p4 = scmp.lt.s32.totalorder %s90_s26, %s90_s26 }
  0x15   :  { %p2029_p5 = scmp.lt.s32.totalorder %s2027_s8, %s2023_s25 }
  0x17   :  { %p2030_p6 = por %p2029_p5, %p2028_p4 }
  0x19   :  { %p2031_p7 = pnand %p2030_p6, %p2024_p3 }
  0x1b   :  { %2034 = shalt.err (!%p2031_p7)
}
  0x1c   :  { %92 = dma.hbm_to_vmem [thread:$0]  %s2552_s22, 16, %s90_s26, [#allocation5]  }
  0x1d   :  { %s2035_s6 = scalar_lea.hbm %s2551_s21, 16 }
  0x1e   :  { %p2036_p8 = scmp.ne.s32.totalorder %s2551_s21, %s2035_s6  ;;  %p2039_p9 = scmp.lt.u32.totalorder %s2035_s6, %s2551_s21 }
  0x20   :  { %p2041_p10 = pnand %p2039_p9, %p2036_p8 }
  0x22   :  { %2044 = shalt.err (!%p2041_p10)
}
  0x23   :  { %s2045_s30 = scalar_lea.vmem %s80_s28, 16  ;;  %s2049_s3 = scalar_lea.vmem %s80_s28, 32 }
  0x24   :  { %p2046_p11 = scmp.ne.s32.totalorder %s80_s28, %s2045_s30  ;;  %p2050_p12 = scmp.lt.s32.totalorder %s80_s28, %s80_s28 }
  0x25   :  { %p2051_p13 = scmp.lt.s32.totalorder %s2049_s3, %s2045_s30 }
  0x27   :  { %p2052_p0 = por %p2051_p13, %p2050_p12 }
  0x29   :  { %p2053_p1 = pnand %p2052_p0, %p2046_p11 }
  0x2b   :  { %2056 = shalt.err (!%p2053_p1)
}
  0x2c   :  { %82 = dma.hbm_to_vmem [thread:$0]  %s2551_s21, 16, %s80_s28, [#allocation3]  }
  0x2d   :  { %s2085_s25 = smov [#allocation6]   ;;  %s2057_s5 = scalar_lea.hbm %s2553_s23, 16 }
  0x2e   :  { %s99_s8 = sshll.u32 %s2085_s25, 4  ;;  %p2058_p2 = scmp.ne.s32.totalorder %s2553_s23, %s2057_s5  ;;  %s100_s8 = int_to_ptr.vmem [resolvable:$true] %s99_s8 }
  0x2f   :  { %p2061_p3 = scmp.lt.u32.totalorder %s2057_s5, %s2553_s23 }
  0x31   :  { %p2063_p4 = pnand %p2061_p3, %p2058_p2 }
  0x33   :  { %2066 = shalt.err (!%p2063_p4)
}
  0x34   :  { %s2067_s0 = scalar_lea.vmem %s100_s8, 16  ;;  %s2071_s21 = scalar_lea.vmem %s100_s8, 32 }
  0x35   :  { %p2068_p5 = scmp.ne.s32.totalorder %s100_s8, %s2067_s0  ;;  %p2072_p6 = scmp.lt.s32.totalorder %s100_s8, %s100_s8 }
  0x36   :  { %p2073_p7 = scmp.lt.s32.totalorder %s2071_s21, %s2067_s0 }
  0x38   :  { %p2074_p8 = por %p2073_p7, %p2072_p6 }
  0x3a   :  { %p2075_p9 = pnand %p2074_p8, %p2068_p5 }
  0x3c   :  { %2078 = shalt.err (!%p2075_p9)
}
  0x3d   :  { %102 = dma.hbm_to_vmem [thread:$0]  %s2553_s23, 16, %s100_s8, [#allocation5]  }
  0x3e   :  { %2079 = dma.done.wait [#allocation3], 16  }
  0x3f   :  { %2080 = vsyncadd [#allocation3], 4294967280 }
  0x40   :  { %2081 = dma.done.wait [#allocation5], 32  }
  0x41   :  { %2082 = vsyncadd [#allocation5], 4294967264  ;;  %v2086_v0 = vmov 0.0|0.0   ;;  %vm2087_vm0 = vmmov 0   ;;  %v2088_v1 = vmov 0.0   ;;  %s2571_s23 = sld [smem:[#allocation15_spill]] }
  0x42   :  { %1941 = vmatprep.subr.bf16.mxu1 %v2086_v0  ;;  %1938 = vmatprep.subr.bf16.mxu0 %v2086_v0  ;;  %s2572_s4 = sld [smem:[#allocation13_spill]]  ;;  %s2573_s2 = sld [smem:[#allocation17_spill]]  ;;  %vm148_vm1 = vcmask 130048   ;;  %v121_v13 = vld [vmem:[%s2540_s10] sm:$0xff]  ;;  %v122_v14 = vld [vmem:[%s2540_s10 + $0x8] sm:$0xff]  ;;  %vm567_vm2 = vcmask 1041408  }
  0x43   :  { %1831 = vmatprep.mubr.msk.f32.mxu1 %vm2087_vm0, %v2088_v1  ;;  %1824 = vmatprep.mubr.msk.f32.mxu0 %vm2087_vm0, %v2088_v1  ;;  %s2574_s7 = sld [smem:[#allocation10_spill]]  ;;  %s2576_s5 = sld [smem:[#allocation11_spill]]  ;;  %v2310_v16 = vpack.c.bf16 %v122_v14, %v121_v13  ;;  %v2341_v27 = vld [vmem:[%s2539_s9] ss:$0 sm:$0xff]  ;;  %vm530_vm3 = vcmask 9216   ;;  %v2089_v37 = vmov 0  }
  0x44   :  { %s2577_s10 = sld [smem:[#allocation16_spill]]  ;;  %s2578_s0 = sld [smem:[#allocation14_spill]]  ;;  %1987 = vset.pattern.permute.xlu0 %v2089_v37  ;;  %1988 = vset.pattern.permute.xlu1 %v2089_v37  ;;  %vm563_vm4 = vcmask 15360   ;;  %v124_v49 = vld [vmem:[%s2542_s12] sm:$0xff]  ;;  %v125_v50 = vld [vmem:[%s2542_s12 + $0x8] sm:$0xff]  ;;  %vm727_vm5 = vcmask 123904  }
  0x45   :  { %s2579_s22 = sld [smem:[#allocation12_spill]]  ;;  %v2360_v51 = vpack.c.bf16 %v125_v50, %v124_v49  ;;  %v2367_v57 = vld [vmem:[%s2541_s11] ss:$0 sm:$0xff] }
  0x46   :  { %v2376_v63 = vld [vmem:[%s2543_s13] ss:$0 sm:$0xff] }
  0x47   :  { %v115_v2 = vld [vmem:[%s2571_s23] sm:$0xff]  ;;  %v116_v3 = vld [vmem:[%s2571_s23 + $0x8] sm:$0xff]  ;;  %s2575_s23 = sld [smem:[#allocation9_spill]] }
  0x48   :  { %v112_v4 = vld [vmem:[%s2572_s4] sm:$0xff]  ;;  %v2266_v5 = vpack.c.bf16 %v116_v3, %v115_v2  ;;  %v113_v6 = vld [vmem:[%s2572_s4 + $0x8] sm:$0xff] }
  0x49   :  { %v2271_v7 = vpack.c.bf16 %v113_v6, %v112_v4  ;;  %v118_v8 = vld [vmem:[%s2573_s2] sm:$0xff]  ;;  %v119_v9 = vld [vmem:[%s2573_s2 + $0x8] sm:$0xff] }
  0x4a   :  { %1943 = vmatpush3.bf16.msra.mxu1 %v2266_v5  ;;  %v140_v10 = vld [vmem:[%s2574_s7] sm:$0x3]  ;;  %v2287_v12 = vpack.c.bf16 %v119_v9, %v118_v8 }
  0x4b   :  { %1940 = vmatpush3.bf16.msra.mxu0 %v2271_v7  ;;  %1841 = vmatprep.subr.mxu1 %v2088_v1  ;;  %v2308_v15 = vld [vmem:[%s2576_s5] sm:$0x3] }
  0x4c   :  { %1944 = vmatprep.subr.bf16.mxu0 %v2086_v0  ;;  %v2321_v17 = vld [vmem:[%s2577_s10] ss:$0 sm:$0xff] }
  0x4d   :  { %v139_v11 = vld [vmem:[%s2575_s23] sm:$0x3]  ;;  %1832 = vmatmul.mubr.msk.f32.vlgmr.msra.gmra.mrb[0].mxu1 %vm148_vm1, %v140_v10 }
  0x4e   :  { %1825 = vmatmul.mubr.msk.f32.vlgmr.msra.gmra.mrb[0].mxu0 %vm148_vm1, %v139_v11  ;;  %1843 = vmatprep.mubr.msk.f32.mxu1 %vm2087_vm0, %v2088_v1  ;;  %v2326_v18 = vld [vmem:[%s2578_s0] ss:$0 sm:$0xff] }
  0x4f   :  { %1946 = vmatpush3.bf16.msra.mxu0 %v2287_v12  ;;  %1838 = vmatprep.mubr.msk.f32.mxu0 %vm2087_vm0, %v2088_v1  ;;  %v457_v32 = vld [vmem:[%s2579_s22] sm:$0x3] }
  0x50   :  { %1947 = vmatprep.subr.bf16.mxu0 %v2086_v0 }
  0x52   :  { %1839 = vmatmul.mubr.msk.f32.vlgmr.msra.gmra.mrb[2].mxu0 %vm148_vm1, %v2308_v15 }
  0x53   :  { %1949 = vmatpush3.bf16.msra.mxu0 %v2310_v16  ;;  %1850 = vmatprep.mubr.msk.f32.mxu0 %vm2087_vm0, %v2088_v1 }
  0x54   :  { %1950 = vmatprep.subr.bf16.mxu0 %v2086_v0 }
 0x120   :  { %v297_v19 = vpop.f32.mrb[0].mxu1 }
 0x121   :  { %v298_v20 = vadd.f32 %v2321_v17, %v297_v19  ;;  %v1833_v21 = vpop.f32.mrb[1].mxu1  ;;  %v218_v22 = vpop.f32.mrb[0].mxu0  ;;  %v129_v19 = vld [vmem:[%s2546_s16] sm:$0xff] }
 0x122   :  { %v219_v23 = vadd.f32 %v2326_v18, %v218_v22  ;;  %v1826_v24 = vpop.f32.mrb[1].mxu0 }
 0x123   :  { %1842 = vmatpush3.xpose.msk.msra.mxu1 %vm148_vm1, %v298_v20  ;;  %v130_v20 = vld [vmem:[%s2546_s16 + $0x8] sm:$0xff] }
 0x124   :  { %1851 = vmatmul.mubr.msk.f32.vlgmr.msra.gmra.mrb[4].mxu0 %vm148_vm1, %v219_v23  ;;  %1853 = vmatprep.subr.mxu1 %v2088_v1  ;;  %v2388_v21 = vpack.c.bf16 %v130_v20, %v129_v19 }
 0x125   :  { %1862 = vmatprep.mubr.msk.f32.mxu0 %vm2087_vm0, %v2088_v1  ;;  %v376_v25 = vpop.f32.mrb[2].mxu0  ;;  %1952 = vmatpush3.bf16.msra.mxu0 %v2360_v51 }
 0x126   :  { %1844 = vmatmul.mubr.msk.f32.vlgmr.msra.gmra.mrb[2].mxu1 %vm148_vm1, %v219_v23  ;;  %v1840_v26 = vpop.f32.mrb[3].mxu0  ;;  %v377_v28 = vadd.f32 %v2341_v27, %v376_v25  ;;  %1956 = vmatprep.subr.bf16.mxu0 %v2086_v0  ;;  %v2395_v25 = vld [vmem:[%s2544_s14] ss:$0 sm:$0xff] }
 0x127   :  { %1855 = vmatprep.mubr.msk.f32.mxu1 %vm2087_vm0, %v2088_v1 }
 0x128   :  { %1854 = vmatpush3.msk.msra.mxu1 %vm567_vm2, %v377_v28  ;;  %v2400_v28 = vld [vmem:[%s2545_s15] ss:$0 sm:$0xff] }
 0x129   :  { %1953 = vmatprep.subr.bf16.mxu1 %v2086_v0 }
 0x1f7   :  { %v525_v29 = vpop.f32.mrb[4].mxu0 }
 0x1f8   :  { %v1852_v30 = vpop.f32.mrb[5].mxu0  ;;  %v529_v38 = vmul.f32 0.25, %v525_v29 }
 0x1f9   :  { %v452_v31 = vpop.f32.mrb[2].mxu1 }
 0x1fa   :  { %v456_v33 = vmul.f32 0.25, %v452_v31  ;;  %v1845_v34 = vpop.f32.mrb[3].mxu1  ;;  %v2415_v31 = vld [vmem:[%s2547_s17] ss:$0 sm:$0xff] }
 0x1fc   :  { %v458_v35 = vadd.f32 %v457_v32, %v456_v33 }
 0x1fe   :  { %v531_v36 = vsel %vm530_vm3, %v458_v35, -inf }
 0x1ff   :  { %532 = vmax.xlane.f32.xlu0 %v531_v36 }
 0x28c   :  { %v533_v39 = vpop.xlane.xlu0 %532 }
 0x28d   :  { %v534_v40 = vmax.f32 %v533_v39, %v529_v38 }
 0x28f   :  { %v543_v41 = vsub.f32 %v529_v38, %v534_v40  ;;  %537 = vperm.xlu0 %1987, %v534_v40   ;;  %v134_v40 = vld [vmem:[%s2550_s20] sm:$0xff] }
 0x291   :  { %v544_v47 = vmul.f32 1.442695, %v543_v41  ;;  %v135_v41 = vld [vmem:[%s2550_s20 + $0x8] sm:$0xff] }
 0x30e   :  { %v538_v42 = vpop.permute.xlu0 %537 }
 0x30f   :  { %v540_v43 = vsub.f32 %v458_v35, %v538_v42  ;;  %v2426_v42 = vpack.c.bf16 %v135_v41, %v134_v40 }
 0x311   :  { %v541_v44 = vmul.f32 1.442695, %v540_v43  ;;  %v1754_v43 = vld [vmem:[%s2575_s23 + $0x2] sm:$0x3] }
 0x313   :  { %1989 = vpow2.f32 %v541_v44 }
 0x314   :  { %1991 = vpow2.f32 %v544_v47 }
 0x31d   :  { %v1990_v45 = vpop.eup %1989 }
 0x31e   :  { %1856 = vmatmul.mubr.msk.f32.vlgmr.msra.gmra.mrb[4].mxu1 %vm563_vm4, %v1990_v45  ;;  %v546_v46 = vsel %vm530_vm3, %v1990_v45, 0.0  ;;  %v1992_v48 = vpop.eup %1991 }
 0x31f   :  { %547 = vadd.xlane.f32.xlu1 %v546_v46  ;;  %1869 = vmatprep.mubr.msk.f32.mxu1 %vm2087_vm0, %v2088_v1 }
 0x320   :  { %1955 = vmatpush3.bf16.msra.mxu1 %v2388_v21 }
 0x321   :  { %1959 = vmatprep.subr.bf16.mxu1 %v2086_v0 }
 0x330   :  { %553 = vperm.xlu1 %1988, %v1992_v48  }
 0x3ac   :  { %v548_v52 = vpop.xlane.xlu1 %547 }
 0x3ad   :  { %v549_v53 = vadd.f32 %v1992_v48, %v548_v52  ;;  %v2441_v48 = vld [vmem:[%s2548_s18] ss:$0 sm:$0xff] }
 0x3af   :  { %1993 = vrcp.f32 %v549_v53 }
 0x3b0   :  { %v554_v58 = vpop.permute.xlu1 %553 }
 0x3b1   :  { %v562_v59 = vmul.f32 %v2367_v57, %v554_v58 }
 0x3b9   :  { %v1994_v54 = vpop.eup %1993 }
 0x3ba   :  { %643 = vperm.xlu1 %1988, %v1994_v54   ;;  %v1755_v54 = vld [vmem:[%s2574_s7 + $0x2] sm:$0x3] }
 0x3f1   :  { %v637_v55 = vpop.f32.mrb[4].mxu1 }
 0x3f2   :  { %v1857_v56 = vpop.f32.mrb[5].mxu1  ;;  %v638_v60 = vadd.f32 %v637_v55, %v562_v59  ;;  %v2464_v55 = vld [vmem:[%s2576_s5 + $0x2] sm:$0x3] }
 0x439   :  { %v644_v61 = vpop.permute.xlu1 %643 }
 0x43a   :  { %v646_v62 = vmul.f32 %v644_v61, %v638_v60 }
 0x43c   :  { %1863 = vmatmul.mubr.msk.f32.vlgmr.msra.gmra.mrb[6].mxu0 %vm148_vm1, %v646_v62 }
 0x43d   :  { %1876 = vmatprep.mubr.msk.f32.mxu0 %vm2087_vm0, %v2088_v1  ;;  %1958 = vmatpush3.bf16.msra.mxu0 %v2426_v42 }
 0x43e   :  { %1962 = vmatprep.subr.bf16.mxu0 %v2086_v0 }
 0x50f   :  { %v722_v2 = vpop.f32.mrb[6].mxu0 }
 0x510   :  { %v723_v3 = vadd.f32 %v2376_v63, %v722_v2  ;;  %v1864_v4 = vpop.f32.mrb[7].mxu0 }
 0x512   :  { %v726_v6 = vadd.f32 %v723_v3, %v2308_v15 }
 0x514   :  { %v728_v8 = vsel %vm727_vm5, %v726_v6, 0.0 }
 0x515   :  { %729 = vadd.xlane.f32.xlu1 %v728_v8 }
 0x5a2   :  { %v730_v9 = vpop.xlane.xlu1 %729 }
 0x5a3   :  { %v732_v10 = vmul.f32 0.0625, %v730_v9 }
 0x5a5   :  { %v733_v11 = vsub.f32 %v726_v6, %v732_v10  ;;  %v1762_v6 = vld [vmem:[%s2579_s22 + $0x2] sm:$0x3] }
 0x5a7   :  { %v734_v13 = vmul.f32 %v733_v11, %v733_v11 }
 0x5a9   :  { %v735_v14 = vsel %vm727_vm5, %v734_v13, 0.0 }
 0x5aa   :  { %736 = vadd.xlane.f32.xlu0 %v735_v14 }
 0x637   :  { %v737_v15 = vpop.xlane.xlu0 %736 }
 0x638   :  { %v738_v22 = vmul.f32 0.0625, %v737_v15 }
 0x63a   :  { %v739_v23 = vadd.f32 1e-05, %v738_v22 }
 0x63c   :  { %1995 = vrsqrt.f32 %v739_v23 }
 0x646   :  { %v1996_v24 = vpop.eup %1995 }
 0x647   :  { %v741_v26 = vmul.f32 %v1996_v24, %v733_v11 }
 0x649   :  { %v748_v29 = vmul.f32 %v2395_v25, %v741_v26 }
 0x64b   :  { %v2404_v30 = vadd.f32 %v2400_v28, %v748_v29 }
 0x64d   :  { %1870 = vmatmul.mubr.msk.f32.vlgmr.msra.gmra.mrb[6].mxu1 %vm148_vm1, %v2404_v30 }
 0x64e   :  { %1961 = vmatpush3.bf16.msra.mxu1 %v2271_v7  ;;  %1883 = vmatprep.mubr.msk.f32.mxu1 %vm2087_vm0, %v2088_v1 }
 0x64f   :  { %1965 = vmatprep.subr.bf16.mxu1 %v2086_v0 }
 0x651   :  { %1884 = vmatmul.mubr.msk.f32.vlgmr.msra.gmra.mrb[8].mxu1 %vm148_vm1, %v1754_v43 }
 0x652   :  { %1967 = vmatpush3.bf16.msra.mxu1 %v2287_v12  ;;  %1897 = vmatprep.mubr.msk.f32.mxu1 %vm2087_vm0, %v2088_v1  ;;  %v2446_v12 = vld [vmem:[%s2549_s19] ss:$0 sm:$0xff] }
 0x653   :  { %1968 = vmatprep.subr.bf16.mxu1 %v2086_v0 }
 0x655   :  { %1898 = vmatmul.mubr.msk.f32.vlgmr.msra.gmra.mrb[10].mxu1 %vm148_vm1, %v2464_v55 }
 0x656   :  { %1970 = vmatpush3.bf16.msra.mxu1 %v2310_v16  ;;  %1909 = vmatprep.mubr.msk.f32.mxu1 %vm2087_vm0, %v2088_v1 }
 0x657   :  { %1971 = vmatprep.subr.bf16.mxu1 %v2086_v0 }
 0x720   :  { %v831_v32 = vpop.f32.mrb[6].mxu1 }
 0x721   :  { %v832_v33 = vadd.f32 %v2415_v31, %v831_v32  ;;  %v1871_v34 = vpop.f32.mrb[7].mxu1 }
 0x723   :  { %v835_v35 = vsel %vm727_vm5, %v832_v33, 0.0 }
 0x724   :  { %836 = vadd.xlane.f32.xlu1 %v835_v35 }
 0x7b1   :  { %v837_v36 = vpop.xlane.xlu1 %836 }
 0x7b2   :  { %v838_v37 = vmul.f32 0.0625, %v837_v36 }
 0x7b4   :  { %v839_v7 = vsub.f32 %v832_v33, %v838_v37 }
 0x7b6   :  { %v840_v38 = vmul.f32 %v839_v7, %v839_v7 }
 0x7b8   :  { %v841_v39 = vsel %vm727_vm5, %v840_v38, 0.0 }
 0x7b9   :  { %842 = vadd.xlane.f32.xlu1 %v841_v39 }
 0x846   :  { %v843_v44 = vpop.xlane.xlu1 %842 }
 0x847   :  { %v844_v45 = vmul.f32 0.0625, %v843_v44 }
 0x849   :  { %v845_v46 = vadd.f32 1e-05, %v844_v45 }
 0x84b   :  { %1997 = vrsqrt.f32 %v845_v46 }
 0x855   :  { %v1998_v47 = vpop.eup %1997 }
 0x856   :  { %v847_v49 = vmul.f32 %v1998_v47, %v839_v7 }
 0x858   :  { %v854_v50 = vmul.f32 %v2441_v48, %v847_v49 }
 0x85a   :  { %v861_v52 = vadd.f32 %v2446_v12, %v854_v50 }
 0x85c   :  { %v862_v53 = vmax.f32 %v861_v52, 0.0 }
 0x85e   :  { %1877 = vmatmul.mubr.msk.f32.vlgmr.msra.gmra.mrb[8].mxu0 %vm148_vm1, %v862_v53 }
 0x85f   :  { %1964 = vmatpush3.bf16.msra.mxu0 %v2266_v5  ;;  %1890 = vmatprep.mubr.msk.f32.mxu0 %vm2087_vm0, %v2088_v1  ;;  %v1046_v5 = vpop.f32.mrb[8].mxu1 }
 0x860   :  { %1900 = vmatprep.subr.mxu0 %v2088_v1  ;;  %v1047_v56 = vadd.f32 %v2326_v18, %v1046_v5  ;;  %v1885_v58 = vpop.f32.mrb[9].mxu1 }
 0x862   :  { %1891 = vmatmul.mubr.msk.f32.vlgmr.msra.gmra.mrb[10].mxu0 %vm148_vm1, %v1755_v54  ;;  %1910 = vmatmul.mubr.msk.f32.vlgmr.msra.gmra.mrb[12].mxu1 %vm148_vm1, %v1047_v56 }
 0x863   :  { %1902 = vmatprep.mubr.msk.f32.mxu0 %vm2087_vm0, %v2088_v1  ;;  %1973 = vmatpush3.bf16.msra.mxu1 %v2360_v51  ;;  %v1192_v51 = vpop.f32.mrb[10].mxu1 }
 0x864   :  { %1921 = vmatprep.mubr.msk.f32.mxu1 %vm2087_vm0, %v2088_v1  ;;  %1977 = vmatprep.subr.bf16.mxu1 %v2086_v0  ;;  %v1193_v62 = vadd.f32 %v2341_v27, %v1192_v51  ;;  %v1899_v2 = vpop.f32.mrb[11].mxu1 }
 0x931   :  { %v2478_v59 = vpop.f32.mrb[8].mxu0 }
 0x932   :  { %v1878_v18 = vpop.f32.mrb[9].mxu0 }
 0x935   :  { %v1119_v60 = vpop.f32.mrb[10].mxu0  ;;  %v1342_v3 = vpop.f32.mrb[12].mxu1 }
 0x936   :  { %v1120_v16 = vadd.f32 %v2321_v17, %v1119_v60  ;;  %v1892_v61 = vpop.f32.mrb[11].mxu0  ;;  %v1911_v17 = vpop.f32.mrb[13].mxu1  ;;  %v1346_v13 = vmul.f32 0.25, %v1342_v3  ;;  %v1752_v3 = vld [vmem:[#allocation4] ss:$0 sm:$0xff] }
 0x938   :  { %1901 = vmatpush3.xpose.msk.msra.mxu0 %vm148_vm1, %v1120_v16 }
 0x939   :  { %1912 = vmatprep.subr.mxu0 %v2088_v1 }
 0x93b   :  { %1903 = vmatmul.mubr.msk.f32.vlgmr.msra.gmra.mrb[12].mxu0 %vm148_vm1, %v1047_v56 }
 0x93c   :  { %1914 = vmatprep.mubr.msk.f32.mxu0 %vm2087_vm0, %v2088_v1  ;;  %1913 = vmatpush3.msk.msra.mxu0 %vm567_vm2, %v1193_v62 }
 0x93d   :  { %1974 = vmatprep.subr.bf16.mxu0 %v2086_v0 }
 0xa0e   :  { %v1268_v4 = vpop.f32.mrb[12].mxu0 }
 0xa0f   :  { %v1272_v8 = vmul.f32 0.25, %v1268_v4  ;;  %v1904_v9 = vpop.f32.mrb[13].mxu0  ;;  %v1753_v4 = vld [vmem:[#allocation6] ss:$0 sm:$0xff] }
 0xa11   :  { %v1275_v10 = vadd.f32 %v1762_v6, %v1272_v8 }
 0xa13   :  { %v1347_v11 = vsel %vm530_vm3, %v1275_v10, -inf }
 0xa14   :  { %1348 = vmax.xlane.f32.xlu1 %v1347_v11 }
 0xaa1   :  { %v1349_v27 = vpop.xlane.xlu1 %1348 }
 0xaa2   :  { %v1350_v14 = vmax.f32 %v1349_v27, %v1346_v13 }
 0xaa4   :  { %v1359_v19 = vsub.f32 %v1346_v13, %v1350_v14  ;;  %1353 = vperm.xlu1 %1988, %v1350_v14  }
 0xaa6   :  { %v1360_v24 = vmul.f32 1.442695, %v1359_v19 }
 0xb23   :  { %v1354_v20 = vpop.permute.xlu1 %1353 }
 0xb24   :  { %v1356_v15 = vsub.f32 %v1275_v10, %v1354_v20 }
 0xb26   :  { %v1357_v0 = vmul.f32 1.442695, %v1356_v15 }
 0xb28   :  { %1999 = vpow2.f32 %v1357_v0 }
 0xb29   :  { %2001 = vpow2.f32 %v1360_v24 }
 0xb32   :  { %v2000_v22 = vpop.eup %1999 }
 0xb33   :  { %1915 = vmatmul.mubr.msk.f32.vlgmr.msra.gmra.mrb[14].mxu0 %vm563_vm4, %v2000_v22  ;;  %v1362_v23 = vsel %vm530_vm3, %v2000_v22, 0.0  ;;  %v2002_v26 = vpop.eup %2001 }
 0xb34   :  { %1363 = vadd.xlane.f32.xlu0 %v1362_v23  ;;  %1976 = vmatpush3.bf16.msra.mxu0 %v2388_v21 }
 0xb35   :  { %1928 = vmatprep.mubr.msk.f32.mxu0 %vm2087_vm0, %v2088_v1 }
 0xb4a   :  { %1369 = vperm.xlu0 %1987, %v2002_v26  }
 0xbc1   :  { %v1364_v29 = vpop.xlane.xlu0 %1363 }
 0xbc2   :  { %v1365_v32 = vadd.f32 %v2002_v26, %v1364_v29 }
 0xbc4   :  { %2003 = vrcp.f32 %v1365_v32 }
 0xbc9   :  { %v1370_v36 = vpop.permute.xlu0 %1369 }
 0xbca   :  { %v1372_v37 = vmul.f32 %v2367_v57, %v1370_v36  ;;  %v1750_v57 = vld [vmem:[#allocation2] ss:$0 sm:$0xff] }
 0xbcb   :  { %v939_v47 = vadd.f32 %v1750_v57, %v2478_v59 }
 0xbce   :  { %v2004_v33 = vpop.eup %2003 }
 0xbcf   :  { %1451 = vperm.xlu1 %1988, %v2004_v33  }
 0xc06   :  { %v1445_v34 = vpop.f32.mrb[14].mxu0 }
 0xc07   :  { %v1916_v35 = vpop.f32.mrb[15].mxu0  ;;  %v1446_v7 = vadd.f32 %v1445_v34, %v1372_v37 }
 0xc4e   :  { %v1452_v38 = vpop.permute.xlu1 %1451 }
 0xc4f   :  { %v1454_v21 = vmul.f32 %v1452_v38, %v1446_v7 }
 0xc51   :  { %1922 = vmatmul.mubr.msk.f32.vlgmr.msra.gmra.mrb[14].mxu1 %vm148_vm1, %v1454_v21 }
 0xc52   :  { %1979 = vmatpush3.bf16.msra.mxu1 %v2426_v42  ;;  %1935 = vmatprep.mubr.msk.f32.mxu1 %vm2087_vm0, %v2088_v1  ;;  %v942_v1 = vadd.f32 %v939_v47, %v2404_v30 }
 0xd24   :  { %v1524_v39 = vpop.f32.mrb[14].mxu1 }
 0xd25   :  { %v1525_v40 = vadd.f32 %v2376_v63, %v1524_v39  ;;  %v1923_v41 = vpop.f32.mrb[15].mxu1  ;;  %v943_v63 = vsel %vm727_vm5, %v942_v1, 0.0 }
 0xd27   :  { %v1528_v43 = vadd.f32 %v2464_v55, %v1525_v40 }
 0xd29   :  { %v1529_v44 = vsel %vm727_vm5, %v1528_v43, 0.0 }
 0xd2a   :  { %1530 = vadd.xlane.f32.xlu1 %v1529_v44 }
 0xdb7   :  { %v1531_v45 = vpop.xlane.xlu1 %1530 }
 0xdb8   :  { %v1532_v46 = vmul.f32 0.0625, %v1531_v45 }
 0xdba   :  { %v1533_v49 = vsub.f32 %v1528_v43, %v1532_v46 }
 0xdbc   :  { %v1534_v50 = vmul.f32 %v1533_v49, %v1533_v49 }
 0xdbe   :  { %v1535_v42 = vsel %vm727_vm5, %v1534_v50, 0.0 }
 0xdbf   :  { %1536 = vadd.xlane.f32.xlu0 %v1535_v42 }
 0xdc3   :  { %944 = vadd.xlane.f32.xlu0 %v943_v63 }
 0xe4c   :  { %v1537_v52 = vpop.xlane.xlu0 %1536 }
 0xe4d   :  { %v1538_v53 = vmul.f32 0.0625, %v1537_v52 }
 0xe4f   :  { %v1539_v54 = vadd.f32 1e-05, %v1538_v53 }
 0xe50   :  { %v945_v55 = vpop.xlane.xlu0 %944 }
 0xe51   :  { %2005 = vrsqrt.f32 %v1539_v54  ;;  %v946_v5 = vmul.f32 0.0625, %v945_v55 }
 0xe53   :  { %v947_v56 = vsub.f32 %v942_v1, %v946_v5 }
 0xe55   :  { %v948_v58 = vmul.f32 %v947_v56, %v947_v56 }
 0xe57   :  { %v949_v59 = vsel %vm727_vm5, %v948_v58, 0.0 }
 0xe58   :  { %950 = vadd.xlane.f32.xlu0 %v949_v59 }
 0xe5b   :  { %v2006_v18 = vpop.eup %2005 }
 0xe5c   :  { %v1541_v60 = vmul.f32 %v2006_v18, %v1533_v49 }
 0xe5e   :  { %v1542_v16 = vmul.f32 %v2395_v25, %v1541_v60 }
 0xe60   :  { %v1543_v30 = vadd.f32 %v2400_v28, %v1542_v16 }
 0xe62   :  { %1929 = vmatmul.mubr.msk.f32.vlgmr.msra.gmra.mrb[16].mxu0 %vm148_vm1, %v1543_v30 }
 0xee5   :  { %v951_v61 = vpop.xlane.xlu0 %950 }
 0xee6   :  { %v952_v51 = vmul.f32 0.0625, %v951_v61 }
 0xee8   :  { %v953_v62 = vadd.f32 1e-05, %v952_v51 }
 0xeea   :  { %2007 = vrsqrt.f32 %v953_v62 }
 0xef4   :  { %v2008_v2 = vpop.eup %2007 }
 0xef5   :  { %v955_v17 = vmul.f32 %v2008_v2, %v947_v56 }
 0xef7   :  { %v962_v6 = vmul.f32 %v1752_v3, %v955_v17 }
 0xef9   :  { %v969_v8 = vadd.f32 %v1753_v4, %v962_v6 }
 0xefb   :  { %970 = vst.msk [vmem:[%s2554_s24] sm:$0x3] %vm727_vm5, %v969_v8 }
 0xf35   :  { %v1613_v25 = vpop.f32.mrb[16].mxu0 }
 0xf36   :  { %v1614_v28 = vadd.f32 %v2415_v31, %v1613_v25  ;;  %v1930_v9 = vpop.f32.mrb[17].mxu0 }
 0xf38   :  { %v1617_v10 = vsel %vm727_vm5, %v1614_v28, 0.0 }
 0xf39   :  { %1618 = vadd.xlane.f32.xlu1 %v1617_v10 }
 0xfc6   :  { %v1619_v11 = vpop.xlane.xlu1 %1618 }
 0xfc7   :  { %v1620_v13 = vmul.f32 0.0625, %v1619_v11 }
 0xfc9   :  { %v1621_v27 = vsub.f32 %v1614_v28, %v1620_v13 }
 0xfcb   :  { %v1622_v14 = vmul.f32 %v1621_v27, %v1621_v27 }
 0xfcd   :  { %v1623_v19 = vsel %vm727_vm5, %v1622_v14, 0.0 }
 0xfce   :  { %1624 = vadd.xlane.f32.xlu1 %v1623_v19 }
0x105b   :  { %v1625_v20 = vpop.xlane.xlu1 %1624 }
0x105c   :  { %v1626_v15 = vmul.f32 0.0625, %v1625_v20 }
0x105e   :  { %v1627_v0 = vadd.f32 1e-05, %v1626_v15 }
0x1060   :  { %2009 = vrsqrt.f32 %v1627_v0 }
0x106a   :  { %v2010_v22 = vpop.eup %2009 }
0x106b   :  { %v1629_v23 = vmul.f32 %v2010_v22, %v1621_v27 }
0x106d   :  { %v1630_v24 = vmul.f32 %v2441_v48, %v1629_v23 }
0x106f   :  { %v1631_v31 = vadd.f32 %v2446_v12, %v1630_v24 }
0x1071   :  { %v1632_v26 = vmax.f32 %v1631_v31, 0.0 }
0x1073   :  { %1936 = vmatmul.mubr.msk.f32.vlgmr.msra.gmra.mrb[16].mxu1 %vm148_vm1, %v1632_v26 }
0x1146   :  { %v1702_v29 = vpop.f32.mrb[16].mxu1 }
0x1147   :  { %v1703_v32 = vadd.f32 %v1750_v57, %v1702_v29  ;;  %v1937_v33 = vpop.f32.mrb[17].mxu1 }
0x1149   :  { %v1706_v34 = vadd.f32 %v1703_v32, %v1543_v30 }
0x114b   :  { %v1707_v35 = vsel %vm727_vm5, %v1706_v34, 0.0 }
0x114c   :  { %1708 = vadd.xlane.f32.xlu1 %v1707_v35 }
0x11d9   :  { %v1709_v36 = vpop.xlane.xlu1 %1708 }
0x11da   :  { %v1710_v37 = vmul.f32 0.0625, %v1709_v36 }
0x11dc   :  { %v1711_v7 = vsub.f32 %v1706_v34, %v1710_v37 }
0x11de   :  { %v1712_v38 = vmul.f32 %v1711_v7, %v1711_v7 }
0x11e0   :  { %v1713_v21 = vsel %vm727_vm5, %v1712_v38, 0.0 }
0x11e1   :  { %1714 = vadd.xlane.f32.xlu1 %v1713_v21 }
0x126e   :  { %v1715_v48 = vpop.xlane.xlu1 %1714 }
0x126f   :  { %v1716_v39 = vmul.f32 0.0625, %v1715_v48 }
0x1271   :  { %v1717_v12 = vadd.f32 1e-05, %v1716_v39 }
0x1273   :  { %2011 = vrsqrt.f32 %v1717_v12 }
0x127d   :  { %v2012_v40 = vpop.eup %2011 }
0x127e   :  { %v1719_v41 = vmul.f32 %v2012_v40, %v1711_v7 }
0x1280   :  { %v1720_v43 = vmul.f32 %v1752_v3, %v1719_v41 }
0x1282   :  { %v1721_v44 = vadd.f32 %v1753_v4, %v1720_v43 }
0x1284   :  { %1769 = vst.msk [vmem:[%s2554_s24 + $0x2] sm:$0x3] %vm727_vm5, %v1721_v44 }
0x1285   :  { %1728 = vsyncpa [#allocation3], 1 }
0x1286   :  { %1729 = vsyncpa [#allocation5], 1 }

// kernel: encoder_forward.22
= control target key start
LH: loop header
LB: loop body
LE: loop exit
PB: predicated region body
PF: predicated region fallthrough
CT: control target
= control target key end

     0   :  { %vm24_vm0 = vcmask 64512   ;;  %v384_v0 = vmov 0.0   ;;  %vm385_vm1 = vmmov 0   ;;  %vm17_vm2 = vcmask 58368   ;;  %s451_s1 = inlined_call_operand.vmem [shape: f32[2,8,16], index: 1, kind: input, shape index: {}]   ;;  %s452_s0 = inlined_call_operand.vmem [shape: f32[2,2,8], index: 0, kind: input, shape index: {}]   ;;  %s453_s2 = inlined_call_operand.vmem [shape: f32[2,8,4], index: 2, kind: input, shape index: {}]   ;;  %s454_s3 = inlined_call_operand.vmem [shape: f32[2,2,16], index: 3, kind: output, shape index: {0}]   ;;  %s455_s4 = inlined_call_operand.vmem [shape: f32[2,2,4], index: 4, kind: output, shape index: {1}]  }
   0x1   :  { %358 = vmatprep.subr.mxu0 %v384_v0  ;;  %v23_v1 = vld [vmem:[%s451_s1] sm:$0xff]  ;;  %360 = vmatprep.mubr.msk.f32.mxu0 %vm385_vm1, %v384_v0  ;;  %v344_v3 = vld [vmem:[%s451_s1 + $0x8] sm:$0xff]  ;;  %vm99_vm3 = vcmask 123904   ;;  %vm172_vm4 = vcmask 25600  }
   0x2   :  { %v16_v2 = vld [vmem:[%s452_s0] sm:$0x3]  ;;  %359 = vmatpush3.msra.mxu0 %v23_v1  ;;  %363 = vmatprep.subr.mxu1 %v384_v0  ;;  %v343_v5 = vld [vmem:[%s452_s0 + $0x2] sm:$0x3]  ;;  %v347_v6 = vld [vmem:[%s453_s2 + $0x8] sm:$0xff] }
   0x3   :  { %v101_v4 = vld [vmem:[%s453_s2] sm:$0xff]  ;;  %361 = vmatmul.mubr.msk.f32.vlgmr.msra.gmra.mrb[0].mxu0 %vm24_vm0, %v16_v2  ;;  %368 = vmatprep.subr.mxu0 %v384_v0  ;;  %v18_v7 = vsel %vm17_vm2, %v16_v2, 0.0  ;;  %v176_v8 = vsel %vm17_vm2, %v343_v5, 0.0 }
   0x4   :  { %364 = vmatpush3.msra.mxu1 %v101_v4  ;;  %365 = vmatprep.mubr.msk.f32.mxu1 %vm385_vm1, %v384_v0 }
   0x5   :  { %369 = vmatpush3.msra.mxu0 %v344_v3  ;;  %366 = vmatmul.mubr.msk.f32.vlgmr.msra.gmra.mrb[0].mxu1 %vm24_vm0, %v16_v2 }
   0x6   :  { %373 = vmatprep.subr.mxu1 %v384_v0  ;;  %370 = vmatprep.mubr.msk.f32.mxu0 %vm385_vm1, %v384_v0 }
   0x7   :  { %374 = vmatpush3.msra.mxu1 %v347_v6  ;;  %371 = vmatmul.mubr.msk.f32.vlgmr.msra.gmra.mrb[2].mxu0 %vm24_vm0, %v343_v5 }
   0x8   :  { %375 = vmatprep.mubr.msk.f32.mxu1 %vm385_vm1, %v384_v0  ;;  %19 = vadd.xlane.f32.xlu0 %v18_v7 }
   0x9   :  { %376 = vmatmul.mubr.msk.f32.vlgmr.msra.gmra.mrb[2].mxu1 %vm24_vm0, %v343_v5 }
   0xc   :  { %177 = vadd.xlane.f32.xlu0 %v176_v8 }
  0x95   :  { %v20_v9 = vpop.xlane.xlu0 %19 }
  0x96   :  { %v21_v10 = vadd.f32 0.001, %v20_v9 }
  0x98   :  { %380 = vrcp.f32 %v21_v10 }
  0x99   :  { %v178_v11 = vpop.xlane.xlu0 %177 }
  0x9a   :  { %v179_v12 = vadd.f32 0.001, %v178_v11 }
  0x9c   :  { %382 = vrcp.f32 %v179_v12 }
  0xa2   :  { %v381_v13 = vpop.eup %380 }
  0xa6   :  { %v383_v17 = vpop.eup %382 }
  0xd6   :  { %v94_v14 = vpop.f32.mrb[0].mxu0 }
  0xd7   :  { %v98_v15 = vmul.f32 %v381_v13, %v94_v14  ;;  %v362_v16 = vpop.f32.mrb[1].mxu0 }
  0xd8   :  { %v168_v18 = vpop.f32.mrb[0].mxu1 }
  0xd9   :  { %100 = vst.msk [vmem:[%s454_s3] sm:$0x3] %vm99_vm3, %v98_v15  ;;  %v367_v19 = vpop.f32.mrb[1].mxu1 }
  0xda   :  { %173 = vst.msk [vmem:[%s455_s4] sm:$0x3] %vm172_vm4, %v168_v18  ;;  %v252_v20 = vpop.f32.mrb[2].mxu0 }
  0xdb   :  { %v256_v21 = vmul.f32 %v383_v17, %v252_v20  ;;  %v372_v22 = vpop.f32.mrb[3].mxu0 }
  0xdc   :  { %v327_v23 = vpop.f32.mrb[2].mxu1 }
  0xdd   :  { %346 = vst.msk [vmem:[%s454_s3 + $0x2] sm:$0x3] %vm99_vm3, %v256_v21  ;;  %v377_v24 = vpop.f32.mrb[3].mxu1 }
  0xde   :  { %349 = vst.msk [vmem:[%s455_s4 + $0x2] sm:$0x3] %vm172_vm4, %v327_v23 }

// kernel: encoder_forward.21
= control target key start
LH: loop header
LB: loop body
LE: loop exit
PB: predicated region body
PF: predicated region fallthrough
CT: control target
= control target key end

     0   :  { %v1969_v0 = vmov 0.0|0.0   ;;  %vm1970_vm0 = vmmov 0   ;;  %v1971_v6 = vmov 0.0   ;;  %vm113_vm1 = vcmask 130048   ;;  %s2378_s6 = inlined_call_operand.vmem [shape: f32[16,16], index: 6, kind: input, shape index: {}]   ;;  %s2379_s4 = inlined_call_operand.vmem [shape: f32[16,16], index: 4, kind: input, shape index: {}]   ;;  %s2380_s8 = inlined_call_operand.vmem [shape: f32[16,16], index: 8, kind: input, shape index: {}]   ;;  %s2381_s1 = inlined_call_operand.vmem [shape: f32[2,2,16], index: 1, kind: input, shape index: {}, may-alias: {1,2}]   ;;  %s2382_s0 = inlined_call_operand.vmem [shape: f32[2,8,16], index: 0, kind: input, shape index: {}]   ;;  %s2383_s10 = inlined_call_operand.vmem [shape: f32[16,1], index: 10, kind: input, shape index: {}]   ;;  %s2384_s2 = inlined_call_operand.vmem [shape: f32[2,2,16], index: 2, kind: input, shape index: {}, may-alias: {1,2}]   ;;  %s2385_s7 = inlined_call_operand.vmem [shape: f32[1,16], index: 7, kind: input, shape index: {}]   ;;  %s2386_s5 = inlined_call_operand.vmem [shape: f32[1,16], index: 5, kind: input, shape index: {}]   ;;  %s2387_s9 = inlined_call_operand.vmem [shape: f32[1,16], index: 9, kind: input, shape index: {}]   ;;  %s2388_s3 = inlined_call_operand.vmem [shape: f32[2,8,2], index: 3, kind: input, shape index: {}]   ;;  %s2389_s12 = inlined_call_operand.vmem [shape: f32[16,16], index: 12, kind: input, shape index: {}]   ;;  %s2390_s11 = inlined_call_operand.vmem [shape: f32[1,16], index: 11, kind: input, shape index: {}]   ;;  %s2391_s13 = inlined_call_operand.vmem [shape: f32[1,16], index: 13, kind: input, shape index: {}]   ;;  %s2392_s16 = inlined_call_operand.vmem [shape: f32[16,16], index: 16, kind: input, shape index: {}]   ;;  %s2393_s14 = inlined_call_operand.vmem [shape: f32[1,16], index: 14, kind: input, shape index: {}]   ;;  %s2394_s15 = inlined_call_operand.vmem [shape: f32[1,16], index: 15, kind: input, shape index: {}]   ;;  %s2395_s17 = inlined_call_operand.vmem [shape: f32[1,16], index: 17, kind: input, shape index: {}]   ;;  %s2396_s20 = inlined_call_operand.vmem [shape: f32[16,16], index: 20, kind: input, shape index: {}]   ;;  %s2397_s18 = inlined_call_operand.vmem [shape: f32[1,16], index: 18, kind: input, shape index: {}]   ;;  %s2398_s19 = inlined_call_operand.vmem [shape: f32[1,16], index: 19, kind: input, shape index: {}]   ;;  %s2399_s21 = inlined_call_operand.vmem [shape: f32[1,16], index: 21, kind: input, shape index: {}]   ;;  %s2400_s22 = inlined_call_operand.vmem [shape: f32[1,16], index: 22, kind: input, shape index: {}]   ;;  %s2401_s23 = inlined_call_operand.vmem [shape: f32[1,16], index: 23, kind: input, shape index: {}]   ;;  %s2402_s24 = inlined_call_operand.vmem [shape: f32[2,8,16], index: 24, kind: output, shape index: {}]  }
   0x1   :  { %2410 = sst [smem:[#allocation2_spill]] %s2378_s6  ;;  %1900 = vmatprep.subr.bf16.mxu1 %v1969_v0  ;;  %1897 = vmatprep.subr.bf16.mxu0 %v1969_v0  ;;  %v2185_v27 = vld [vmem:[%s2387_s9] ss:$0 sm:$0xff]  ;;  %vm531_vm2 = vcmask 1041408   ;;  %vm495_vm3 = vcmask 15360   ;;  %v1972_v37 = vmov 0  }
   0x2   :  { %2411 = sst [smem:[#allocation3_spill]] %s2379_s4  ;;  %s2419_s27 = sld [smem:[#allocation2_spill]]  ;;  %1790 = vmatprep.mubr.msk.f32.mxu1 %vm1970_vm0, %v1971_v6  ;;  %1783 = vmatprep.mubr.msk.f32.mxu0 %vm1970_vm0, %v1971_v6  ;;  %v422_v32 = vld [vmem:[%s2388_s3] sm:$0xff]  ;;  %v90_v50 = vld [vmem:[%s2389_s12 + $0x8] sm:$0xff] }
   0x3   :  { %2412 = sst [smem:[#allocation4_spill]] %s2380_s8  ;;  %1943 = vset.pattern.permute.xlu0 %v1972_v37  ;;  %1944 = vset.pattern.permute.xlu1 %v1972_v37  ;;  %v89_v49 = vld [vmem:[%s2389_s12] sm:$0xff] }
   0x4   :  { %2413 = sst [smem:[#allocation5_spill]] %s2381_s1  ;;  %s2420_s1 = sld [smem:[#allocation3_spill]]  ;;  %v2204_v51 = vpack.c.bf16 %v90_v50, %v89_v49  ;;  %v2211_v57 = vld [vmem:[%s2390_s11] ss:$0 sm:$0xff] }
   0x5   :  { %2414 = sst [smem:[#allocation6_spill]] %s2382_s0  ;;  %s2421_s25 = sld [smem:[#allocation4_spill]]  ;;  %v2220_v63 = vld [vmem:[%s2391_s13] ss:$0 sm:$0xff] }
   0x6   :  { %2415 = sst [smem:[#allocation7_spill]] %s2383_s10  ;;  %s2422_s10 = sld [smem:[#allocation5_spill]] }
   0x7   :  { %2416 = sst [smem:[#allocation8_spill]] %s2384_s2  ;;  %s2423_s8 = sld [smem:[#allocation6_spill]] }
   0x8   :  { %2417 = sst [smem:[#allocation9_spill]] %s2385_s7  ;;  %v80_v1 = vld [vmem:[%s2419_s27] sm:$0xff]  ;;  %v81_v2 = vld [vmem:[%s2419_s27 + $0x8] sm:$0xff]  ;;  %s2424_s7 = sld [smem:[#allocation7_spill]] }
   0x9   :  { %2418 = sst [smem:[#allocation10_spill]] %s2386_s5  ;;  %v2109_v4 = vpack.c.bf16 %v81_v2, %v80_v1  ;;  %s2425_s0 = sld [smem:[#allocation8_spill]] }
   0xa   :  { %v77_v3 = vld [vmem:[%s2420_s1] sm:$0xff]  ;;  %v78_v5 = vld [vmem:[%s2420_s1 + $0x8] sm:$0xff]  ;;  %s2426_s27 = sld [smem:[#allocation9_spill]]  ;;  %s2427_s29 = sld [smem:[#allocation10_spill]] }
   0xb   :  { %v2118_v7 = vpack.c.bf16 %v78_v5, %v77_v3  ;;  %v83_v8 = vld [vmem:[%s2421_s25] sm:$0xff]  ;;  %1902 = vmatpush3.bf16.msra.mxu1 %v2109_v4  ;;  %v84_v10 = vld [vmem:[%s2421_s25 + $0x8] sm:$0xff] }
   0xc   :  { %v105_v9 = vld [vmem:[%s2422_s10] sm:$0x3]  ;;  %v2134_v12 = vpack.c.bf16 %v84_v10, %v83_v8  ;;  %1800 = vmatprep.subr.mxu1 %v1971_v6 }
   0xd   :  { %1899 = vmatpush3.bf16.msra.mxu0 %v2118_v7  ;;  %v104_v11 = vld [vmem:[%s2423_s8] sm:$0xff] }
   0xe   :  { %1903 = vmatprep.subr.bf16.mxu0 %v1969_v0  ;;  %1791 = vmatmul.mubr.msk.f32.vlgmr.msra.gmra.mrb[0].mxu1 %vm113_vm1, %v105_v9  ;;  %v86_v13 = vld [vmem:[%s2424_s7] sm:$0xff]  ;;  %v87_v14 = vld [vmem:[%s2424_s7 + $0x8] sm:$0xff] }
   0xf   :  { %1802 = vmatprep.mubr.msk.f32.mxu1 %vm1970_vm0, %v1971_v6  ;;  %v106_v15 = vld [vmem:[%s2425_s0] sm:$0x3]  ;;  %v2155_v16 = vpack.c.bf16 %v87_v14, %v86_v13 }
  0x10   :  { %1784 = vmatmul.mubr.msk.f32.vlgmr.msra.gmra.mrb[0].mxu0 %vm113_vm1, %v104_v11  ;;  %v2165_v17 = vld [vmem:[%s2426_s27] ss:$0 sm:$0xff] }
  0x11   :  { %1905 = vmatpush3.bf16.msra.mxu0 %v2134_v12  ;;  %1797 = vmatprep.mubr.msk.f32.mxu0 %vm1970_vm0, %v1971_v6  ;;  %v2170_v18 = vld [vmem:[%s2427_s29] ss:$0 sm:$0xff] }
  0x12   :  { %1906 = vmatprep.subr.bf16.mxu0 %v1969_v0  ;;  %v94_v14 = vld [vmem:[%s2392_s16] sm:$0xff] }
  0x14   :  { %1798 = vmatmul.mubr.msk.f32.vlgmr.msra.gmra.mrb[2].mxu0 %vm113_vm1, %v106_v15  ;;  %v95_v15 = vld [vmem:[%s2392_s16 + $0x8] sm:$0xff] }
  0x15   :  { %1908 = vmatpush3.bf16.msra.mxu0 %v2155_v16  ;;  %1809 = vmatprep.mubr.msk.f32.mxu0 %vm1970_vm0, %v1971_v6 }
  0x16   :  { %1909 = vmatprep.subr.bf16.mxu0 %v1969_v0 }
  0xe1   :  { %v262_v19 = vpop.f32.mrb[0].mxu1 }
  0xe2   :  { %v263_v20 = vadd.f32 %v2165_v17, %v262_v19  ;;  %v1792_v21 = vpop.f32.mrb[1].mxu1  ;;  %v2231_v19 = vpack.c.bf16 %v95_v15, %v94_v14 }
  0xe3   :  { %v183_v22 = vpop.f32.mrb[0].mxu0 }
  0xe4   :  { %v184_v23 = vadd.f32 %v2170_v18, %v183_v22  ;;  %v1785_v24 = vpop.f32.mrb[1].mxu0  ;;  %1801 = vmatpush3.xpose.msk.msra.mxu1 %vm113_vm1, %v263_v20 }
  0xe5   :  { %1812 = vmatprep.subr.mxu1 %v1971_v6  ;;  %v2238_v24 = vld [vmem:[%s2393_s14] ss:$0 sm:$0xff] }
  0xe6   :  { %1810 = vmatmul.mubr.msk.f32.vlgmr.msra.gmra.mrb[4].mxu0 %vm113_vm1, %v184_v23 }
  0xe7   :  { %1821 = vmatprep.mubr.msk.f32.mxu0 %vm1970_vm0, %v1971_v6  ;;  %1803 = vmatmul.mubr.msk.f32.vlgmr.msra.gmra.mrb[2].mxu1 %vm113_vm1, %v184_v23  ;;  %v341_v25 = vpop.f32.mrb[2].mxu0 }
  0xe8   :  { %1814 = vmatprep.mubr.msk.f32.mxu1 %vm1970_vm0, %v1971_v6  ;;  %v1799_v26 = vpop.f32.mrb[3].mxu0  ;;  %v342_v28 = vadd.f32 %v2185_v27, %v341_v25  ;;  %1911 = vmatpush3.bf16.msra.mxu0 %v2204_v51 }
  0xe9   :  { %1915 = vmatprep.subr.bf16.mxu0 %v1969_v0  ;;  %v2243_v26 = vld [vmem:[%s2394_s15] ss:$0 sm:$0xff] }
  0xea   :  { %1813 = vmatpush3.msk.msra.mxu1 %vm531_vm2, %v342_v28 }
  0xeb   :  { %1912 = vmatprep.subr.bf16.mxu1 %v1969_v0 }
 0x1b9   :  { %v490_v29 = vpop.f32.mrb[4].mxu0 }
 0x1ba   :  { %v1811_v30 = vpop.f32.mrb[5].mxu0  ;;  %v417_v31 = vpop.f32.mrb[2].mxu1  ;;  %v494_v38 = vmul.f32 0.25, %v490_v29 }
 0x1bb   :  { %v421_v33 = vmul.f32 0.25, %v417_v31  ;;  %v1804_v34 = vpop.f32.mrb[3].mxu1  ;;  %v1713_v30 = vld [vmem:[%s2423_s8 + $0x8] sm:$0xff]  ;;  %v2266_v31 = vld [vmem:[%s2395_s17] ss:$0 sm:$0xff] }
 0x1bd   :  { %v423_v35 = vadd.f32 %v422_v32, %v421_v33 }
 0x1bf   :  { %v496_v36 = vsel %vm495_vm3, %v423_v35, -inf }
 0x1c0   :  { %497 = vmax.xlane.f32.xlu0 %v496_v36 }
 0x24d   :  { %v498_v39 = vpop.xlane.xlu0 %497 }
 0x24e   :  { %v499_v40 = vmax.f32 %v498_v39, %v494_v38  ;;  %v99_v39 = vld [vmem:[%s2396_s20] sm:$0xff] }
 0x250   :  { %v508_v41 = vsub.f32 %v494_v38, %v499_v40  ;;  %502 = vperm.xlu0 %1943, %v499_v40   ;;  %v100_v40 = vld [vmem:[%s2396_s20 + $0x8] sm:$0xff] }
 0x252   :  { %v509_v47 = vmul.f32 1.442695, %v508_v41  ;;  %v2277_v41 = vpack.c.bf16 %v100_v40, %v99_v39 }
 0x2cf   :  { %v503_v42 = vpop.permute.xlu0 %502 }
 0x2d0   :  { %v505_v43 = vsub.f32 %v423_v35, %v503_v42 }
 0x2d2   :  { %v506_v44 = vmul.f32 1.442695, %v505_v43 }
 0x2d4   :  { %1945 = vpow2.f32 %v506_v44 }
 0x2d5   :  { %1947 = vpow2.f32 %v509_v47 }
 0x2de   :  { %v1946_v45 = vpop.eup %1945 }
 0x2df   :  { %1815 = vmatmul.mubr.msk.f32.vlgmr.msra.gmra.mrb[4].mxu1 %vm495_vm3, %v1946_v45  ;;  %v511_v46 = vsel %vm495_vm3, %v1946_v45, 0.0  ;;  %v1948_v48 = vpop.eup %1947 }
 0x2e0   :  { %512 = vadd.xlane.f32.xlu1 %v511_v46  ;;  %1828 = vmatprep.mubr.msk.f32.mxu1 %vm1970_vm0, %v1971_v6  ;;  %v2284_v46 = vld [vmem:[%s2397_s18] ss:$0 sm:$0xff] }
 0x2e1   :  { %1914 = vmatpush3.bf16.msra.mxu1 %v2231_v19 }
 0x2e2   :  { %1918 = vmatprep.subr.bf16.mxu1 %v1969_v0 }
 0x2f1   :  { %518 = vperm.xlu1 %1944, %v1948_v48  }
 0x36d   :  { %v513_v52 = vpop.xlane.xlu1 %512 }
 0x36e   :  { %v514_v53 = vadd.f32 %v1948_v48, %v513_v52  ;;  %v2289_v48 = vld [vmem:[%s2398_s19] ss:$0 sm:$0xff] }
 0x370   :  { %1949 = vrcp.f32 %v514_v53  ;;  %v1714_v53 = vld [vmem:[%s2422_s10 + $0x2] sm:$0x3] }
 0x371   :  { %v519_v58 = vpop.permute.xlu1 %518 }
 0x372   :  { %v527_v59 = vmul.f32 %v2211_v57, %v519_v58 }
 0x37a   :  { %v1950_v54 = vpop.eup %1949 }
 0x37b   :  { %607 = vperm.xlu1 %1944, %v1950_v54   ;;  %v1715_v54 = vld [vmem:[%s2425_s0 + $0x2] sm:$0x3] }
 0x3b2   :  { %v601_v55 = vpop.f32.mrb[4].mxu1 }
 0x3b3   :  { %v1816_v56 = vpop.f32.mrb[5].mxu1  ;;  %v602_v60 = vadd.f32 %v601_v55, %v527_v59 }
 0x3fa   :  { %v608_v61 = vpop.permute.xlu1 %607 }
 0x3fb   :  { %v610_v62 = vmul.f32 %v608_v61, %v602_v60 }
 0x3fd   :  { %1822 = vmatmul.mubr.msk.f32.vlgmr.msra.gmra.mrb[6].mxu0 %vm113_vm1, %v610_v62 }
 0x3fe   :  { %1835 = vmatprep.mubr.msk.f32.mxu0 %vm1970_vm0, %v1971_v6  ;;  %1917 = vmatpush3.bf16.msra.mxu0 %v2277_v41 }
 0x3ff   :  { %1921 = vmatprep.subr.bf16.mxu0 %v1969_v0 }
 0x4d0   :  { %v686_v1 = vpop.f32.mrb[6].mxu0 }
 0x4d1   :  { %v687_v2 = vadd.f32 %v2220_v63, %v686_v1  ;;  %v1823_v3 = vpop.f32.mrb[7].mxu0 }
 0x4d2   :  { %v1721_v3 = vld [vmem:[%s2388_s3 + $0x8] sm:$0xff] }
 0x4d3   :  { %v690_v5 = vsel %vm113_vm1, %v687_v2, 0.0 }
 0x4d4   :  { %691 = vadd.xlane.f32.xlu1 %v690_v5 }
 0x561   :  { %v692_v8 = vpop.xlane.xlu1 %691 }
 0x562   :  { %v694_v9 = vmul.f32 0.0625, %v692_v8 }
 0x564   :  { %v695_v10 = vsub.f32 %v687_v2, %v694_v9 }
 0x566   :  { %v696_v11 = vmul.f32 %v695_v10, %v695_v10 }
 0x568   :  { %v697_v13 = vsel %vm113_vm1, %v696_v11, 0.0 }
 0x569   :  { %698 = vadd.xlane.f32.xlu0 %v697_v13 }
 0x5f6   :  { %v699_v20 = vpop.xlane.xlu0 %698 }
 0x5f7   :  { %v700_v21 = vmul.f32 0.0625, %v699_v20 }
 0x5f9   :  { %v701_v22 = vadd.f32 1e-05, %v700_v21 }
 0x5fb   :  { %1951 = vrsqrt.f32 %v701_v22 }
 0x605   :  { %v1952_v23 = vpop.eup %1951 }
 0x606   :  { %v703_v25 = vmul.f32 %v1952_v23, %v695_v10 }
 0x608   :  { %v710_v28 = vmul.f32 %v2238_v24, %v703_v25 }
 0x60a   :  { %v2247_v29 = vadd.f32 %v2243_v26, %v710_v28 }
 0x60c   :  { %1829 = vmatmul.mubr.msk.f32.vlgmr.msra.gmra.mrb[6].mxu1 %vm113_vm1, %v2247_v29 }
 0x60d   :  { %1920 = vmatpush3.bf16.msra.mxu1 %v2118_v7  ;;  %1842 = vmatprep.mubr.msk.f32.mxu1 %vm1970_vm0, %v1971_v6 }
 0x60e   :  { %1924 = vmatprep.subr.bf16.mxu1 %v1969_v0 }
 0x610   :  { %1843 = vmatmul.mubr.msk.f32.vlgmr.msra.gmra.mrb[8].mxu1 %vm113_vm1, %v1713_v30 }
 0x611   :  { %1926 = vmatpush3.bf16.msra.mxu1 %v2134_v12  ;;  %1856 = vmatprep.mubr.msk.f32.mxu1 %vm1970_vm0, %v1971_v6 }
 0x612   :  { %1927 = vmatprep.subr.bf16.mxu1 %v1969_v0 }
 0x614   :  { %1857 = vmatmul.mubr.msk.f32.vlgmr.msra.gmra.mrb[10].mxu1 %vm113_vm1, %v1715_v54 }
 0x615   :  { %1929 = vmatpush3.bf16.msra.mxu1 %v2155_v16  ;;  %1868 = vmatprep.mubr.msk.f32.mxu1 %vm1970_vm0, %v1971_v6 }
 0x616   :  { %1930 = vmatprep.subr.bf16.mxu1 %v1969_v0 }
 0x6df   :  { %v793_v7 = vpop.f32.mrb[6].mxu1 }
 0x6e0   :  { %v794_v32 = vadd.f32 %v2266_v31, %v793_v7  ;;  %v1830_v33 = vpop.f32.mrb[7].mxu1 }
 0x6e2   :  { %v797_v34 = vsel %vm113_vm1, %v794_v32, 0.0 }
 0x6e3   :  { %798 = vadd.xlane.f32.xlu1 %v797_v34  ;;  %v1008_v55 = vpop.f32.mrb[8].mxu1 }
 0x6e4   :  { %v1009_v56 = vadd.f32 %v2170_v18, %v1008_v55 }
 0x6e6   :  { %1869 = vmatmul.mubr.msk.f32.vlgmr.msra.gmra.mrb[12].mxu1 %vm113_vm1, %v1009_v56 }
 0x6e7   :  { %1932 = vmatpush3.bf16.msra.mxu1 %v2204_v51  ;;  %1880 = vmatprep.mubr.msk.f32.mxu1 %vm1970_vm0, %v1971_v6 }
 0x6e8   :  { %1936 = vmatprep.subr.bf16.mxu1 %v1969_v0 }
 0x770   :  { %v799_v35 = vpop.xlane.xlu1 %798 }
 0x771   :  { %v800_v36 = vmul.f32 0.0625, %v799_v35 }
 0x773   :  { %v801_v12 = vsub.f32 %v794_v32, %v800_v36 }
 0x775   :  { %v802_v37 = vmul.f32 %v801_v12, %v801_v12 }
 0x777   :  { %v803_v38 = vsel %vm113_vm1, %v802_v37, 0.0 }
 0x778   :  { %804 = vadd.xlane.f32.xlu1 %v803_v38 }
 0x805   :  { %v805_v42 = vpop.xlane.xlu1 %804 }
 0x806   :  { %v806_v43 = vmul.f32 0.0625, %v805_v42 }
 0x808   :  { %v807_v44 = vadd.f32 1e-05, %v806_v43 }
 0x80a   :  { %1953 = vrsqrt.f32 %v807_v44 }
 0x814   :  { %v1954_v45 = vpop.eup %1953 }
 0x815   :  { %v809_v47 = vmul.f32 %v1954_v45, %v801_v12 }
 0x817   :  { %v816_v49 = vmul.f32 %v2284_v46, %v809_v47 }
 0x819   :  { %v823_v50 = vadd.f32 %v2289_v48, %v816_v49 }
 0x81b   :  { %v824_v52 = vmax.f32 %v823_v50, 0.0 }
 0x81d   :  { %1836 = vmatmul.mubr.msk.f32.vlgmr.msra.gmra.mrb[8].mxu0 %vm113_vm1, %v824_v52 }
 0x81e   :  { %1923 = vmatpush3.bf16.msra.mxu0 %v2109_v4  ;;  %1849 = vmatprep.mubr.msk.f32.mxu0 %vm1970_vm0, %v1971_v6  ;;  %v1844_v4 = vpop.f32.mrb[9].mxu1 }
 0x81f   :  { %1859 = vmatprep.subr.mxu0 %v1971_v6  ;;  %v1154_v51 = vpop.f32.mrb[10].mxu1 }
 0x820   :  { %v1155_v61 = vadd.f32 %v2185_v27, %v1154_v51  ;;  %v1858_v62 = vpop.f32.mrb[11].mxu1 }
 0x821   :  { %1850 = vmatmul.mubr.msk.f32.vlgmr.msra.gmra.mrb[10].mxu0 %vm113_vm1, %v1714_v53  ;;  %v1304_v1 = vpop.f32.mrb[12].mxu1  ;;  %v1711_v62 = vld [vmem:[%s2400_s22] ss:$0 sm:$0xff] }
 0x822   :  { %1861 = vmatprep.mubr.msk.f32.mxu0 %vm1970_vm0, %v1971_v6  ;;  %v1308_v11 = vmul.f32 0.25, %v1304_v1 }
 0x8f0   :  { %v2318_v58 = vpop.f32.mrb[8].mxu0 }
 0x8f1   :  { %v1837_v18 = vpop.f32.mrb[9].mxu0 }
 0x8f4   :  { %v1081_v59 = vpop.f32.mrb[10].mxu0 }
 0x8f5   :  { %v1082_v16 = vadd.f32 %v2165_v17, %v1081_v59  ;;  %v1851_v60 = vpop.f32.mrb[11].mxu0  ;;  %v1870_v17 = vpop.f32.mrb[13].mxu1 }
 0x8f6   :  { %v1712_v17 = vld [vmem:[%s2401_s23] ss:$0 sm:$0xff] }
 0x8f7   :  { %1860 = vmatpush3.xpose.msk.msra.mxu0 %vm113_vm1, %v1082_v16 }
 0x8f8   :  { %1871 = vmatprep.subr.mxu0 %v1971_v6 }
 0x8fa   :  { %1862 = vmatmul.mubr.msk.f32.vlgmr.msra.gmra.mrb[12].mxu0 %vm113_vm1, %v1009_v56 }
 0x8fb   :  { %1873 = vmatprep.mubr.msk.f32.mxu0 %vm1970_vm0, %v1971_v6  ;;  %1872 = vmatpush3.msk.msra.mxu0 %vm531_vm2, %v1155_v61 }
 0x8fc   :  { %1933 = vmatprep.subr.bf16.mxu0 %v1969_v0 }
 0x9cd   :  { %v1230_v2 = vpop.f32.mrb[12].mxu0 }
 0x9ce   :  { %v1234_v5 = vmul.f32 0.25, %v1230_v2  ;;  %v1863_v8 = vpop.f32.mrb[13].mxu0 }
 0x9d0   :  { %v1237_v9 = vadd.f32 %v1721_v3, %v1234_v5 }
 0x9d2   :  { %v1309_v10 = vsel %vm495_vm3, %v1237_v9, -inf }
 0x9d3   :  { %1310 = vmax.xlane.f32.xlu1 %v1309_v10 }
 0xa60   :  { %v1311_v27 = vpop.xlane.xlu1 %1310 }
 0xa61   :  { %v1312_v13 = vmax.f32 %v1311_v27, %v1308_v11 }
 0xa63   :  { %v1321_v14 = vsub.f32 %v1308_v11, %v1312_v13  ;;  %1315 = vperm.xlu1 %1944, %v1312_v13  }
 0xa65   :  { %v1322_v23 = vmul.f32 1.442695, %v1321_v14 }
 0xae2   :  { %v1316_v15 = vpop.permute.xlu1 %1315 }
 0xae3   :  { %v1318_v20 = vsub.f32 %v1237_v9, %v1316_v15 }
 0xae5   :  { %v1319_v0 = vmul.f32 1.442695, %v1318_v20 }
 0xae7   :  { %1955 = vpow2.f32 %v1319_v0 }
 0xae8   :  { %1957 = vpow2.f32 %v1322_v23 }
 0xaf1   :  { %v1956_v21 = vpop.eup %1955 }
 0xaf2   :  { %1874 = vmatmul.mubr.msk.f32.vlgmr.msra.gmra.mrb[14].mxu0 %vm495_vm3, %v1956_v21  ;;  %v1324_v22 = vsel %vm495_vm3, %v1956_v21, 0.0  ;;  %v1958_v25 = vpop.eup %1957 }
 0xaf3   :  { %1325 = vadd.xlane.f32.xlu0 %v1324_v22  ;;  %1935 = vmatpush3.bf16.msra.mxu0 %v2231_v19 }
 0xaf4   :  { %1887 = vmatprep.mubr.msk.f32.mxu0 %vm1970_vm0, %v1971_v6 }
 0xb09   :  { %1331 = vperm.xlu0 %1943, %v1958_v25  }
 0xb80   :  { %v1326_v28 = vpop.xlane.xlu0 %1325 }
 0xb81   :  { %v1327_v30 = vadd.f32 %v1958_v25, %v1326_v28 }
 0xb83   :  { %1959 = vrcp.f32 %v1327_v30 }
 0xb88   :  { %v1332_v34 = vpop.permute.xlu0 %1331 }
 0xb89   :  { %v1334_v35 = vmul.f32 %v2211_v57, %v1332_v34  ;;  %v1709_v57 = vld [vmem:[%s2399_s21] ss:$0 sm:$0xff] }
 0xb8a   :  { %v901_v44 = vadd.f32 %v1709_v57, %v2318_v58 }
 0xb8d   :  { %v1960_v7 = vpop.eup %1959 }
 0xb8e   :  { %1413 = vperm.xlu1 %1944, %v1960_v7  }
 0xbc5   :  { %v1407_v32 = vpop.f32.mrb[14].mxu0 }
 0xbc6   :  { %v1875_v33 = vpop.f32.mrb[15].mxu0  ;;  %v1408_v36 = vadd.f32 %v1407_v32, %v1334_v35 }
 0xc0d   :  { %v1414_v12 = vpop.permute.xlu1 %1413 }
 0xc0e   :  { %v1416_v19 = vmul.f32 %v1414_v12, %v1408_v36 }
 0xc10   :  { %1881 = vmatmul.mubr.msk.f32.vlgmr.msra.gmra.mrb[14].mxu1 %vm113_vm1, %v1416_v19 }
 0xc11   :  { %1938 = vmatpush3.bf16.msra.mxu1 %v2277_v41  ;;  %1894 = vmatprep.mubr.msk.f32.mxu1 %vm1970_vm0, %v1971_v6  ;;  %v904_v6 = vadd.f32 %v901_v44, %v2247_v29 }
 0xce3   :  { %v1486_v37 = vpop.f32.mrb[14].mxu1 }
 0xce4   :  { %v1487_v38 = vadd.f32 %v2220_v63, %v1486_v37  ;;  %v1882_v39 = vpop.f32.mrb[15].mxu1  ;;  %v905_v63 = vsel %vm113_vm1, %v904_v6, 0.0 }
 0xce6   :  { %v1490_v40 = vsel %vm113_vm1, %v1487_v38, 0.0 }
 0xce7   :  { %1491 = vadd.xlane.f32.xlu1 %v1490_v40 }
 0xd74   :  { %v1492_v42 = vpop.xlane.xlu1 %1491 }
 0xd75   :  { %v1493_v43 = vmul.f32 0.0625, %v1492_v42 }
 0xd77   :  { %v1494_v45 = vsub.f32 %v1487_v38, %v1493_v43 }
 0xd79   :  { %v1495_v41 = vmul.f32 %v1494_v45, %v1494_v45 }
 0xd7b   :  { %v1496_v47 = vsel %vm113_vm1, %v1495_v41, 0.0 }
 0xd7c   :  { %1497 = vadd.xlane.f32.xlu0 %v1496_v47 }
 0xd80   :  { %906 = vadd.xlane.f32.xlu0 %v905_v63 }
 0xe09   :  { %v1498_v49 = vpop.xlane.xlu0 %1497 }
 0xe0a   :  { %v1499_v50 = vmul.f32 0.0625, %v1498_v49 }
 0xe0c   :  { %v1500_v52 = vadd.f32 1e-05, %v1499_v50 }
 0xe0d   :  { %v907_v53 = vpop.xlane.xlu0 %906 }
 0xe0e   :  { %1961 = vrsqrt.f32 %v1500_v52  ;;  %v908_v54 = vmul.f32 0.0625, %v907_v53 }
 0xe10   :  { %v909_v55 = vsub.f32 %v904_v6, %v908_v54 }
 0xe12   :  { %v910_v56 = vmul.f32 %v909_v55, %v909_v55 }
 0xe14   :  { %v911_v4 = vsel %vm113_vm1, %v910_v56, 0.0 }
 0xe15   :  { %912 = vadd.xlane.f32.xlu0 %v911_v4 }
 0xe18   :  { %v1962_v58 = vpop.eup %1961 }
 0xe19   :  { %v1502_v18 = vmul.f32 %v1962_v58, %v1494_v45 }
 0xe1b   :  { %v1503_v59 = vmul.f32 %v2238_v24, %v1502_v18 }
 0xe1d   :  { %v1504_v29 = vadd.f32 %v2243_v26, %v1503_v59 }
 0xe1f   :  { %1888 = vmatmul.mubr.msk.f32.vlgmr.msra.gmra.mrb[16].mxu0 %vm113_vm1, %v1504_v29 }
 0xea2   :  { %v913_v16 = vpop.xlane.xlu0 %912 }
 0xea3   :  { %v914_v60 = vmul.f32 0.0625, %v913_v16 }
 0xea5   :  { %v915_v51 = vadd.f32 1e-05, %v914_v60 }
 0xea7   :  { %1963 = vrsqrt.f32 %v915_v51 }
 0xeb1   :  { %v1964_v61 = vpop.eup %1963 }
 0xeb2   :  { %v917_v1 = vmul.f32 %v1964_v61, %v909_v55 }
 0xeb4   :  { %v924_v2 = vmul.f32 %v1711_v62, %v917_v1 }
 0xeb6   :  { %v931_v24 = vadd.f32 %v1712_v17, %v924_v2 }
 0xeb8   :  { %932 = vst.msk [vmem:[%s2402_s24] sm:$0xff] %vm113_vm1, %v931_v24 }
 0xef2   :  { %v1574_v26 = vpop.f32.mrb[16].mxu0 }
 0xef3   :  { %v1575_v3 = vadd.f32 %v2266_v31, %v1574_v26  ;;  %v1889_v5 = vpop.f32.mrb[17].mxu0 }
 0xef5   :  { %v1578_v8 = vsel %vm113_vm1, %v1575_v3, 0.0 }
 0xef6   :  { %1579 = vadd.xlane.f32.xlu1 %v1578_v8 }
 0xf83   :  { %v1580_v9 = vpop.xlane.xlu1 %1579 }
 0xf84   :  { %v1581_v10 = vmul.f32 0.0625, %v1580_v9 }
 0xf86   :  { %v1582_v11 = vsub.f32 %v1575_v3, %v1581_v10 }
 0xf88   :  { %v1583_v27 = vmul.f32 %v1582_v11, %v1582_v11 }
 0xf8a   :  { %v1584_v13 = vsel %vm113_vm1, %v1583_v27, 0.0 }
 0xf8b   :  { %1585 = vadd.xlane.f32.xlu1 %v1584_v13 }
0x1018   :  { %v1586_v14 = vpop.xlane.xlu1 %1585 }
0x1019   :  { %v1587_v15 = vmul.f32 0.0625, %v1586_v14 }
0x101b   :  { %v1588_v20 = vadd.f32 1e-05, %v1587_v15 }
0x101d   :  { %1965 = vrsqrt.f32 %v1588_v20 }
0x1027   :  { %v1966_v0 = vpop.eup %1965 }
0x1028   :  { %v1590_v21 = vmul.f32 %v1966_v0, %v1582_v11 }
0x102a   :  { %v1591_v22 = vmul.f32 %v2284_v46, %v1590_v21 }
0x102c   :  { %v1592_v31 = vadd.f32 %v2289_v48, %v1591_v22 }
0x102e   :  { %v1593_v23 = vmax.f32 %v1592_v31, 0.0 }
0x1030   :  { %1895 = vmatmul.mubr.msk.f32.vlgmr.msra.gmra.mrb[16].mxu1 %vm113_vm1, %v1593_v23 }
0x1103   :  { %v1663_v25 = vpop.f32.mrb[16].mxu1 }
0x1104   :  { %v1664_v28 = vadd.f32 %v1709_v57, %v1663_v25  ;;  %v1896_v30 = vpop.f32.mrb[17].mxu1 }
0x1106   :  { %v1667_v7 = vadd.f32 %v1664_v28, %v1504_v29 }
0x1108   :  { %v1668_v32 = vsel %vm113_vm1, %v1667_v7, 0.0 }
0x1109   :  { %1669 = vadd.xlane.f32.xlu1 %v1668_v32 }
0x1196   :  { %v1670_v33 = vpop.xlane.xlu1 %1669 }
0x1197   :  { %v1671_v34 = vmul.f32 0.0625, %v1670_v33 }
0x1199   :  { %v1672_v35 = vsub.f32 %v1667_v7, %v1671_v34 }
0x119b   :  { %v1673_v36 = vmul.f32 %v1672_v35, %v1672_v35 }
0x119d   :  { %v1674_v12 = vsel %vm113_vm1, %v1673_v36, 0.0 }
0x119e   :  { %1675 = vadd.xlane.f32.xlu1 %v1674_v12 }
0x122b   :  { %v1676_v46 = vpop.xlane.xlu1 %1675 }
0x122c   :  { %v1677_v19 = vmul.f32 0.0625, %v1676_v46 }
0x122e   :  { %v1678_v48 = vadd.f32 1e-05, %v1677_v19 }
0x1230   :  { %1967 = vrsqrt.f32 %v1678_v48 }
0x123a   :  { %v1968_v37 = vpop.eup %1967 }
0x123b   :  { %v1680_v38 = vmul.f32 %v1968_v37, %v1672_v35 }
0x123d   :  { %v1681_v39 = vmul.f32 %v1711_v62, %v1680_v38 }
0x123f   :  { %v1682_v40 = vadd.f32 %v1712_v17, %v1681_v39 }
0x1241   :  { %1728 = vst.msk [vmem:[%s2402_s24 + $0x8] sm:$0xff] %vm113_vm1, %v1682_v40 }

// kernel: encoder_forward.23
= control target key start
LH: loop header
LB: loop body
LE: loop exit
PB: predicated region body
PF: predicated region fallthrough
CT: control target
= control target key end

     0   :  { %vm40_vm0 = vcmask 1046528   ;;  %v281_v0 = vmov 0.0|0.0   ;;  %vm282_vm1 = vmmov 1   ;;  %vm283_vm3 = vmmov 0   ;;  %s357_s1 = inlined_call_operand.vmem [shape: f32[15,11], index: 1, kind: input, shape index: {}]   ;;  %s358_s0 = inlined_call_operand.vmem [shape: f32[4,15], index: 0, kind: input, shape index: {}]   ;;  %s359_s2 = inlined_call_operand.vmem [shape: f32[1,11], index: 2, kind: input, shape index: {}]   ;;  %s360_s5 = inlined_call_operand.vmem [shape: f32[11,8], index: 5, kind: input, shape index: {}]   ;;  %s361_s3 = inlined_call_operand.vmem [shape: f32[1,11], index: 3, kind: input, shape index: {}]   ;;  %s362_s4 = inlined_call_operand.vmem [shape: f32[1,11], index: 4, kind: input, shape index: {}]   ;;  %s363_s6 = inlined_call_operand.vmem [shape: f32[1,8], index: 6, kind: input, shape index: {}]   ;;  %s364_s7 = inlined_call_operand.vmem [shape: f32[4,8], index: 7, kind: output, shape index: {}]  }
   0x1   :  { %267 = vmatprep.subr.bf16.mxu0 %v281_v0  ;;  %v27_v1 = vld [vmem:[%s357_s1] sm:$0xff]  ;;  %v28_v2 = vld [vmem:[%s357_s1 + $0x8] sm:$0x7f]  ;;  %vm269_vm2 = vmpackc.low %vm40_vm0, %vm282_vm1  ;;  %271 = vmatprep.subr.bf16.mxu1 %v281_v0  ;;  %v284_v4 = vmov 0.0   ;;  %vm36_vm4 = vcmask 121856   ;;  %vm116_vm5 = vcmask 84992  }
   0x2   :  { %v268_v3 = vpack.c.bf16 %v28_v2, %v27_v1  ;;  %257 = vmatprep.mubr.msk.f32.mxu0 %vm283_vm3, %v284_v4  ;;  %264 = vmatprep.mubr.msk.f32.mxu1 %vm283_vm3, %v284_v4  ;;  %v26_v5 = vld [vmem:[%s358_s0] sm:$0xf]  ;;  %vm159_vm6 = vcmask 1042432   ;;  %v147_v17 = vld [vmem:[%s360_s5 + $0x8] sm:$0x7]  ;;  %vm155_vm8 = vcmask 89088  }
   0x3   :  { %v239_v6 = vld [vmem:[%s359_s2] ss:$0 sm:$0xff]  ;;  %vm273_vm7 = vmpackc.low %vm159_vm6, %vm282_vm1  ;;  %vm233_vm9 = vcmask 60416  }
   0x4   :  { %270 = vmatpush3.bf16.msk.msra.mxu0 %vm269_vm2, %v268_v3  ;;  %v146_v16 = vld [vmem:[%s360_s5] sm:$0xff] }
   0x5   :  { %v272_v18 = vpack.c.bf16 %v147_v17, %v146_v16  ;;  %v242_v23 = vld [vmem:[%s361_s3] ss:$0 sm:$0xff] }
   0x6   :  { %v243_v25 = vld [vmem:[%s362_s4] ss:$0 sm:$0xff] }
   0x7   :  { %258 = vmatmul.mubr.msk.f32.vlgmr.msra.gmra.mrb[0].mxu0 %vm36_vm4, %v26_v5  ;;  %274 = vmatpush3.bf16.msk.msra.mxu1 %vm273_vm7, %v272_v18  ;;  %v244_v29 = vld [vmem:[%s363_s6] ss:$0 sm:$0xff] }
  0xda   :  { %v110_v7 = vpop.f32.mrb[0].mxu0 }
  0xdb   :  { %v111_v8 = vadd.f32 %v239_v6, %v110_v7  ;;  %v259_v9 = vpop.f32.mrb[1].mxu0 }
  0xdd   :  { %v117_v10 = vsel %vm116_vm5, %v111_v8, 0.0 }
  0xde   :  { %118 = vadd.xlane.f32.xlu0 %v117_v10 }
 0x16b   :  { %v119_v11 = vpop.xlane.xlu0 %118 }
 0x16c   :  { %v121_v12 = vmul.f32 0.09090909, %v119_v11 }
 0x16e   :  { %v122_v13 = vsub.f32 %v111_v8, %v121_v12 }
 0x170   :  { %v123_v14 = vmul.f32 %v122_v13, %v122_v13 }
 0x172   :  { %v124_v15 = vsel %vm116_vm5, %v123_v14, 0.0 }
 0x173   :  { %125 = vadd.xlane.f32.xlu0 %v124_v15 }
 0x200   :  { %v126_v19 = vpop.xlane.xlu0 %125 }
 0x201   :  { %v127_v20 = vmul.f32 0.09090909, %v126_v19 }
 0x203   :  { %v128_v21 = vadd.f32 1e-05, %v127_v20 }
 0x205   :  { %279 = vrsqrt.f32 %v128_v21 }
 0x20f   :  { %v280_v22 = vpop.eup %279 }
 0x210   :  { %v130_v24 = vmul.f32 %v280_v22, %v122_v13 }
 0x212   :  { %v137_v26 = vmul.f32 %v242_v23, %v130_v24 }
 0x214   :  { %v144_v27 = vadd.f32 %v243_v25, %v137_v26 }
 0x216   :  { %v145_v28 = vmax.f32 %v144_v27, 0.0 }
 0x218   :  { %265 = vmatmul.mubr.msk.f32.vlgmr.msra.gmra.mrb[0].mxu1 %vm155_vm8, %v145_v28 }
 0x2eb   :  { %v229_v30 = vpop.f32.mrb[0].mxu1 }
 0x2ec   :  { %v230_v31 = vadd.f32 %v244_v29, %v229_v30  ;;  %v266_v32 = vpop.f32.mrb[1].mxu1 }
 0x2ee   :  { %234 = vst.msk [vmem:[%s364_s7] sm:$0xf] %vm233_vm9, %v230_v31 }

// kernel: encoder_forward.24
= control target key start
LH: loop header
LB: loop body
LE: loop exit
PB: predicated region body
PF: predicated region fallthrough
CT: control target
= control target key end

     0   :  { %vm35_vm0 = vcmask 64512   ;;  %v268_v0 = vmov 0.0   ;;  %vm269_vm1 = vmmov 0   ;;  %vm111_vm2 = vcmask 84992   ;;  %s339_s1 = inlined_call_operand.vmem [shape: f32[8,11], index: 1, kind: input, shape index: {}]   ;;  %s340_s0 = inlined_call_operand.vmem [shape: f32[4,8], index: 0, kind: input, shape index: {}]   ;;  %s341_s2 = inlined_call_operand.vmem [shape: f32[1,11], index: 2, kind: input, shape index: {}]   ;;  %s342_s5 = inlined_call_operand.vmem [shape: f32[11,15], index: 5, kind: input, shape index: {}]   ;;  %s343_s3 = inlined_call_operand.vmem [shape: f32[1,11], index: 3, kind: input, shape index: {}]   ;;  %s344_s4 = inlined_call_operand.vmem [shape: f32[1,11], index: 4, kind: input, shape index: {}]   ;;  %s345_s6 = inlined_call_operand.vmem [shape: f32[1,15], index: 6, kind: input, shape index: {}]   ;;  %s346_s7 = inlined_call_operand.vmem [shape: f32[4,15], index: 7, kind: output, shape index: {}]  }
   0x1   :  { %246 = vmatprep.subr.mxu0 %v268_v0  ;;  %v27_v1 = vld [vmem:[%s339_s1] sm:$0xff]  ;;  %248 = vmatprep.mubr.msk.f32.mxu0 %vm269_vm1, %v268_v0  ;;  %vm154_vm3 = vcmask 1042432   ;;  %v270_v13 = vmov 0.0|0.0   ;;  %v142_v15 = vld [vmem:[%s342_s5 + $0x8] sm:$0x7]  ;;  %vm271_vm4 = vmmov 1  }
   0x2   :  { %v26_v2 = vld [vmem:[%s340_s0] sm:$0xf]  ;;  %247 = vmatpush3.msra.mxu0 %v27_v1  ;;  %255 = vmatprep.mubr.msk.f32.mxu1 %vm269_vm1, %v268_v0  ;;  %vm260_vm5 = vmpackc.low %vm154_vm3, %vm271_vm4  ;;  %vm150_vm6 = vcmask 89088   ;;  %vm228_vm7 = vcmask 117760  }
   0x3   :  { %249 = vmatmul.mubr.msk.f32.vlgmr.msra.gmra.mrb[0].mxu0 %vm35_vm0, %v26_v2  ;;  %v234_v3 = vld [vmem:[%s341_s2] ss:$0 sm:$0xff]  ;;  %258 = vmatprep.subr.bf16.mxu1 %v270_v13 }
   0x4   :  { %v141_v14 = vld [vmem:[%s342_s5] sm:$0xff] }
   0x5   :  { %v259_v16 = vpack.c.bf16 %v142_v15, %v141_v14  ;;  %v236_v21 = vld [vmem:[%s343_s3] ss:$0 sm:$0xff] }
   0x6   :  { %v237_v23 = vld [vmem:[%s344_s4] ss:$0 sm:$0xff] }
   0x7   :  { %261 = vmatpush3.bf16.msk.msra.mxu1 %vm260_vm5, %v259_v16  ;;  %v238_v27 = vld [vmem:[%s345_s6] ss:$0 sm:$0xff] }
  0xd6   :  { %v105_v4 = vpop.f32.mrb[0].mxu0 }
  0xd7   :  { %v106_v5 = vadd.f32 %v234_v3, %v105_v4  ;;  %v250_v6 = vpop.f32.mrb[1].mxu0 }
  0xd9   :  { %v112_v7 = vsel %vm111_vm2, %v106_v5, 0.0 }
  0xda   :  { %113 = vadd.xlane.f32.xlu0 %v112_v7 }
 0x167   :  { %v114_v8 = vpop.xlane.xlu0 %113 }
 0x168   :  { %v116_v9 = vmul.f32 0.09090909, %v114_v8 }
 0x16a   :  { %v117_v10 = vsub.f32 %v106_v5, %v116_v9 }
 0x16c   :  { %v118_v11 = vmul.f32 %v117_v10, %v117_v10 }
 0x16e   :  { %v119_v12 = vsel %vm111_vm2, %v118_v11, 0.0 }
 0x16f   :  { %120 = vadd.xlane.f32.xlu0 %v119_v12 }
 0x1fc   :  { %v121_v17 = vpop.xlane.xlu0 %120 }
 0x1fd   :  { %v122_v18 = vmul.f32 0.09090909, %v121_v17 }
 0x1ff   :  { %v123_v19 = vadd.f32 1e-05, %v122_v18 }
 0x201   :  { %266 = vrsqrt.f32 %v123_v19 }
 0x20b   :  { %v267_v20 = vpop.eup %266 }
 0x20c   :  { %v125_v22 = vmul.f32 %v267_v20, %v117_v10 }
 0x20e   :  { %v132_v24 = vmul.f32 %v236_v21, %v125_v22 }
 0x210   :  { %v139_v25 = vadd.f32 %v237_v23, %v132_v24 }
 0x212   :  { %v140_v26 = vmax.f32 %v139_v25, 0.0 }
 0x214   :  { %256 = vmatmul.mubr.msk.f32.vlgmr.msra.gmra.mrb[0].mxu1 %vm150_vm6, %v140_v26 }
 0x2e7   :  { %v224_v28 = vpop.f32.mrb[0].mxu1 }
 0x2e8   :  { %v225_v29 = vadd.f32 %v238_v27, %v224_v28  ;;  %v257_v30 = vpop.f32.mrb[1].mxu1 }
 0x2ea   :  { %229 = vst.msk [vmem:[%s346_s7] sm:$0xf] %vm228_vm7, %v225_v29 }

</bundles_post_ra>
